<compile_context>
chip_gen: v5e
topology: v5e:2x2
jax: 0.10.0
libtpu: 0.0.40
codegen_flags: <defaults>
</compile_context>

<pallas_src>
import jax
import jax.numpy as jnp
from jax.experimental import pallas as pl
from jax.experimental.pallas import tpu as pltpu


# --------------------------------------------------------------------------
# Fused encoder kernel (all layers, whole sequence, one invocation).
# --------------------------------------------------------------------------
def _make_encoder_kernel(num_layers, unroll_threshold=16):
    def kernel(*refs):
        x_ref = refs[0]
        w_refs = refs[1:1 + 3 * num_layers]            # (wih, whh, b) per layer
        h_out = refs[1 + 3 * num_layers]               # (L, B, H)
        c_out = refs[2 + 3 * num_layers]               # (L, B, H)
        gx_sc, y_sc, h_sc, c_sc = refs[3 + 3 * num_layers:]

        T, B, _ = x_ref.shape
        H = h_sc.shape[-1]

        def cell(gates, c_prev):
            i_g = jax.nn.sigmoid(gates[:, 0 * H:1 * H])
            f_g = jax.nn.sigmoid(gates[:, 1 * H:2 * H])
            g_g = jnp.tanh(gates[:, 2 * H:3 * H])
            o_g = jax.nn.sigmoid(gates[:, 3 * H:4 * H])
            c_new = f_g * c_prev + i_g * g_g
            h_new = o_g * jnp.tanh(c_new)
            return h_new, c_new

        for layer in range(num_layers):
            wih = w_refs[3 * layer]                    # (in, 4H)
            whh = w_refs[3 * layer + 1]                # (H, 4H)
            b = w_refs[3 * layer + 2]                  # (1, 4H)
            inp_ref = x_ref if layer == 0 else y_sc
            in_dim = inp_ref.shape[-1]
            write_seq = layer < num_layers - 1         # last layer: h_n/c_n only

            # Hoisted input projection: one MXU-friendly (T*B, in) matmul
            # instead of T tiny (B, in) matmuls on the serial path.
            gx_sc[...] = (
                jnp.dot(inp_ref[...].reshape(T * B, in_dim), wih[...],
                        preferred_element_type=jnp.float32)
                + b[...]).reshape(T, B, 4 * H)

            h_sc[...] = jnp.zeros_like(h_sc)
            c_sc[...] = jnp.zeros_like(c_sc)

            whh_v = whh[...]                           # loop-invariant load

            def step(t, whh_v=whh_v, write_seq=write_seq):
                gates = gx_sc[t] + jnp.dot(
                    h_sc[...], whh_v, preferred_element_type=jnp.float32)
                h_new, c_new = cell(gates, c_sc[...])
                h_sc[...] = h_new
                c_sc[...] = c_new
                if write_seq:
                    y_sc[t] = h_new                    # feeds the next layer

            if T <= unroll_threshold:
                # Short sequence: full static unroll (best LLO scheduling).
                for t in range(T):
                    step(t)
            else:
                pl.loop(0, T)(step)

            h_out[layer] = h_sc[...]
            c_out[layer] = c_sc[...]

    return kernel


# --------------------------------------------------------------------------
# Public forward: x (B, T, input) -> (h_n, c_n), each (num_layers, B, hidden).
# --------------------------------------------------------------------------
@jax.jit
def encoder_forward(x, params):
    B, T, _ = x.shape
    num_layers = len(params["lstm"])
    H = params["lstm"][0][1].shape[0]

    # Pad batch to a multiple of 8 (f32 sublane tile) for full-vreg tiles.
    B_pad = ((B + 7) // 8) * 8
    x_tm = jnp.swapaxes(x, 0, 1)                       # (T, B, I) time-major
    if B_pad != B:
        x_tm = jnp.pad(x_tm, ((0, 0), (0, B_pad - B), (0, 0)))

    flat_w = []
    for (wih, whh, b) in params["lstm"]:
        flat_w += [wih, whh, b]

    # TODO(synk): at the full module size (input=4096, hidden=1024) the resident
    # f32 weights + (T, B, 4H) gate scratch exceed VMEM (esp. v7x's 64 MiB);
    # tile W_ih / the hoisted projection over the 4H gate axis (and cast weights
    # to bf16 for the MXU) before scaling up.
    out_shape = (
        jax.ShapeDtypeStruct((num_layers, B_pad, H), jnp.float32),
        jax.ShapeDtypeStruct((num_layers, B_pad, H), jnp.float32),
    )
    h_n, c_n = pl.pallas_call(
        _make_encoder_kernel(num_layers),
        out_shape=out_shape,
        scratch_shapes=[
            pltpu.VMEM((T, B_pad, 4 * H), jnp.float32),  # hoisted input-proj gates
            pltpu.VMEM((T, B_pad, H), jnp.float32),      # per-layer output sequence
            pltpu.VMEM((B_pad, H), jnp.float32),         # h carry
            pltpu.VMEM((B_pad, H), jnp.float32),         # c carry
        ],
    )(x_tm, *flat_w)
    return h_n[:, :B, :], c_n[:, :B, :]


# --------------------------------------------------------------------------
# Pure-JAX reference (lax.scan) for correctness checking.
# --------------------------------------------------------------------------
def encoder_reference(x, params):
    B = x.shape[0]
    H = params["lstm"][0][1].shape[0]
    y = x
    h_fin, c_fin = [], []
    for (wih, whh, b) in params["lstm"]:
        def step(carry, x_t, wih=wih, whh=whh, b=b):
            h, c = carry
            gates = (jnp.dot(x_t, wih, precision=jax.lax.Precision.HIGHEST)
                     + jnp.dot(h, whh, precision=jax.lax.Precision.HIGHEST)
                     + b[0])
            i = jax.nn.sigmoid(gates[:, 0 * H:1 * H])
            f = jax.nn.sigmoid(gates[:, 1 * H:2 * H])
            g = jnp.tanh(gates[:, 2 * H:3 * H])
            o = jax.nn.sigmoid(gates[:, 3 * H:4 * H])
            c = f * c + i * g
            h = o * jnp.tanh(c)
            return (h, c), h

        h0 = jnp.zeros((B, H), jnp.float32)
        c0 = jnp.zeros((B, H), jnp.float32)
        (hT, cT), ys = jax.lax.scan(step, (h0, c0), jnp.swapaxes(y, 0, 1))
        y = jnp.swapaxes(ys, 0, 1)
        h_fin.append(hT)
        c_fin.append(cT)
    return jnp.stack(h_fin, 0), jnp.stack(c_fin, 0)


# --------------------------------------------------------------------------
# Deterministic parameter init (PyTorch-style uniform(-1/sqrt(H), 1/sqrt(H))).
# Stored pre-transposed: W_ih^T (in, 4H), W_hh^T (H, 4H), combined bias (1, 4H).
# --------------------------------------------------------------------------
def init_params(key, input_size, hidden_size, num_layers):
    params = {"lstm": []}
    k = 1.0 / jnp.sqrt(hidden_size)
    for layer in range(num_layers):
        in_sz = input_size if layer == 0 else hidden_size
        key, k1, k2, k3, k4 = jax.random.split(key, 5)
        w_ih = jax.random.uniform(k1, (4 * hidden_size, in_sz),
                                  jnp.float32, -k, k)
        w_hh = jax.random.uniform(k2, (4 * hidden_size, hidden_size),
                                  jnp.float32, -k, k)
        b_ih = jax.random.uniform(k3, (4 * hidden_size,), jnp.float32, -k, k)
        b_hh = jax.random.uniform(k4, (4 * hidden_size,), jnp.float32, -k, k)
        params["lstm"].append((w_ih.T, w_hh.T, (b_ih + b_hh)[None, :]))
    return params, key


if __name__ == "__main__":
    # Small but TPU-friendly sizes (feature dims multiples of 128).
    B, T = 4, 8
    INPUT, HIDDEN, LAYERS = 128, 128, 2

    key = jax.random.PRNGKey(0)
    params, key = init_params(key, INPUT, HIDDEN, LAYERS)

    key, kx = jax.random.split(key)
    x = jax.random.normal(kx, (B, T, INPUT), jnp.float32)

    h_out, c_out = encoder_forward(x, params)
    jax.block_until_ready((h_out, c_out))

    # Correctness check against the pure-JAX reference.
    h_ref, c_ref = encoder_reference(x, params)
    assert h_out.shape == (LAYERS, B, HIDDEN)
    assert c_out.shape == (LAYERS, B, HIDDEN)
    assert jnp.allclose(h_out, h_ref, atol=1e-3, rtol=1e-3)
    assert jnp.allclose(c_out, c_ref, atol=1e-3, rtol=1e-3)

    print("KERNEL_OK")
</pallas_src>

<mosaic_0001>
module attributes {stable_mosaic.version = 11 : i64} {
  func.func @kernel(%arg0: memref<8x8x128xf32, #tpu.memory_space<vmem>>, %arg1: memref<128x512xf32, #tpu.memory_space<vmem>>, %arg2: memref<128x512xf32, #tpu.memory_space<vmem>>, %arg3: memref<1x512xf32, #tpu.memory_space<vmem>>, %arg4: memref<128x512xf32, #tpu.memory_space<vmem>>, %arg5: memref<128x512xf32, #tpu.memory_space<vmem>>, %arg6: memref<1x512xf32, #tpu.memory_space<vmem>>, %arg7: memref<2x8x128xf32, #tpu.memory_space<vmem>>, %arg8: memref<2x8x128xf32, #tpu.memory_space<vmem>>, %arg9: memref<8x8x512xf32, #tpu.memory_space<vmem>>, %arg10: memref<8x8x128xf32, #tpu.memory_space<vmem>>, %arg11: memref<8x128xf32, #tpu.memory_space<vmem>>, %arg12: memref<8x128xf32, #tpu.memory_space<vmem>>) attributes {dimension_semantics = [], scalar_prefetch = 0 : i64, scratch_operands = 4 : i64, tpu.core_type = #tpu.core_type<tc>} {
    %c0 = arith.constant 0 : index
    %c0_0 = arith.constant 0 : index
    %c0_1 = arith.constant 0 : index
    %0 = vector.load %arg0[%c0, %c0_0, %c0_1] : memref<8x8x128xf32, #tpu.memory_space<vmem>>, vector<8x8x128xf32>
    %1 = vector.shape_cast %0 : vector<8x8x128xf32> to vector<64x128xf32>
    %c0_2 = arith.constant 0 : index
    %c0_3 = arith.constant 0 : index
    %2 = vector.load %arg1[%c0_2, %c0_3] : memref<128x512xf32, #tpu.memory_space<vmem>>, vector<128x512xf32>
    %cst = arith.constant dense<0.000000e+00> : vector<64x512xf32>
    %3 = tpu.matmul %1, %2, %cst {dimension_numbers = #tpu.dot_dimension_numbers<[1], [0], [0], [1], [0, 0, 1, 1], [], []>} : vector<64x128xf32>, vector<128x512xf32>, vector<64x512xf32> -> vector<64x512xf32>
    %c0_4 = arith.constant 0 : index
    %c0_5 = arith.constant 0 : index
    %4 = vector.load %arg3[%c0_4, %c0_5] : memref<1x512xf32, #tpu.memory_space<vmem>>, vector<1x512xf32>
    %5 = vector.broadcast %4 : vector<1x512xf32> to vector<64x512xf32>
    %6 = arith.addf %3, %5 : vector<64x512xf32>
    %7 = vector.shape_cast %6 : vector<64x512xf32> to vector<8x8x512xf32>
    %c0_6 = arith.constant 0 : index
    %c0_7 = arith.constant 0 : index
    %c0_8 = arith.constant 0 : index
    %8 = vector.load %arg9[%c0_6, %c0_7, %c0_8] : memref<8x8x512xf32, #tpu.memory_space<vmem>>, vector<8x8x512xf32>
    tpu.vector_store %arg9[%c0_6, %c0_7, %c0_8], %7 {strides = array<i32>} : memref<8x8x512xf32, #tpu.memory_space<vmem>>, vector<8x8x512xf32>,
    %cst_9 = arith.constant 0.000000e+00 : f32
    %9 = vector.broadcast %cst_9 : f32 to vector<8x128xf32>
    %c0_10 = arith.constant 0 : index
    %c0_11 = arith.constant 0 : index
    %10 = vector.load %arg11[%c0_10, %c0_11] : memref<8x128xf32, #tpu.memory_space<vmem>>, vector<8x128xf32>
    tpu.vector_store %arg11[%c0_10, %c0_11], %9 {strides = array<i32>} : memref<8x128xf32, #tpu.memory_space<vmem>>, vector<8x128xf32>,
    %cst_12 = arith.constant 0.000000e+00 : f32
    %11 = vector.broadcast %cst_12 : f32 to vector<8x128xf32>
    %c0_13 = arith.constant 0 : index
    %c0_14 = arith.constant 0 : index
    %12 = vector.load %arg12[%c0_13, %c0_14] : memref<8x128xf32, #tpu.memory_space<vmem>>, vector<8x128xf32>
    tpu.vector_store %arg12[%c0_13, %c0_14], %11 {strides = array<i32>} : memref<8x128xf32, #tpu.memory_space<vmem>>, vector<8x128xf32>,
    %c0_15 = arith.constant 0 : index
    %c0_16 = arith.constant 0 : index
    %13 = vector.load %arg2[%c0_15, %c0_16] : memref<128x512xf32, #tpu.memory_space<vmem>>, vector<128x512xf32>
    %c0_17 = arith.constant 0 : index
    %c0_18 = arith.constant 0 : index
    %c0_19 = arith.constant 0 : index
    %14 = vector.load %arg9[%c0_17, %c0_18, %c0_19] : memref<8x8x512xf32, #tpu.memory_space<vmem>>, vector<1x8x512xf32>
    %15 = vector.shape_cast %14 : vector<1x8x512xf32> to vector<8x512xf32>
    %c0_20 = arith.constant 0 : index
    %c0_21 = arith.constant 0 : index
    %16 = vector.load %arg11[%c0_20, %c0_21] : memref<8x128xf32, #tpu.memory_space<vmem>>, vector<8x128xf32>
    %cst_22 = arith.constant dense<0.000000e+00> : vector<8x512xf32>
    %17 = tpu.matmul %16, %13, %cst_22 {dimension_numbers = #tpu.dot_dimension_numbers<[1], [0], [0], [1], [0, 0, 1, 1], [], []>} : vector<8x128xf32>, vector<128x512xf32>, vector<8x512xf32> -> vector<8x512xf32>
    %18 = arith.addf %15, %17 : vector<8x512xf32>
    %c0_23 = arith.constant 0 : index
    %c0_24 = arith.constant 0 : index
    %19 = vector.load %arg12[%c0_23, %c0_24] : memref<8x128xf32, #tpu.memory_space<vmem>>, vector<8x128xf32>
    %20 = vector.extract_strided_slice %18 {offsets = [0, 0], sizes = [8, 128], strides = [1, 1]} : vector<8x512xf32> to vector<8x128xf32>
    %21 = arith.negf %20 : vector<8x128xf32>
    %22 = math.exp %21 : vector<8x128xf32>
    %cst_25 = arith.constant 1.000000e+00 : f32
    %23 = vector.broadcast %cst_25 : f32 to vector<8x128xf32>
    %24 = arith.addf %23, %22 : vector<8x128xf32>
    %25 = arith.divf %23, %24 : vector<8x128xf32>
    %26 = vector.extract_strided_slice %18 {offsets = [0, 128], sizes = [8, 128], strides = [1, 1]} : vector<8x512xf32> to vector<8x128xf32>
    %27 = arith.negf %26 : vector<8x128xf32>
    %28 = math.exp %27 : vector<8x128xf32>
    %cst_26 = arith.constant 1.000000e+00 : f32
    %29 = vector.broadcast %cst_26 : f32 to vector<8x128xf32>
    %30 = arith.addf %29, %28 : vector<8x128xf32>
    %31 = arith.divf %29, %30 : vector<8x128xf32>
    %32 = vector.extract_strided_slice %18 {offsets = [0, 256], sizes = [8, 128], strides = [1, 1]} : vector<8x512xf32> to vector<8x128xf32>
    %33 = math.tanh %32 : vector<8x128xf32>
    %34 = vector.extract_strided_slice %18 {offsets = [0, 384], sizes = [8, 128], strides = [1, 1]} : vector<8x512xf32> to vector<8x128xf32>
    %35 = arith.negf %34 : vector<8x128xf32>
    %36 = math.exp %35 : vector<8x128xf32>
    %cst_27 = arith.constant 1.000000e+00 : f32
    %37 = vector.broadcast %cst_27 : f32 to vector<8x128xf32>
    %38 = arith.addf %37, %36 : vector<8x128xf32>
    %39 = arith.divf %37, %38 : vector<8x128xf32>
    %40 = arith.mulf %31, %19 : vector<8x128xf32>
    %41 = arith.mulf %25, %33 : vector<8x128xf32>
    %42 = arith.addf %40, %41 : vector<8x128xf32>
    %43 = math.tanh %42 : vector<8x128xf32>
    %44 = arith.mulf %39, %43 : vector<8x128xf32>
    %c0_28 = arith.constant 0 : index
    %c0_29 = arith.constant 0 : index
    %45 = vector.load %arg11[%c0_28, %c0_29] : memref<8x128xf32, #tpu.memory_space<vmem>>, vector<8x128xf32>
    tpu.vector_store %arg11[%c0_28, %c0_29], %44 {strides = array<i32>} : memref<8x128xf32, #tpu.memory_space<vmem>>, vector<8x128xf32>,
    %c0_30 = arith.constant 0 : index
    %c0_31 = arith.constant 0 : index
    %46 = vector.load %arg12[%c0_30, %c0_31] : memref<8x128xf32, #tpu.memory_space<vmem>>, vector<8x128xf32>
    tpu.vector_store %arg12[%c0_30, %c0_31], %42 {strides = array<i32>} : memref<8x128xf32, #tpu.memory_space<vmem>>, vector<8x128xf32>,
    %c0_32 = arith.constant 0 : index
    %c0_33 = arith.constant 0 : index
    %c0_34 = arith.constant 0 : index
    %47 = vector.load %arg10[%c0_32, %c0_33, %c0_34] : memref<8x8x128xf32, #tpu.memory_space<vmem>>, vector<1x8x128xf32>
    %48 = vector.shape_cast %47 : vector<1x8x128xf32> to vector<8x128xf32>
    %49 = vector.shape_cast %44 : vector<8x128xf32> to vector<1x8x128xf32>
    tpu.vector_store %arg10[%c0_32, %c0_33, %c0_34], %49 {strides = array<i32>} : memref<8x8x128xf32, #tpu.memory_space<vmem>>, vector<1x8x128xf32>,
    %c1 = arith.constant 1 : index
    %c0_35 = arith.constant 0 : index
    %c0_36 = arith.constant 0 : index
    %50 = vector.load %arg9[%c1, %c0_35, %c0_36] : memref<8x8x512xf32, #tpu.memory_space<vmem>>, vector<1x8x512xf32>
    %51 = vector.shape_cast %50 : vector<1x8x512xf32> to vector<8x512xf32>
    %c0_37 = arith.constant 0 : index
    %c0_38 = arith.constant 0 : index
    %52 = vector.load %arg11[%c0_37, %c0_38] : memref<8x128xf32, #tpu.memory_space<vmem>>, vector<8x128xf32>
    %cst_39 = arith.constant dense<0.000000e+00> : vector<8x512xf32>
    %53 = tpu.matmul %52, %13, %cst_39 {dimension_numbers = #tpu.dot_dimension_numbers<[1], [0], [0], [1], [0, 0, 1, 1], [], []>} : vector<8x128xf32>, vector<128x512xf32>, vector<8x512xf32> -> vector<8x512xf32>
    %54 = arith.addf %51, %53 : vector<8x512xf32>
    %c0_40 = arith.constant 0 : index
    %c0_41 = arith.constant 0 : index
    %55 = vector.load %arg12[%c0_40, %c0_41] : memref<8x128xf32, #tpu.memory_space<vmem>>, vector<8x128xf32>
    %56 = vector.extract_strided_slice %54 {offsets = [0, 0], sizes = [8, 128], strides = [1, 1]} : vector<8x512xf32> to vector<8x128xf32>
    %57 = arith.negf %56 : vector<8x128xf32>
    %58 = math.exp %57 : vector<8x128xf32>
    %cst_42 = arith.constant 1.000000e+00 : f32
    %59 = vector.broadcast %cst_42 : f32 to vector<8x128xf32>
    %60 = arith.addf %59, %58 : vector<8x128xf32>
    %61 = arith.divf %59, %60 : vector<8x128xf32>
    %62 = vector.extract_strided_slice %54 {offsets = [0, 128], sizes = [8, 128], strides = [1, 1]} : vector<8x512xf32> to vector<8x128xf32>
    %63 = arith.negf %62 : vector<8x128xf32>
    %64 = math.exp %63 : vector<8x128xf32>
    %cst_43 = arith.constant 1.000000e+00 : f32
    %65 = vector.broadcast %cst_43 : f32 to vector<8x128xf32>
    %66 = arith.addf %65, %64 : vector<8x128xf32>
    %67 = arith.divf %65, %66 : vector<8x128xf32>
    %68 = vector.extract_strided_slice %54 {offsets = [0, 256], sizes = [8, 128], strides = [1, 1]} : vector<8x512xf32> to vector<8x128xf32>
    %69 = math.tanh %68 : vector<8x128xf32>
    %70 = vector.extract_strided_slice %54 {offsets = [0, 384], sizes = [8, 128], strides = [1, 1]} : vector<8x512xf32> to vector<8x128xf32>
    %71 = arith.negf %70 : vector<8x128xf32>
    %72 = math.exp %71 : vector<8x128xf32>
    %cst_44 = arith.constant 1.000000e+00 : f32
    %73 = vector.broadcast %cst_44 : f32 to vector<8x128xf32>
    %74 = arith.addf %73, %72 : vector<8x128xf32>
    %75 = arith.divf %73, %74 : vector<8x128xf32>
    %76 = arith.mulf %67, %55 : vector<8x128xf32>
    %77 = arith.mulf %61, %69 : vector<8x128xf32>
    %78 = arith.addf %76, %77 : vector<8x128xf32>
    %79 = math.tanh %78 : vector<8x128xf32>
    %80 = arith.mulf %75, %79 : vector<8x128xf32>
    %c0_45 = arith.constant 0 : index
    %c0_46 = arith.constant 0 : index
    %81 = vector.load %arg11[%c0_45, %c0_46] : memref<8x128xf32, #tpu.memory_space<vmem>>, vector<8x128xf32>
    tpu.vector_store %arg11[%c0_45, %c0_46], %80 {strides = array<i32>} : memref<8x128xf32, #tpu.memory_space<vmem>>, vector<8x128xf32>,
    %c0_47 = arith.constant 0 : index
    %c0_48 = arith.constant 0 : index
    %82 = vector.load %arg12[%c0_47, %c0_48] : memref<8x128xf32, #tpu.memory_space<vmem>>, vector<8x128xf32>
    tpu.vector_store %arg12[%c0_47, %c0_48], %78 {strides = array<i32>} : memref<8x128xf32, #tpu.memory_space<vmem>>, vector<8x128xf32>,
    %c1_49 = arith.constant 1 : index
    %c0_50 = arith.constant 0 : index
    %c0_51 = arith.constant 0 : index
    %83 = vector.load %arg10[%c1_49, %c0_50, %c0_51] : memref<8x8x128xf32, #tpu.memory_space<vmem>>, vector<1x8x128xf32>
    %84 = vector.shape_cast %83 : vector<1x8x128xf32> to vector<8x128xf32>
    %85 = vector.shape_cast %80 : vector<8x128xf32> to vector<1x8x128xf32>
    tpu.vector_store %arg10[%c1_49, %c0_50, %c0_51], %85 {strides = array<i32>} : memref<8x8x128xf32, #tpu.memory_space<vmem>>, vector<1x8x128xf32>,
    %c2 = arith.constant 2 : index
    %c0_52 = arith.constant 0 : index
    %c0_53 = arith.constant 0 : index
    %86 = vector.load %arg9[%c2, %c0_52, %c0_53] : memref<8x8x512xf32, #tpu.memory_space<vmem>>, vector<1x8x512xf32>
    %87 = vector.shape_cast %86 : vector<1x8x512xf32> to vector<8x512xf32>
    %c0_54 = arith.constant 0 : index
    %c0_55 = arith.constant 0 : index
    %88 = vector.load %arg11[%c0_54, %c0_55] : memref<8x128xf32, #tpu.memory_space<vmem>>, vector<8x128xf32>
    %cst_56 = arith.constant dense<0.000000e+00> : vector<8x512xf32>
    %89 = tpu.matmul %88, %13, %cst_56 {dimension_numbers = #tpu.dot_dimension_numbers<[1], [0], [0], [1], [0, 0, 1, 1], [], []>} : vector<8x128xf32>, vector<128x512xf32>, vector<8x512xf32> -> vector<8x512xf32>
    %90 = arith.addf %87, %89 : vector<8x512xf32>
    %c0_57 = arith.constant 0 : index
    %c0_58 = arith.constant 0 : index
    %91 = vector.load %arg12[%c0_57, %c0_58] : memref<8x128xf32, #tpu.memory_space<vmem>>, vector<8x128xf32>
    %92 = vector.extract_strided_slice %90 {offsets = [0, 0], sizes = [8, 128], strides = [1, 1]} : vector<8x512xf32> to vector<8x128xf32>
    %93 = arith.negf %92 : vector<8x128xf32>
    %94 = math.exp %93 : vector<8x128xf32>
    %cst_59 = arith.constant 1.000000e+00 : f32
    %95 = vector.broadcast %cst_59 : f32 to vector<8x128xf32>
    %96 = arith.addf %95, %94 : vector<8x128xf32>
    %97 = arith.divf %95, %96 : vector<8x128xf32>
    %98 = vector.extract_strided_slice %90 {offsets = [0, 128], sizes = [8, 128], strides = [1, 1]} : vector<8x512xf32> to vector<8x128xf32>
    %99 = arith.negf %98 : vector<8x128xf32>
    %100 = math.exp %99 : vector<8x128xf32>
    %cst_60 = arith.constant 1.000000e+00 : f32
    %101 = vector.broadcast %cst_60 : f32 to vector<8x128xf32>
    %102 = arith.addf %101, %100 : vector<8x128xf32>
    %103 = arith.divf %101, %102 : vector<8x128xf32>
    %104 = vector.extract_strided_slice %90 {offsets = [0, 256], sizes = [8, 128], strides = [1, 1]} : vector<8x512xf32> to vector<8x128xf32>
    %105 = math.tanh %104 : vector<8x128xf32>
    %106 = vector.extract_strided_slice %90 {offsets = [0, 384], sizes = [8, 128], strides = [1, 1]} : vector<8x512xf32> to vector<8x128xf32>
    %107 = arith.negf %106 : vector<8x128xf32>
    %108 = math.exp %107 : vector<8x128xf32>
    %cst_61 = arith.constant 1.000000e+00 : f32
    %109 = vector.broadcast %cst_61 : f32 to vector<8x128xf32>
    %110 = arith.addf %109, %108 : vector<8x128xf32>
    %111 = arith.divf %109, %110 : vector<8x128xf32>
    %112 = arith.mulf %103, %91 : vector<8x128xf32>
    %113 = arith.mulf %97, %105 : vector<8x128xf32>
    %114 = arith.addf %112, %113 : vector<8x128xf32>
    %115 = math.tanh %114 : vector<8x128xf32>
    %116 = arith.mulf %111, %115 : vector<8x128xf32>
    %c0_62 = arith.constant 0 : index
    %c0_63 = arith.constant 0 : index
    %117 = vector.load %arg11[%c0_62, %c0_63] : memref<8x128xf32, #tpu.memory_space<vmem>>, vector<8x128xf32>
    tpu.vector_store %arg11[%c0_62, %c0_63], %116 {strides = array<i32>} : memref<8x128xf32, #tpu.memory_space<vmem>>, vector<8x128xf32>,
    %c0_64 = arith.constant 0 : index
    %c0_65 = arith.constant 0 : index
    %118 = vector.load %arg12[%c0_64, %c0_65] : memref<8x128xf32, #tpu.memory_space<vmem>>, vector<8x128xf32>
    tpu.vector_store %arg12[%c0_64, %c0_65], %114 {strides = array<i32>} : memref<8x128xf32, #tpu.memory_space<vmem>>, vector<8x128xf32>,
    %c2_66 = arith.constant 2 : index
    %c0_67 = arith.constant 0 : index
    %c0_68 = arith.constant 0 : index
    %119 = vector.load %arg10[%c2_66, %c0_67, %c0_68] : memref<8x8x128xf32, #tpu.memory_space<vmem>>, vector<1x8x128xf32>
    %120 = vector.shape_cast %119 : vector<1x8x128xf32> to vector<8x128xf32>
    %121 = vector.shape_cast %116 : vector<8x128xf32> to vector<1x8x128xf32>
    tpu.vector_store %arg10[%c2_66, %c0_67, %c0_68], %121 {strides = array<i32>} : memref<8x8x128xf32, #tpu.memory_space<vmem>>, vector<1x8x128xf32>,
    %c3 = arith.constant 3 : index
    %c0_69 = arith.constant 0 : index
    %c0_70 = arith.constant 0 : index
    %122 = vector.load %arg9[%c3, %c0_69, %c0_70] : memref<8x8x512xf32, #tpu.memory_space<vmem>>, vector<1x8x512xf32>
    %123 = vector.shape_cast %122 : vector<1x8x512xf32> to vector<8x512xf32>
    %c0_71 = arith.constant 0 : index
    %c0_72 = arith.constant 0 : index
    %124 = vector.load %arg11[%c0_71, %c0_72] : memref<8x128xf32, #tpu.memory_space<vmem>>, vector<8x128xf32>
    %cst_73 = arith.constant dense<0.000000e+00> : vector<8x512xf32>
    %125 = tpu.matmul %124, %13, %cst_73 {dimension_numbers = #tpu.dot_dimension_numbers<[1], [0], [0], [1], [0, 0, 1, 1], [], []>} : vector<8x128xf32>, vector<128x512xf32>, vector<8x512xf32> -> vector<8x512xf32>
    %126 = arith.addf %123, %125 : vector<8x512xf32>
    %c0_74 = arith.constant 0 : index
    %c0_75 = arith.constant 0 : index
    %127 = vector.load %arg12[%c0_74, %c0_75] : memref<8x128xf32, #tpu.memory_space<vmem>>, vector<8x128xf32>
    %128 = vector.extract_strided_slice %126 {offsets = [0, 0], sizes = [8, 128], strides = [1, 1]} : vector<8x512xf32> to vector<8x128xf32>
    %129 = arith.negf %128 : vector<8x128xf32>
    %130 = math.exp %129 : vector<8x128xf32>
    %cst_76 = arith.constant 1.000000e+00 : f32
    %131 = vector.broadcast %cst_76 : f32 to vector<8x128xf32>
    %132 = arith.addf %131, %130 : vector<8x128xf32>
    %133 = arith.divf %131, %132 : vector<8x128xf32>
    %134 = vector.extract_strided_slice %126 {offsets = [0, 128], sizes = [8, 128], strides = [1, 1]} : vector<8x512xf32> to vector<8x128xf32>
    %135 = arith.negf %134 : vector<8x128xf32>
    %136 = math.exp %135 : vector<8x128xf32>
    %cst_77 = arith.constant 1.000000e+00 : f32
    %137 = vector.broadcast %cst_77 : f32 to vector<8x128xf32>
    %138 = arith.addf %137, %136 : vector<8x128xf32>
    %139 = arith.divf %137, %138 : vector<8x128xf32>
    %140 = vector.extract_strided_slice %126 {offsets = [0, 256], sizes = [8, 128], strides = [1, 1]} : vector<8x512xf32> to vector<8x128xf32>
    %141 = math.tanh %140 : vector<8x128xf32>
    %142 = vector.extract_strided_slice %126 {offsets = [0, 384], sizes = [8, 128], strides = [1, 1]} : vector<8x512xf32> to vector<8x128xf32>
    %143 = arith.negf %142 : vector<8x128xf32>
    %144 = math.exp %143 : vector<8x128xf32>
    %cst_78 = arith.constant 1.000000e+00 : f32
    %145 = vector.broadcast %cst_78 : f32 to vector<8x128xf32>
    %146 = arith.addf %145, %144 : vector<8x128xf32>
    %147 = arith.divf %145, %146 : vector<8x128xf32>
    %148 = arith.mulf %139, %127 : vector<8x128xf32>
    %149 = arith.mulf %133, %141 : vector<8x128xf32>
    %150 = arith.addf %148, %149 : vector<8x128xf32>
    %151 = math.tanh %150 : vector<8x128xf32>
    %152 = arith.mulf %147, %151 : vector<8x128xf32>
    %c0_79 = arith.constant 0 : index
    %c0_80 = arith.constant 0 : index
    %153 = vector.load %arg11[%c0_79, %c0_80] : memref<8x128xf32, #tpu.memory_space<vmem>>, vector<8x128xf32>
    tpu.vector_store %arg11[%c0_79, %c0_80], %152 {strides = array<i32>} : memref<8x128xf32, #tpu.memory_space<vmem>>, vector<8x128xf32>,
    %c0_81 = arith.constant 0 : index
    %c0_82 = arith.constant 0 : index
    %154 = vector.load %arg12[%c0_81, %c0_82] : memref<8x128xf32, #tpu.memory_space<vmem>>, vector<8x128xf32>
    tpu.vector_store %arg12[%c0_81, %c0_82], %150 {strides = array<i32>} : memref<8x128xf32, #tpu.memory_space<vmem>>, vector<8x128xf32>,
    %c3_83 = arith.constant 3 : index
    %c0_84 = arith.constant 0 : index
    %c0_85 = arith.constant 0 : index
    %155 = vector.load %arg10[%c3_83, %c0_84, %c0_85] : memref<8x8x128xf32, #tpu.memory_space<vmem>>, vector<1x8x128xf32>
    %156 = vector.shape_cast %155 : vector<1x8x128xf32> to vector<8x128xf32>
    %157 = vector.shape_cast %152 : vector<8x128xf32> to vector<1x8x128xf32>
    tpu.vector_store %arg10[%c3_83, %c0_84, %c0_85], %157 {strides = array<i32>} : memref<8x8x128xf32, #tpu.memory_space<vmem>>, vector<1x8x128xf32>,
    %c4 = arith.constant 4 : index
    %c0_86 = arith.constant 0 : index
    %c0_87 = arith.constant 0 : index
    %158 = vector.load %arg9[%c4, %c0_86, %c0_87] : memref<8x8x512xf32, #tpu.memory_space<vmem>>, vector<1x8x512xf32>
    %159 = vector.shape_cast %158 : vector<1x8x512xf32> to vector<8x512xf32>
    %c0_88 = arith.constant 0 : index
    %c0_89 = arith.constant 0 : index
    %160 = vector.load %arg11[%c0_88, %c0_89] : memref<8x128xf32, #tpu.memory_space<vmem>>, vector<8x128xf32>
    %cst_90 = arith.constant dense<0.000000e+00> : vector<8x512xf32>
    %161 = tpu.matmul %160, %13, %cst_90 {dimension_numbers = #tpu.dot_dimension_numbers<[1], [0], [0], [1], [0, 0, 1, 1], [], []>} : vector<8x128xf32>, vector<128x512xf32>, vector<8x512xf32> -> vector<8x512xf32>
    %162 = arith.addf %159, %161 : vector<8x512xf32>
    %c0_91 = arith.constant 0 : index
    %c0_92 = arith.constant 0 : index
    %163 = vector.load %arg12[%c0_91, %c0_92] : memref<8x128xf32, #tpu.memory_space<vmem>>, vector<8x128xf32>
    %164 = vector.extract_strided_slice %162 {offsets = [0, 0], sizes = [8, 128], strides = [1, 1]} : vector<8x512xf32> to vector<8x128xf32>
    %165 = arith.negf %164 : vector<8x128xf32>
    %166 = math.exp %165 : vector<8x128xf32>
    %cst_93 = arith.constant 1.000000e+00 : f32
    %167 = vector.broadcast %cst_93 : f32 to vector<8x128xf32>
    %168 = arith.addf %167, %166 : vector<8x128xf32>
    %169 = arith.divf %167, %168 : vector<8x128xf32>
    %170 = vector.extract_strided_slice %162 {offsets = [0, 128], sizes = [8, 128], strides = [1, 1]} : vector<8x512xf32> to vector<8x128xf32>
    %171 = arith.negf %170 : vector<8x128xf32>
    %172 = math.exp %171 : vector<8x128xf32>
    %cst_94 = arith.constant 1.000000e+00 : f32
    %173 = vector.broadcast %cst_94 : f32 to vector<8x128xf32>
    %174 = arith.addf %173, %172 : vector<8x128xf32>
    %175 = arith.divf %173, %174 : vector<8x128xf32>
    %176 = vector.extract_strided_slice %162 {offsets = [0, 256], sizes = [8, 128], strides = [1, 1]} : vector<8x512xf32> to vector<8x128xf32>
    %177 = math.tanh %176 : vector<8x128xf32>
    %178 = vector.extract_strided_slice %162 {offsets = [0, 384], sizes = [8, 128], strides = [1, 1]} : vector<8x512xf32> to vector<8x128xf32>
    %179 = arith.negf %178 : vector<8x128xf32>
    %180 = math.exp %179 : vector<8x128xf32>
    %cst_95 = arith.constant 1.000000e+00 : f32
    %181 = vector.broadcast %cst_95 : f32 to vector<8x128xf32>
    %182 = arith.addf %181, %180 : vector<8x128xf32>
    %183 = arith.divf %181, %182 : vector<8x128xf32>
    %184 = arith.mulf %175, %163 : vector<8x128xf32>
    %185 = arith.mulf %169, %177 : vector<8x128xf32>
    %186 = arith.addf %184, %185 : vector<8x128xf32>
    %187 = math.tanh %186 : vector<8x128xf32>
    %188 = arith.mulf %183, %187 : vector<8x128xf32>
    %c0_96 = arith.constant 0 : index
    %c0_97 = arith.constant 0 : index
    %189 = vector.load %arg11[%c0_96, %c0_97] : memref<8x128xf32, #tpu.memory_space<vmem>>, vector<8x128xf32>
    tpu.vector_store %arg11[%c0_96, %c0_97], %188 {strides = array<i32>} : memref<8x128xf32, #tpu.memory_space<vmem>>, vector<8x128xf32>,
    %c0_98 = arith.constant 0 : index
    %c0_99 = arith.constant 0 : index
    %190 = vector.load %arg12[%c0_98, %c0_99] : memref<8x128xf32, #tpu.memory_space<vmem>>, vector<8x128xf32>
    tpu.vector_store %arg12[%c0_98, %c0_99], %186 {strides = array<i32>} : memref<8x128xf32, #tpu.memory_space<vmem>>, vector<8x128xf32>,
    %c4_100 = arith.constant 4 : index
    %c0_101 = arith.constant 0 : index
    %c0_102 = arith.constant 0 : index
    %191 = vector.load %arg10[%c4_100, %c0_101, %c0_102] : memref<8x8x128xf32, #tpu.memory_space<vmem>>, vector<1x8x128xf32>
    %192 = vector.shape_cast %191 : vector<1x8x128xf32> to vector<8x128xf32>
    %193 = vector.shape_cast %188 : vector<8x128xf32> to vector<1x8x128xf32>
    tpu.vector_store %arg10[%c4_100, %c0_101, %c0_102], %193 {strides = array<i32>} : memref<8x8x128xf32, #tpu.memory_space<vmem>>, vector<1x8x128xf32>,
    %c5 = arith.constant 5 : index
    %c0_103 = arith.constant 0 : index
    %c0_104 = arith.constant 0 : index
    %194 = vector.load %arg9[%c5, %c0_103, %c0_104] : memref<8x8x512xf32, #tpu.memory_space<vmem>>, vector<1x8x512xf32>
    %195 = vector.shape_cast %194 : vector<1x8x512xf32> to vector<8x512xf32>
    %c0_105 = arith.constant 0 : index
    %c0_106 = arith.constant 0 : index
    %196 = vector.load %arg11[%c0_105, %c0_106] : memref<8x128xf32, #tpu.memory_space<vmem>>, vector<8x128xf32>
    %cst_107 = arith.constant dense<0.000000e+00> : vector<8x512xf32>
    %197 = tpu.matmul %196, %13, %cst_107 {dimension_numbers = #tpu.dot_dimension_numbers<[1], [0], [0], [1], [0, 0, 1, 1], [], []>} : vector<8x128xf32>, vector<128x512xf32>, vector<8x512xf32> -> vector<8x512xf32>
    %198 = arith.addf %195, %197 : vector<8x512xf32>
    %c0_108 = arith.constant 0 : index
    %c0_109 = arith.constant 0 : index
    %199 = vector.load %arg12[%c0_108, %c0_109] : memref<8x128xf32, #tpu.memory_space<vmem>>, vector<8x128xf32>
    %200 = vector.extract_strided_slice %198 {offsets = [0, 0], sizes = [8, 128], strides = [1, 1]} : vector<8x512xf32> to vector<8x128xf32>
    %201 = arith.negf %200 : vector<8x128xf32>
    %202 = math.exp %201 : vector<8x128xf32>
    %cst_110 = arith.constant 1.000000e+00 : f32
    %203 = vector.broadcast %cst_110 : f32 to vector<8x128xf32>
    %204 = arith.addf %203, %202 : vector<8x128xf32>
    %205 = arith.divf %203, %204 : vector<8x128xf32>
    %206 = vector.extract_strided_slice %198 {offsets = [0, 128], sizes = [8, 128], strides = [1, 1]} : vector<8x512xf32> to vector<8x128xf32>
    %207 = arith.negf %206 : vector<8x128xf32>
    %208 = math.exp %207 : vector<8x128xf32>
    %cst_111 = arith.constant 1.000000e+00 : f32
    %209 = vector.broadcast %cst_111 : f32 to vector<8x128xf32>
    %210 = arith.addf %209, %208 : vector<8x128xf32>
    %211 = arith.divf %209, %210 : vector<8x128xf32>
    %212 = vector.extract_strided_slice %198 {offsets = [0, 256], sizes = [8, 128], strides = [1, 1]} : vector<8x512xf32> to vector<8x128xf32>
    %213 = math.tanh %212 : vector<8x128xf32>
    %214 = vector.extract_strided_slice %198 {offsets = [0, 384], sizes = [8, 128], strides = [1, 1]} : vector<8x512xf32> to vector<8x128xf32>
    %215 = arith.negf %214 : vector<8x128xf32>
    %216 = math.exp %215 : vector<8x128xf32>
    %cst_112 = arith.constant 1.000000e+00 : f32
    %217 = vector.broadcast %cst_112 : f32 to vector<8x128xf32>
    %218 = arith.addf %217, %216 : vector<8x128xf32>
    %219 = arith.divf %217, %218 : vector<8x128xf32>
    %220 = arith.mulf %211, %199 : vector<8x128xf32>
    %221 = arith.mulf %205, %213 : vector<8x128xf32>
    %222 = arith.addf %220, %221 : vector<8x128xf32>
    %223 = math.tanh %222 : vector<8x128xf32>
    %224 = arith.mulf %219, %223 : vector<8x128xf32>
    %c0_113 = arith.constant 0 : index
    %c0_114 = arith.constant 0 : index
    %225 = vector.load %arg11[%c0_113, %c0_114] : memref<8x128xf32, #tpu.memory_space<vmem>>, vector<8x128xf32>
    tpu.vector_store %arg11[%c0_113, %c0_114], %224 {strides = array<i32>} : memref<8x128xf32, #tpu.memory_space<vmem>>, vector<8x128xf32>,
    %c0_115 = arith.constant 0 : index
    %c0_116 = arith.constant 0 : index
    %226 = vector.load %arg12[%c0_115, %c0_116] : memref<8x128xf32, #tpu.memory_space<vmem>>, vector<8x128xf32>
    tpu.vector_store %arg12[%c0_115, %c0_116], %222 {strides = array<i32>} : memref<8x128xf32, #tpu.memory_space<vmem>>, vector<8x128xf32>,
    %c5_117 = arith.constant 5 : index
    %c0_118 = arith.constant 0 : index
    %c0_119 = arith.constant 0 : index
    %227 = vector.load %arg10[%c5_117, %c0_118, %c0_119] : memref<8x8x128xf32, #tpu.memory_space<vmem>>, vector<1x8x128xf32>
    %228 = vector.shape_cast %227 : vector<1x8x128xf32> to vector<8x128xf32>
    %229 = vector.shape_cast %224 : vector<8x128xf32> to vector<1x8x128xf32>
    tpu.vector_store %arg10[%c5_117, %c0_118, %c0_119], %229 {strides = array<i32>} : memref<8x8x128xf32, #tpu.memory_space<vmem>>, vector<1x8x128xf32>,
    %c6 = arith.constant 6 : index
    %c0_120 = arith.constant 0 : index
    %c0_121 = arith.constant 0 : index
    %230 = vector.load %arg9[%c6, %c0_120, %c0_121] : memref<8x8x512xf32, #tpu.memory_space<vmem>>, vector<1x8x512xf32>
    %231 = vector.shape_cast %230 : vector<1x8x512xf32> to vector<8x512xf32>
    %c0_122 = arith.constant 0 : index
    %c0_123 = arith.constant 0 : index
    %232 = vector.load %arg11[%c0_122, %c0_123] : memref<8x128xf32, #tpu.memory_space<vmem>>, vector<8x128xf32>
    %cst_124 = arith.constant dense<0.000000e+00> : vector<8x512xf32>
    %233 = tpu.matmul %232, %13, %cst_124 {dimension_numbers = #tpu.dot_dimension_numbers<[1], [0], [0], [1], [0, 0, 1, 1], [], []>} : vector<8x128xf32>, vector<128x512xf32>, vector<8x512xf32> -> vector<8x512xf32>
    %234 = arith.addf %231, %233 : vector<8x512xf32>
    %c0_125 = arith.constant 0 : index
    %c0_126 = arith.constant 0 : index
    %235 = vector.load %arg12[%c0_125, %c0_126] : memref<8x128xf32, #tpu.memory_space<vmem>>, vector<8x128xf32>
    %236 = vector.extract_strided_slice %234 {offsets = [0, 0], sizes = [8, 128], strides = [1, 1]} : vector<8x512xf32> to vector<8x128xf32>
    %237 = arith.negf %236 : vector<8x128xf32>
    %238 = math.exp %237 : vector<8x128xf32>
    %cst_127 = arith.constant 1.000000e+00 : f32
    %239 = vector.broadcast %cst_127 : f32 to vector<8x128xf32>
    %240 = arith.addf %239, %238 : vector<8x128xf32>
    %241 = arith.divf %239, %240 : vector<8x128xf32>
    %242 = vector.extract_strided_slice %234 {offsets = [0, 128], sizes = [8, 128], strides = [1, 1]} : vector<8x512xf32> to vector<8x128xf32>
    %243 = arith.negf %242 : vector<8x128xf32>
    %244 = math.exp %243 : vector<8x128xf32>
    %cst_128 = arith.constant 1.000000e+00 : f32
    %245 = vector.broadcast %cst_128 : f32 to vector<8x128xf32>
    %246 = arith.addf %245, %244 : vector<8x128xf32>
    %247 = arith.divf %245, %246 : vector<8x128xf32>
    %248 = vector.extract_strided_slice %234 {offsets = [0, 256], sizes = [8, 128], strides = [1, 1]} : vector<8x512xf32> to vector<8x128xf32>
    %249 = math.tanh %248 : vector<8x128xf32>
    %250 = vector.extract_strided_slice %234 {offsets = [0, 384], sizes = [8, 128], strides = [1, 1]} : vector<8x512xf32> to vector<8x128xf32>
    %251 = arith.negf %250 : vector<8x128xf32>
    %252 = math.exp %251 : vector<8x128xf32>
    %cst_129 = arith.constant 1.000000e+00 : f32
    %253 = vector.broadcast %cst_129 : f32 to vector<8x128xf32>
    %254 = arith.addf %253, %252 : vector<8x128xf32>
    %255 = arith.divf %253, %254 : vector<8x128xf32>
    %256 = arith.mulf %247, %235 : vector<8x128xf32>
    %257 = arith.mulf %241, %249 : vector<8x128xf32>
    %258 = arith.addf %256, %257 : vector<8x128xf32>
    %259 = math.tanh %258 : vector<8x128xf32>
    %260 = arith.mulf %255, %259 : vector<8x128xf32>
    %c0_130 = arith.constant 0 : index
    %c0_131 = arith.constant 0 : index
    %261 = vector.load %arg11[%c0_130, %c0_131] : memref<8x128xf32, #tpu.memory_space<vmem>>, vector<8x128xf32>
    tpu.vector_store %arg11[%c0_130, %c0_131], %260 {strides = array<i32>} : memref<8x128xf32, #tpu.memory_space<vmem>>, vector<8x128xf32>,
    %c0_132 = arith.constant 0 : index
    %c0_133 = arith.constant 0 : index
    %262 = vector.load %arg12[%c0_132, %c0_133] : memref<8x128xf32, #tpu.memory_space<vmem>>, vector<8x128xf32>
    tpu.vector_store %arg12[%c0_132, %c0_133], %258 {strides = array<i32>} : memref<8x128xf32, #tpu.memory_space<vmem>>, vector<8x128xf32>,
    %c6_134 = arith.constant 6 : index
    %c0_135 = arith.constant 0 : index
    %c0_136 = arith.constant 0 : index
    %263 = vector.load %arg10[%c6_134, %c0_135, %c0_136] : memref<8x8x128xf32, #tpu.memory_space<vmem>>, vector<1x8x128xf32>
    %264 = vector.shape_cast %263 : vector<1x8x128xf32> to vector<8x128xf32>
    %265 = vector.shape_cast %260 : vector<8x128xf32> to vector<1x8x128xf32>
    tpu.vector_store %arg10[%c6_134, %c0_135, %c0_136], %265 {strides = array<i32>} : memref<8x8x128xf32, #tpu.memory_space<vmem>>, vector<1x8x128xf32>,
    %c7 = arith.constant 7 : index
    %c0_137 = arith.constant 0 : index
    %c0_138 = arith.constant 0 : index
    %266 = vector.load %arg9[%c7, %c0_137, %c0_138] : memref<8x8x512xf32, #tpu.memory_space<vmem>>, vector<1x8x512xf32>
    %267 = vector.shape_cast %266 : vector<1x8x512xf32> to vector<8x512xf32>
    %c0_139 = arith.constant 0 : index
    %c0_140 = arith.constant 0 : index
    %268 = vector.load %arg11[%c0_139, %c0_140] : memref<8x128xf32, #tpu.memory_space<vmem>>, vector<8x128xf32>
    %cst_141 = arith.constant dense<0.000000e+00> : vector<8x512xf32>
    %269 = tpu.matmul %268, %13, %cst_141 {dimension_numbers = #tpu.dot_dimension_numbers<[1], [0], [0], [1], [0, 0, 1, 1], [], []>} : vector<8x128xf32>, vector<128x512xf32>, vector<8x512xf32> -> vector<8x512xf32>
    %270 = arith.addf %267, %269 : vector<8x512xf32>
    %c0_142 = arith.constant 0 : index
    %c0_143 = arith.constant 0 : index
    %271 = vector.load %arg12[%c0_142, %c0_143] : memref<8x128xf32, #tpu.memory_space<vmem>>, vector<8x128xf32>
    %272 = vector.extract_strided_slice %270 {offsets = [0, 0], sizes = [8, 128], strides = [1, 1]} : vector<8x512xf32> to vector<8x128xf32>
    %273 = arith.negf %272 : vector<8x128xf32>
    %274 = math.exp %273 : vector<8x128xf32>
    %cst_144 = arith.constant 1.000000e+00 : f32
    %275 = vector.broadcast %cst_144 : f32 to vector<8x128xf32>
    %276 = arith.addf %275, %274 : vector<8x128xf32>
    %277 = arith.divf %275, %276 : vector<8x128xf32>
    %278 = vector.extract_strided_slice %270 {offsets = [0, 128], sizes = [8, 128], strides = [1, 1]} : vector<8x512xf32> to vector<8x128xf32>
    %279 = arith.negf %278 : vector<8x128xf32>
    %280 = math.exp %279 : vector<8x128xf32>
    %cst_145 = arith.constant 1.000000e+00 : f32
    %281 = vector.broadcast %cst_145 : f32 to vector<8x128xf32>
    %282 = arith.addf %281, %280 : vector<8x128xf32>
    %283 = arith.divf %281, %282 : vector<8x128xf32>
    %284 = vector.extract_strided_slice %270 {offsets = [0, 256], sizes = [8, 128], strides = [1, 1]} : vector<8x512xf32> to vector<8x128xf32>
    %285 = math.tanh %284 : vector<8x128xf32>
    %286 = vector.extract_strided_slice %270 {offsets = [0, 384], sizes = [8, 128], strides = [1, 1]} : vector<8x512xf32> to vector<8x128xf32>
    %287 = arith.negf %286 : vector<8x128xf32>
    %288 = math.exp %287 : vector<8x128xf32>
    %cst_146 = arith.constant 1.000000e+00 : f32
    %289 = vector.broadcast %cst_146 : f32 to vector<8x128xf32>
    %290 = arith.addf %289, %288 : vector<8x128xf32>
    %291 = arith.divf %289, %290 : vector<8x128xf32>
    %292 = arith.mulf %283, %271 : vector<8x128xf32>
    %293 = arith.mulf %277, %285 : vector<8x128xf32>
    %294 = arith.addf %292, %293 : vector<8x128xf32>
    %295 = math.tanh %294 : vector<8x128xf32>
    %296 = arith.mulf %291, %295 : vector<8x128xf32>
    %c0_147 = arith.constant 0 : index
    %c0_148 = arith.constant 0 : index
    %297 = vector.load %arg11[%c0_147, %c0_148] : memref<8x128xf32, #tpu.memory_space<vmem>>, vector<8x128xf32>
    tpu.vector_store %arg11[%c0_147, %c0_148], %296 {strides = array<i32>} : memref<8x128xf32, #tpu.memory_space<vmem>>, vector<8x128xf32>,
    %c0_149 = arith.constant 0 : index
    %c0_150 = arith.constant 0 : index
    %298 = vector.load %arg12[%c0_149, %c0_150] : memref<8x128xf32, #tpu.memory_space<vmem>>, vector<8x128xf32>
    tpu.vector_store %arg12[%c0_149, %c0_150], %294 {strides = array<i32>} : memref<8x128xf32, #tpu.memory_space<vmem>>, vector<8x128xf32>,
    %c7_151 = arith.constant 7 : index
    %c0_152 = arith.constant 0 : index
    %c0_153 = arith.constant 0 : index
    %299 = vector.load %arg10[%c7_151, %c0_152, %c0_153] : memref<8x8x128xf32, #tpu.memory_space<vmem>>, vector<1x8x128xf32>
    %300 = vector.shape_cast %299 : vector<1x8x128xf32> to vector<8x128xf32>
    %301 = vector.shape_cast %296 : vector<8x128xf32> to vector<1x8x128xf32>
    tpu.vector_store %arg10[%c7_151, %c0_152, %c0_153], %301 {strides = array<i32>} : memref<8x8x128xf32, #tpu.memory_space<vmem>>, vector<1x8x128xf32>,
    %c0_154 = arith.constant 0 : index
    %c0_155 = arith.constant 0 : index
    %302 = vector.load %arg11[%c0_154, %c0_155] : memref<8x128xf32, #tpu.memory_space<vmem>>, vector<8x128xf32>
    %c0_156 = arith.constant 0 : index
    %c0_157 = arith.constant 0 : index
    %c0_158 = arith.constant 0 : index
    %303 = vector.load %arg7[%c0_156, %c0_157, %c0_158] : memref<2x8x128xf32, #tpu.memory_space<vmem>>, vector<1x8x128xf32>
    %304 = vector.shape_cast %303 : vector<1x8x128xf32> to vector<8x128xf32>
    %305 = vector.shape_cast %302 : vector<8x128xf32> to vector<1x8x128xf32>
    tpu.vector_store %arg7[%c0_156, %c0_157, %c0_158], %305 {strides = array<i32>} : memref<2x8x128xf32, #tpu.memory_space<vmem>>, vector<1x8x128xf32>,
    %c0_159 = arith.constant 0 : index
    %c0_160 = arith.constant 0 : index
    %306 = vector.load %arg12[%c0_159, %c0_160] : memref<8x128xf32, #tpu.memory_space<vmem>>, vector<8x128xf32>
    %c0_161 = arith.constant 0 : index
    %c0_162 = arith.constant 0 : index
    %c0_163 = arith.constant 0 : index
    %307 = vector.load %arg8[%c0_161, %c0_162, %c0_163] : memref<2x8x128xf32, #tpu.memory_space<vmem>>, vector<1x8x128xf32>
    %308 = vector.shape_cast %307 : vector<1x8x128xf32> to vector<8x128xf32>
    %309 = vector.shape_cast %306 : vector<8x128xf32> to vector<1x8x128xf32>
    tpu.vector_store %arg8[%c0_161, %c0_162, %c0_163], %309 {strides = array<i32>} : memref<2x8x128xf32, #tpu.memory_space<vmem>>, vector<1x8x128xf32>,
    %c0_164 = arith.constant 0 : index
    %c0_165 = arith.constant 0 : index
    %c0_166 = arith.constant 0 : index
    %310 = vector.load %arg10[%c0_164, %c0_165, %c0_166] : memref<8x8x128xf32, #tpu.memory_space<vmem>>, vector<8x8x128xf32>
    %311 = vector.shape_cast %310 : vector<8x8x128xf32> to vector<64x128xf32>
    %c0_167 = arith.constant 0 : index
    %c0_168 = arith.constant 0 : index
    %312 = vector.load %arg4[%c0_167, %c0_168] : memref<128x512xf32, #tpu.memory_space<vmem>>, vector<128x512xf32>
    %cst_169 = arith.constant dense<0.000000e+00> : vector<64x512xf32>
    %313 = tpu.matmul %311, %312, %cst_169 {dimension_numbers = #tpu.dot_dimension_numbers<[1], [0], [0], [1], [0, 0, 1, 1], [], []>} : vector<64x128xf32>, vector<128x512xf32>, vector<64x512xf32> -> vector<64x512xf32>
    %c0_170 = arith.constant 0 : index
    %c0_171 = arith.constant 0 : index
    %314 = vector.load %arg6[%c0_170, %c0_171] : memref<1x512xf32, #tpu.memory_space<vmem>>, vector<1x512xf32>
    %315 = vector.broadcast %314 : vector<1x512xf32> to vector<64x512xf32>
    %316 = arith.addf %313, %315 : vector<64x512xf32>
    %317 = vector.shape_cast %316 : vector<64x512xf32> to vector<8x8x512xf32>
    %c0_172 = arith.constant 0 : index
    %c0_173 = arith.constant 0 : index
    %c0_174 = arith.constant 0 : index
    %318 = vector.load %arg9[%c0_172, %c0_173, %c0_174] : memref<8x8x512xf32, #tpu.memory_space<vmem>>, vector<8x8x512xf32>
    tpu.vector_store %arg9[%c0_172, %c0_173, %c0_174], %317 {strides = array<i32>} : memref<8x8x512xf32, #tpu.memory_space<vmem>>, vector<8x8x512xf32>,
    %cst_175 = arith.constant 0.000000e+00 : f32
    %319 = vector.broadcast %cst_175 : f32 to vector<8x128xf32>
    %c0_176 = arith.constant 0 : index
    %c0_177 = arith.constant 0 : index
    %320 = vector.load %arg11[%c0_176, %c0_177] : memref<8x128xf32, #tpu.memory_space<vmem>>, vector<8x128xf32>
    tpu.vector_store %arg11[%c0_176, %c0_177], %319 {strides = array<i32>} : memref<8x128xf32, #tpu.memory_space<vmem>>, vector<8x128xf32>,
    %cst_178 = arith.constant 0.000000e+00 : f32
    %321 = vector.broadcast %cst_178 : f32 to vector<8x128xf32>
    %c0_179 = arith.constant 0 : index
    %c0_180 = arith.constant 0 : index
    %322 = vector.load %arg12[%c0_179, %c0_180] : memref<8x128xf32, #tpu.memory_space<vmem>>, vector<8x128xf32>
    tpu.vector_store %arg12[%c0_179, %c0_180], %321 {strides = array<i32>} : memref<8x128xf32, #tpu.memory_space<vmem>>, vector<8x128xf32>,
    %c0_181 = arith.constant 0 : index
    %c0_182 = arith.constant 0 : index
    %323 = vector.load %arg5[%c0_181, %c0_182] : memref<128x512xf32, #tpu.memory_space<vmem>>, vector<128x512xf32>
    %c0_183 = arith.constant 0 : index
    %c0_184 = arith.constant 0 : index
    %c0_185 = arith.constant 0 : index
    %324 = vector.load %arg9[%c0_183, %c0_184, %c0_185] : memref<8x8x512xf32, #tpu.memory_space<vmem>>, vector<1x8x512xf32>
    %325 = vector.shape_cast %324 : vector<1x8x512xf32> to vector<8x512xf32>
    %c0_186 = arith.constant 0 : index
    %c0_187 = arith.constant 0 : index
    %326 = vector.load %arg11[%c0_186, %c0_187] : memref<8x128xf32, #tpu.memory_space<vmem>>, vector<8x128xf32>
    %cst_188 = arith.constant dense<0.000000e+00> : vector<8x512xf32>
    %327 = tpu.matmul %326, %323, %cst_188 {dimension_numbers = #tpu.dot_dimension_numbers<[1], [0], [0], [1], [0, 0, 1, 1], [], []>} : vector<8x128xf32>, vector<128x512xf32>, vector<8x512xf32> -> vector<8x512xf32>
    %328 = arith.addf %325, %327 : vector<8x512xf32>
    %c0_189 = arith.constant 0 : index
    %c0_190 = arith.constant 0 : index
    %329 = vector.load %arg12[%c0_189, %c0_190] : memref<8x128xf32, #tpu.memory_space<vmem>>, vector<8x128xf32>
    %330 = vector.extract_strided_slice %328 {offsets = [0, 0], sizes = [8, 128], strides = [1, 1]} : vector<8x512xf32> to vector<8x128xf32>
    %331 = arith.negf %330 : vector<8x128xf32>
    %332 = math.exp %331 : vector<8x128xf32>
    %cst_191 = arith.constant 1.000000e+00 : f32
    %333 = vector.broadcast %cst_191 : f32 to vector<8x128xf32>
    %334 = arith.addf %333, %332 : vector<8x128xf32>
    %335 = arith.divf %333, %334 : vector<8x128xf32>
    %336 = vector.extract_strided_slice %328 {offsets = [0, 128], sizes = [8, 128], strides = [1, 1]} : vector<8x512xf32> to vector<8x128xf32>
    %337 = arith.negf %336 : vector<8x128xf32>
    %338 = math.exp %337 : vector<8x128xf32>
    %cst_192 = arith.constant 1.000000e+00 : f32
    %339 = vector.broadcast %cst_192 : f32 to vector<8x128xf32>
    %340 = arith.addf %339, %338 : vector<8x128xf32>
    %341 = arith.divf %339, %340 : vector<8x128xf32>
    %342 = vector.extract_strided_slice %328 {offsets = [0, 256], sizes = [8, 128], strides = [1, 1]} : vector<8x512xf32> to vector<8x128xf32>
    %343 = math.tanh %342 : vector<8x128xf32>
    %344 = vector.extract_strided_slice %328 {offsets = [0, 384], sizes = [8, 128], strides = [1, 1]} : vector<8x512xf32> to vector<8x128xf32>
    %345 = arith.negf %344 : vector<8x128xf32>
    %346 = math.exp %345 : vector<8x128xf32>
    %cst_193 = arith.constant 1.000000e+00 : f32
    %347 = vector.broadcast %cst_193 : f32 to vector<8x128xf32>
    %348 = arith.addf %347, %346 : vector<8x128xf32>
    %349 = arith.divf %347, %348 : vector<8x128xf32>
    %350 = arith.mulf %341, %329 : vector<8x128xf32>
    %351 = arith.mulf %335, %343 : vector<8x128xf32>
    %352 = arith.addf %350, %351 : vector<8x128xf32>
    %353 = math.tanh %352 : vector<8x128xf32>
    %354 = arith.mulf %349, %353 : vector<8x128xf32>
    %c0_194 = arith.constant 0 : index
    %c0_195 = arith.constant 0 : index
    %355 = vector.load %arg11[%c0_194, %c0_195] : memref<8x128xf32, #tpu.memory_space<vmem>>, vector<8x128xf32>
    tpu.vector_store %arg11[%c0_194, %c0_195], %354 {strides = array<i32>} : memref<8x128xf32, #tpu.memory_space<vmem>>, vector<8x128xf32>,
    %c0_196 = arith.constant 0 : index
    %c0_197 = arith.constant 0 : index
    %356 = vector.load %arg12[%c0_196, %c0_197] : memref<8x128xf32, #tpu.memory_space<vmem>>, vector<8x128xf32>
    tpu.vector_store %arg12[%c0_196, %c0_197], %352 {strides = array<i32>} : memref<8x128xf32, #tpu.memory_space<vmem>>, vector<8x128xf32>,
    %c1_198 = arith.constant 1 : index
    %c0_199 = arith.constant 0 : index
    %c0_200 = arith.constant 0 : index
    %357 = vector.load %arg9[%c1_198, %c0_199, %c0_200] : memref<8x8x512xf32, #tpu.memory_space<vmem>>, vector<1x8x512xf32>
    %358 = vector.shape_cast %357 : vector<1x8x512xf32> to vector<8x512xf32>
    %c0_201 = arith.constant 0 : index
    %c0_202 = arith.constant 0 : index
    %359 = vector.load %arg11[%c0_201, %c0_202] : memref<8x128xf32, #tpu.memory_space<vmem>>, vector<8x128xf32>
    %cst_203 = arith.constant dense<0.000000e+00> : vector<8x512xf32>
    %360 = tpu.matmul %359, %323, %cst_203 {dimension_numbers = #tpu.dot_dimension_numbers<[1], [0], [0], [1], [0, 0, 1, 1], [], []>} : vector<8x128xf32>, vector<128x512xf32>, vector<8x512xf32> -> vector<8x512xf32>
    %361 = arith.addf %358, %360 : vector<8x512xf32>
    %c0_204 = arith.constant 0 : index
    %c0_205 = arith.constant 0 : index
    %362 = vector.load %arg12[%c0_204, %c0_205] : memref<8x128xf32, #tpu.memory_space<vmem>>, vector<8x128xf32>
    %363 = vector.extract_strided_slice %361 {offsets = [0, 0], sizes = [8, 128], strides = [1, 1]} : vector<8x512xf32> to vector<8x128xf32>
    %364 = arith.negf %363 : vector<8x128xf32>
    %365 = math.exp %364 : vector<8x128xf32>
    %cst_206 = arith.constant 1.000000e+00 : f32
    %366 = vector.broadcast %cst_206 : f32 to vector<8x128xf32>
    %367 = arith.addf %366, %365 : vector<8x128xf32>
    %368 = arith.divf %366, %367 : vector<8x128xf32>
    %369 = vector.extract_strided_slice %361 {offsets = [0, 128], sizes = [8, 128], strides = [1, 1]} : vector<8x512xf32> to vector<8x128xf32>
    %370 = arith.negf %369 : vector<8x128xf32>
    %371 = math.exp %370 : vector<8x128xf32>
    %cst_207 = arith.constant 1.000000e+00 : f32
    %372 = vector.broadcast %cst_207 : f32 to vector<8x128xf32>
    %373 = arith.addf %372, %371 : vector<8x128xf32>
    %374 = arith.divf %372, %373 : vector<8x128xf32>
    %375 = vector.extract_strided_slice %361 {offsets = [0, 256], sizes = [8, 128], strides = [1, 1]} : vector<8x512xf32> to vector<8x128xf32>
    %376 = math.tanh %375 : vector<8x128xf32>
    %377 = vector.extract_strided_slice %361 {offsets = [0, 384], sizes = [8, 128], strides = [1, 1]} : vector<8x512xf32> to vector<8x128xf32>
    %378 = arith.negf %377 : vector<8x128xf32>
    %379 = math.exp %378 : vector<8x128xf32>
    %cst_208 = arith.constant 1.000000e+00 : f32
    %380 = vector.broadcast %cst_208 : f32 to vector<8x128xf32>
    %381 = arith.addf %380, %379 : vector<8x128xf32>
    %382 = arith.divf %380, %381 : vector<8x128xf32>
    %383 = arith.mulf %374, %362 : vector<8x128xf32>
    %384 = arith.mulf %368, %376 : vector<8x128xf32>
    %385 = arith.addf %383, %384 : vector<8x128xf32>
    %386 = math.tanh %385 : vector<8x128xf32>
    %387 = arith.mulf %382, %386 : vector<8x128xf32>
    %c0_209 = arith.constant 0 : index
    %c0_210 = arith.constant 0 : index
    %388 = vector.load %arg11[%c0_209, %c0_210] : memref<8x128xf32, #tpu.memory_space<vmem>>, vector<8x128xf32>
    tpu.vector_store %arg11[%c0_209, %c0_210], %387 {strides = array<i32>} : memref<8x128xf32, #tpu.memory_space<vmem>>, vector<8x128xf32>,
    %c0_211 = arith.constant 0 : index
    %c0_212 = arith.constant 0 : index
    %389 = vector.load %arg12[%c0_211, %c0_212] : memref<8x128xf32, #tpu.memory_space<vmem>>, vector<8x128xf32>
    tpu.vector_store %arg12[%c0_211, %c0_212], %385 {strides = array<i32>} : memref<8x128xf32, #tpu.memory_space<vmem>>, vector<8x128xf32>,
    %c2_213 = arith.constant 2 : index
    %c0_214 = arith.constant 0 : index
    %c0_215 = arith.constant 0 : index
    %390 = vector.load %arg9[%c2_213, %c0_214, %c0_215] : memref<8x8x512xf32, #tpu.memory_space<vmem>>, vector<1x8x512xf32>
    %391 = vector.shape_cast %390 : vector<1x8x512xf32> to vector<8x512xf32>
    %c0_216 = arith.constant 0 : index
    %c0_217 = arith.constant 0 : index
    %392 = vector.load %arg11[%c0_216, %c0_217] : memref<8x128xf32, #tpu.memory_space<vmem>>, vector<8x128xf32>
    %cst_218 = arith.constant dense<0.000000e+00> : vector<8x512xf32>
    %393 = tpu.matmul %392, %323, %cst_218 {dimension_numbers = #tpu.dot_dimension_numbers<[1], [0], [0], [1], [0, 0, 1, 1], [], []>} : vector<8x128xf32>, vector<128x512xf32>, vector<8x512xf32> -> vector<8x512xf32>
    %394 = arith.addf %391, %393 : vector<8x512xf32>
    %c0_219 = arith.constant 0 : index
    %c0_220 = arith.constant 0 : index
    %395 = vector.load %arg12[%c0_219, %c0_220] : memref<8x128xf32, #tpu.memory_space<vmem>>, vector<8x128xf32>
    %396 = vector.extract_strided_slice %394 {offsets = [0, 0], sizes = [8, 128], strides = [1, 1]} : vector<8x512xf32> to vector<8x128xf32>
    %397 = arith.negf %396 : vector<8x128xf32>
    %398 = math.exp %397 : vector<8x128xf32>
    %cst_221 = arith.constant 1.000000e+00 : f32
    %399 = vector.broadcast %cst_221 : f32 to vector<8x128xf32>
    %400 = arith.addf %399, %398 : vector<8x128xf32>
    %401 = arith.divf %399, %400 : vector<8x128xf32>
    %402 = vector.extract_strided_slice %394 {offsets = [0, 128], sizes = [8, 128], strides = [1, 1]} : vector<8x512xf32> to vector<8x128xf32>
    %403 = arith.negf %402 : vector<8x128xf32>
    %404 = math.exp %403 : vector<8x128xf32>
    %cst_222 = arith.constant 1.000000e+00 : f32
    %405 = vector.broadcast %cst_222 : f32 to vector<8x128xf32>
    %406 = arith.addf %405, %404 : vector<8x128xf32>
    %407 = arith.divf %405, %406 : vector<8x128xf32>
    %408 = vector.extract_strided_slice %394 {offsets = [0, 256], sizes = [8, 128], strides = [1, 1]} : vector<8x512xf32> to vector<8x128xf32>
    %409 = math.tanh %408 : vector<8x128xf32>
    %410 = vector.extract_strided_slice %394 {offsets = [0, 384], sizes = [8, 128], strides = [1, 1]} : vector<8x512xf32> to vector<8x128xf32>
    %411 = arith.negf %410 : vector<8x128xf32>
    %412 = math.exp %411 : vector<8x128xf32>
    %cst_223 = arith.constant 1.000000e+00 : f32
    %413 = vector.broadcast %cst_223 : f32 to vector<8x128xf32>
    %414 = arith.addf %413, %412 : vector<8x128xf32>
    %415 = arith.divf %413, %414 : vector<8x128xf32>
    %416 = arith.mulf %407, %395 : vector<8x128xf32>
    %417 = arith.mulf %401, %409 : vector<8x128xf32>
    %418 = arith.addf %416, %417 : vector<8x128xf32>
    %419 = math.tanh %418 : vector<8x128xf32>
    %420 = arith.mulf %415, %419 : vector<8x128xf32>
    %c0_224 = arith.constant 0 : index
    %c0_225 = arith.constant 0 : index
    %421 = vector.load %arg11[%c0_224, %c0_225] : memref<8x128xf32, #tpu.memory_space<vmem>>, vector<8x128xf32>
    tpu.vector_store %arg11[%c0_224, %c0_225], %420 {strides = array<i32>} : memref<8x128xf32, #tpu.memory_space<vmem>>, vector<8x128xf32>,
    %c0_226 = arith.constant 0 : index
    %c0_227 = arith.constant 0 : index
    %422 = vector.load %arg12[%c0_226, %c0_227] : memref<8x128xf32, #tpu.memory_space<vmem>>, vector<8x128xf32>
    tpu.vector_store %arg12[%c0_226, %c0_227], %418 {strides = array<i32>} : memref<8x128xf32, #tpu.memory_space<vmem>>, vector<8x128xf32>,
    %c3_228 = arith.constant 3 : index
    %c0_229 = arith.constant 0 : index
    %c0_230 = arith.constant 0 : index
    %423 = vector.load %arg9[%c3_228, %c0_229, %c0_230] : memref<8x8x512xf32, #tpu.memory_space<vmem>>, vector<1x8x512xf32>
    %424 = vector.shape_cast %423 : vector<1x8x512xf32> to vector<8x512xf32>
    %c0_231 = arith.constant 0 : index
    %c0_232 = arith.constant 0 : index
    %425 = vector.load %arg11[%c0_231, %c0_232] : memref<8x128xf32, #tpu.memory_space<vmem>>, vector<8x128xf32>
    %cst_233 = arith.constant dense<0.000000e+00> : vector<8x512xf32>
    %426 = tpu.matmul %425, %323, %cst_233 {dimension_numbers = #tpu.dot_dimension_numbers<[1], [0], [0], [1], [0, 0, 1, 1], [], []>} : vector<8x128xf32>, vector<128x512xf32>, vector<8x512xf32> -> vector<8x512xf32>
    %427 = arith.addf %424, %426 : vector<8x512xf32>
    %c0_234 = arith.constant 0 : index
    %c0_235 = arith.constant 0 : index
    %428 = vector.load %arg12[%c0_234, %c0_235] : memref<8x128xf32, #tpu.memory_space<vmem>>, vector<8x128xf32>
    %429 = vector.extract_strided_slice %427 {offsets = [0, 0], sizes = [8, 128], strides = [1, 1]} : vector<8x512xf32> to vector<8x128xf32>
    %430 = arith.negf %429 : vector<8x128xf32>
    %431 = math.exp %430 : vector<8x128xf32>
    %cst_236 = arith.constant 1.000000e+00 : f32
    %432 = vector.broadcast %cst_236 : f32 to vector<8x128xf32>
    %433 = arith.addf %432, %431 : vector<8x128xf32>
    %434 = arith.divf %432, %433 : vector<8x128xf32>
    %435 = vector.extract_strided_slice %427 {offsets = [0, 128], sizes = [8, 128], strides = [1, 1]} : vector<8x512xf32> to vector<8x128xf32>
    %436 = arith.negf %435 : vector<8x128xf32>
    %437 = math.exp %436 : vector<8x128xf32>
    %cst_237 = arith.constant 1.000000e+00 : f32
    %438 = vector.broadcast %cst_237 : f32 to vector<8x128xf32>
    %439 = arith.addf %438, %437 : vector<8x128xf32>
    %440 = arith.divf %438, %439 : vector<8x128xf32>
    %441 = vector.extract_strided_slice %427 {offsets = [0, 256], sizes = [8, 128], strides = [1, 1]} : vector<8x512xf32> to vector<8x128xf32>
    %442 = math.tanh %441 : vector<8x128xf32>
    %443 = vector.extract_strided_slice %427 {offsets = [0, 384], sizes = [8, 128], strides = [1, 1]} : vector<8x512xf32> to vector<8x128xf32>
    %444 = arith.negf %443 : vector<8x128xf32>
    %445 = math.exp %444 : vector<8x128xf32>
    %cst_238 = arith.constant 1.000000e+00 : f32
    %446 = vector.broadcast %cst_238 : f32 to vector<8x128xf32>
    %447 = arith.addf %446, %445 : vector<8x128xf32>
    %448 = arith.divf %446, %447 : vector<8x128xf32>
    %449 = arith.mulf %440, %428 : vector<8x128xf32>
    %450 = arith.mulf %434, %442 : vector<8x128xf32>
    %451 = arith.addf %449, %450 : vector<8x128xf32>
    %452 = math.tanh %451 : vector<8x128xf32>
    %453 = arith.mulf %448, %452 : vector<8x128xf32>
    %c0_239 = arith.constant 0 : index
    %c0_240 = arith.constant 0 : index
    %454 = vector.load %arg11[%c0_239, %c0_240] : memref<8x128xf32, #tpu.memory_space<vmem>>, vector<8x128xf32>
    tpu.vector_store %arg11[%c0_239, %c0_240], %453 {strides = array<i32>} : memref<8x128xf32, #tpu.memory_space<vmem>>, vector<8x128xf32>,
    %c0_241 = arith.constant 0 : index
    %c0_242 = arith.constant 0 : index
    %455 = vector.load %arg12[%c0_241, %c0_242] : memref<8x128xf32, #tpu.memory_space<vmem>>, vector<8x128xf32>
    tpu.vector_store %arg12[%c0_241, %c0_242], %451 {strides = array<i32>} : memref<8x128xf32, #tpu.memory_space<vmem>>, vector<8x128xf32>,
    %c4_243 = arith.constant 4 : index
    %c0_244 = arith.constant 0 : index
    %c0_245 = arith.constant 0 : index
    %456 = vector.load %arg9[%c4_243, %c0_244, %c0_245] : memref<8x8x512xf32, #tpu.memory_space<vmem>>, vector<1x8x512xf32>
    %457 = vector.shape_cast %456 : vector<1x8x512xf32> to vector<8x512xf32>
    %c0_246 = arith.constant 0 : index
    %c0_247 = arith.constant 0 : index
    %458 = vector.load %arg11[%c0_246, %c0_247] : memref<8x128xf32, #tpu.memory_space<vmem>>, vector<8x128xf32>
    %cst_248 = arith.constant dense<0.000000e+00> : vector<8x512xf32>
    %459 = tpu.matmul %458, %323, %cst_248 {dimension_numbers = #tpu.dot_dimension_numbers<[1], [0], [0], [1], [0, 0, 1, 1], [], []>} : vector<8x128xf32>, vector<128x512xf32>, vector<8x512xf32> -> vector<8x512xf32>
    %460 = arith.addf %457, %459 : vector<8x512xf32>
    %c0_249 = arith.constant 0 : index
    %c0_250 = arith.constant 0 : index
    %461 = vector.load %arg12[%c0_249, %c0_250] : memref<8x128xf32, #tpu.memory_space<vmem>>, vector<8x128xf32>
    %462 = vector.extract_strided_slice %460 {offsets = [0, 0], sizes = [8, 128], strides = [1, 1]} : vector<8x512xf32> to vector<8x128xf32>
    %463 = arith.negf %462 : vector<8x128xf32>
    %464 = math.exp %463 : vector<8x128xf32>
    %cst_251 = arith.constant 1.000000e+00 : f32
    %465 = vector.broadcast %cst_251 : f32 to vector<8x128xf32>
    %466 = arith.addf %465, %464 : vector<8x128xf32>
    %467 = arith.divf %465, %466 : vector<8x128xf32>
    %468 = vector.extract_strided_slice %460 {offsets = [0, 128], sizes = [8, 128], strides = [1, 1]} : vector<8x512xf32> to vector<8x128xf32>
    %469 = arith.negf %468 : vector<8x128xf32>
    %470 = math.exp %469 : vector<8x128xf32>
    %cst_252 = arith.constant 1.000000e+00 : f32
    %471 = vector.broadcast %cst_252 : f32 to vector<8x128xf32>
    %472 = arith.addf %471, %470 : vector<8x128xf32>
    %473 = arith.divf %471, %472 : vector<8x128xf32>
    %474 = vector.extract_strided_slice %460 {offsets = [0, 256], sizes = [8, 128], strides = [1, 1]} : vector<8x512xf32> to vector<8x128xf32>
    %475 = math.tanh %474 : vector<8x128xf32>
    %476 = vector.extract_strided_slice %460 {offsets = [0, 384], sizes = [8, 128], strides = [1, 1]} : vector<8x512xf32> to vector<8x128xf32>
    %477 = arith.negf %476 : vector<8x128xf32>
    %478 = math.exp %477 : vector<8x128xf32>
    %cst_253 = arith.constant 1.000000e+00 : f32
    %479 = vector.broadcast %cst_253 : f32 to vector<8x128xf32>
    %480 = arith.addf %479, %478 : vector<8x128xf32>
    %481 = arith.divf %479, %480 : vector<8x128xf32>
    %482 = arith.mulf %473, %461 : vector<8x128xf32>
    %483 = arith.mulf %467, %475 : vector<8x128xf32>
    %484 = arith.addf %482, %483 : vector<8x128xf32>
    %485 = math.tanh %484 : vector<8x128xf32>
    %486 = arith.mulf %481, %485 : vector<8x128xf32>
    %c0_254 = arith.constant 0 : index
    %c0_255 = arith.constant 0 : index
    %487 = vector.load %arg11[%c0_254, %c0_255] : memref<8x128xf32, #tpu.memory_space<vmem>>, vector<8x128xf32>
    tpu.vector_store %arg11[%c0_254, %c0_255], %486 {strides = array<i32>} : memref<8x128xf32, #tpu.memory_space<vmem>>, vector<8x128xf32>,
    %c0_256 = arith.constant 0 : index
    %c0_257 = arith.constant 0 : index
    %488 = vector.load %arg12[%c0_256, %c0_257] : memref<8x128xf32, #tpu.memory_space<vmem>>, vector<8x128xf32>
    tpu.vector_store %arg12[%c0_256, %c0_257], %484 {strides = array<i32>} : memref<8x128xf32, #tpu.memory_space<vmem>>, vector<8x128xf32>,
    %c5_258 = arith.constant 5 : index
    %c0_259 = arith.constant 0 : index
    %c0_260 = arith.constant 0 : index
    %489 = vector.load %arg9[%c5_258, %c0_259, %c0_260] : memref<8x8x512xf32, #tpu.memory_space<vmem>>, vector<1x8x512xf32>
    %490 = vector.shape_cast %489 : vector<1x8x512xf32> to vector<8x512xf32>
    %c0_261 = arith.constant 0 : index
    %c0_262 = arith.constant 0 : index
    %491 = vector.load %arg11[%c0_261, %c0_262] : memref<8x128xf32, #tpu.memory_space<vmem>>, vector<8x128xf32>
    %cst_263 = arith.constant dense<0.000000e+00> : vector<8x512xf32>
    %492 = tpu.matmul %491, %323, %cst_263 {dimension_numbers = #tpu.dot_dimension_numbers<[1], [0], [0], [1], [0, 0, 1, 1], [], []>} : vector<8x128xf32>, vector<128x512xf32>, vector<8x512xf32> -> vector<8x512xf32>
    %493 = arith.addf %490, %492 : vector<8x512xf32>
    %c0_264 = arith.constant 0 : index
    %c0_265 = arith.constant 0 : index
    %494 = vector.load %arg12[%c0_264, %c0_265] : memref<8x128xf32, #tpu.memory_space<vmem>>, vector<8x128xf32>
    %495 = vector.extract_strided_slice %493 {offsets = [0, 0], sizes = [8, 128], strides = [1, 1]} : vector<8x512xf32> to vector<8x128xf32>
    %496 = arith.negf %495 : vector<8x128xf32>
    %497 = math.exp %496 : vector<8x128xf32>
    %cst_266 = arith.constant 1.000000e+00 : f32
    %498 = vector.broadcast %cst_266 : f32 to vector<8x128xf32>
    %499 = arith.addf %498, %497 : vector<8x128xf32>
    %500 = arith.divf %498, %499 : vector<8x128xf32>
    %501 = vector.extract_strided_slice %493 {offsets = [0, 128], sizes = [8, 128], strides = [1, 1]} : vector<8x512xf32> to vector<8x128xf32>
    %502 = arith.negf %501 : vector<8x128xf32>
    %503 = math.exp %502 : vector<8x128xf32>
    %cst_267 = arith.constant 1.000000e+00 : f32
    %504 = vector.broadcast %cst_267 : f32 to vector<8x128xf32>
    %505 = arith.addf %504, %503 : vector<8x128xf32>
    %506 = arith.divf %504, %505 : vector<8x128xf32>
    %507 = vector.extract_strided_slice %493 {offsets = [0, 256], sizes = [8, 128], strides = [1, 1]} : vector<8x512xf32> to vector<8x128xf32>
    %508 = math.tanh %507 : vector<8x128xf32>
    %509 = vector.extract_strided_slice %493 {offsets = [0, 384], sizes = [8, 128], strides = [1, 1]} : vector<8x512xf32> to vector<8x128xf32>
    %510 = arith.negf %509 : vector<8x128xf32>
    %511 = math.exp %510 : vector<8x128xf32>
    %cst_268 = arith.constant 1.000000e+00 : f32
    %512 = vector.broadcast %cst_268 : f32 to vector<8x128xf32>
    %513 = arith.addf %512, %511 : vector<8x128xf32>
    %514 = arith.divf %512, %513 : vector<8x128xf32>
    %515 = arith.mulf %506, %494 : vector<8x128xf32>
    %516 = arith.mulf %500, %508 : vector<8x128xf32>
    %517 = arith.addf %515, %516 : vector<8x128xf32>
    %518 = math.tanh %517 : vector<8x128xf32>
    %519 = arith.mulf %514, %518 : vector<8x128xf32>
    %c0_269 = arith.constant 0 : index
    %c0_270 = arith.constant 0 : index
    %520 = vector.load %arg11[%c0_269, %c0_270] : memref<8x128xf32, #tpu.memory_space<vmem>>, vector<8x128xf32>
    tpu.vector_store %arg11[%c0_269, %c0_270], %519 {strides = array<i32>} : memref<8x128xf32, #tpu.memory_space<vmem>>, vector<8x128xf32>,
    %c0_271 = arith.constant 0 : index
    %c0_272 = arith.constant 0 : index
    %521 = vector.load %arg12[%c0_271, %c0_272] : memref<8x128xf32, #tpu.memory_space<vmem>>, vector<8x128xf32>
    tpu.vector_store %arg12[%c0_271, %c0_272], %517 {strides = array<i32>} : memref<8x128xf32, #tpu.memory_space<vmem>>, vector<8x128xf32>,
    %c6_273 = arith.constant 6 : index
    %c0_274 = arith.constant 0 : index
    %c0_275 = arith.constant 0 : index
    %522 = vector.load %arg9[%c6_273, %c0_274, %c0_275] : memref<8x8x512xf32, #tpu.memory_space<vmem>>, vector<1x8x512xf32>
    %523 = vector.shape_cast %522 : vector<1x8x512xf32> to vector<8x512xf32>
    %c0_276 = arith.constant 0 : index
    %c0_277 = arith.constant 0 : index
    %524 = vector.load %arg11[%c0_276, %c0_277] : memref<8x128xf32, #tpu.memory_space<vmem>>, vector<8x128xf32>
    %cst_278 = arith.constant dense<0.000000e+00> : vector<8x512xf32>
    %525 = tpu.matmul %524, %323, %cst_278 {dimension_numbers = #tpu.dot_dimension_numbers<[1], [0], [0], [1], [0, 0, 1, 1], [], []>} : vector<8x128xf32>, vector<128x512xf32>, vector<8x512xf32> -> vector<8x512xf32>
    %526 = arith.addf %523, %525 : vector<8x512xf32>
    %c0_279 = arith.constant 0 : index
    %c0_280 = arith.constant 0 : index
    %527 = vector.load %arg12[%c0_279, %c0_280] : memref<8x128xf32, #tpu.memory_space<vmem>>, vector<8x128xf32>
    %528 = vector.extract_strided_slice %526 {offsets = [0, 0], sizes = [8, 128], strides = [1, 1]} : vector<8x512xf32> to vector<8x128xf32>
    %529 = arith.negf %528 : vector<8x128xf32>
    %530 = math.exp %529 : vector<8x128xf32>
    %cst_281 = arith.constant 1.000000e+00 : f32
    %531 = vector.broadcast %cst_281 : f32 to vector<8x128xf32>
    %532 = arith.addf %531, %530 : vector<8x128xf32>
    %533 = arith.divf %531, %532 : vector<8x128xf32>
    %534 = vector.extract_strided_slice %526 {offsets = [0, 128], sizes = [8, 128], strides = [1, 1]} : vector<8x512xf32> to vector<8x128xf32>
    %535 = arith.negf %534 : vector<8x128xf32>
    %536 = math.exp %535 : vector<8x128xf32>
    %cst_282 = arith.constant 1.000000e+00 : f32
    %537 = vector.broadcast %cst_282 : f32 to vector<8x128xf32>
    %538 = arith.addf %537, %536 : vector<8x128xf32>
    %539 = arith.divf %537, %538 : vector<8x128xf32>
    %540 = vector.extract_strided_slice %526 {offsets = [0, 256], sizes = [8, 128], strides = [1, 1]} : vector<8x512xf32> to vector<8x128xf32>
    %541 = math.tanh %540 : vector<8x128xf32>
    %542 = vector.extract_strided_slice %526 {offsets = [0, 384], sizes = [8, 128], strides = [1, 1]} : vector<8x512xf32> to vector<8x128xf32>
    %543 = arith.negf %542 : vector<8x128xf32>
    %544 = math.exp %543 : vector<8x128xf32>
    %cst_283 = arith.constant 1.000000e+00 : f32
    %545 = vector.broadcast %cst_283 : f32 to vector<8x128xf32>
    %546 = arith.addf %545, %544 : vector<8x128xf32>
    %547 = arith.divf %545, %546 : vector<8x128xf32>
    %548 = arith.mulf %539, %527 : vector<8x128xf32>
    %549 = arith.mulf %533, %541 : vector<8x128xf32>
    %550 = arith.addf %548, %549 : vector<8x128xf32>
    %551 = math.tanh %550 : vector<8x128xf32>
    %552 = arith.mulf %547, %551 : vector<8x128xf32>
    %c0_284 = arith.constant 0 : index
    %c0_285 = arith.constant 0 : index
    %553 = vector.load %arg11[%c0_284, %c0_285] : memref<8x128xf32, #tpu.memory_space<vmem>>, vector<8x128xf32>
    tpu.vector_store %arg11[%c0_284, %c0_285], %552 {strides = array<i32>} : memref<8x128xf32, #tpu.memory_space<vmem>>, vector<8x128xf32>,
    %c0_286 = arith.constant 0 : index
    %c0_287 = arith.constant 0 : index
    %554 = vector.load %arg12[%c0_286, %c0_287] : memref<8x128xf32, #tpu.memory_space<vmem>>, vector<8x128xf32>
    tpu.vector_store %arg12[%c0_286, %c0_287], %550 {strides = array<i32>} : memref<8x128xf32, #tpu.memory_space<vmem>>, vector<8x128xf32>,
    %c7_288 = arith.constant 7 : index
    %c0_289 = arith.constant 0 : index
    %c0_290 = arith.constant 0 : index
    %555 = vector.load %arg9[%c7_288, %c0_289, %c0_290] : memref<8x8x512xf32, #tpu.memory_space<vmem>>, vector<1x8x512xf32>
    %556 = vector.shape_cast %555 : vector<1x8x512xf32> to vector<8x512xf32>
    %c0_291 = arith.constant 0 : index
    %c0_292 = arith.constant 0 : index
    %557 = vector.load %arg11[%c0_291, %c0_292] : memref<8x128xf32, #tpu.memory_space<vmem>>, vector<8x128xf32>
    %cst_293 = arith.constant dense<0.000000e+00> : vector<8x512xf32>
    %558 = tpu.matmul %557, %323, %cst_293 {dimension_numbers = #tpu.dot_dimension_numbers<[1], [0], [0], [1], [0, 0, 1, 1], [], []>} : vector<8x128xf32>, vector<128x512xf32>, vector<8x512xf32> -> vector<8x512xf32>
    %559 = arith.addf %556, %558 : vector<8x512xf32>
    %c0_294 = arith.constant 0 : index
    %c0_295 = arith.constant 0 : index
    %560 = vector.load %arg12[%c0_294, %c0_295] : memref<8x128xf32, #tpu.memory_space<vmem>>, vector<8x128xf32>
    %561 = vector.extract_strided_slice %559 {offsets = [0, 0], sizes = [8, 128], strides = [1, 1]} : vector<8x512xf32> to vector<8x128xf32>
    %562 = arith.negf %561 : vector<8x128xf32>
    %563 = math.exp %562 : vector<8x128xf32>
    %cst_296 = arith.constant 1.000000e+00 : f32
    %564 = vector.broadcast %cst_296 : f32 to vector<8x128xf32>
    %565 = arith.addf %564, %563 : vector<8x128xf32>
    %566 = arith.divf %564, %565 : vector<8x128xf32>
    %567 = vector.extract_strided_slice %559 {offsets = [0, 128], sizes = [8, 128], strides = [1, 1]} : vector<8x512xf32> to vector<8x128xf32>
    %568 = arith.negf %567 : vector<8x128xf32>
    %569 = math.exp %568 : vector<8x128xf32>
    %cst_297 = arith.constant 1.000000e+00 : f32
    %570 = vector.broadcast %cst_297 : f32 to vector<8x128xf32>
    %571 = arith.addf %570, %569 : vector<8x128xf32>
    %572 = arith.divf %570, %571 : vector<8x128xf32>
    %573 = vector.extract_strided_slice %559 {offsets = [0, 256], sizes = [8, 128], strides = [1, 1]} : vector<8x512xf32> to vector<8x128xf32>
    %574 = math.tanh %573 : vector<8x128xf32>
    %575 = vector.extract_strided_slice %559 {offsets = [0, 384], sizes = [8, 128], strides = [1, 1]} : vector<8x512xf32> to vector<8x128xf32>
    %576 = arith.negf %575 : vector<8x128xf32>
    %577 = math.exp %576 : vector<8x128xf32>
    %cst_298 = arith.constant 1.000000e+00 : f32
    %578 = vector.broadcast %cst_298 : f32 to vector<8x128xf32>
    %579 = arith.addf %578, %577 : vector<8x128xf32>
    %580 = arith.divf %578, %579 : vector<8x128xf32>
    %581 = arith.mulf %572, %560 : vector<8x128xf32>
    %582 = arith.mulf %566, %574 : vector<8x128xf32>
    %583 = arith.addf %581, %582 : vector<8x128xf32>
    %584 = math.tanh %583 : vector<8x128xf32>
    %585 = arith.mulf %580, %584 : vector<8x128xf32>
    %c0_299 = arith.constant 0 : index
    %c0_300 = arith.constant 0 : index
    %586 = vector.load %arg11[%c0_299, %c0_300] : memref<8x128xf32, #tpu.memory_space<vmem>>, vector<8x128xf32>
    tpu.vector_store %arg11[%c0_299, %c0_300], %585 {strides = array<i32>} : memref<8x128xf32, #tpu.memory_space<vmem>>, vector<8x128xf32>,
    %c0_301 = arith.constant 0 : index
    %c0_302 = arith.constant 0 : index
    %587 = vector.load %arg12[%c0_301, %c0_302] : memref<8x128xf32, #tpu.memory_space<vmem>>, vector<8x128xf32>
    tpu.vector_store %arg12[%c0_301, %c0_302], %583 {strides = array<i32>} : memref<8x128xf32, #tpu.memory_space<vmem>>, vector<8x128xf32>,
    %c0_303 = arith.constant 0 : index
    %c0_304 = arith.constant 0 : index
    %588 = vector.load %arg11[%c0_303, %c0_304] : memref<8x128xf32, #tpu.memory_space<vmem>>, vector<8x128xf32>
    %c1_305 = arith.constant 1 : index
    %c0_306 = arith.constant 0 : index
    %c0_307 = arith.constant 0 : index
    %589 = vector.load %arg7[%c1_305, %c0_306, %c0_307] : memref<2x8x128xf32, #tpu.memory_space<vmem>>, vector<1x8x128xf32>
    %590 = vector.shape_cast %589 : vector<1x8x128xf32> to vector<8x128xf32>
    %591 = vector.shape_cast %588 : vector<8x128xf32> to vector<1x8x128xf32>
    tpu.vector_store %arg7[%c1_305, %c0_306, %c0_307], %591 {strides = array<i32>} : memref<2x8x128xf32, #tpu.memory_space<vmem>>, vector<1x8x128xf32>,
    %c0_308 = arith.constant 0 : index
    %c0_309 = arith.constant 0 : index
    %592 = vector.load %arg12[%c0_308, %c0_309] : memref<8x128xf32, #tpu.memory_space<vmem>>, vector<8x128xf32>
    %c1_310 = arith.constant 1 : index
    %c0_311 = arith.constant 0 : index
    %c0_312 = arith.constant 0 : index
    %593 = vector.load %arg8[%c1_310, %c0_311, %c0_312] : memref<2x8x128xf32, #tpu.memory_space<vmem>>, vector<1x8x128xf32>
    %594 = vector.shape_cast %593 : vector<1x8x128xf32> to vector<8x128xf32>
    %595 = vector.shape_cast %592 : vector<8x128xf32> to vector<1x8x128xf32>
    tpu.vector_store %arg8[%c1_310, %c0_311, %c0_312], %595 {strides = array<i32>} : memref<2x8x128xf32, #tpu.memory_space<vmem>>, vector<1x8x128xf32>,
    return
  }
}

</mosaic_0001>

<bundles_post_ra>
// kernel: encoder_forward.1
= control target key start
LH: loop header
LB: loop body
LE: loop exit
PB: predicated region body
PF: predicated region fallthrough
CT: control target
= control target key end

     0   :  { %14 = vsyncpa [#allocation7], 0  ;;  %s5903_s0 = inlined_call_operand.vmem [shape: f32[8,8,128], index: 0, kind: input, shape index: {}]   ;;  %s5904_s1 = inlined_call_operand.hbm [shape: f32[128,512], index: 1, kind: input, shape index: {}]   ;;  %s5905_s2 = inlined_call_operand.hbm [shape: f32[128,512], index: 2, kind: input, shape index: {}]   ;;  %s5906_s3 = inlined_call_operand.vmem [shape: f32[1,512], index: 3, kind: input, shape index: {}]   ;;  %s5907_s4 = inlined_call_operand.hbm [shape: f32[128,512], index: 4, kind: input, shape index: {}]   ;;  %s5908_s5 = inlined_call_operand.hbm [shape: f32[128,512], index: 5, kind: input, shape index: {}]   ;;  %s5909_s6 = inlined_call_operand.vmem [shape: f32[1,512], index: 6, kind: input, shape index: {}]   ;;  %s5910_s7 = inlined_call_operand.vmem [shape: f32[2,8,128], index: 7, kind: output, shape index: {0}]   ;;  %s5911_s8 = inlined_call_operand.vmem [shape: f32[2,8,128], index: 8, kind: output, shape index: {1}]  }
   0x1   :  { %15 = vsyncpa [#allocation9], 0 }
   0x2   :  { %16 = vsyncpa [#allocation12], 0  ;;  %s36_s29 = sshll.u32 %s5905_s2, 4  ;;  %s3845_s30 = smov [#allocation8]   ;;  %s37_s29 = int_to_ptr.hbm [resolvable:$true] %s36_s29 }
   0x3   :  { %s38_s9 = sshll.u32 %s3845_s30, 4  ;;  %s23_s12 = sshll.u32 %s5904_s1, 4  ;;  %s39_s9 = int_to_ptr.vmem [resolvable:$true] %s38_s9  ;;  %s24_s12 = int_to_ptr.hbm [resolvable:$true] %s23_s12 }
   0x4   :  { %s3846_s13 = smov 512   ;;  %s3847_s14 = smov 32  }
   0x5   :  { %44 = dma.hbm_to_vmem [thread:$0]  %s37_s29, 8192, %s39_s9, [#allocation9], %s3846_s13, %s3846_s13, %s3847_s14  }
   0x6   :  { %s3848_s15 = smov [#allocation6]   ;;  %s51_s19 = sshll.u32 %s5907_s4, 4  ;;  %s52_s19 = int_to_ptr.hbm [resolvable:$true] %s51_s19 }
   0x7   :  { %s25_s16 = sshll.u32 %s3848_s15, 4  ;;  %s64_s21 = sshll.u32 %s5908_s5, 4  ;;  %s26_s16 = int_to_ptr.vmem [resolvable:$true] %s25_s16  ;;  %s65_s21 = int_to_ptr.hbm [resolvable:$true] %s64_s21 }
   0x8   :  { %31 = dma.hbm_to_vmem [thread:$0]  %s24_s12, 8192, %s26_s16, [#allocation7], %s3846_s13, %s3846_s13, %s3847_s14  }
   0x9   :  { %s3849_s22 = smov [#allocation10]   ;;  %s3850_s1 = smov [#allocation11]  }
   0xa   :  { %s53_s23 = sshll.u32 %s3849_s22, 4  ;;  %s66_s24 = sshll.u32 %s3850_s1, 4  ;;  %s54_s23 = int_to_ptr.vmem [resolvable:$true] %s53_s23  ;;  %s67_s24 = int_to_ptr.vmem [resolvable:$true] %s66_s24 }
   0xb   :  { %59 = dma.hbm_to_vmem [thread:$0]  %s52_s19, 8192, %s54_s23, [#allocation9], %s3846_s13, %s3846_s13, %s3847_s14  }
   0xc   :  { %72 = dma.hbm_to_vmem [thread:$0]  %s65_s21, 8192, %s67_s24, [#allocation12], %s3846_s13, %s3846_s13, %s3847_s14  }
   0xd   :  { %3839 = dma.done.wait [#allocation7], 8192  }
   0xe   :  { %3840 = vsyncadd [#allocation7], 4294959104 }
   0xf   :  { %3841 = dma.done.wait [#allocation9], 16384  }
  0x10   :  { %3842 = vsyncadd [#allocation9], 4294950912 }
  0x11   :  { %3843 = dma.done.wait [#allocation12], 8192  }
  0x12   :  { %3844 = vsyncadd [#allocation12], 4294959104  ;;  %v159_v0 = vld [vmem:[#allocation6 + $0x1e0] sm:$0xff]  ;;  %v160_v1 = vld [vmem:[#allocation6 + $0x1e8] sm:$0xff] }
  0x13   :  { %v161_v2 = vld [vmem:[#allocation6 + $0x1f0] sm:$0xff]  ;;  %173 = vmatpush.msra.mxu0 %v159_v0  ;;  %214 = vmatpush.msra.mxu1 %v160_v1  ;;  %v162_v3 = vld [vmem:[#allocation6 + $0x1f8] sm:$0xff]  ;;  %v155_v4 = vld [vmem:[#allocation6 + $0x1c0] sm:$0xff] }
  0x14   :  { %v156_v5 = vld [vmem:[#allocation6 + $0x1c8] sm:$0xff]  ;;  %255 = vmatpush.msra.mxu2 %v161_v2  ;;  %296 = vmatpush.msra.mxu3 %v162_v3  ;;  %v157_v6 = vld [vmem:[#allocation6 + $0x1d0] sm:$0xff]  ;;  %v158_v7 = vld [vmem:[#allocation6 + $0x1d8] sm:$0xff] }
  0x15   :  { %v151_v8 = vld [vmem:[#allocation6 + $0x1a0] sm:$0xff]  ;;  %174 = vmatpush.msra.mxu0 %v155_v4  ;;  %215 = vmatpush.msra.mxu1 %v156_v5  ;;  %v152_v9 = vld [vmem:[#allocation6 + $0x1a8] sm:$0xff]  ;;  %v153_v10 = vld [vmem:[#allocation6 + $0x1b0] sm:$0xff] }
  0x16   :  { %v154_v11 = vld [vmem:[#allocation6 + $0x1b8] sm:$0xff]  ;;  %256 = vmatpush.msra.mxu2 %v157_v6  ;;  %297 = vmatpush.msra.mxu3 %v158_v7  ;;  %v147_v12 = vld [vmem:[#allocation6 + $0x180] sm:$0xff]  ;;  %v148_v13 = vld [vmem:[#allocation6 + $0x188] sm:$0xff] }
  0x17   :  { %175 = vmatpush.msra.mxu0 %v151_v8  ;;  %216 = vmatpush.msra.mxu1 %v152_v9  ;;  %v149_v14 = vld [vmem:[#allocation6 + $0x190] sm:$0xff]  ;;  %v150_v15 = vld [vmem:[#allocation6 + $0x198] sm:$0xff]  ;;  %v143_v16 = vld [vmem:[#allocation6 + $0x160] sm:$0xff] }
  0x18   :  { %257 = vmatpush.msra.mxu2 %v153_v10  ;;  %298 = vmatpush.msra.mxu3 %v154_v11  ;;  %v144_v17 = vld [vmem:[#allocation6 + $0x168] sm:$0xff]  ;;  %v145_v18 = vld [vmem:[#allocation6 + $0x170] sm:$0xff]  ;;  %v146_v19 = vld [vmem:[#allocation6 + $0x178] sm:$0xff] }
  0x19   :  { %176 = vmatpush.msra.mxu0 %v147_v12  ;;  %217 = vmatpush.msra.mxu1 %v148_v13  ;;  %v139_v20 = vld [vmem:[#allocation6 + $0x140] sm:$0xff]  ;;  %v140_v21 = vld [vmem:[#allocation6 + $0x148] sm:$0xff]  ;;  %v141_v22 = vld [vmem:[#allocation6 + $0x150] sm:$0xff] }
  0x1a   :  { %258 = vmatpush.msra.mxu2 %v149_v14  ;;  %299 = vmatpush.msra.mxu3 %v150_v15  ;;  %v142_v23 = vld [vmem:[#allocation6 + $0x158] sm:$0xff]  ;;  %v135_v24 = vld [vmem:[#allocation6 + $0x120] sm:$0xff]  ;;  %v136_v25 = vld [vmem:[#allocation6 + $0x128] sm:$0xff] }
  0x1b   :  { %177 = vmatpush.msra.mxu0 %v143_v16  ;;  %218 = vmatpush.msra.mxu1 %v144_v17  ;;  %v137_v26 = vld [vmem:[#allocation6 + $0x130] sm:$0xff]  ;;  %v138_v27 = vld [vmem:[#allocation6 + $0x138] sm:$0xff]  ;;  %v131_v28 = vld [vmem:[#allocation6 + $0x100] sm:$0xff] }
  0x1c   :  { %259 = vmatpush.msra.mxu2 %v145_v18  ;;  %300 = vmatpush.msra.mxu3 %v146_v19  ;;  %v132_v29 = vld [vmem:[#allocation6 + $0x108] sm:$0xff]  ;;  %v133_v30 = vld [vmem:[#allocation6 + $0x110] sm:$0xff]  ;;  %v134_v31 = vld [vmem:[#allocation6 + $0x118] sm:$0xff] }
  0x1d   :  { %178 = vmatpush.msra.mxu0 %v139_v20  ;;  %219 = vmatpush.msra.mxu1 %v140_v21  ;;  %v127_v32 = vld [vmem:[#allocation6 + $0xe0] sm:$0xff]  ;;  %v128_v33 = vld [vmem:[#allocation6 + $0xe8] sm:$0xff]  ;;  %v129_v34 = vld [vmem:[#allocation6 + $0xf0] sm:$0xff] }
  0x1e   :  { %260 = vmatpush.msra.mxu2 %v141_v22  ;;  %301 = vmatpush.msra.mxu3 %v142_v23  ;;  %v130_v35 = vld [vmem:[#allocation6 + $0xf8] sm:$0xff]  ;;  %v123_v36 = vld [vmem:[#allocation6 + $0xc0] sm:$0xff]  ;;  %v124_v37 = vld [vmem:[#allocation6 + $0xc8] sm:$0xff] }
  0x1f   :  { %179 = vmatpush.msra.mxu0 %v135_v24  ;;  %220 = vmatpush.msra.mxu1 %v136_v25  ;;  %v125_v38 = vld [vmem:[#allocation6 + $0xd0] sm:$0xff]  ;;  %v126_v39 = vld [vmem:[#allocation6 + $0xd8] sm:$0xff]  ;;  %v119_v40 = vld [vmem:[#allocation6 + $0xa0] sm:$0xff] }
  0x20   :  { %261 = vmatpush.msra.mxu2 %v137_v26  ;;  %302 = vmatpush.msra.mxu3 %v138_v27  ;;  %v120_v41 = vld [vmem:[#allocation6 + $0xa8] sm:$0xff]  ;;  %v121_v42 = vld [vmem:[#allocation6 + $0xb0] sm:$0xff]  ;;  %v122_v43 = vld [vmem:[#allocation6 + $0xb8] sm:$0xff] }
  0x21   :  { %180 = vmatpush.msra.mxu0 %v131_v28  ;;  %221 = vmatpush.msra.mxu1 %v132_v29  ;;  %v115_v44 = vld [vmem:[#allocation6 + $0x80] sm:$0xff]  ;;  %v116_v45 = vld [vmem:[#allocation6 + $0x88] sm:$0xff]  ;;  %v117_v46 = vld [vmem:[#allocation6 + $0x90] sm:$0xff] }
  0x22   :  { %262 = vmatpush.msra.mxu2 %v133_v30  ;;  %303 = vmatpush.msra.mxu3 %v134_v31  ;;  %v118_v47 = vld [vmem:[#allocation6 + $0x98] sm:$0xff]  ;;  %v111_v48 = vld [vmem:[#allocation6 + $0x60] sm:$0xff]  ;;  %v112_v49 = vld [vmem:[#allocation6 + $0x68] sm:$0xff] }
  0x23   :  { %181 = vmatpush.msra.mxu0 %v127_v32  ;;  %222 = vmatpush.msra.mxu1 %v128_v33  ;;  %v113_v50 = vld [vmem:[#allocation6 + $0x70] sm:$0xff]  ;;  %v114_v51 = vld [vmem:[#allocation6 + $0x78] sm:$0xff]  ;;  %v107_v52 = vld [vmem:[#allocation6 + $0x40] sm:$0xff] }
  0x24   :  { %263 = vmatpush.msra.mxu2 %v129_v34  ;;  %304 = vmatpush.msra.mxu3 %v130_v35  ;;  %v108_v53 = vld [vmem:[#allocation6 + $0x48] sm:$0xff]  ;;  %v109_v54 = vld [vmem:[#allocation6 + $0x50] sm:$0xff]  ;;  %v110_v55 = vld [vmem:[#allocation6 + $0x58] sm:$0xff] }
  0x25   :  { %182 = vmatpush.msra.mxu0 %v123_v36  ;;  %223 = vmatpush.msra.mxu1 %v124_v37  ;;  %v103_v56 = vld [vmem:[#allocation6 + $0x20] sm:$0xff]  ;;  %v104_v57 = vld [vmem:[#allocation6 + $0x28] sm:$0xff]  ;;  %v105_v58 = vld [vmem:[#allocation6 + $0x30] sm:$0xff] }
  0x26   :  { %264 = vmatpush.msra.mxu2 %v125_v38  ;;  %305 = vmatpush.msra.mxu3 %v126_v39  ;;  %v106_v59 = vld [vmem:[#allocation6 + $0x38] sm:$0xff]  ;;  %v99_v60 = vld [vmem:[#allocation6] sm:$0xff]  ;;  %v100_v61 = vld [vmem:[#allocation6 + $0x8] sm:$0xff] }
  0x27   :  { %183 = vmatpush.msra.mxu0 %v119_v40  ;;  %224 = vmatpush.msra.mxu1 %v120_v41  ;;  %v101_v62 = vld [vmem:[#allocation6 + $0x10] sm:$0xff]  ;;  %v102_v63 = vld [vmem:[#allocation6 + $0x18] sm:$0xff]  ;;  %v91_v0 = vld [vmem:[%s5903_s0] sm:$0xff] }
  0x28   :  { %265 = vmatpush.msra.mxu2 %v121_v42  ;;  %306 = vmatpush.msra.mxu3 %v122_v43  ;;  %v3912_v1 = vld [vmem:[#allocation8 + $0x1e0] sm:$0xff]  ;;  %v3914_v2 = vld [vmem:[#allocation8 + $0x1e8] sm:$0xff]  ;;  %v3916_v3 = vld [vmem:[#allocation8 + $0x1f8] sm:$0xff] }
  0x29   :  { %184 = vmatpush.msra.mxu0 %v115_v44  ;;  %225 = vmatpush.msra.mxu1 %v116_v45  ;;  %v3918_v4 = vld [vmem:[#allocation8 + $0x1f0] sm:$0xff]  ;;  %v3920_v5 = vld [vmem:[#allocation8 + $0x1c0] sm:$0xff]  ;;  %v3922_v6 = vld [vmem:[#allocation8 + $0x1c8] sm:$0xff] }
  0x2a   :  { %266 = vmatpush.msra.mxu2 %v117_v46  ;;  %307 = vmatpush.msra.mxu3 %v118_v47  ;;  %v3926_v7 = vld [vmem:[#allocation8 + $0x1d8] sm:$0xff]  ;;  %v3928_v8 = vld [vmem:[#allocation8 + $0x1d0] sm:$0xff]  ;;  %v3931_v9 = vld [vmem:[#allocation8 + $0x1a0] sm:$0xff] }
  0x2b   :  { %185 = vmatpush.msra.mxu0 %v111_v48  ;;  %226 = vmatpush.msra.mxu1 %v112_v49  ;;  %v3933_v10 = vld [vmem:[#allocation8 + $0x1a8] sm:$0xff]  ;;  %v3938_v11 = vld [vmem:[#allocation8 + $0x1b8] sm:$0xff]  ;;  %v3940_v12 = vld [vmem:[#allocation8 + $0x1b0] sm:$0xff] }
  0x2c   :  { %267 = vmatpush.msra.mxu2 %v113_v50  ;;  %308 = vmatpush.msra.mxu3 %v114_v51  ;;  %v92_v13 = vld [vmem:[%s5903_s0 + $0x8] sm:$0xff]  ;;  %v3949_v14 = vld [vmem:[#allocation8 + $0x180] sm:$0xff]  ;;  %v3955_v16 = vld [vmem:[#allocation8 + $0x198] sm:$0xff] }
  0x2d   :  { %186 = vmatpush.msra.mxu0 %v107_v52  ;;  %227 = vmatpush.msra.mxu1 %v108_v53  ;;  %v3951_v15 = vld [vmem:[#allocation8 + $0x188] sm:$0xff]  ;;  %v3957_v17 = vld [vmem:[#allocation8 + $0x190] sm:$0xff]  ;;  %v3959_v18 = vld [vmem:[#allocation8 + $0x160] sm:$0xff] }
  0x2e   :  { %268 = vmatpush.msra.mxu2 %v109_v54  ;;  %309 = vmatpush.msra.mxu3 %v110_v55  ;;  %v3961_v19 = vld [vmem:[#allocation8 + $0x168] sm:$0xff]  ;;  %v3965_v20 = vld [vmem:[#allocation8 + $0x178] sm:$0xff]  ;;  %v3967_v21 = vld [vmem:[#allocation8 + $0x170] sm:$0xff] }
  0x2f   :  { %187 = vmatpush.msra.mxu0 %v103_v56  ;;  %228 = vmatpush.msra.mxu1 %v104_v57  ;;  %v3970_v22 = vld [vmem:[#allocation8 + $0x140] sm:$0xff]  ;;  %v3972_v23 = vld [vmem:[#allocation8 + $0x148] sm:$0xff]  ;;  %v3977_v24 = vld [vmem:[#allocation8 + $0x158] sm:$0xff] }
  0x30   :  { %269 = vmatpush.msra.mxu2 %v105_v58  ;;  %310 = vmatpush.msra.mxu3 %v106_v59  ;;  %v3979_v25 = vld [vmem:[#allocation8 + $0x150] sm:$0xff]  ;;  %v3988_v27 = vld [vmem:[#allocation8 + $0x120] sm:$0xff]  ;;  %v3990_v28 = vld [vmem:[#allocation8 + $0x128] sm:$0xff] }
  0x31   :  { %188 = vmatpush.msra.mxu0 %v99_v60  ;;  %229 = vmatpush.msra.mxu1 %v100_v61  ;;  %v93_v26 = vld [vmem:[%s5903_s0 + $0x10] sm:$0xff]  ;;  %v3994_v29 = vld [vmem:[#allocation8 + $0x138] sm:$0xff]  ;;  %v3998_v31 = vld [vmem:[#allocation8 + $0x100] sm:$0xff] }
  0x32   :  { %270 = vmatpush.msra.mxu2 %v101_v62  ;;  %311 = vmatpush.msra.mxu3 %v102_v63  ;;  %v3996_v30 = vld [vmem:[#allocation8 + $0x130] sm:$0xff]  ;;  %v4000_v32 = vld [vmem:[#allocation8 + $0x108] sm:$0xff]  ;;  %v4004_v33 = vld [vmem:[#allocation8 + $0x118] sm:$0xff] }
  0x33   :  { %189 = vmatmul.f32.vlgmr.msra.gmra.mxu0 %v91_v0  ;;  %230 = vmatmul.f32.vlgmr.msra.gmra.mxu1 %v91_v0  ;;  %v4006_v34 = vld [vmem:[#allocation8 + $0x110] sm:$0xff]  ;;  %v4009_v35 = vld [vmem:[#allocation8 + $0xe0] sm:$0xff]  ;;  %v4011_v36 = vld [vmem:[#allocation8 + $0xe8] sm:$0xff] }
  0x34   :  { %271 = vmatmul.f32.vlgmr.msra.gmra.mxu2 %v91_v0  ;;  %312 = vmatmul.f32.vlgmr.msra.gmra.mxu3 %v91_v0  ;;  %v4016_v37 = vld [vmem:[#allocation8 + $0xf8] sm:$0xff]  ;;  %v4018_v38 = vld [vmem:[#allocation8 + $0xf0] sm:$0xff]  ;;  %v4027_v40 = vld [vmem:[#allocation8 + $0xc0] sm:$0xff] }
  0x35   :  { %440 = vmatpush.msrb.mxu0 %v3912_v1  ;;  %460 = vmatpush.msrb.mxu1 %v3914_v2  ;;  %v94_v39 = vld [vmem:[%s5903_s0 + $0x18] sm:$0xff]  ;;  %v4029_v41 = vld [vmem:[#allocation8 + $0xc8] sm:$0xff]  ;;  %v4035_v43 = vld [vmem:[#allocation8 + $0xd0] sm:$0xff] }
  0x36   :  { %500 = vmatpush.msrb.mxu3 %v3916_v3  ;;  %480 = vmatpush.msrb.mxu2 %v3918_v4  ;;  %v4033_v42 = vld [vmem:[#allocation8 + $0xd8] sm:$0xff]  ;;  %6181 = vst [vmem:[#allocation17_spill] sm:$0xff] %v4035_v43  ;;  %v4037_v44 = vld [vmem:[#allocation8 + $0xa0] sm:$0xff]  ;;  %v4039_v45 = vld [vmem:[#allocation8 + $0xa8] sm:$0xff] }
  0x37   :  { %441 = vmatpush.msrb.mxu0 %v3920_v5  ;;  %461 = vmatpush.msrb.mxu1 %v3922_v6  ;;  %6180 = vst [vmem:[#allocation16_spill] sm:$0xff] %v4033_v42  ;;  %v4043_v46 = vld [vmem:[#allocation8 + $0xb8] sm:$0xff]  ;;  %v4045_v47 = vld [vmem:[#allocation8 + $0xb0] sm:$0xff]  ;;  %v4048_v48 = vld [vmem:[#allocation8 + $0x80] sm:$0xff] }
  0x38   :  { %501 = vmatpush.msrb.mxu3 %v3926_v7  ;;  %481 = vmatpush.msrb.mxu2 %v3928_v8  ;;  %6182 = vst [vmem:[#allocation18_spill] sm:$0xff] %v4037_v44  ;;  %v4050_v49 = vld [vmem:[#allocation8 + $0x88] sm:$0xff]  ;;  %v4055_v50 = vld [vmem:[#allocation8 + $0x98] sm:$0xff]  ;;  %v4057_v51 = vld [vmem:[#allocation8 + $0x90] sm:$0xff] }
  0x39   :  { %442 = vmatpush.msrb.mxu0 %v3931_v9  ;;  %462 = vmatpush.msrb.mxu1 %v3933_v10  ;;  %6183 = vst [vmem:[#allocation19_spill] sm:$0xff] %v4039_v45  ;;  %v95_v52 = vld [vmem:[%s5903_s0 + $0x20] sm:$0xff]  ;;  %v4068_v54 = vld [vmem:[#allocation8 + $0x68] sm:$0xff]  ;;  %v4072_v55 = vld [vmem:[#allocation8 + $0x78] sm:$0xff] }
  0x3a   :  { %502 = vmatpush.msrb.mxu3 %v3938_v11  ;;  %482 = vmatpush.msrb.mxu2 %v3940_v12  ;;  %6184 = vst [vmem:[#allocation20_spill] sm:$0xff] %v4043_v46  ;;  %v4066_v53 = vld [vmem:[#allocation8 + $0x60] sm:$0xff]  ;;  %v4074_v56 = vld [vmem:[#allocation8 + $0x70] sm:$0xff]  ;;  %v4078_v58 = vld [vmem:[#allocation8 + $0x48] sm:$0xff] }
  0x3b   :  { %192 = vmatmul.f32.gmra.mxu0 %v92_v13  ;;  %233 = vmatmul.f32.gmra.mxu1 %v92_v13  ;;  %6185 = vst [vmem:[#allocation21_spill] sm:$0xff] %v4045_v47  ;;  %v4076_v57 = vld [vmem:[#allocation8 + $0x40] sm:$0xff]  ;;  %v4082_v59 = vld [vmem:[#allocation8 + $0x58] sm:$0xff]  ;;  %v4084_v60 = vld [vmem:[#allocation8 + $0x50] sm:$0xff] }
  0x3c   :  { %274 = vmatmul.f32.gmra.mxu2 %v92_v13  ;;  %315 = vmatmul.f32.gmra.mxu3 %v92_v13  ;;  %6186 = vst [vmem:[#allocation22_spill] sm:$0xff] %v4048_v48  ;;  %v4087_v61 = vld [vmem:[#allocation8 + $0x20] sm:$0xff]  ;;  %v4089_v62 = vld [vmem:[#allocation8 + $0x28] sm:$0xff]  ;;  %v4094_v63 = vld [vmem:[#allocation8 + $0x30] sm:$0xff] }
  0x3d   :  { %443 = vmatpush.msrb.mxu0 %v3949_v14  ;;  %463 = vmatpush.msrb.mxu1 %v3951_v15  ;;  %6187 = vst [vmem:[#allocation23_spill] sm:$0xff] %v4050_v49  ;;  %v4096_v0 = vld [vmem:[#allocation8 + $0x38] sm:$0xff]  ;;  %v96_v13 = vld [vmem:[%s5903_s0 + $0x28] sm:$0xff] }
  0x3e   :  { %503 = vmatpush.msrb.mxu3 %v3955_v16  ;;  %483 = vmatpush.msrb.mxu2 %v3957_v17  ;;  %6188 = vst [vmem:[#allocation24_spill] sm:$0xff] %v4055_v50 }
  0x3f   :  { %444 = vmatpush.msrb.mxu0 %v3959_v18  ;;  %464 = vmatpush.msrb.mxu1 %v3961_v19  ;;  %6189 = vst [vmem:[#allocation25_spill] sm:$0xff] %v4057_v51 }
  0x40   :  { %504 = vmatpush.msrb.mxu3 %v3965_v20  ;;  %484 = vmatpush.msrb.mxu2 %v3967_v21  ;;  %6190 = vst [vmem:[#allocation26_spill] sm:$0xff] %v4066_v53 }
  0x41   :  { %445 = vmatpush.msrb.mxu0 %v3970_v22  ;;  %465 = vmatpush.msrb.mxu1 %v3972_v23  ;;  %6191 = vst [vmem:[#allocation27_spill] sm:$0xff] %v4068_v54 }
  0x42   :  { %505 = vmatpush.msrb.mxu3 %v3977_v24  ;;  %485 = vmatpush.msrb.mxu2 %v3979_v25  ;;  %6192 = vst [vmem:[#allocation28_spill] sm:$0xff] %v4072_v55 }
  0x43   :  { %195 = vmatmul.f32.gmra.mxu0 %v93_v26  ;;  %236 = vmatmul.f32.gmra.mxu1 %v93_v26  ;;  %6193 = vst [vmem:[#allocation29_spill] sm:$0xff] %v4074_v56 }
  0x44   :  { %277 = vmatmul.f32.gmra.mxu2 %v93_v26  ;;  %318 = vmatmul.f32.gmra.mxu3 %v93_v26  ;;  %6194 = vst [vmem:[#allocation30_spill] sm:$0xff] %v4076_v57  ;;  %v4105_v26 = vld [vmem:[#allocation8] sm:$0xff] }
  0x45   :  { %446 = vmatpush.msrb.mxu0 %v3988_v27  ;;  %466 = vmatpush.msrb.mxu1 %v3990_v28  ;;  %6195 = vst [vmem:[#allocation31_spill] sm:$0xff] %v4078_v58 }
  0x46   :  { %506 = vmatpush.msrb.mxu3 %v3994_v29  ;;  %486 = vmatpush.msrb.mxu2 %v3996_v30  ;;  %6196 = vst [vmem:[#allocation32_spill] sm:$0xff] %v4082_v59 }
  0x47   :  { %447 = vmatpush.msrb.mxu0 %v3998_v31  ;;  %467 = vmatpush.msrb.mxu1 %v4000_v32  ;;  %6197 = vst [vmem:[#allocation33_spill] sm:$0xff] %v4084_v60 }
  0x48   :  { %507 = vmatpush.msrb.mxu3 %v4004_v33  ;;  %487 = vmatpush.msrb.mxu2 %v4006_v34  ;;  %6198 = vst [vmem:[#allocation34_spill] sm:$0xff] %v4087_v61 }
  0x49   :  { %448 = vmatpush.msrb.mxu0 %v4009_v35  ;;  %468 = vmatpush.msrb.mxu1 %v4011_v36  ;;  %6199 = vst [vmem:[#allocation35_spill] sm:$0xff] %v4089_v62 }
  0x4a   :  { %508 = vmatpush.msrb.mxu3 %v4016_v37  ;;  %488 = vmatpush.msrb.mxu2 %v4018_v38  ;;  %6200 = vst [vmem:[#allocation36_spill] sm:$0xff] %v4094_v63 }
  0x4b   :  { %198 = vmatmul.f32.gmra.mxu0 %v94_v39  ;;  %239 = vmatmul.f32.gmra.mxu1 %v94_v39  ;;  %6201 = vst [vmem:[#allocation37_spill] sm:$0xff] %v4096_v0 }
  0x4c   :  { %280 = vmatmul.f32.gmra.mxu2 %v94_v39  ;;  %321 = vmatmul.f32.gmra.mxu3 %v94_v39  ;;  %6202 = vst [vmem:[#allocation38_spill] sm:$0xff] %v4105_v26  ;;  %v4107_v39 = vld [vmem:[#allocation8 + $0x8] sm:$0xff] }
  0x4d   :  { %449 = vmatpush.msrb.mxu0 %v4027_v40  ;;  %469 = vmatpush.msrb.mxu1 %v4029_v41  ;;  %6203 = vst [vmem:[#allocation39_spill] sm:$0xff] %v4107_v39 }
  0x4e   :  { %509 = vmatpush.msrb.mxu3 %v4033_v42  ;;  %489 = vmatpush.msrb.mxu2 %v4035_v43 }
  0x4f   :  { %450 = vmatpush.msrb.mxu0 %v4037_v44  ;;  %470 = vmatpush.msrb.mxu1 %v4039_v45 }
  0x50   :  { %510 = vmatpush.msrb.mxu3 %v4043_v46  ;;  %490 = vmatpush.msrb.mxu2 %v4045_v47 }
  0x51   :  { %451 = vmatpush.msrb.mxu0 %v4048_v48  ;;  %471 = vmatpush.msrb.mxu1 %v4050_v49 }
  0x52   :  { %511 = vmatpush.msrb.mxu3 %v4055_v50  ;;  %491 = vmatpush.msrb.mxu2 %v4057_v51 }
  0x53   :  { %201 = vmatmul.f32.gmra.mxu0 %v95_v52  ;;  %242 = vmatmul.f32.gmra.mxu1 %v95_v52 }
  0x54   :  { %283 = vmatmul.f32.gmra.mxu2 %v95_v52  ;;  %324 = vmatmul.f32.gmra.mxu3 %v95_v52  ;;  %v4111_v52 = vld [vmem:[#allocation8 + $0x10] sm:$0xff] }
  0x55   :  { %452 = vmatpush.msrb.mxu0 %v4066_v53  ;;  %472 = vmatpush.msrb.mxu1 %v4068_v54  ;;  %6204 = vst [vmem:[#allocation40_spill] sm:$0xff] %v4111_v52 }
  0x56   :  { %512 = vmatpush.msrb.mxu3 %v4072_v55  ;;  %492 = vmatpush.msrb.mxu2 %v4074_v56 }
  0x57   :  { %453 = vmatpush.msrb.mxu0 %v4076_v57  ;;  %473 = vmatpush.msrb.mxu1 %v4078_v58  ;;  %v4113_v58 = vld [vmem:[#allocation8 + $0x18] sm:$0xff] }
  0x58   :  { %513 = vmatpush.msrb.mxu3 %v4082_v59  ;;  %493 = vmatpush.msrb.mxu2 %v4084_v60  ;;  %6205 = vst [vmem:[#allocation41_spill] sm:$0xff] %v4113_v58 }
  0x59   :  { %454 = vmatpush.msrb.mxu0 %v4087_v61  ;;  %474 = vmatpush.msrb.mxu1 %v4089_v62 }
  0x5a   :  { %494 = vmatpush.msrb.mxu2 %v4094_v63  ;;  %514 = vmatpush.msrb.mxu3 %v4096_v0  ;;  %v97_v0 = vld [vmem:[%s5903_s0 + $0x30] sm:$0xff] }
  0x5b   :  { %204 = vmatmul.f32.gmra.mxu0 %v96_v13  ;;  %245 = vmatmul.f32.gmra.mxu1 %v96_v13 }
  0x5c   :  { %286 = vmatmul.f32.gmra.mxu2 %v96_v13  ;;  %327 = vmatmul.f32.gmra.mxu3 %v96_v13  ;;  %v98_v13 = vld [vmem:[%s5903_s0 + $0x38] sm:$0xff] }
  0x5d   :  { %455 = vmatpush.msrb.mxu0 %v4105_v26  ;;  %475 = vmatpush.msrb.mxu1 %v4107_v39 }
  0x5e   :  { %495 = vmatpush.msrb.mxu2 %v4111_v52  ;;  %515 = vmatpush.msrb.mxu3 %v4113_v58 }
  0x5f   :  { %597 = vmatpush.msra.mxu0 %v3912_v1  ;;  %617 = vmatpush.msra.mxu1 %v3914_v2 }
  0x60   :  { %637 = vmatpush.msra.mxu2 %v3918_v4  ;;  %657 = vmatpush.msra.mxu3 %v3916_v3 }
  0x61   :  { %598 = vmatpush.msra.mxu0 %v3920_v5  ;;  %618 = vmatpush.msra.mxu1 %v3922_v6 }
  0x62   :  { %638 = vmatpush.msra.mxu2 %v3928_v8  ;;  %658 = vmatpush.msra.mxu3 %v3926_v7 }
  0x63   :  { %207 = vmatmul.f32.gmra.mxu0 %v97_v0  ;;  %248 = vmatmul.f32.gmra.mxu1 %v97_v0 }
  0x64   :  { %289 = vmatmul.f32.gmra.mxu2 %v97_v0  ;;  %330 = vmatmul.f32.gmra.mxu3 %v97_v0  ;;  %v5916_v0 = vmov 0.0  }
  0x65   :  { %599 = vmatpush.msra.mxu0 %v3931_v9  ;;  %619 = vmatpush.msra.mxu1 %v3933_v10 }
  0x66   :  { %639 = vmatpush.msra.mxu2 %v3940_v12  ;;  %659 = vmatpush.msra.mxu3 %v3938_v11 }
  0x67   :  { %600 = vmatpush.msra.mxu0 %v3949_v14  ;;  %620 = vmatpush.msra.mxu1 %v3951_v15 }
  0x68   :  { %640 = vmatpush.msra.mxu2 %v3957_v17  ;;  %660 = vmatpush.msra.mxu3 %v3955_v16 }
  0x69   :  { %601 = vmatpush.msra.mxu0 %v3959_v18  ;;  %621 = vmatpush.msra.mxu1 %v3961_v19 }
  0x6a   :  { %641 = vmatpush.msra.mxu2 %v3967_v21  ;;  %661 = vmatpush.msra.mxu3 %v3965_v20 }
  0x6b   :  { %210 = vmatmul.f32.gmra.mxu0 %v98_v13  ;;  %251 = vmatmul.f32.gmra.mxu1 %v98_v13 }
  0x6c   :  { %292 = vmatmul.f32.gmra.mxu2 %v98_v13  ;;  %333 = vmatmul.f32.gmra.mxu3 %v98_v13  ;;  %v6206_v13 = vld [vmem:[#allocation31_spill] sm:$0xff] }
  0x6d   :  { %602 = vmatpush.msra.mxu0 %v3970_v22  ;;  %622 = vmatpush.msra.mxu1 %v3972_v23 }
  0x6e   :  { %642 = vmatpush.msra.mxu2 %v3979_v25  ;;  %662 = vmatpush.msra.mxu3 %v3977_v24 }
  0x6f   :  { %603 = vmatpush.msra.mxu0 %v3988_v27  ;;  %623 = vmatpush.msra.mxu1 %v3990_v28 }
  0x70   :  { %643 = vmatpush.msra.mxu2 %v3996_v30  ;;  %663 = vmatpush.msra.mxu3 %v3994_v29 }
  0x71   :  { %604 = vmatpush.msra.mxu0 %v3998_v31  ;;  %624 = vmatpush.msra.mxu1 %v4000_v32 }
  0x72   :  { %644 = vmatpush.msra.mxu2 %v4006_v34  ;;  %664 = vmatpush.msra.mxu3 %v4004_v33 }
  0x73   :  { %456 = vmatmul.f32.vlgmr.msrb.gmra.mxu0 %v5916_v0  ;;  %476 = vmatmul.f32.vlgmr.msrb.gmra.mxu1 %v5916_v0 }
  0x74   :  { %496 = vmatmul.f32.vlgmr.msrb.gmra.mxu2 %v5916_v0  ;;  %516 = vmatmul.f32.vlgmr.msrb.gmra.mxu3 %v5916_v0  ;;  %v6207_v0 = vld [vmem:[#allocation37_spill] sm:$0xff] }
  0x75   :  { %605 = vmatpush.msra.mxu0 %v4009_v35  ;;  %625 = vmatpush.msra.mxu1 %v4011_v36 }
  0x76   :  { %645 = vmatpush.msra.mxu2 %v4018_v38  ;;  %665 = vmatpush.msra.mxu3 %v4016_v37 }
  0x77   :  { %606 = vmatpush.msra.mxu0 %v4027_v40  ;;  %626 = vmatpush.msra.mxu1 %v4029_v41 }
  0x78   :  { %646 = vmatpush.msra.mxu2 %v4035_v43  ;;  %666 = vmatpush.msra.mxu3 %v4033_v42 }
  0x79   :  { %607 = vmatpush.msra.mxu0 %v4037_v44  ;;  %627 = vmatpush.msra.mxu1 %v4039_v45 }
  0x7a   :  { %647 = vmatpush.msra.mxu2 %v4045_v47  ;;  %667 = vmatpush.msra.mxu3 %v4043_v46 }
  0x7b   :  { %608 = vmatpush.msra.mxu0 %v4048_v48  ;;  %628 = vmatpush.msra.mxu1 %v4050_v49 }
  0x7c   :  { %648 = vmatpush.msra.mxu2 %v4057_v51  ;;  %668 = vmatpush.msra.mxu3 %v4055_v50 }
  0x7d   :  { %609 = vmatpush.msra.mxu0 %v4066_v53  ;;  %629 = vmatpush.msra.mxu1 %v4068_v54 }
  0x7e   :  { %649 = vmatpush.msra.mxu2 %v4074_v56  ;;  %669 = vmatpush.msra.mxu3 %v4072_v55 }
  0x7f   :  { %610 = vmatpush.msra.mxu0 %v4076_v57  ;;  %630 = vmatpush.msra.mxu1 %v6206_v13 }
  0x80   :  { %650 = vmatpush.msra.mxu2 %v4084_v60  ;;  %670 = vmatpush.msra.mxu3 %v4082_v59 }
  0x81   :  { %611 = vmatpush.msra.mxu0 %v4087_v61  ;;  %631 = vmatpush.msra.mxu1 %v4089_v62 }
  0x82   :  { %651 = vmatpush.msra.mxu2 %v4094_v63  ;;  %671 = vmatpush.msra.mxu3 %v6207_v0 }
  0x83   :  { %612 = vmatpush.msra.mxu0 %v4105_v26  ;;  %632 = vmatpush.msra.mxu1 %v4107_v39 }
  0x84   :  { %652 = vmatpush.msra.mxu2 %v4111_v52  ;;  %672 = vmatpush.msra.mxu3 %v4113_v58 }
  0x85   :  { %755 = vmatpush.msrb.mxu0 %v3912_v1  ;;  %775 = vmatpush.msrb.mxu1 %v3914_v2 }
  0x86   :  { %795 = vmatpush.msrb.mxu2 %v3918_v4  ;;  %815 = vmatpush.msrb.mxu3 %v3916_v3 }
  0x87   :  { %756 = vmatpush.msrb.mxu0 %v3920_v5  ;;  %776 = vmatpush.msrb.mxu1 %v3922_v6 }
  0x88   :  { %796 = vmatpush.msrb.mxu2 %v3928_v8  ;;  %816 = vmatpush.msrb.mxu3 %v3926_v7 }
  0x89   :  { %757 = vmatpush.msrb.mxu0 %v3931_v9  ;;  %777 = vmatpush.msrb.mxu1 %v3933_v10 }
  0x8a   :  { %797 = vmatpush.msrb.mxu2 %v3940_v12  ;;  %817 = vmatpush.msrb.mxu3 %v3938_v11 }
  0x8b   :  { %758 = vmatpush.msrb.mxu0 %v3949_v14  ;;  %778 = vmatpush.msrb.mxu1 %v3951_v15 }
  0x8c   :  { %798 = vmatpush.msrb.mxu2 %v3957_v17  ;;  %818 = vmatpush.msrb.mxu3 %v3955_v16 }
  0x8d   :  { %759 = vmatpush.msrb.mxu0 %v3959_v18  ;;  %779 = vmatpush.msrb.mxu1 %v3961_v19 }
  0x8e   :  { %799 = vmatpush.msrb.mxu2 %v3967_v21  ;;  %819 = vmatpush.msrb.mxu3 %v3965_v20 }
  0x8f   :  { %760 = vmatpush.msrb.mxu0 %v3970_v22  ;;  %780 = vmatpush.msrb.mxu1 %v3972_v23 }
  0x90   :  { %800 = vmatpush.msrb.mxu2 %v3979_v25  ;;  %820 = vmatpush.msrb.mxu3 %v3977_v24 }
  0x91   :  { %761 = vmatpush.msrb.mxu0 %v3988_v27  ;;  %781 = vmatpush.msrb.mxu1 %v3990_v28 }
  0x92   :  { %801 = vmatpush.msrb.mxu2 %v3996_v30  ;;  %821 = vmatpush.msrb.mxu3 %v3994_v29 }
  0x93   :  { %762 = vmatpush.msrb.mxu0 %v3998_v31  ;;  %782 = vmatpush.msrb.mxu1 %v4000_v32 }
  0x94   :  { %802 = vmatpush.msrb.mxu2 %v4006_v34  ;;  %822 = vmatpush.msrb.mxu3 %v4004_v33 }
  0x95   :  { %763 = vmatpush.msrb.mxu0 %v4009_v35  ;;  %783 = vmatpush.msrb.mxu1 %v4011_v36 }
  0x96   :  { %803 = vmatpush.msrb.mxu2 %v4018_v38  ;;  %823 = vmatpush.msrb.mxu3 %v4016_v37 }
  0x97   :  { %764 = vmatpush.msrb.mxu0 %v4027_v40  ;;  %784 = vmatpush.msrb.mxu1 %v4029_v41 }
  0x98   :  { %804 = vmatpush.msrb.mxu2 %v4035_v43  ;;  %824 = vmatpush.msrb.mxu3 %v4033_v42 }
  0x99   :  { %765 = vmatpush.msrb.mxu0 %v4037_v44  ;;  %785 = vmatpush.msrb.mxu1 %v4039_v45 }
  0x9a   :  { %805 = vmatpush.msrb.mxu2 %v4045_v47  ;;  %825 = vmatpush.msrb.mxu3 %v4043_v46 }
  0x9b   :  { %766 = vmatpush.msrb.mxu0 %v4048_v48  ;;  %786 = vmatpush.msrb.mxu1 %v4050_v49 }
  0x9c   :  { %806 = vmatpush.msrb.mxu2 %v4057_v51  ;;  %826 = vmatpush.msrb.mxu3 %v4055_v50 }
  0x9d   :  { %767 = vmatpush.msrb.mxu0 %v4066_v53  ;;  %787 = vmatpush.msrb.mxu1 %v4068_v54 }
  0x9e   :  { %807 = vmatpush.msrb.mxu2 %v4074_v56  ;;  %827 = vmatpush.msrb.mxu3 %v4072_v55 }
  0x9f   :  { %768 = vmatpush.msrb.mxu0 %v4076_v57  ;;  %788 = vmatpush.msrb.mxu1 %v6206_v13 }
  0xa0   :  { %808 = vmatpush.msrb.mxu2 %v4084_v60  ;;  %828 = vmatpush.msrb.mxu3 %v4082_v59 }
  0xa1   :  { %769 = vmatpush.msrb.mxu0 %v4087_v61  ;;  %789 = vmatpush.msrb.mxu1 %v4089_v62 }
  0xa2   :  { %809 = vmatpush.msrb.mxu2 %v4094_v63  ;;  %829 = vmatpush.msrb.mxu3 %v6207_v0 }
  0xa3   :  { %770 = vmatpush.msrb.mxu0 %v4105_v26  ;;  %790 = vmatpush.msrb.mxu1 %v4107_v39 }
  0xa4   :  { %810 = vmatpush.msrb.mxu2 %v4111_v52  ;;  %830 = vmatpush.msrb.mxu3 %v4113_v58 }
  0xb0   :  { %v190_v13 = vpop.f32.mrf.mxu0  ;;  %v231_v60 = vpop.f32.mrf.mxu1 }
  0xb7   :  { %v272_v57 = vpop.f32.mrf.mxu2  ;;  %v313_v59 = vpop.f32.mrf.mxu3 }
  0xb8   :  { %v4257_v55 = vpop.f32.mrf.mxu0  ;;  %v4259_v61 = vpop.f32.mrf.mxu1 }
  0xb9   :  { %6208 = vst [vmem:[#allocation42_spill] sm:$0xff] %v4257_v55 }
  0xba   :  { %6209 = vst [vmem:[#allocation43_spill] sm:$0xff] %v4259_v61 }
  0xbf   :  { %v4261_v62 = vpop.f32.mrf.mxu2  ;;  %v4263_v63 = vpop.f32.mrf.mxu3 }
  0xc0   :  { %6210 = vst [vmem:[#allocation44_spill] sm:$0xff] %v4261_v62  ;;  %v4265_v0 = vpop.f32.mrf.mxu0  ;;  %v4267_v26 = vpop.f32.mrf.mxu1 }
  0xc1   :  { %6211 = vst [vmem:[#allocation45_spill] sm:$0xff] %v4263_v63 }
  0xc2   :  { %6212 = vst [vmem:[#allocation46_spill] sm:$0xff] %v4265_v0 }
  0xc3   :  { %6213 = vst [vmem:[#allocation47_spill] sm:$0xff] %v4267_v26 }
  0xc7   :  { %v4269_v39 = vpop.f32.mrf.mxu2  ;;  %v4271_v52 = vpop.f32.mrf.mxu3 }
  0xc8   :  { %6214 = vst [vmem:[#allocation48_spill] sm:$0xff] %v4269_v39  ;;  %v4273_v58 = vpop.f32.mrf.mxu0  ;;  %v4275_v56 = vpop.f32.mrf.mxu1 }
  0xc9   :  { %6215 = vst [vmem:[#allocation49_spill] sm:$0xff] %v4271_v52 }
  0xca   :  { %6216 = vst [vmem:[#allocation50_spill] sm:$0xff] %v4273_v58 }
  0xcb   :  { %6217 = vst [vmem:[#allocation51_spill] sm:$0xff] %v4275_v56 }
  0xcf   :  { %v4277_v54 = vpop.f32.mrf.mxu2  ;;  %v4279_v55 = vpop.f32.mrf.mxu3 }
  0xd0   :  { %6218 = vst [vmem:[#allocation52_spill] sm:$0xff] %v4277_v54  ;;  %v4281_v61 = vpop.f32.mrf.mxu0  ;;  %v4283_v62 = vpop.f32.mrf.mxu1 }
  0xd1   :  { %6219 = vst [vmem:[#allocation53_spill] sm:$0xff] %v4279_v55 }
  0xd2   :  { %6220 = vst [vmem:[#allocation54_spill] sm:$0xff] %v4281_v61 }
  0xd3   :  { %6221 = vst [vmem:[#allocation55_spill] sm:$0xff] %v4283_v62 }
  0xd7   :  { %v4285_v63 = vpop.f32.mrf.mxu3  ;;  %v4291_v39 = vpop.f32.mrf.mxu2 }
  0xd8   :  { %6222 = vst [vmem:[#allocation56_spill] sm:$0xff] %v4285_v63  ;;  %v4287_v0 = vpop.f32.mrf.mxu0  ;;  %v4289_v26 = vpop.f32.mrf.mxu1  ;;  %v163_v63 = vld [vmem:[%s5906_s3] sm:$0xf] }
  0xd9   :  { %6223 = vst [vmem:[#allocation57_spill] sm:$0xff] %v4287_v0  ;;  %v4320_v51 = vperm.slane %v163_v63, 3 }
  0xda   :  { %6224 = vst [vmem:[#allocation58_spill] sm:$0xff] %v4289_v26  ;;  %v4310_v26 = vperm.slane %v163_v63, 0 }
  0xdb   :  { %6225 = vst [vmem:[#allocation59_spill] sm:$0xff] %v4291_v39  ;;  %v4312_v39 = vperm.slane %v163_v63, 1  ;;  %v314_v49 = vadd.f32 %v313_v59, %v4320_v51 }
  0xdc   :  { %6233 = vst [vmem:[#allocation67_spill] sm:$0xff] %v4310_v26 }
  0xdd   :  { %6234 = vst [vmem:[#allocation68_spill] sm:$0xff] %v4312_v39 }
  0xde   :  { %6237 = vst [vmem:[#allocation71_spill] sm:$0xff] %v4320_v51 }
  0xdf   :  { %v4293_v52 = vpop.f32.mrf.mxu3  ;;  %v4299_v54 = vpop.f32.mrf.mxu2 }
  0xe0   :  { %6226 = vst [vmem:[#allocation60_spill] sm:$0xff] %v4293_v52  ;;  %v4295_v58 = vpop.f32.mrf.mxu0  ;;  %v4297_v56 = vpop.f32.mrf.mxu1 }
  0xe1   :  { %6227 = vst [vmem:[#allocation61_spill] sm:$0xff] %v4295_v58  ;;  %v232_v58 = vadd.f32 %v231_v60, %v4312_v39 }
  0xe2   :  { %6228 = vst [vmem:[#allocation62_spill] sm:$0xff] %v4297_v56  ;;  %v191_v56 = vadd.f32 %v190_v13, %v4310_v26 }
  0xe3   :  { %6229 = vst [vmem:[#allocation63_spill] sm:$0xff] %v4299_v54 }
  0xe7   :  { %v4301_v55 = vpop.f32.mrf.mxu3  ;;  %v4314_v52 = vpop.f32.mrf.mxu2 }
  0xe8   :  { %6230 = vst [vmem:[#allocation64_spill] sm:$0xff] %v4301_v55  ;;  %v4306_v62 = vpop.f32.mrf.mxu0  ;;  %v4308_v0 = vpop.f32.mrf.mxu1 }
  0xe9   :  { %6231 = vst [vmem:[#allocation65_spill] sm:$0xff] %v4306_v62 }
  0xea   :  { %6232 = vst [vmem:[#allocation66_spill] sm:$0xff] %v4308_v0 }
  0xeb   :  { %6235 = vst [vmem:[#allocation69_spill] sm:$0xff] %v4314_v52 }
  0xef   :  { %v4318_v54 = vpop.f32.mrf.mxu3  ;;  %v4323_v48 = vpop.f32.mrf.mxu2 }
  0xf0   :  { %6236 = vst [vmem:[#allocation70_spill] sm:$0xff] %v4318_v54  ;;  %v457_v55 = vpop.f32.mrf.mxu0  ;;  %v477_v61 = vpop.f32.mrf.mxu1 }
  0xf1   :  { %v520_v53 = vadd.f32 %v457_v55, %v191_v56  ;;  %v521_v50 = vadd.f32 %v477_v61, %v232_v58  ;;  %6238 = vst [vmem:[#allocation72_spill] sm:$0xff] %v4323_v48  ;;  %v4325_v55 = vperm.slane %v163_v63, 2 }
  0xf3   :  { %v3302_v62 = vmul.f32 -1.442695, %v520_v53  ;;  %v3303_v0 = vmul.f32 -1.442695, %v521_v50  ;;  %6239 = vst [vmem:[#allocation73_spill] sm:$0xff] %v4325_v55  ;;  %v273_v56 = vadd.f32 %v272_v57, %v4325_v55 }
  0xf5   :  { %3359 = vpow2.f32 %v3302_v62 }
  0xf6   :  { %3361 = vpow2.f32 %v3303_v0 }
  0xf7   :  { %v517_v52 = vpop.f32.mrf.mxu3  ;;  %v497_v53 = vpop.f32.mrf.mxu2 }
  0xf8   :  { %v523_v13 = vadd.f32 %v517_v52, %v314_v49  ;;  %v522_v61 = vadd.f32 %v497_v53, %v273_v56 }
  0xfa   :  { %v3304_v26 = vmul.f32 -1.442695, %v523_v13 }
  0xfb   :  { %v3360_v60 = vpop.eup %3359 }
  0xfc   :  { %v3362_v39 = vpop.eup %3361  ;;  %v528_v54 = vadd.f32 1.0, %v3360_v60  ;;  %3363 = vpow2.f32 %v3304_v26 }
  0xfd   :  { %v547_v46 = vadd.f32 1.0, %v3362_v39 }
  0xfe   :  { %3365 = vrcp.f32 %v528_v54  ;;  %v540_v60 = vand.u32 2147483648, %v528_v54  ;;  %v538_v39 = vand.u32 2147483647, %v528_v54  ;;  %vm534_vm2 = vweird.f32 %v528_v54 }
  0xff   :  { %3367 = vrcp.f32 %v547_v46  ;;  %v559_v26 = vand.u32 2147483648, %v547_v46  ;;  %v557_v51 = vand.u32 2147483647, %v547_v46  ;;  %vm553_vm3 = vweird.f32 %v547_v46 }
 0x100   :  { %v541_v53 = vor.u32 1.1754944e-38, %v540_v60  ;;  %vm539_vm5 = vcmp.eq.f32.partialorder %v538_v39, 8.507059e+37 }
 0x101   :  { %v560_v55 = vor.u32 1.1754944e-38, %v559_v26  ;;  %vm558_vm7 = vcmp.eq.f32.partialorder %v557_v51, 8.507059e+37 }
 0x102   :  { %v3364_v50 = vpop.eup %3363 }
 0x103   :  { %v567_v58 = vadd.f32 1.0, %v3364_v50 }
 0x104   :  { %v3366_v59 = vpop.eup %3365 }
 0x105   :  { %v3368_v62 = vpop.eup %3367  ;;  %v530_v0 = vmul.f32 %v3366_v59, %v528_v54  ;;  %3369 = vrcp.f32 %v567_v58  ;;  %vm535_vm0 = vweird.f32 %v3366_v59  ;;  %vm573_vm9 = vweird.f32 %v567_v58 }
 0x106   :  { %v549_v49 = vmul.f32 %v3368_v62, %v547_v46  ;;  %3371 = vtanh.f32 %v522_v61  ;;  %vm554_vm1 = vweird.f32 %v3368_v62  ;;  %vm536_vm4 = vmor %vm534_vm2, %vm535_vm0  ;;  %v577_v54 = vand.u32 2147483647, %v567_v58 }
 0x107   :  { %v531_v52 = vsub.f32 1.0, %v530_v0  ;;  %vm555_vm6 = vmor %vm553_vm3, %vm554_vm1 }
 0x108   :  { %v550_v13 = vsub.f32 1.0, %v549_v49  ;;  %vm578_vm11 = vcmp.eq.f32.partialorder %v577_v54, 8.507059e+37 }
 0x109   :  { %v532_v63 = vmul.f32 %v3366_v59, %v531_v52 }
 0x10a   :  { %v551_v48 = vmul.f32 %v3368_v62, %v550_v13 }
 0x10b   :  { %v3370_v47 = vpop.eup %3369  ;;  %v533_v57 = vadd.f32 %v3366_v59, %v532_v63 }
 0x10c   :  { %v552_v50 = vadd.f32 %v3368_v62, %v551_v48  ;;  %v569_v56 = vmul.f32 %v3370_v47, %v567_v58  ;;  %v3372_v61 = vpop.eup %3371  ;;  %vm574_vm8 = vweird.f32 %v3370_v47  ;;  %v579_v48 = vand.u32 2147483648, %v567_v58 }
 0x10d   :  { %v537_v0 = vsel %vm536_vm4, %v3366_v59, %v533_v57  ;;  %vm575_vm10 = vmor %vm573_vm9, %vm574_vm8 }
 0x10e   :  { %v542_v49 = vsel %vm539_vm5, %v541_v53, %v537_v0  ;;  %v556_v52 = vsel %vm555_vm6, %v3368_v62, %v552_v50  ;;  %v570_v45 = vsub.f32 1.0, %v569_v56  ;;  %v580_v60 = vor.u32 1.1754944e-38, %v579_v48  ;;  %v6273_v0 = vld [vmem:[#allocation73_spill] sm:$0xff] }
 0x10f   :  { %v561_v13 = vsel %vm558_vm7, %v560_v55, %v556_v52  ;;  %v584_v44 = vmul.f32 %v3372_v61, %v542_v49  ;;  %v6274_v61 = vld [vmem:[#allocation44_spill] sm:$0xff] }
 0x110   :  { %v583_v42 = vmul.f32 0.0, %v561_v13  ;;  %v571_v43 = vmul.f32 %v3370_v47, %v570_v45  ;;  %v276_v49 = vadd.f32 %v6274_v61, %v6273_v0 }
 0x112   :  { %v4328_v63 = vadd.f32 %v584_v44, %v583_v42  ;;  %v572_v46 = vadd.f32 %v3370_v47, %v571_v43  ;;  %v6271_v42 = vld [vmem:[#allocation71_spill] sm:$0xff]  ;;  %v6272_v43 = vld [vmem:[#allocation45_spill] sm:$0xff] }
 0x113   :  { %v317_v44 = vadd.f32 %v6272_v43, %v6271_v42 }
 0x114   :  { %3373 = vtanh.f32 %v4328_v63  ;;  %v576_v59 = vsel %vm575_vm10, %v3370_v47, %v572_v46 }
 0x115   :  { %v581_v51 = vsel %vm578_vm11, %v580_v60, %v576_v59 }
 0x11a   :  { %v3374_v62 = vpop.eup %3373 }
 0x11b   :  { %v4331_v26 = vmul.f32 %v3374_v62, %v581_v51 }
 0x11d   :  { %6240 = vst [vmem:[#allocation74_spill] sm:$0xff] %v4331_v26  ;;  %613 = vmatmul.f32.vlgmr.msra.gmra.mxu0 %v4331_v26  ;;  %633 = vmatmul.f32.vlgmr.msra.gmra.mxu1 %v4331_v26 }
 0x11e   :  { %653 = vmatmul.f32.vlgmr.msra.gmra.mxu2 %v4331_v26  ;;  %673 = vmatmul.f32.vlgmr.msra.gmra.mxu3 %v4331_v26  ;;  %v4515_v26 = vld [vmem:[#allocation8 + $0xe0] sm:$0xff] }
 0x11f   :  { %913 = vmatpush.msra.mxu0 %v3912_v1  ;;  %933 = vmatpush.msra.mxu1 %v3914_v2  ;;  %v6241_v1 = vld [vmem:[#allocation17_spill] sm:$0xff]  ;;  %v6242_v2 = vld [vmem:[#allocation16_spill] sm:$0xff] }
 0x120   :  { %953 = vmatpush.msra.mxu2 %v3918_v4  ;;  %973 = vmatpush.msra.mxu3 %v3916_v3  ;;  %v6243_v3 = vld [vmem:[#allocation18_spill] sm:$0xff]  ;;  %v6244_v4 = vld [vmem:[#allocation19_spill] sm:$0xff] }
 0x121   :  { %914 = vmatpush.msra.mxu0 %v3920_v5  ;;  %934 = vmatpush.msra.mxu1 %v3922_v6  ;;  %v6245_v5 = vld [vmem:[#allocation21_spill] sm:$0xff]  ;;  %v6246_v6 = vld [vmem:[#allocation20_spill] sm:$0xff] }
 0x122   :  { %954 = vmatpush.msra.mxu2 %v3928_v8  ;;  %974 = vmatpush.msra.mxu3 %v3926_v7  ;;  %v6247_v7 = vld [vmem:[#allocation22_spill] sm:$0xff]  ;;  %v6248_v8 = vld [vmem:[#allocation23_spill] sm:$0xff] }
 0x123   :  { %915 = vmatpush.msra.mxu0 %v3931_v9  ;;  %935 = vmatpush.msra.mxu1 %v3933_v10  ;;  %v6249_v9 = vld [vmem:[#allocation25_spill] sm:$0xff]  ;;  %v6250_v10 = vld [vmem:[#allocation24_spill] sm:$0xff] }
 0x124   :  { %955 = vmatpush.msra.mxu2 %v3940_v12  ;;  %975 = vmatpush.msra.mxu3 %v3938_v11  ;;  %v6251_v11 = vld [vmem:[#allocation26_spill] sm:$0xff]  ;;  %v6252_v12 = vld [vmem:[#allocation27_spill] sm:$0xff] }
 0x125   :  { %916 = vmatpush.msra.mxu0 %v3949_v14  ;;  %936 = vmatpush.msra.mxu1 %v3951_v15  ;;  %v6253_v14 = vld [vmem:[#allocation29_spill] sm:$0xff]  ;;  %v6254_v15 = vld [vmem:[#allocation28_spill] sm:$0xff] }
 0x126   :  { %956 = vmatpush.msra.mxu2 %v3957_v17  ;;  %976 = vmatpush.msra.mxu3 %v3955_v16  ;;  %v6255_v16 = vld [vmem:[#allocation30_spill] sm:$0xff]  ;;  %v6256_v17 = vld [vmem:[#allocation31_spill] sm:$0xff] }
 0x127   :  { %917 = vmatpush.msra.mxu0 %v3959_v18  ;;  %937 = vmatpush.msra.mxu1 %v3961_v19  ;;  %v6257_v18 = vld [vmem:[#allocation33_spill] sm:$0xff]  ;;  %v6258_v19 = vld [vmem:[#allocation32_spill] sm:$0xff] }
 0x128   :  { %957 = vmatpush.msra.mxu2 %v3967_v21  ;;  %977 = vmatpush.msra.mxu3 %v3965_v20  ;;  %v6259_v20 = vld [vmem:[#allocation34_spill] sm:$0xff]  ;;  %v6260_v21 = vld [vmem:[#allocation35_spill] sm:$0xff] }
 0x129   :  { %918 = vmatpush.msra.mxu0 %v3970_v22  ;;  %938 = vmatpush.msra.mxu1 %v3972_v23  ;;  %v6261_v22 = vld [vmem:[#allocation36_spill] sm:$0xff]  ;;  %v6262_v23 = vld [vmem:[#allocation37_spill] sm:$0xff] }
 0x12a   :  { %958 = vmatpush.msra.mxu2 %v3979_v25  ;;  %978 = vmatpush.msra.mxu3 %v3977_v24  ;;  %v6263_v24 = vld [vmem:[#allocation38_spill] sm:$0xff]  ;;  %v6264_v25 = vld [vmem:[#allocation39_spill] sm:$0xff] }
 0x12b   :  { %919 = vmatpush.msra.mxu0 %v3988_v27  ;;  %939 = vmatpush.msra.mxu1 %v3990_v28  ;;  %v6265_v27 = vld [vmem:[#allocation40_spill] sm:$0xff]  ;;  %v6266_v28 = vld [vmem:[#allocation41_spill] sm:$0xff] }
 0x12c   :  { %959 = vmatpush.msra.mxu2 %v3996_v30  ;;  %979 = vmatpush.msra.mxu3 %v3994_v29  ;;  %v6267_v29 = vld [vmem:[#allocation67_spill] sm:$0xff]  ;;  %v6268_v30 = vld [vmem:[#allocation42_spill] sm:$0xff] }
 0x12d   :  { %920 = vmatpush.msra.mxu0 %v3998_v31  ;;  %940 = vmatpush.msra.mxu1 %v4000_v32  ;;  %v194_v31 = vadd.f32 %v6268_v30, %v6267_v29  ;;  %v6269_v32 = vld [vmem:[#allocation68_spill] sm:$0xff] }
 0x12e   :  { %960 = vmatpush.msra.mxu2 %v4006_v34  ;;  %980 = vmatpush.msra.mxu3 %v4004_v33  ;;  %v6270_v33 = vld [vmem:[#allocation43_spill] sm:$0xff] }
 0x12f   :  { %921 = vmatpush.msra.mxu0 %v4009_v35  ;;  %941 = vmatpush.msra.mxu1 %v4011_v36  ;;  %v235_v34 = vadd.f32 %v6270_v33, %v6269_v32 }
 0x130   :  { %961 = vmatpush.msra.mxu2 %v4018_v38  ;;  %981 = vmatpush.msra.mxu3 %v4016_v37 }
 0x131   :  { %922 = vmatpush.msra.mxu0 %v4027_v40  ;;  %942 = vmatpush.msra.mxu1 %v4029_v41 }
 0x132   :  { %962 = vmatpush.msra.mxu2 %v6241_v1  ;;  %982 = vmatpush.msra.mxu3 %v6242_v2 }
 0x133   :  { %923 = vmatpush.msra.mxu0 %v6243_v3  ;;  %943 = vmatpush.msra.mxu1 %v6244_v4 }
 0x134   :  { %963 = vmatpush.msra.mxu2 %v6245_v5  ;;  %983 = vmatpush.msra.mxu3 %v6246_v6 }
 0x135   :  { %924 = vmatpush.msra.mxu0 %v6247_v7  ;;  %944 = vmatpush.msra.mxu1 %v6248_v8 }
 0x136   :  { %964 = vmatpush.msra.mxu2 %v6249_v9  ;;  %984 = vmatpush.msra.mxu3 %v6250_v10 }
 0x137   :  { %925 = vmatpush.msra.mxu0 %v6251_v11  ;;  %945 = vmatpush.msra.mxu1 %v6252_v12 }
 0x138   :  { %965 = vmatpush.msra.mxu2 %v6253_v14  ;;  %985 = vmatpush.msra.mxu3 %v6254_v15 }
 0x139   :  { %926 = vmatpush.msra.mxu0 %v6255_v16  ;;  %946 = vmatpush.msra.mxu1 %v6256_v17 }
 0x13a   :  { %966 = vmatpush.msra.mxu2 %v6257_v18  ;;  %986 = vmatpush.msra.mxu3 %v6258_v19 }
 0x13b   :  { %927 = vmatpush.msra.mxu0 %v6259_v20  ;;  %947 = vmatpush.msra.mxu1 %v6260_v21 }
 0x13c   :  { %967 = vmatpush.msra.mxu2 %v6261_v22  ;;  %987 = vmatpush.msra.mxu3 %v6262_v23 }
 0x13d   :  { %928 = vmatpush.msra.mxu0 %v6263_v24  ;;  %948 = vmatpush.msra.mxu1 %v6264_v25 }
 0x13e   :  { %968 = vmatpush.msra.mxu2 %v6265_v27  ;;  %988 = vmatpush.msra.mxu3 %v6266_v28 }
 0x19a   :  { %v614_v35 = vpop.f32.mrf.mxu0  ;;  %v634_v36 = vpop.f32.mrf.mxu1 }
 0x19b   :  { %v677_v37 = vadd.f32 %v614_v35, %v194_v31  ;;  %v678_v38 = vadd.f32 %v634_v36, %v235_v34 }
 0x19d   :  { %v3305_v40 = vmul.f32 -1.442695, %v677_v37  ;;  %v3306_v41 = vmul.f32 -1.442695, %v678_v38 }
 0x19f   :  { %3375 = vpow2.f32 %v3305_v40 }
 0x1a0   :  { %3377 = vpow2.f32 %v3306_v41 }
 0x1a1   :  { %v674_v45 = vpop.f32.mrf.mxu3  ;;  %v654_v50 = vpop.f32.mrf.mxu2 }
 0x1a2   :  { %v680_v47 = vadd.f32 %v674_v45, %v317_v44  ;;  %v679_v46 = vadd.f32 %v654_v50, %v276_v49 }
 0x1a4   :  { %v3307_v55 = vmul.f32 -1.442695, %v680_v47 }
 0x1a5   :  { %v3376_v58 = vpop.eup %3375 }
 0x1a6   :  { %v3378_v39 = vpop.eup %3377  ;;  %v685_v57 = vadd.f32 1.0, %v3376_v58  ;;  %3379 = vpow2.f32 %v3307_v55 }
 0x1a7   :  { %v704_v53 = vadd.f32 1.0, %v3378_v39 }
 0x1a8   :  { %3381 = vrcp.f32 %v685_v57  ;;  %v697_v51 = vand.u32 2147483648, %v685_v57  ;;  %v695_v33 = vand.u32 2147483647, %v685_v57  ;;  %vm691_vm14 = vweird.f32 %v685_v57 }
 0x1a9   :  { %3383 = vrcp.f32 %v704_v53  ;;  %v716_v30 = vand.u32 2147483648, %v704_v53  ;;  %v714_v35 = vand.u32 2147483647, %v704_v53  ;;  %vm710_vm15 = vweird.f32 %v704_v53 }
 0x1aa   :  { %v698_v38 = vor.u32 1.1754944e-38, %v697_v51  ;;  %vm696_vm2 = vcmp.eq.f32.partialorder %v695_v33, 8.507059e+37  ;;  %v4428_v51 = vld [vmem:[#allocation8 + $0x1f8] sm:$0xff]  ;;  %v4437_v33 = vld [vmem:[#allocation8 + $0x1d0] sm:$0xff] }
 0x1ab   :  { %v717_v43 = vor.u32 1.1754944e-38, %v716_v30  ;;  %vm715_vm3 = vcmp.eq.f32.partialorder %v714_v35, 8.507059e+37  ;;  %v4431_v30 = vld [vmem:[#allocation8 + $0x1c0] sm:$0xff] }
 0x1ac   :  { %v3380_v56 = vpop.eup %3379  ;;  %v4443_v35 = vld [vmem:[#allocation8 + $0x1a0] sm:$0xff] }
 0x1ad   :  { %v724_v52 = vadd.f32 1.0, %v3380_v56 }
 0x1ae   :  { %v3382_v13 = vpop.eup %3381 }
 0x1af   :  { %v3384_v48 = vpop.eup %3383  ;;  %v687_v54 = vmul.f32 %v3382_v13, %v685_v57  ;;  %3385 = vrcp.f32 %v724_v52  ;;  %vm692_vm12 = vweird.f32 %v3382_v13  ;;  %v736_v49 = vand.u32 2147483648, %v724_v52 }
 0x1b0   :  { %v706_v59 = vmul.f32 %v3384_v48, %v704_v53  ;;  %3387 = vtanh.f32 %v679_v46  ;;  %vm711_vm13 = vweird.f32 %v3384_v48  ;;  %vm693_vm0 = vmor %vm691_vm14, %vm692_vm12  ;;  %vm730_vm5 = vweird.f32 %v724_v52 }
 0x1b1   :  { %v688_v60 = vsub.f32 1.0, %v687_v54  ;;  %vm712_vm1 = vmor %vm710_vm15, %vm711_vm13  ;;  %v737_v54 = vor.u32 1.1754944e-38, %v736_v49  ;;  %v4494_v49 = vld [vmem:[#allocation8 + $0x128] sm:$0xff] }
 0x1b2   :  { %v707_v62 = vsub.f32 1.0, %v706_v59 }
 0x1b3   :  { %v689_v31 = vmul.f32 %v3382_v13, %v688_v60 }
 0x1b4   :  { %v708_v34 = vmul.f32 %v3384_v48, %v707_v62  ;;  %v4425_v62 = vld [vmem:[#allocation8 + $0x1f0] sm:$0xff] }
 0x1b5   :  { %v3386_v36 = vpop.eup %3385  ;;  %v690_v37 = vadd.f32 %v3382_v13, %v689_v31  ;;  %v4434_v31 = vld [vmem:[#allocation8 + $0x1c8] sm:$0xff] }
 0x1b6   :  { %v709_v40 = vadd.f32 %v3384_v48, %v708_v34  ;;  %v726_v41 = vmul.f32 %v3386_v36, %v724_v52  ;;  %v3388_v45 = vpop.eup %3387  ;;  %vm731_vm4 = vweird.f32 %v3386_v36  ;;  %v4440_v34 = vld [vmem:[#allocation8 + $0x1d8] sm:$0xff] }
 0x1b7   :  { %v694_v44 = vsel %vm693_vm0, %v3382_v13, %v690_v37  ;;  %v734_v13 = vand.u32 2147483647, %v724_v52  ;;  %vm732_vm6 = vmor %vm730_vm5, %vm731_vm4  ;;  %v4422_v52 = vld [vmem:[#allocation8 + $0x1e8] sm:$0xff]  ;;  %v4449_v37 = vld [vmem:[#allocation8 + $0x1b0] sm:$0xff] }
 0x1b8   :  { %v699_v47 = vsel %vm696_vm2, %v698_v38, %v694_v44  ;;  %v713_v55 = vsel %vm712_vm1, %v3384_v48, %v709_v40  ;;  %v727_v58 = vsub.f32 1.0, %v726_v41  ;;  %v4452_v38 = vld [vmem:[#allocation8 + $0x1b8] sm:$0xff]  ;;  %v4455_v40 = vld [vmem:[#allocation8 + $0x180] sm:$0xff]  ;;  %v4458_v41 = vld [vmem:[#allocation8 + $0x188] sm:$0xff] }
 0x1b9   :  { %v718_v39 = vsel %vm715_vm3, %v717_v43, %v713_v55  ;;  %v741_v50 = vmul.f32 %v3388_v45, %v699_v47  ;;  %vm735_vm7 = vcmp.eq.f32.partialorder %v734_v13, 8.507059e+37  ;;  %v4461_v43 = vld [vmem:[#allocation8 + $0x190] sm:$0xff]  ;;  %v4464_v44 = vld [vmem:[#allocation8 + $0x198] sm:$0xff]  ;;  %v4467_v45 = vld [vmem:[#allocation8 + $0x160] sm:$0xff] }
 0x1ba   :  { %v740_v56 = vmul.f32 %v718_v39, %v4328_v63  ;;  %v728_v61 = vmul.f32 %v3386_v36, %v727_v58  ;;  %v4419_v63 = vld [vmem:[#allocation8 + $0x1e0] sm:$0xff]  ;;  %v4470_v47 = vld [vmem:[#allocation8 + $0x168] sm:$0xff]  ;;  %v4473_v55 = vld [vmem:[#allocation8 + $0x170] sm:$0xff] }
 0x1bb   :  { %v4476_v58 = vld [vmem:[#allocation8 + $0x178] sm:$0xff]  ;;  %v4479_v39 = vld [vmem:[#allocation8 + $0x140] sm:$0xff]  ;;  %v4497_v13 = vld [vmem:[#allocation8 + $0x130] sm:$0xff] }
 0x1bc   :  { %v4410_v57 = vadd.f32 %v741_v50, %v740_v56  ;;  %v729_v53 = vadd.f32 %v3386_v36, %v728_v61  ;;  %v4482_v50 = vld [vmem:[#allocation8 + $0x148] sm:$0xff]  ;;  %v4485_v56 = vld [vmem:[#allocation8 + $0x150] sm:$0xff]  ;;  %v4488_v61 = vld [vmem:[#allocation8 + $0x158] sm:$0xff] }
 0x1be   :  { %3389 = vtanh.f32 %v4410_v57  ;;  %v733_v46 = vsel %vm732_vm6, %v3386_v36, %v729_v53  ;;  %v4446_v36 = vld [vmem:[#allocation8 + $0x1a8] sm:$0xff]  ;;  %v4491_v53 = vld [vmem:[#allocation8 + $0x120] sm:$0xff] }
 0x1bf   :  { %v738_v59 = vsel %vm735_vm7, %v737_v54, %v733_v46  ;;  %v4500_v46 = vld [vmem:[#allocation8 + $0x138] sm:$0xff]  ;;  %v4503_v54 = vld [vmem:[#allocation8 + $0x100] sm:$0xff] }
 0x1c0   :  { %6276 = vst [vmem:[#allocation16_spill] sm:$0xff] %v4500_v46 }
 0x1c1   :  { %6277 = vst [vmem:[#allocation18_spill] sm:$0xff] %v4503_v54 }
 0x1c4   :  { %v3390_v48 = vpop.eup %3389 }
 0x1c5   :  { %v4413_v60 = vmul.f32 %v3390_v48, %v738_v59  ;;  %v4506_v48 = vld [vmem:[#allocation8 + $0x108] sm:$0xff]  ;;  %v4509_v59 = vld [vmem:[#allocation8 + $0x110] sm:$0xff] }
 0x1c6   :  { %6278 = vst [vmem:[#allocation19_spill] sm:$0xff] %v4506_v48 }
 0x1c7   :  { %6275 = vst [vmem:[#allocation17_spill] sm:$0xff] %v4413_v60  ;;  %771 = vmatmul.f32.vlgmr.msrb.gmra.mxu0 %v4413_v60  ;;  %791 = vmatmul.f32.vlgmr.msrb.gmra.mxu1 %v4413_v60 }
 0x1c8   :  { %811 = vmatmul.f32.vlgmr.msrb.gmra.mxu2 %v4413_v60  ;;  %831 = vmatmul.f32.vlgmr.msrb.gmra.mxu3 %v4413_v60  ;;  %6279 = vst [vmem:[#allocation21_spill] sm:$0xff] %v4509_v59  ;;  %v4512_v60 = vld [vmem:[#allocation8 + $0x118] sm:$0xff] }
 0x1c9   :  { %1071 = vmatpush.msrb.mxu0 %v4419_v63  ;;  %1091 = vmatpush.msrb.mxu1 %v4422_v52  ;;  %6280 = vst [vmem:[#allocation20_spill] sm:$0xff] %v4512_v60 }
 0x1ca   :  { %1111 = vmatpush.msrb.mxu2 %v4425_v62  ;;  %1131 = vmatpush.msrb.mxu3 %v4428_v51 }
 0x1cb   :  { %1072 = vmatpush.msrb.mxu0 %v4431_v30  ;;  %1092 = vmatpush.msrb.mxu1 %v4434_v31 }
 0x1cc   :  { %1112 = vmatpush.msrb.mxu2 %v4437_v33  ;;  %1132 = vmatpush.msrb.mxu3 %v4440_v34 }
 0x1cd   :  { %1073 = vmatpush.msrb.mxu0 %v4443_v35  ;;  %1093 = vmatpush.msrb.mxu1 %v4446_v36 }
 0x1ce   :  { %1113 = vmatpush.msrb.mxu2 %v4449_v37  ;;  %1133 = vmatpush.msrb.mxu3 %v4452_v38 }
 0x1cf   :  { %1074 = vmatpush.msrb.mxu0 %v4455_v40  ;;  %1094 = vmatpush.msrb.mxu1 %v4458_v41 }
 0x1d0   :  { %1114 = vmatpush.msrb.mxu2 %v4461_v43  ;;  %1134 = vmatpush.msrb.mxu3 %v4464_v44 }
 0x1d1   :  { %1075 = vmatpush.msrb.mxu0 %v4467_v45  ;;  %1095 = vmatpush.msrb.mxu1 %v4470_v47 }
 0x1d2   :  { %1115 = vmatpush.msrb.mxu2 %v4473_v55  ;;  %1135 = vmatpush.msrb.mxu3 %v4476_v58 }
 0x1d3   :  { %1076 = vmatpush.msrb.mxu0 %v4479_v39  ;;  %1096 = vmatpush.msrb.mxu1 %v4482_v50 }
 0x1d4   :  { %1116 = vmatpush.msrb.mxu2 %v4485_v56  ;;  %1136 = vmatpush.msrb.mxu3 %v4488_v61 }
 0x1d5   :  { %1077 = vmatpush.msrb.mxu0 %v4491_v53  ;;  %1097 = vmatpush.msrb.mxu1 %v4494_v49 }
 0x1d6   :  { %1117 = vmatpush.msrb.mxu2 %v4497_v13  ;;  %1137 = vmatpush.msrb.mxu3 %v4500_v46  ;;  %v4518_v46 = vld [vmem:[#allocation8 + $0xe8] sm:$0xff] }
 0x1d7   :  { %1078 = vmatpush.msrb.mxu0 %v4503_v54  ;;  %1098 = vmatpush.msrb.mxu1 %v4506_v48  ;;  %v4521_v54 = vld [vmem:[#allocation8 + $0xf0] sm:$0xff]  ;;  %v4524_v48 = vld [vmem:[#allocation8 + $0xf8] sm:$0xff] }
 0x1d8   :  { %1118 = vmatpush.msrb.mxu2 %v4509_v59  ;;  %1138 = vmatpush.msrb.mxu3 %v4512_v60  ;;  %v4527_v59 = vld [vmem:[#allocation8 + $0xc0] sm:$0xff]  ;;  %v4530_v60 = vld [vmem:[#allocation8 + $0xc8] sm:$0xff] }
 0x1d9   :  { %1079 = vmatpush.msrb.mxu0 %v4515_v26  ;;  %1099 = vmatpush.msrb.mxu1 %v4518_v46 }
 0x1da   :  { %1119 = vmatpush.msrb.mxu2 %v4521_v54  ;;  %1139 = vmatpush.msrb.mxu3 %v4524_v48 }
 0x1db   :  { %1080 = vmatpush.msrb.mxu0 %v4527_v59  ;;  %1100 = vmatpush.msrb.mxu1 %v4530_v60 }
 0x1dc   :  { %1120 = vmatpush.msrb.mxu2 %v6241_v1  ;;  %1140 = vmatpush.msrb.mxu3 %v6242_v2  ;;  %v6281_v1 = vld [vmem:[#allocation46_spill] sm:$0xff] }
 0x1dd   :  { %1081 = vmatpush.msrb.mxu0 %v6243_v3  ;;  %1101 = vmatpush.msrb.mxu1 %v6244_v4  ;;  %v197_v2 = vadd.f32 %v6281_v1, %v6267_v29  ;;  %v6282_v3 = vld [vmem:[#allocation47_spill] sm:$0xff] }
 0x1de   :  { %1121 = vmatpush.msrb.mxu2 %v6245_v5  ;;  %1141 = vmatpush.msrb.mxu3 %v6246_v6  ;;  %v238_v4 = vadd.f32 %v6282_v3, %v6269_v32 }
 0x1df   :  { %1082 = vmatpush.msrb.mxu0 %v6247_v7  ;;  %1102 = vmatpush.msrb.mxu1 %v6248_v8 }
 0x1e0   :  { %1122 = vmatpush.msrb.mxu2 %v6249_v9  ;;  %1142 = vmatpush.msrb.mxu3 %v6250_v10 }
 0x1e1   :  { %1083 = vmatpush.msrb.mxu0 %v6251_v11  ;;  %1103 = vmatpush.msrb.mxu1 %v6252_v12  ;;  %v6283_v11 = vld [vmem:[#allocation49_spill] sm:$0xff] }
 0x1e2   :  { %1123 = vmatpush.msrb.mxu2 %v6253_v14  ;;  %1143 = vmatpush.msrb.mxu3 %v6254_v15  ;;  %v320_v12 = vadd.f32 %v6283_v11, %v6271_v42 }
 0x1e3   :  { %1084 = vmatpush.msrb.mxu0 %v6255_v16  ;;  %1104 = vmatpush.msrb.mxu1 %v6256_v17 }
 0x1e4   :  { %1124 = vmatpush.msrb.mxu2 %v6257_v18  ;;  %1144 = vmatpush.msrb.mxu3 %v6258_v19 }
 0x1e5   :  { %1085 = vmatpush.msrb.mxu0 %v6259_v20  ;;  %1105 = vmatpush.msrb.mxu1 %v6260_v21 }
 0x1e6   :  { %1125 = vmatpush.msrb.mxu2 %v6261_v22  ;;  %1145 = vmatpush.msrb.mxu3 %v6262_v23  ;;  %v6284_v23 = vld [vmem:[#allocation48_spill] sm:$0xff] }
 0x1e7   :  { %1086 = vmatpush.msrb.mxu0 %v6263_v24  ;;  %1106 = vmatpush.msrb.mxu1 %v6264_v25  ;;  %v279_v24 = vadd.f32 %v6284_v23, %v6273_v0 }
 0x1e8   :  { %1126 = vmatpush.msrb.mxu2 %v6265_v27  ;;  %1146 = vmatpush.msrb.mxu3 %v6266_v28 }
 0x244   :  { %v772_v5 = vpop.f32.mrf.mxu0  ;;  %v792_v6 = vpop.f32.mrf.mxu1 }
 0x245   :  { %v835_v7 = vadd.f32 %v772_v5, %v197_v2  ;;  %v836_v8 = vadd.f32 %v792_v6, %v238_v4 }
 0x247   :  { %v3308_v9 = vmul.f32 -1.442695, %v835_v7  ;;  %v3309_v10 = vmul.f32 -1.442695, %v836_v8 }
 0x249   :  { %3391 = vpow2.f32 %v3308_v9 }
 0x24a   :  { %3393 = vpow2.f32 %v3309_v10 }
 0x24b   :  { %v832_v14 = vpop.f32.mrf.mxu3  ;;  %v812_v21 = vpop.f32.mrf.mxu2 }
 0x24c   :  { %v838_v15 = vadd.f32 %v832_v14, %v320_v12  ;;  %v837_v28 = vadd.f32 %v812_v21, %v279_v24 }
 0x24e   :  { %v3310_v16 = vmul.f32 -1.442695, %v838_v15 }
 0x24f   :  { %v3392_v17 = vpop.eup %3391 }
 0x250   :  { %v3394_v18 = vpop.eup %3393  ;;  %v843_v19 = vadd.f32 1.0, %v3392_v17  ;;  %3395 = vpow2.f32 %v3310_v16 }
 0x251   :  { %v862_v20 = vadd.f32 1.0, %v3394_v18 }
 0x252   :  { %3397 = vrcp.f32 %v843_v19  ;;  %v855_v6 = vand.u32 2147483648, %v843_v19  ;;  %v853_v9 = vand.u32 2147483647, %v843_v19  ;;  %vm849_vm10 = vweird.f32 %v843_v19 }
 0x253   :  { %3399 = vrcp.f32 %v862_v20  ;;  %v874_v7 = vand.u32 2147483648, %v862_v20  ;;  %v872_v11 = vand.u32 2147483647, %v862_v20  ;;  %vm868_vm11 = vweird.f32 %v862_v20 }
 0x254   :  { %v856_v15 = vor.u32 1.1754944e-38, %v855_v6  ;;  %vm854_vm14 = vcmp.eq.f32.partialorder %v853_v9, 8.507059e+37 }
 0x255   :  { %v875_v18 = vor.u32 1.1754944e-38, %v874_v7  ;;  %vm873_vm15 = vcmp.eq.f32.partialorder %v872_v11, 8.507059e+37  ;;  %v6288_v11 = vld [vmem:[#allocation19_spill] sm:$0xff] }
 0x256   :  { %v3396_v22 = vpop.eup %3395 }
 0x257   :  { %v882_v25 = vadd.f32 1.0, %v3396_v22 }
 0x258   :  { %v3398_v27 = vpop.eup %3397 }
 0x259   :  { %v3400_v1 = vpop.eup %3399  ;;  %v845_v2 = vmul.f32 %v3398_v27, %v843_v19  ;;  %3401 = vrcp.f32 %v882_v25  ;;  %vm850_vm8 = vweird.f32 %v3398_v27  ;;  %v894_v6 = vand.u32 2147483648, %v882_v25 }
 0x25a   :  { %v864_v3 = vmul.f32 %v3400_v1, %v862_v20  ;;  %3403 = vtanh.f32 %v837_v28  ;;  %vm869_vm9 = vweird.f32 %v3400_v1  ;;  %vm851_vm12 = vmor %vm849_vm10, %vm850_vm8  ;;  %vm888_vm1 = vweird.f32 %v882_v25 }
 0x25b   :  { %v846_v4 = vsub.f32 1.0, %v845_v2  ;;  %vm870_vm13 = vmor %vm868_vm11, %vm869_vm9 }
 0x25c   :  { %v865_v5 = vsub.f32 1.0, %v864_v3 }
 0x25d   :  { %v847_v8 = vmul.f32 %v3398_v27, %v846_v4 }
 0x25e   :  { %v866_v10 = vmul.f32 %v3400_v1, %v865_v5 }
 0x25f   :  { %v3402_v12 = vpop.eup %3401  ;;  %v848_v14 = vadd.f32 %v3398_v27, %v847_v8  ;;  %v895_v8 = vor.u32 1.1754944e-38, %v894_v6  ;;  %v4657_v6 = vld [vmem:[#allocation8 + $0x40] sm:$0xff] }
 0x260   :  { %v867_v16 = vadd.f32 %v3400_v1, %v866_v10  ;;  %v884_v17 = vmul.f32 %v3402_v12, %v882_v25  ;;  %v3404_v22 = vpop.eup %3403  ;;  %vm889_vm0 = vweird.f32 %v3402_v12  ;;  %6305 = vst [vmem:[#allocation37_spill] sm:$0xff] %v4657_v6 }
 0x261   :  { %v852_v21 = vsel %vm851_vm12, %v3398_v27, %v848_v14  ;;  %v892_v27 = vand.u32 2147483647, %v882_v25  ;;  %vm890_vm2 = vmor %vm888_vm1, %vm889_vm0  ;;  %v6287_v25 = vld [vmem:[#allocation18_spill] sm:$0xff]  ;;  %v6290_v14 = vld [vmem:[#allocation20_spill] sm:$0xff] }
 0x262   :  { %v857_v23 = vsel %vm854_vm14, %v856_v15, %v852_v21  ;;  %v871_v24 = vsel %vm870_vm13, %v3400_v1, %v867_v16  ;;  %v885_v28 = vsub.f32 1.0, %v884_v17  ;;  %v4615_v15 = vld [vmem:[#allocation8 + $0xd0] sm:$0xff]  ;;  %v4618_v16 = vld [vmem:[#allocation8 + $0xd8] sm:$0xff]  ;;  %v4621_v17 = vld [vmem:[#allocation8 + $0xa0] sm:$0xff] }
 0x263   :  { %v876_v2 = vsel %vm873_vm15, %v875_v18, %v871_v24  ;;  %v899_v3 = vmul.f32 %v3404_v22, %v857_v23  ;;  %vm893_vm3 = vcmp.eq.f32.partialorder %v892_v27, 8.507059e+37  ;;  %6291 = vst [vmem:[#allocation23_spill] sm:$0xff] %v4615_v15  ;;  %v4624_v18 = vld [vmem:[#allocation8 + $0xa8] sm:$0xff]  ;;  %v4627_v21 = vld [vmem:[#allocation8 + $0xb0] sm:$0xff]  ;;  %v4630_v22 = vld [vmem:[#allocation8 + $0xb8] sm:$0xff] }
 0x264   :  { %v898_v4 = vmul.f32 %v876_v2, %v4410_v57  ;;  %v886_v5 = vmul.f32 %v3402_v12, %v885_v28  ;;  %v6286_v57 = vld [vmem:[#allocation16_spill] sm:$0xff]  ;;  %6292 = vst [vmem:[#allocation25_spill] sm:$0xff] %v4618_v16  ;;  %v4636_v24 = vld [vmem:[#allocation8 + $0x88] sm:$0xff]  ;;  %v4639_v28 = vld [vmem:[#allocation8 + $0x90] sm:$0xff] }
 0x265   :  { %6293 = vst [vmem:[#allocation24_spill] sm:$0xff] %v4621_v17  ;;  %v4633_v23 = vld [vmem:[#allocation8 + $0x80] sm:$0xff]  ;;  %v4642_v2 = vld [vmem:[#allocation8 + $0x98] sm:$0xff]  ;;  %v4660_v27 = vld [vmem:[#allocation8 + $0x48] sm:$0xff] }
 0x266   :  { %v4568_v19 = vadd.f32 %v899_v3, %v898_v4  ;;  %v887_v20 = vadd.f32 %v3402_v12, %v886_v5  ;;  %6294 = vst [vmem:[#allocation26_spill] sm:$0xff] %v4624_v18  ;;  %v4645_v3 = vld [vmem:[#allocation8 + $0x60] sm:$0xff]  ;;  %v4648_v4 = vld [vmem:[#allocation8 + $0x68] sm:$0xff]  ;;  %v4651_v5 = vld [vmem:[#allocation8 + $0x70] sm:$0xff] }
 0x267   :  { %6295 = vst [vmem:[#allocation27_spill] sm:$0xff] %v4627_v21 }
 0x268   :  { %3405 = vtanh.f32 %v4568_v19  ;;  %v891_v7 = vsel %vm890_vm2, %v3402_v12, %v887_v20  ;;  %v6289_v12 = vld [vmem:[#allocation21_spill] sm:$0xff]  ;;  %6296 = vst [vmem:[#allocation29_spill] sm:$0xff] %v4630_v22  ;;  %v4654_v20 = vld [vmem:[#allocation8 + $0x78] sm:$0xff] }
 0x269   :  { %v896_v9 = vsel %vm893_vm3, %v895_v8, %v891_v7  ;;  %6297 = vst [vmem:[#allocation28_spill] sm:$0xff] %v4633_v23  ;;  %v4663_v7 = vld [vmem:[#allocation8 + $0x50] sm:$0xff]  ;;  %v4666_v8 = vld [vmem:[#allocation8 + $0x58] sm:$0xff] }
 0x26a   :  { %6298 = vst [vmem:[#allocation30_spill] sm:$0xff] %v4636_v24 }
 0x26b   :  { %6299 = vst [vmem:[#allocation31_spill] sm:$0xff] %v4639_v28 }
 0x26c   :  { %6300 = vst [vmem:[#allocation33_spill] sm:$0xff] %v4642_v2 }
 0x26d   :  { %6301 = vst [vmem:[#allocation32_spill] sm:$0xff] %v4645_v3 }
 0x26e   :  { %v3406_v1 = vpop.eup %3405  ;;  %6302 = vst [vmem:[#allocation34_spill] sm:$0xff] %v4648_v4 }
 0x26f   :  { %v4571_v10 = vmul.f32 %v3406_v1, %v896_v9  ;;  %6303 = vst [vmem:[#allocation35_spill] sm:$0xff] %v4651_v5  ;;  %v4669_v1 = vld [vmem:[#allocation8 + $0x20] sm:$0xff]  ;;  %v4672_v9 = vld [vmem:[#allocation8 + $0x28] sm:$0xff] }
 0x270   :  { %6304 = vst [vmem:[#allocation36_spill] sm:$0xff] %v4654_v20 }
 0x271   :  { %6285 = vst [vmem:[#allocation22_spill] sm:$0xff] %v4571_v10  ;;  %929 = vmatmul.f32.vlgmr.msra.gmra.mxu0 %v4571_v10  ;;  %949 = vmatmul.f32.vlgmr.msra.gmra.mxu1 %v4571_v10 }
 0x272   :  { %969 = vmatmul.f32.vlgmr.msra.gmra.mxu2 %v4571_v10  ;;  %989 = vmatmul.f32.vlgmr.msra.gmra.mxu3 %v4571_v10  ;;  %6306 = vst [vmem:[#allocation38_spill] sm:$0xff] %v4660_v27  ;;  %v4675_v10 = vld [vmem:[#allocation8 + $0x30] sm:$0xff] }
 0x273   :  { %1229 = vmatpush.msra.mxu0 %v4419_v63  ;;  %1249 = vmatpush.msra.mxu1 %v4422_v52  ;;  %6307 = vst [vmem:[#allocation39_spill] sm:$0xff] %v4663_v7 }
 0x274   :  { %1269 = vmatpush.msra.mxu2 %v4425_v62  ;;  %1289 = vmatpush.msra.mxu3 %v4428_v51  ;;  %6308 = vst [vmem:[#allocation40_spill] sm:$0xff] %v4666_v8 }
 0x275   :  { %1230 = vmatpush.msra.mxu0 %v4431_v30  ;;  %1250 = vmatpush.msra.mxu1 %v4434_v31  ;;  %6309 = vst [vmem:[#allocation41_spill] sm:$0xff] %v4669_v1 }
 0x276   :  { %1270 = vmatpush.msra.mxu2 %v4437_v33  ;;  %1290 = vmatpush.msra.mxu3 %v4440_v34  ;;  %6310 = vst [vmem:[#allocation42_spill] sm:$0xff] %v4672_v9 }
 0x277   :  { %1231 = vmatpush.msra.mxu0 %v4443_v35  ;;  %1251 = vmatpush.msra.mxu1 %v4446_v36  ;;  %6311 = vst [vmem:[#allocation43_spill] sm:$0xff] %v4675_v10 }
 0x278   :  { %1271 = vmatpush.msra.mxu2 %v4449_v37  ;;  %1291 = vmatpush.msra.mxu3 %v4452_v38 }
 0x279   :  { %1232 = vmatpush.msra.mxu0 %v4455_v40  ;;  %1252 = vmatpush.msra.mxu1 %v4458_v41 }
 0x27a   :  { %1272 = vmatpush.msra.mxu2 %v4461_v43  ;;  %1292 = vmatpush.msra.mxu3 %v4464_v44 }
 0x27b   :  { %1233 = vmatpush.msra.mxu0 %v4467_v45  ;;  %1253 = vmatpush.msra.mxu1 %v4470_v47 }
 0x27c   :  { %1273 = vmatpush.msra.mxu2 %v4473_v55  ;;  %1293 = vmatpush.msra.mxu3 %v4476_v58 }
 0x27d   :  { %1234 = vmatpush.msra.mxu0 %v4479_v39  ;;  %1254 = vmatpush.msra.mxu1 %v4482_v50 }
 0x27e   :  { %1274 = vmatpush.msra.mxu2 %v4485_v56  ;;  %1294 = vmatpush.msra.mxu3 %v4488_v61 }
 0x27f   :  { %1235 = vmatpush.msra.mxu0 %v4491_v53  ;;  %1255 = vmatpush.msra.mxu1 %v4494_v49 }
 0x280   :  { %1275 = vmatpush.msra.mxu2 %v4497_v13  ;;  %1295 = vmatpush.msra.mxu3 %v6286_v57 }
 0x281   :  { %1236 = vmatpush.msra.mxu0 %v6287_v25  ;;  %1256 = vmatpush.msra.mxu1 %v6288_v11 }
 0x282   :  { %1276 = vmatpush.msra.mxu2 %v6289_v12  ;;  %1296 = vmatpush.msra.mxu3 %v6290_v14 }
 0x283   :  { %1237 = vmatpush.msra.mxu0 %v4515_v26  ;;  %1257 = vmatpush.msra.mxu1 %v4518_v46 }
 0x284   :  { %1277 = vmatpush.msra.mxu2 %v4521_v54  ;;  %1297 = vmatpush.msra.mxu3 %v4524_v48 }
 0x285   :  { %1238 = vmatpush.msra.mxu0 %v4527_v59  ;;  %1258 = vmatpush.msra.mxu1 %v4530_v60 }
 0x286   :  { %1278 = vmatpush.msra.mxu2 %v4615_v15  ;;  %1298 = vmatpush.msra.mxu3 %v4618_v16 }
 0x287   :  { %1239 = vmatpush.msra.mxu0 %v4621_v17  ;;  %1259 = vmatpush.msra.mxu1 %v4624_v18 }
 0x288   :  { %1279 = vmatpush.msra.mxu2 %v4627_v21  ;;  %1299 = vmatpush.msra.mxu3 %v4630_v22 }
 0x289   :  { %1240 = vmatpush.msra.mxu0 %v4633_v23  ;;  %1260 = vmatpush.msra.mxu1 %v4636_v24 }
 0x28a   :  { %1280 = vmatpush.msra.mxu2 %v4639_v28  ;;  %1300 = vmatpush.msra.mxu3 %v4642_v2  ;;  %v6319_v28 = vld [vmem:[#allocation53_spill] sm:$0xff] }
 0x28b   :  { %1241 = vmatpush.msra.mxu0 %v4645_v3  ;;  %1261 = vmatpush.msra.mxu1 %v4648_v4 }
 0x28c   :  { %1281 = vmatpush.msra.mxu2 %v4651_v5  ;;  %1301 = vmatpush.msra.mxu3 %v4654_v20 }
 0x28d   :  { %1242 = vmatpush.msra.mxu0 %v4657_v6  ;;  %1262 = vmatpush.msra.mxu1 %v4660_v27  ;;  %v4678_v27 = vld [vmem:[#allocation8 + $0x38] sm:$0xff] }
 0x28e   :  { %1282 = vmatpush.msra.mxu2 %v4663_v7  ;;  %1302 = vmatpush.msra.mxu3 %v4666_v8  ;;  %6312 = vst [vmem:[#allocation45_spill] sm:$0xff] %v4678_v27  ;;  %v4681_v7 = vld [vmem:[#allocation8] sm:$0xff]  ;;  %v4684_v8 = vld [vmem:[#allocation8 + $0x8] sm:$0xff] }
 0x28f   :  { %1243 = vmatpush.msra.mxu0 %v4669_v1  ;;  %1263 = vmatpush.msra.mxu1 %v4672_v9  ;;  %6313 = vst [vmem:[#allocation44_spill] sm:$0xff] %v4681_v7  ;;  %v4687_v1 = vld [vmem:[#allocation8 + $0x10] sm:$0xff]  ;;  %v4690_v9 = vld [vmem:[#allocation8 + $0x18] sm:$0xff] }
 0x290   :  { %1283 = vmatpush.msra.mxu2 %v4675_v10  ;;  %1303 = vmatpush.msra.mxu3 %v4678_v27  ;;  %6314 = vst [vmem:[#allocation46_spill] sm:$0xff] %v4684_v8  ;;  %v6317_v10 = vld [vmem:[#allocation50_spill] sm:$0xff]  ;;  %v6318_v27 = vld [vmem:[#allocation51_spill] sm:$0xff] }
 0x291   :  { %1244 = vmatpush.msra.mxu0 %v4681_v7  ;;  %1264 = vmatpush.msra.mxu1 %v4684_v8  ;;  %6315 = vst [vmem:[#allocation47_spill] sm:$0xff] %v4687_v1  ;;  %v200_v6 = vadd.f32 %v6317_v10, %v6267_v29  ;;  %v241_v20 = vadd.f32 %v6318_v27, %v6269_v32 }
 0x292   :  { %1284 = vmatpush.msra.mxu2 %v4687_v1  ;;  %6316 = vst [vmem:[#allocation49_spill] sm:$0xff] %v4690_v9  ;;  %1304 = vmatpush.msra.mxu3 %v4690_v9  ;;  %v323_v1 = vadd.f32 %v6319_v28, %v6271_v42 }
 0x2ee   :  { %v930_v5 = vpop.f32.mrf.mxu0  ;;  %v950_v7 = vpop.f32.mrf.mxu1 }
 0x2ef   :  { %v993_v4 = vadd.f32 %v930_v5, %v200_v6  ;;  %v994_v3 = vadd.f32 %v950_v7, %v241_v20 }
 0x2f1   :  { %v3311_v2 = vmul.f32 -1.442695, %v993_v4  ;;  %v3312_v8 = vmul.f32 -1.442695, %v994_v3  ;;  %v6320_v4 = vld [vmem:[#allocation52_spill] sm:$0xff] }
 0x2f2   :  { %v282_v3 = vadd.f32 %v6320_v4, %v6273_v0 }
 0x2f3   :  { %3407 = vpow2.f32 %v3311_v2 }
 0x2f4   :  { %3409 = vpow2.f32 %v3312_v8 }
 0x2f5   :  { %v990_v24 = vpop.f32.mrf.mxu3  ;;  %v970_v27 = vpop.f32.mrf.mxu2 }
 0x2f6   :  { %v996_v23 = vadd.f32 %v990_v24, %v323_v1  ;;  %v995_v6 = vadd.f32 %v970_v27, %v282_v3 }
 0x2f8   :  { %v3313_v9 = vmul.f32 -1.442695, %v996_v23 }
 0x2f9   :  { %v3408_v22 = vpop.eup %3407 }
 0x2fa   :  { %v3410_v21 = vpop.eup %3409  ;;  %v1001_v10 = vadd.f32 1.0, %v3408_v22  ;;  %3411 = vpow2.f32 %v3313_v9 }
 0x2fb   :  { %v1020_v29 = vadd.f32 1.0, %v3410_v21 }
 0x2fc   :  { %3413 = vrcp.f32 %v1001_v10  ;;  %v1013_v1 = vand.u32 2147483648, %v1001_v10  ;;  %v1011_v9 = vand.u32 2147483647, %v1001_v10  ;;  %vm1007_vm6 = vweird.f32 %v1001_v10 }
 0x2fd   :  { %3415 = vrcp.f32 %v1020_v29  ;;  %v1032_v22 = vand.u32 2147483648, %v1020_v29  ;;  %v1030_v32 = vand.u32 2147483647, %v1020_v29  ;;  %vm1026_vm7 = vweird.f32 %v1020_v29 }
 0x2fe   :  { %v1014_v27 = vor.u32 1.1754944e-38, %v1013_v1  ;;  %vm1012_vm10 = vcmp.eq.f32.partialorder %v1011_v9, 8.507059e+37 }
 0x2ff   :  { %vm1031_vm11 = vcmp.eq.f32.partialorder %v1030_v32, 8.507059e+37 }
 0x300   :  { %v3412_v5 = vpop.eup %3411 }
 0x301   :  { %v1040_v2 = vadd.f32 1.0, %v3412_v5 }
 0x302   :  { %v3414_v20 = vpop.eup %3413 }
 0x303   :  { %v3416_v28 = vpop.eup %3415  ;;  %v1003_v7 = vmul.f32 %v3414_v20, %v1001_v10  ;;  %3417 = vrcp.f32 %v1040_v2  ;;  %vm1008_vm4 = vweird.f32 %v3414_v20  ;;  %vm1046_vm13 = vweird.f32 %v1040_v2 }
 0x304   :  { %v1022_v24 = vmul.f32 %v3416_v28, %v1020_v29  ;;  %3419 = vtanh.f32 %v995_v6  ;;  %vm1027_vm5 = vweird.f32 %v3416_v28  ;;  %vm1009_vm8 = vmor %vm1007_vm6, %vm1008_vm4 }
 0x305   :  { %v1004_v23 = vsub.f32 1.0, %v1003_v7  ;;  %vm1028_vm9 = vmor %vm1026_vm7, %vm1027_vm5  ;;  %v1033_v7 = vor.u32 1.1754944e-38, %v1032_v22 }
 0x306   :  { %v1023_v8 = vsub.f32 1.0, %v1022_v24 }
 0x307   :  { %v1005_v21 = vmul.f32 %v3414_v20, %v1004_v23 }
 0x308   :  { %v1024_v42 = vmul.f32 %v3416_v28, %v1023_v8 }
 0x309   :  { %v3418_v18 = vpop.eup %3417  ;;  %v1006_v4 = vadd.f32 %v3414_v20, %v1005_v21 }
 0x30a   :  { %v1025_v5 = vadd.f32 %v3416_v28, %v1024_v42  ;;  %v1042_v3 = vmul.f32 %v3418_v18, %v1040_v2  ;;  %v3420_v6 = vpop.eup %3419  ;;  %vm1047_vm12 = vweird.f32 %v3418_v18  ;;  %v1052_v42 = vand.u32 2147483648, %v1040_v2 }
 0x30b   :  { %v1010_v24 = vsel %vm1009_vm8, %v3414_v20, %v1006_v4  ;;  %v1050_v20 = vand.u32 2147483647, %v1040_v2  ;;  %vm1048_vm14 = vmor %vm1046_vm13, %vm1047_vm12  ;;  %v6328_v2 = vld [vmem:[#allocation28_spill] sm:$0xff]  ;;  %v6329_v4 = vld [vmem:[#allocation30_spill] sm:$0xff] }
 0x30c   :  { %v1015_v0 = vsel %vm1012_vm10, %v1014_v27, %v1010_v24  ;;  %v1029_v23 = vsel %vm1028_vm9, %v3416_v28, %v1025_v5  ;;  %v1043_v17 = vsub.f32 1.0, %v1042_v3  ;;  %v1053_v22 = vor.u32 1.1754944e-38, %v1052_v42  ;;  %v6330_v27 = vld [vmem:[#allocation31_spill] sm:$0xff]  ;;  %v6331_v5 = vld [vmem:[#allocation33_spill] sm:$0xff]  ;;  %v6332_v3 = vld [vmem:[#allocation32_spill] sm:$0xff] }
 0x30d   :  { %v1034_v8 = vsel %vm1031_vm11, %v1033_v7, %v1029_v23  ;;  %v1057_v16 = vmul.f32 %v3420_v6, %v1015_v0  ;;  %vm1051_vm15 = vcmp.eq.f32.partialorder %v1050_v20, 8.507059e+37  ;;  %v6322_v0 = vld [vmem:[#allocation23_spill] sm:$0xff]  ;;  %v6333_v7 = vld [vmem:[#allocation34_spill] sm:$0xff]  ;;  %v6335_v6 = vld [vmem:[#allocation36_spill] sm:$0xff] }
 0x30e   :  { %v1056_v15 = vmul.f32 %v1034_v8, %v4568_v19  ;;  %v1044_v21 = vmul.f32 %v3418_v18, %v1043_v17  ;;  %v6323_v19 = vld [vmem:[#allocation25_spill] sm:$0xff]  ;;  %v6326_v17 = vld [vmem:[#allocation27_spill] sm:$0xff]  ;;  %v6337_v8 = vld [vmem:[#allocation38_spill] sm:$0xff] }
 0x30f   :  { %v6334_v24 = vld [vmem:[#allocation35_spill] sm:$0xff]  ;;  %v6336_v23 = vld [vmem:[#allocation37_spill] sm:$0xff]  ;;  %v6341_v20 = vld [vmem:[#allocation42_spill] sm:$0xff] }
 0x310   :  { %v4702_v10 = vadd.f32 %v1057_v16, %v1056_v15  ;;  %v1045_v29 = vadd.f32 %v3418_v18, %v1044_v21  ;;  %v6324_v15 = vld [vmem:[#allocation24_spill] sm:$0xff]  ;;  %v6325_v16 = vld [vmem:[#allocation26_spill] sm:$0xff]  ;;  %v6338_v21 = vld [vmem:[#allocation39_spill] sm:$0xff] }
 0x311   :  { %v6340_v42 = vld [vmem:[#allocation41_spill] sm:$0xff] }
 0x312   :  { %3421 = vtanh.f32 %v4702_v10  ;;  %v1049_v1 = vsel %vm1048_vm14, %v3418_v18, %v1045_v29  ;;  %v6327_v18 = vld [vmem:[#allocation29_spill] sm:$0xff]  ;;  %v6339_v29 = vld [vmem:[#allocation40_spill] sm:$0xff] }
 0x313   :  { %v1054_v28 = vsel %vm1051_vm15, %v1053_v22, %v1049_v1  ;;  %v6342_v1 = vld [vmem:[#allocation43_spill] sm:$0xff]  ;;  %v6343_v22 = vld [vmem:[#allocation45_spill] sm:$0xff] }
 0x318   :  { %v3422_v32 = vpop.eup %3421 }
 0x319   :  { %v4705_v9 = vmul.f32 %v3422_v32, %v1054_v28  ;;  %v6344_v32 = vld [vmem:[#allocation44_spill] sm:$0xff]  ;;  %v6345_v28 = vld [vmem:[#allocation46_spill] sm:$0xff] }
 0x31b   :  { %6321 = vst [vmem:[#allocation48_spill] sm:$0xff] %v4705_v9  ;;  %1087 = vmatmul.f32.vlgmr.msrb.gmra.mxu0 %v4705_v9  ;;  %1107 = vmatmul.f32.vlgmr.msrb.gmra.mxu1 %v4705_v9 }
 0x31c   :  { %1127 = vmatmul.f32.vlgmr.msrb.gmra.mxu2 %v4705_v9  ;;  %1147 = vmatmul.f32.vlgmr.msrb.gmra.mxu3 %v4705_v9  ;;  %v6346_v9 = vld [vmem:[#allocation47_spill] sm:$0xff] }
 0x31d   :  { %1387 = vmatpush.msrb.mxu0 %v4419_v63  ;;  %1407 = vmatpush.msrb.mxu1 %v4422_v52 }
 0x31e   :  { %1427 = vmatpush.msrb.mxu2 %v4425_v62  ;;  %1447 = vmatpush.msrb.mxu3 %v4428_v51 }
 0x31f   :  { %1388 = vmatpush.msrb.mxu0 %v4431_v30  ;;  %1408 = vmatpush.msrb.mxu1 %v4434_v31 }
 0x320   :  { %1428 = vmatpush.msrb.mxu2 %v4437_v33  ;;  %1448 = vmatpush.msrb.mxu3 %v4440_v34 }
 0x321   :  { %1389 = vmatpush.msrb.mxu0 %v4443_v35  ;;  %1409 = vmatpush.msrb.mxu1 %v4446_v36 }
 0x322   :  { %1429 = vmatpush.msrb.mxu2 %v4449_v37  ;;  %1449 = vmatpush.msrb.mxu3 %v4452_v38 }
 0x323   :  { %1390 = vmatpush.msrb.mxu0 %v4455_v40  ;;  %1410 = vmatpush.msrb.mxu1 %v4458_v41 }
 0x324   :  { %1430 = vmatpush.msrb.mxu2 %v4461_v43  ;;  %1450 = vmatpush.msrb.mxu3 %v4464_v44 }
 0x325   :  { %1391 = vmatpush.msrb.mxu0 %v4467_v45  ;;  %1411 = vmatpush.msrb.mxu1 %v4470_v47 }
 0x326   :  { %1431 = vmatpush.msrb.mxu2 %v4473_v55  ;;  %1451 = vmatpush.msrb.mxu3 %v4476_v58 }
 0x327   :  { %1392 = vmatpush.msrb.mxu0 %v4479_v39  ;;  %1412 = vmatpush.msrb.mxu1 %v4482_v50 }
 0x328   :  { %1432 = vmatpush.msrb.mxu2 %v4485_v56  ;;  %1452 = vmatpush.msrb.mxu3 %v4488_v61 }
 0x329   :  { %1393 = vmatpush.msrb.mxu0 %v4491_v53  ;;  %1413 = vmatpush.msrb.mxu1 %v4494_v49 }
 0x32a   :  { %1433 = vmatpush.msrb.mxu2 %v4497_v13  ;;  %1453 = vmatpush.msrb.mxu3 %v6286_v57 }
 0x32b   :  { %1394 = vmatpush.msrb.mxu0 %v6287_v25  ;;  %1414 = vmatpush.msrb.mxu1 %v6288_v11 }
 0x32c   :  { %1434 = vmatpush.msrb.mxu2 %v6289_v12  ;;  %1454 = vmatpush.msrb.mxu3 %v6290_v14 }
 0x32d   :  { %1395 = vmatpush.msrb.mxu0 %v4515_v26  ;;  %1415 = vmatpush.msrb.mxu1 %v4518_v46 }
 0x32e   :  { %1435 = vmatpush.msrb.mxu2 %v4521_v54  ;;  %1455 = vmatpush.msrb.mxu3 %v4524_v48 }
 0x32f   :  { %1396 = vmatpush.msrb.mxu0 %v4527_v59  ;;  %1416 = vmatpush.msrb.mxu1 %v4530_v60 }
 0x330   :  { %1436 = vmatpush.msrb.mxu2 %v6322_v0  ;;  %1456 = vmatpush.msrb.mxu3 %v6323_v19 }
 0x331   :  { %1397 = vmatpush.msrb.mxu0 %v6324_v15  ;;  %1417 = vmatpush.msrb.mxu1 %v6325_v16 }
 0x332   :  { %1437 = vmatpush.msrb.mxu2 %v6326_v17  ;;  %1457 = vmatpush.msrb.mxu3 %v6327_v18 }
 0x333   :  { %1398 = vmatpush.msrb.mxu0 %v6328_v2  ;;  %1418 = vmatpush.msrb.mxu1 %v6329_v4 }
 0x334   :  { %1438 = vmatpush.msrb.mxu2 %v6330_v27  ;;  %1458 = vmatpush.msrb.mxu3 %v6331_v5  ;;  %v6353_v27 = vld [vmem:[#allocation56_spill] sm:$0xff] }
 0x335   :  { %1399 = vmatpush.msrb.mxu0 %v6332_v3  ;;  %1419 = vmatpush.msrb.mxu1 %v6333_v7 }
 0x336   :  { %1439 = vmatpush.msrb.mxu2 %v6334_v24  ;;  %1459 = vmatpush.msrb.mxu3 %v6335_v6  ;;  %v6351_v24 = vld [vmem:[#allocation55_spill] sm:$0xff] }
 0x337   :  { %1400 = vmatpush.msrb.mxu0 %v6336_v23  ;;  %1420 = vmatpush.msrb.mxu1 %v6337_v8  ;;  %v6347_v23 = vld [vmem:[#allocation49_spill] sm:$0xff]  ;;  %v6348_v8 = vld [vmem:[#allocation67_spill] sm:$0xff] }
 0x338   :  { %1440 = vmatpush.msrb.mxu2 %v6338_v21  ;;  %1460 = vmatpush.msrb.mxu3 %v6339_v29  ;;  %v6349_v21 = vld [vmem:[#allocation54_spill] sm:$0xff]  ;;  %v6350_v29 = vld [vmem:[#allocation68_spill] sm:$0xff] }
 0x339   :  { %1401 = vmatpush.msrb.mxu0 %v6340_v42  ;;  %1421 = vmatpush.msrb.mxu1 %v6341_v20  ;;  %v203_v6 = vadd.f32 %v6349_v21, %v6348_v8  ;;  %v244_v42 = vadd.f32 %v6351_v24, %v6350_v29 }
 0x33a   :  { %1441 = vmatpush.msrb.mxu2 %v6342_v1  ;;  %1461 = vmatpush.msrb.mxu3 %v6343_v22 }
 0x33b   :  { %1402 = vmatpush.msrb.mxu0 %v6344_v32  ;;  %1422 = vmatpush.msrb.mxu1 %v6345_v28  ;;  %v6352_v32 = vld [vmem:[#allocation71_spill] sm:$0xff] }
 0x33c   :  { %1442 = vmatpush.msrb.mxu2 %v6346_v9  ;;  %1462 = vmatpush.msrb.mxu3 %v6347_v23  ;;  %v326_v28 = vadd.f32 %v6353_v27, %v6352_v32 }
 0x398   :  { %v1088_v7 = vpop.f32.mrf.mxu0  ;;  %v1108_v20 = vpop.f32.mrf.mxu1 }
 0x399   :  { %v1151_v3 = vadd.f32 %v1088_v7, %v203_v6  ;;  %v1152_v1 = vadd.f32 %v1108_v20, %v244_v42  ;;  %v6354_v6 = vld [vmem:[#allocation73_spill] sm:$0xff] }
 0x39b   :  { %v3314_v5 = vmul.f32 -1.442695, %v1151_v3  ;;  %v3315_v22 = vmul.f32 -1.442695, %v1152_v1  ;;  %v6355_v3 = vld [vmem:[#allocation59_spill] sm:$0xff] }
 0x39c   :  { %v285_v42 = vadd.f32 %v6355_v3, %v6354_v6 }
 0x39d   :  { %3423 = vpow2.f32 %v3314_v5 }
 0x39e   :  { %3425 = vpow2.f32 %v3315_v22 }
 0x39f   :  { %v1148_v9 = vpop.f32.mrf.mxu3  ;;  %v1128_v24 = vpop.f32.mrf.mxu2 }
 0x3a0   :  { %v1154_v4 = vadd.f32 %v1148_v9, %v326_v28  ;;  %v1153_v1 = vadd.f32 %v1128_v24, %v285_v42 }
 0x3a2   :  { %v3316_v23 = vmul.f32 -1.442695, %v1154_v4 }
 0x3a3   :  { %v3424_v2 = vpop.eup %3423 }
 0x3a4   :  { %v3426_v18 = vpop.eup %3425  ;;  %v1159_v21 = vadd.f32 1.0, %v3424_v2  ;;  %3427 = vpow2.f32 %v3316_v23 }
 0x3a5   :  { %v1178_v8 = vadd.f32 1.0, %v3426_v18 }
 0x3a6   :  { %3429 = vrcp.f32 %v1159_v21  ;;  %v1171_v32 = vand.u32 2147483648, %v1159_v21  ;;  %v1169_v23 = vand.u32 2147483647, %v1159_v21  ;;  %vm1165_vm2 = vweird.f32 %v1159_v21 }
 0x3a7   :  { %3431 = vrcp.f32 %v1178_v8  ;;  %v1190_v2 = vand.u32 2147483648, %v1178_v8  ;;  %v1188_v17 = vand.u32 2147483647, %v1178_v8  ;;  %vm1184_vm3 = vweird.f32 %v1178_v8 }
 0x3a8   :  { %v1172_v24 = vor.u32 1.1754944e-38, %v1171_v32  ;;  %vm1170_vm6 = vcmp.eq.f32.partialorder %v1169_v23, 8.507059e+37 }
 0x3a9   :  { %vm1189_vm7 = vcmp.eq.f32.partialorder %v1188_v17, 8.507059e+37 }
 0x3aa   :  { %v3428_v7 = vpop.eup %3427 }
 0x3ab   :  { %v1198_v5 = vadd.f32 1.0, %v3428_v7 }
 0x3ac   :  { %v3430_v20 = vpop.eup %3429 }
 0x3ad   :  { %v3432_v27 = vpop.eup %3431  ;;  %v1161_v22 = vmul.f32 %v3430_v20, %v1159_v21  ;;  %3433 = vrcp.f32 %v1198_v5  ;;  %vm1166_vm0 = vweird.f32 %v3430_v20  ;;  %vm1204_vm9 = vweird.f32 %v1198_v5 }
 0x3ae   :  { %v1180_v9 = vmul.f32 %v3432_v27, %v1178_v8  ;;  %3435 = vtanh.f32 %v1153_v1  ;;  %vm1185_vm1 = vweird.f32 %v3432_v27  ;;  %vm1167_vm4 = vmor %vm1165_vm2, %vm1166_vm0  ;;  %v1208_v32 = vand.u32 2147483647, %v1198_v5 }
 0x3af   :  { %v1162_v4 = vsub.f32 1.0, %v1161_v22  ;;  %vm1186_vm5 = vmor %vm1184_vm3, %vm1185_vm1  ;;  %v1191_v22 = vor.u32 1.1754944e-38, %v1190_v2 }
 0x3b0   :  { %v1181_v28 = vsub.f32 1.0, %v1180_v9  ;;  %vm1209_vm11 = vcmp.eq.f32.partialorder %v1208_v32, 8.507059e+37 }
 0x3b1   :  { %v1163_v18 = vmul.f32 %v3430_v20, %v1162_v4 }
 0x3b2   :  { %v1182_v29 = vmul.f32 %v3432_v27, %v1181_v28 }
 0x3b3   :  { %v3434_v16 = vpop.eup %3433  ;;  %v1164_v3 = vadd.f32 %v3430_v20, %v1163_v18 }
 0x3b4   :  { %v1183_v7 = vadd.f32 %v3432_v27, %v1182_v29  ;;  %v1200_v42 = vmul.f32 %v3434_v16, %v1198_v5  ;;  %v3436_v1 = vpop.eup %3435  ;;  %vm1205_vm8 = vweird.f32 %v3434_v16  ;;  %v1210_v29 = vand.u32 2147483648, %v1198_v5 }
 0x3b5   :  { %v1168_v9 = vsel %vm1167_vm4, %v3430_v20, %v1164_v3  ;;  %vm1206_vm10 = vmor %vm1204_vm9, %vm1205_vm8 }
 0x3b6   :  { %v1173_v6 = vsel %vm1170_vm6, %v1172_v24, %v1168_v9  ;;  %v1187_v4 = vsel %vm1186_vm5, %v3432_v27, %v1183_v7  ;;  %v1201_v15 = vsub.f32 1.0, %v1200_v42  ;;  %v1211_v2 = vor.u32 1.1754944e-38, %v1210_v29  ;;  %v6388_v9 = vld [vmem:[#allocation73_spill] sm:$0xff] }
 0x3b7   :  { %v1192_v28 = vsel %vm1189_vm7, %v1191_v22, %v1187_v4  ;;  %v1215_v19 = vmul.f32 %v3436_v1, %v1173_v6  ;;  %v6389_v1 = vld [vmem:[#allocation63_spill] sm:$0xff] }
 0x3b8   :  { %v1214_v0 = vmul.f32 %v1192_v28, %v4702_v10  ;;  %v1202_v18 = vmul.f32 %v3434_v16, %v1201_v15  ;;  %v6386_v10 = vld [vmem:[#allocation71_spill] sm:$0xff]  ;;  %v288_v4 = vadd.f32 %v6389_v1, %v6388_v9  ;;  %v6390_v1 = vld [vmem:[#allocation61_spill] sm:$0xff] }
 0x3ba   :  { %v4784_v21 = vadd.f32 %v1215_v19, %v1214_v0  ;;  %v1203_v8 = vadd.f32 %v3434_v16, %v1202_v18  ;;  %v6387_v0 = vld [vmem:[#allocation60_spill] sm:$0xff] }
 0x3bb   :  { %v329_v19 = vadd.f32 %v6387_v0, %v6386_v10  ;;  %v1761_v0 = vld [vmem:[#allocation10 + $0x1a0] sm:$0xff] }
 0x3bc   :  { %3437 = vtanh.f32 %v4784_v21  ;;  %v1207_v20 = vsel %vm1206_vm10, %v3434_v16, %v1203_v8 }
 0x3bd   :  { %v1212_v27 = vsel %vm1209_vm11, %v1211_v2, %v1207_v20 }
 0x3c2   :  { %v3438_v17 = vpop.eup %3437 }
 0x3c3   :  { %v4787_v23 = vmul.f32 %v3438_v17, %v1212_v27 }
 0x3c5   :  { %1245 = vmatmul.f32.vlgmr.msra.gmra.mxu0 %v4787_v23  ;;  %1265 = vmatmul.f32.vlgmr.msra.gmra.mxu1 %v4787_v23 }
 0x3c6   :  { %1285 = vmatmul.f32.vlgmr.msra.gmra.mxu2 %v4787_v23  ;;  %1305 = vmatmul.f32.vlgmr.msra.gmra.mxu3 %v4787_v23 }
 0x3c7   :  { %1545 = vmatpush.msra.mxu0 %v4419_v63  ;;  %1565 = vmatpush.msra.mxu1 %v4422_v52  ;;  %v6356_v63 = vld [vmem:[#allocation23_spill] sm:$0xff]  ;;  %v6357_v52 = vld [vmem:[#allocation25_spill] sm:$0xff] }
 0x3c8   :  { %1585 = vmatpush.msra.mxu2 %v4425_v62  ;;  %1605 = vmatpush.msra.mxu3 %v4428_v51  ;;  %v6358_v62 = vld [vmem:[#allocation24_spill] sm:$0xff]  ;;  %v6359_v51 = vld [vmem:[#allocation26_spill] sm:$0xff] }
 0x3c9   :  { %1546 = vmatpush.msra.mxu0 %v4431_v30  ;;  %1566 = vmatpush.msra.mxu1 %v4434_v31  ;;  %v6360_v30 = vld [vmem:[#allocation27_spill] sm:$0xff]  ;;  %v6362_v31 = vld [vmem:[#allocation28_spill] sm:$0xff] }
 0x3ca   :  { %1586 = vmatpush.msra.mxu2 %v4437_v33  ;;  %1606 = vmatpush.msra.mxu3 %v4440_v34  ;;  %v6363_v33 = vld [vmem:[#allocation30_spill] sm:$0xff]  ;;  %v6364_v34 = vld [vmem:[#allocation31_spill] sm:$0xff] }
 0x3cb   :  { %1547 = vmatpush.msra.mxu0 %v4443_v35  ;;  %1567 = vmatpush.msra.mxu1 %v4446_v36  ;;  %v6365_v35 = vld [vmem:[#allocation33_spill] sm:$0xff]  ;;  %v6367_v36 = vld [vmem:[#allocation34_spill] sm:$0xff] }
 0x3cc   :  { %1587 = vmatpush.msra.mxu2 %v4449_v37  ;;  %1607 = vmatpush.msra.mxu3 %v4452_v38  ;;  %v6368_v37 = vld [vmem:[#allocation35_spill] sm:$0xff]  ;;  %v6369_v38 = vld [vmem:[#allocation36_spill] sm:$0xff] }
 0x3cd   :  { %1548 = vmatpush.msra.mxu0 %v4455_v40  ;;  %1568 = vmatpush.msra.mxu1 %v4458_v41  ;;  %v6370_v40 = vld [vmem:[#allocation37_spill] sm:$0xff]  ;;  %v6371_v41 = vld [vmem:[#allocation38_spill] sm:$0xff] }
 0x3ce   :  { %1588 = vmatpush.msra.mxu2 %v4461_v43  ;;  %1608 = vmatpush.msra.mxu3 %v4464_v44  ;;  %v6372_v43 = vld [vmem:[#allocation39_spill] sm:$0xff]  ;;  %v6373_v44 = vld [vmem:[#allocation40_spill] sm:$0xff] }
 0x3cf   :  { %1549 = vmatpush.msra.mxu0 %v4467_v45  ;;  %1569 = vmatpush.msra.mxu1 %v4470_v47  ;;  %v6374_v45 = vld [vmem:[#allocation41_spill] sm:$0xff]  ;;  %v6375_v47 = vld [vmem:[#allocation42_spill] sm:$0xff] }
 0x3d0   :  { %1589 = vmatpush.msra.mxu2 %v4473_v55  ;;  %1609 = vmatpush.msra.mxu3 %v4476_v58  ;;  %v6376_v55 = vld [vmem:[#allocation43_spill] sm:$0xff]  ;;  %v6377_v58 = vld [vmem:[#allocation45_spill] sm:$0xff] }
 0x3d1   :  { %1550 = vmatpush.msra.mxu0 %v4479_v39  ;;  %1570 = vmatpush.msra.mxu1 %v4482_v50  ;;  %v6378_v39 = vld [vmem:[#allocation44_spill] sm:$0xff]  ;;  %v6379_v50 = vld [vmem:[#allocation46_spill] sm:$0xff] }
 0x3d2   :  { %1590 = vmatpush.msra.mxu2 %v4485_v56  ;;  %1610 = vmatpush.msra.mxu3 %v4488_v61  ;;  %v6380_v56 = vld [vmem:[#allocation47_spill] sm:$0xff]  ;;  %v6381_v61 = vld [vmem:[#allocation49_spill] sm:$0xff] }
 0x3d3   :  { %1551 = vmatpush.msra.mxu0 %v4491_v53  ;;  %1571 = vmatpush.msra.mxu1 %v4494_v49  ;;  %v6382_v53 = vld [vmem:[#allocation67_spill] sm:$0xff]  ;;  %v6383_v49 = vld [vmem:[#allocation57_spill] sm:$0xff] }
 0x3d4   :  { %1591 = vmatpush.msra.mxu2 %v4497_v13  ;;  %1611 = vmatpush.msra.mxu3 %v6286_v57  ;;  %v206_v13 = vadd.f32 %v6383_v49, %v6382_v53 }
 0x3d5   :  { %1552 = vmatpush.msra.mxu0 %v6287_v25  ;;  %1572 = vmatpush.msra.mxu1 %v6288_v11 }
 0x3d6   :  { %1592 = vmatpush.msra.mxu2 %v6289_v12  ;;  %1612 = vmatpush.msra.mxu3 %v6290_v14 }
 0x3d7   :  { %1553 = vmatpush.msra.mxu0 %v4515_v26  ;;  %1573 = vmatpush.msra.mxu1 %v4518_v46  ;;  %v6361_v26 = vld [vmem:[#allocation29_spill] sm:$0xff]  ;;  %v6384_v46 = vld [vmem:[#allocation68_spill] sm:$0xff] }
 0x3d8   :  { %1593 = vmatpush.msra.mxu2 %v4521_v54  ;;  %1613 = vmatpush.msra.mxu3 %v4524_v48  ;;  %v6385_v54 = vld [vmem:[#allocation58_spill] sm:$0xff] }
 0x3d9   :  { %1554 = vmatpush.msra.mxu0 %v4527_v59  ;;  %1574 = vmatpush.msra.mxu1 %v4530_v60  ;;  %v6366_v60 = vld [vmem:[#allocation32_spill] sm:$0xff]  ;;  %v247_v48 = vadd.f32 %v6385_v54, %v6384_v46 }
 0x3da   :  { %1594 = vmatpush.msra.mxu2 %v6356_v63  ;;  %1614 = vmatpush.msra.mxu3 %v6357_v52 }
 0x3db   :  { %1555 = vmatpush.msra.mxu0 %v6358_v62  ;;  %1575 = vmatpush.msra.mxu1 %v6359_v51 }
 0x3dc   :  { %1595 = vmatpush.msra.mxu2 %v6360_v30  ;;  %1615 = vmatpush.msra.mxu3 %v6361_v26 }
 0x3dd   :  { %1556 = vmatpush.msra.mxu0 %v6362_v31  ;;  %1576 = vmatpush.msra.mxu1 %v6363_v33 }
 0x3de   :  { %1596 = vmatpush.msra.mxu2 %v6364_v34  ;;  %1616 = vmatpush.msra.mxu3 %v6365_v35 }
 0x3df   :  { %1557 = vmatpush.msra.mxu0 %v6366_v60  ;;  %1577 = vmatpush.msra.mxu1 %v6367_v36 }
 0x3e0   :  { %1597 = vmatpush.msra.mxu2 %v6368_v37  ;;  %1617 = vmatpush.msra.mxu3 %v6369_v38 }
 0x3e1   :  { %1558 = vmatpush.msra.mxu0 %v6370_v40  ;;  %1578 = vmatpush.msra.mxu1 %v6371_v41 }
 0x3e2   :  { %1598 = vmatpush.msra.mxu2 %v6372_v43  ;;  %1618 = vmatpush.msra.mxu3 %v6373_v44 }
 0x3e3   :  { %1559 = vmatpush.msra.mxu0 %v6374_v45  ;;  %1579 = vmatpush.msra.mxu1 %v6375_v47 }
 0x3e4   :  { %1599 = vmatpush.msra.mxu2 %v6376_v55  ;;  %1619 = vmatpush.msra.mxu3 %v6377_v58 }
 0x3e5   :  { %1560 = vmatpush.msra.mxu0 %v6378_v39  ;;  %1580 = vmatpush.msra.mxu1 %v6379_v50 }
 0x3e6   :  { %1600 = vmatpush.msra.mxu2 %v6380_v56  ;;  %1620 = vmatpush.msra.mxu3 %v6381_v61 }
 0x442   :  { %v1246_v59 = vpop.f32.mrf.mxu0  ;;  %v1266_v57 = vpop.f32.mrf.mxu1 }
 0x443   :  { %v1309_v25 = vadd.f32 %v1246_v59, %v206_v13  ;;  %v1310_v11 = vadd.f32 %v1266_v57, %v247_v48  ;;  %v1770_v48 = vld [vmem:[#allocation10 + $0x1e8] sm:$0xff]  ;;  %v1771_v59 = vld [vmem:[#allocation10 + $0x1f0] sm:$0xff]  ;;  %v1772_v57 = vld [vmem:[#allocation10 + $0x1f8] sm:$0xff] }
 0x445   :  { %v3317_v12 = vmul.f32 -1.442695, %v1309_v25  ;;  %v3318_v14 = vmul.f32 -1.442695, %v1310_v11  ;;  %v1765_v25 = vld [vmem:[#allocation10 + $0x1c0] sm:$0xff]  ;;  %v1766_v11 = vld [vmem:[#allocation10 + $0x1c8] sm:$0xff] }
 0x447   :  { %3439 = vpow2.f32 %v3317_v12  ;;  %v1767_v12 = vld [vmem:[#allocation10 + $0x1d0] sm:$0xff] }
 0x448   :  { %3441 = vpow2.f32 %v3318_v14  ;;  %v1768_v14 = vld [vmem:[#allocation10 + $0x1d8] sm:$0xff] }
 0x449   :  { %v1306_v15 = vpop.f32.mrf.mxu3  ;;  %v1286_v42 = vpop.f32.mrf.mxu2 }
 0x44a   :  { %v1312_v16 = vadd.f32 %v1306_v15, %v329_v19  ;;  %v1311_v8 = vadd.f32 %v1286_v42, %v288_v4  ;;  %v1762_v19 = vld [vmem:[#allocation10 + $0x1a8] sm:$0xff]  ;;  %v1763_v15 = vld [vmem:[#allocation10 + $0x1b0] sm:$0xff]  ;;  %v209_v4 = vadd.f32 %v6390_v1, %v6382_v53 }
 0x44b   :  { %v1754_v42 = vld [vmem:[#allocation10 + $0x168] sm:$0xff] }
 0x44c   :  { %v3319_v6 = vmul.f32 -1.442695, %v1312_v16  ;;  %v1764_v16 = vld [vmem:[#allocation10 + $0x1b8] sm:$0xff] }
 0x44d   :  { %v3440_v5 = vpop.eup %3439 }
 0x44e   :  { %v3442_v3 = vpop.eup %3441  ;;  %v1317_v24 = vadd.f32 1.0, %v3440_v5  ;;  %3443 = vpow2.f32 %v3319_v6  ;;  %v1757_v6 = vld [vmem:[#allocation10 + $0x180] sm:$0xff]  ;;  %v1758_v5 = vld [vmem:[#allocation10 + $0x188] sm:$0xff] }
 0x44f   :  { %v1336_v7 = vadd.f32 1.0, %v3442_v3  ;;  %v1759_v3 = vld [vmem:[#allocation10 + $0x190] sm:$0xff] }
 0x450   :  { %3445 = vrcp.f32 %v1317_v24  ;;  %v1329_v27 = vand.u32 2147483648, %v1317_v24  ;;  %v1327_v62 = vand.u32 2147483647, %v1317_v24  ;;  %vm1323_vm14 = vweird.f32 %v1317_v24 }
 0x451   :  { %3447 = vrcp.f32 %v1336_v7  ;;  %v1348_v63 = vand.u32 2147483648, %v1336_v7  ;;  %v1346_v30 = vand.u32 2147483647, %v1336_v7  ;;  %vm1342_vm15 = vweird.f32 %v1336_v7 }
 0x452   :  { %v1330_v33 = vor.u32 1.1754944e-38, %v1329_v27  ;;  %vm1328_vm2 = vcmp.eq.f32.partialorder %v1327_v62, 8.507059e+37  ;;  %v1745_v62 = vld [vmem:[#allocation10 + $0x120] sm:$0xff] }
 0x453   :  { %v1349_v60 = vor.u32 1.1754944e-38, %v1348_v63  ;;  %vm1347_vm3 = vcmp.eq.f32.partialorder %v1346_v30, 8.507059e+37  ;;  %v1747_v30 = vld [vmem:[#allocation10 + $0x130] sm:$0xff] }
 0x454   :  { %v3444_v22 = vpop.eup %3443 }
 0x455   :  { %v1356_v28 = vadd.f32 1.0, %v3444_v22  ;;  %v1755_v22 = vld [vmem:[#allocation10 + $0x170] sm:$0xff] }
 0x456   :  { %v3446_v18 = vpop.eup %3445 }
 0x457   :  { %v3448_v29 = vpop.eup %3447  ;;  %v1319_v32 = vmul.f32 %v3446_v18, %v1317_v24  ;;  %3449 = vrcp.f32 %v1356_v28  ;;  %vm1324_vm12 = vweird.f32 %v3446_v18  ;;  %v1368_v39 = vand.u32 2147483648, %v1356_v28  ;;  %v1760_v24 = vld [vmem:[#allocation10 + $0x198] sm:$0xff] }
 0x458   :  { %v1338_v20 = vmul.f32 %v3448_v29, %v1336_v7  ;;  %3451 = vtanh.f32 %v1311_v8  ;;  %vm1343_vm13 = vweird.f32 %v3448_v29  ;;  %vm1325_vm0 = vmor %vm1323_vm14, %vm1324_vm12  ;;  %vm1362_vm5 = vweird.f32 %v1356_v28  ;;  %v1753_v7 = vld [vmem:[#allocation10 + $0x160] sm:$0xff]  ;;  %v1756_v8 = vld [vmem:[#allocation10 + $0x178] sm:$0xff] }
 0x459   :  { %v1320_v2 = vsub.f32 1.0, %v1319_v32  ;;  %vm1344_vm1 = vmor %vm1342_vm15, %vm1343_vm13  ;;  %v1366_v50 = vand.u32 2147483647, %v1356_v28  ;;  %v1369_v61 = vor.u32 1.1754944e-38, %v1368_v39  ;;  %v1734_v39 = vld [vmem:[#allocation10 + $0xc8] sm:$0xff] }
 0x45a   :  { %v1339_v17 = vsub.f32 1.0, %v1338_v20  ;;  %v1749_v20 = vld [vmem:[#allocation10 + $0x140] sm:$0xff] }
 0x45b   :  { %v1321_v52 = vmul.f32 %v3446_v18, %v1320_v2  ;;  %vm1367_vm7 = vcmp.eq.f32.partialorder %v1366_v50, 8.507059e+37  ;;  %v1750_v2 = vld [vmem:[#allocation10 + $0x148] sm:$0xff]  ;;  %v1735_v50 = vld [vmem:[#allocation10 + $0xd0] sm:$0xff] }
 0x45c   :  { %v1340_v51 = vmul.f32 %v3448_v29, %v1339_v17  ;;  %v1751_v17 = vld [vmem:[#allocation10 + $0x150] sm:$0xff] }
 0x45d   :  { %v3450_v26 = vpop.eup %3449  ;;  %v1322_v31 = vadd.f32 %v3446_v18, %v1321_v52  ;;  %v1752_v52 = vld [vmem:[#allocation10 + $0x158] sm:$0xff] }
 0x45e   :  { %v1341_v34 = vadd.f32 %v3448_v29, %v1340_v51  ;;  %v1358_v35 = vmul.f32 %v3450_v26, %v1356_v28  ;;  %v3452_v37 = vpop.eup %3451  ;;  %vm1363_vm4 = vweird.f32 %v3450_v26  ;;  %v6391_v28 = vld [vmem:[#allocation62_spill] sm:$0xff]  ;;  %v1746_v51 = vld [vmem:[#allocation10 + $0x128] sm:$0xff] }
 0x45f   :  { %v1326_v36 = vsel %vm1325_vm0, %v3446_v18, %v1322_v31  ;;  %vm1364_vm6 = vmor %vm1362_vm5, %vm1363_vm4  ;;  %v250_v18 = vadd.f32 %v6391_v28, %v6384_v46  ;;  %v1715_v28 = vld [vmem:[#allocation10 + $0x30] sm:$0xff] }
 0x460   :  { %v1331_v38 = vsel %vm1328_vm2, %v1330_v33, %v1326_v36  ;;  %v1345_v40 = vsel %vm1344_vm1, %v3448_v29, %v1341_v34  ;;  %v1359_v41 = vsub.f32 1.0, %v1358_v35  ;;  %v1748_v33 = vld [vmem:[#allocation10 + $0x138] sm:$0xff]  ;;  %v1741_v34 = vld [vmem:[#allocation10 + $0x100] sm:$0xff]  ;;  %v1742_v35 = vld [vmem:[#allocation10 + $0x108] sm:$0xff] }
 0x461   :  { %v1350_v43 = vsel %vm1347_vm3, %v1349_v60, %v1345_v40  ;;  %v1373_v44 = vmul.f32 %v3452_v37, %v1331_v38  ;;  %v1743_v60 = vld [vmem:[#allocation10 + $0x110] sm:$0xff]  ;;  %v1744_v36 = vld [vmem:[#allocation10 + $0x118] sm:$0xff]  ;;  %v6392_v37 = vld [vmem:[#allocation64_spill] sm:$0xff] }
 0x462   :  { %v1372_v45 = vmul.f32 %v1350_v43, %v4784_v21  ;;  %v1360_v47 = vmul.f32 %v3450_v26, %v1359_v41  ;;  %v1769_v21 = vld [vmem:[#allocation10 + $0x1e0] sm:$0xff]  ;;  %v332_v38 = vadd.f32 %v6392_v37, %v6386_v10  ;;  %v1738_v41 = vld [vmem:[#allocation10 + $0xe8] sm:$0xff]  ;;  %v1739_v43 = vld [vmem:[#allocation10 + $0xf0] sm:$0xff] }
 0x463   :  { %v1737_v40 = vld [vmem:[#allocation10 + $0xe0] sm:$0xff] }
 0x464   :  { %v4866_v55 = vadd.f32 %v1373_v44, %v1372_v45  ;;  %v1361_v58 = vadd.f32 %v3450_v26, %v1360_v47  ;;  %v1740_v45 = vld [vmem:[#allocation10 + $0xf8] sm:$0xff] }
 0x466   :  { %3453 = vtanh.f32 %v4866_v55  ;;  %v1365_v56 = vsel %vm1364_vm6, %v3450_v26, %v1361_v58  ;;  %v1733_v58 = vld [vmem:[#allocation10 + $0xc0] sm:$0xff] }
 0x467   :  { %v1370_v13 = vsel %vm1367_vm7, %v1369_v61, %v1365_v56  ;;  %v1736_v56 = vld [vmem:[#allocation10 + $0xd8] sm:$0xff] }
 0x46c   :  { %v3454_v49 = vpop.eup %3453 }
 0x46d   :  { %v4869_v54 = vmul.f32 %v3454_v49, %v1370_v13  ;;  %v1729_v49 = vld [vmem:[#allocation10 + $0xa0] sm:$0xff]  ;;  %v1730_v13 = vld [vmem:[#allocation10 + $0xa8] sm:$0xff] }
 0x46f   :  { %1403 = vmatmul.f32.vlgmr.msrb.gmra.mxu0 %v4869_v54  ;;  %1423 = vmatmul.f32.vlgmr.msrb.gmra.mxu1 %v4869_v54 }
 0x470   :  { %1443 = vmatmul.f32.vlgmr.msrb.gmra.mxu2 %v4869_v54  ;;  %1463 = vmatmul.f32.vlgmr.msrb.gmra.mxu3 %v4869_v54 }
 0x471   :  { %1783 = vmatpush.msrb.mxu0 %v1769_v21  ;;  %1824 = vmatpush.msrb.mxu1 %v1770_v48  ;;  %v1731_v21 = vld [vmem:[#allocation10 + $0xb0] sm:$0xff] }
 0x472   :  { %1865 = vmatpush.msrb.mxu2 %v1771_v59  ;;  %1906 = vmatpush.msrb.mxu3 %v1772_v57  ;;  %v1732_v59 = vld [vmem:[#allocation10 + $0xb8] sm:$0xff]  ;;  %v1725_v57 = vld [vmem:[#allocation10 + $0x80] sm:$0xff] }
 0x473   :  { %1784 = vmatpush.msrb.mxu0 %v1765_v25  ;;  %1825 = vmatpush.msrb.mxu1 %v1766_v11  ;;  %v1726_v25 = vld [vmem:[#allocation10 + $0x88] sm:$0xff] }
 0x474   :  { %1866 = vmatpush.msrb.mxu2 %v1767_v12  ;;  %1907 = vmatpush.msrb.mxu3 %v1768_v14  ;;  %v1727_v14 = vld [vmem:[#allocation10 + $0x90] sm:$0xff] }
 0x475   :  { %1785 = vmatpush.msrb.mxu0 %v1761_v0  ;;  %1826 = vmatpush.msrb.mxu1 %v1762_v19  ;;  %v1728_v0 = vld [vmem:[#allocation10 + $0x98] sm:$0xff] }
 0x476   :  { %1867 = vmatpush.msrb.mxu2 %v1763_v15  ;;  %1908 = vmatpush.msrb.mxu3 %v1764_v16  ;;  %v1721_v15 = vld [vmem:[#allocation10 + $0x60] sm:$0xff]  ;;  %v1722_v16 = vld [vmem:[#allocation10 + $0x68] sm:$0xff] }
 0x477   :  { %1786 = vmatpush.msrb.mxu0 %v1757_v6  ;;  %1827 = vmatpush.msrb.mxu1 %v1758_v5  ;;  %v1723_v6 = vld [vmem:[#allocation10 + $0x70] sm:$0xff]  ;;  %v1724_v5 = vld [vmem:[#allocation10 + $0x78] sm:$0xff] }
 0x478   :  { %1868 = vmatpush.msrb.mxu2 %v1759_v3  ;;  %1909 = vmatpush.msrb.mxu3 %v1760_v24  ;;  %v1717_v3 = vld [vmem:[#allocation10 + $0x40] sm:$0xff]  ;;  %v1718_v24 = vld [vmem:[#allocation10 + $0x48] sm:$0xff] }
 0x479   :  { %1787 = vmatpush.msrb.mxu0 %v1753_v7  ;;  %1828 = vmatpush.msrb.mxu1 %v1754_v42  ;;  %v1719_v7 = vld [vmem:[#allocation10 + $0x50] sm:$0xff]  ;;  %v1720_v42 = vld [vmem:[#allocation10 + $0x58] sm:$0xff] }
 0x47a   :  { %1869 = vmatpush.msrb.mxu2 %v1755_v22  ;;  %1910 = vmatpush.msrb.mxu3 %v1756_v8  ;;  %v1713_v22 = vld [vmem:[#allocation10 + $0x20] sm:$0xff] }
 0x47b   :  { %1788 = vmatpush.msrb.mxu0 %v1749_v20  ;;  %1829 = vmatpush.msrb.mxu1 %v1750_v2  ;;  %v1709_v20 = vld [vmem:[#allocation10] sm:$0xff]  ;;  %v1710_v2 = vld [vmem:[#allocation10 + $0x8] sm:$0xff] }
 0x47c   :  { %1870 = vmatpush.msrb.mxu2 %v1751_v17  ;;  %1911 = vmatpush.msrb.mxu3 %v1752_v52 }
 0x47d   :  { %1789 = vmatpush.msrb.mxu0 %v1745_v62  ;;  %1830 = vmatpush.msrb.mxu1 %v1746_v51 }
 0x47e   :  { %1871 = vmatpush.msrb.mxu2 %v1747_v30  ;;  %1912 = vmatpush.msrb.mxu3 %v1748_v33 }
 0x47f   :  { %1790 = vmatpush.msrb.mxu0 %v1741_v34  ;;  %1831 = vmatpush.msrb.mxu1 %v1742_v35 }
 0x480   :  { %1872 = vmatpush.msrb.mxu2 %v1743_v60  ;;  %1913 = vmatpush.msrb.mxu3 %v1744_v36 }
 0x481   :  { %1791 = vmatpush.msrb.mxu0 %v1737_v40  ;;  %1832 = vmatpush.msrb.mxu1 %v1738_v41 }
 0x482   :  { %1873 = vmatpush.msrb.mxu2 %v1739_v43  ;;  %1914 = vmatpush.msrb.mxu3 %v1740_v45 }
 0x483   :  { %1792 = vmatpush.msrb.mxu0 %v1733_v58  ;;  %1833 = vmatpush.msrb.mxu1 %v1734_v39 }
 0x484   :  { %1874 = vmatpush.msrb.mxu2 %v1735_v50  ;;  %1915 = vmatpush.msrb.mxu3 %v1736_v56 }
 0x485   :  { %1793 = vmatpush.msrb.mxu0 %v1729_v49  ;;  %1834 = vmatpush.msrb.mxu1 %v1730_v13 }
 0x486   :  { %1875 = vmatpush.msrb.mxu2 %v1731_v21  ;;  %1916 = vmatpush.msrb.mxu3 %v1732_v59 }
 0x487   :  { %1794 = vmatpush.msrb.mxu0 %v1725_v57  ;;  %1835 = vmatpush.msrb.mxu1 %v1726_v25 }
 0x488   :  { %1876 = vmatpush.msrb.mxu2 %v1727_v14  ;;  %1917 = vmatpush.msrb.mxu3 %v1728_v0 }
 0x489   :  { %1795 = vmatpush.msrb.mxu0 %v1721_v15  ;;  %1836 = vmatpush.msrb.mxu1 %v1722_v16  ;;  %v6395_v16 = vld [vmem:[#allocation17_spill] sm:$0xff] }
 0x48a   :  { %1877 = vmatpush.msrb.mxu2 %v1723_v6  ;;  %1918 = vmatpush.msrb.mxu3 %v1724_v5  ;;  %v6396_v6 = vld [vmem:[#allocation22_spill] sm:$0xff]  ;;  %v4913_v5 = vld [vmem:[#allocation11 + $0x1e0] sm:$0xff] }
 0x48b   :  { %1796 = vmatpush.msrb.mxu0 %v1717_v3  ;;  %1837 = vmatpush.msrb.mxu1 %v1718_v24  ;;  %v4915_v3 = vld [vmem:[#allocation11 + $0x1e8] sm:$0xff]  ;;  %v4917_v24 = vld [vmem:[#allocation11 + $0x1c0] sm:$0xff] }
 0x48c   :  { %1878 = vmatpush.msrb.mxu2 %v1719_v7  ;;  %1919 = vmatpush.msrb.mxu3 %v1720_v42  ;;  %v4921_v7 = vld [vmem:[#allocation11 + $0x1c8] sm:$0xff]  ;;  %v4923_v42 = vld [vmem:[#allocation11 + $0x1f8] sm:$0xff] }
 0x48d   :  { %1797 = vmatpush.msrb.mxu0 %v1713_v22  ;;  %6397 = vst [vmem:[#allocation16_spill] sm:$0xff] %v4921_v7  ;;  %v4926_v22 = vld [vmem:[#allocation11 + $0x1a0] sm:$0xff] }
 0x48e   :  { %1879 = vmatpush.msrb.mxu2 %v1715_v28  ;;  %6398 = vst [vmem:[#allocation18_spill] sm:$0xff] %v4923_v42  ;;  %v6401_v28 = vld [vmem:[#allocation48_spill] sm:$0xff] }
 0x48f   :  { %1798 = vmatpush.msrb.mxu0 %v1709_v20  ;;  %6399 = vst [vmem:[#allocation19_spill] sm:$0xff] %v4926_v22  ;;  %v4966_v20 = vld [vmem:[#allocation11 + $0x168] sm:$0xff] }
 0x4ec   :  { %v1404_v29 = vpop.f32.mrf.mxu0  ;;  %v1424_v32 = vpop.f32.mrf.mxu1 }
 0x4ed   :  { %v1467_v27 = vadd.f32 %v1404_v29, %v209_v4  ;;  %v1468_v63 = vadd.f32 %v1424_v32, %v250_v18  ;;  %v1714_v4 = vld [vmem:[#allocation10 + $0x28] sm:$0xff]  ;;  %v1716_v18 = vld [vmem:[#allocation10 + $0x38] sm:$0xff] }
 0x4ee   :  { %v6393_v29 = vld [vmem:[#allocation69_spill] sm:$0xff]  ;;  %1838 = vmatpush.msrb.mxu1 %v1714_v4  ;;  %1920 = vmatpush.msrb.mxu3 %v1716_v18  ;;  %v4930_v4 = vld [vmem:[#allocation11 + $0x1d8] sm:$0xff]  ;;  %v4949_v18 = vld [vmem:[#allocation11 + $0x1f0] sm:$0xff] }
 0x4ef   :  { %v3320_v26 = vmul.f32 -1.442695, %v1467_v27  ;;  %v3321_v31 = vmul.f32 -1.442695, %v1468_v63  ;;  %v291_v32 = vadd.f32 %v6393_v29, %v6388_v9  ;;  %v1711_v27 = vld [vmem:[#allocation10 + $0x10] sm:$0xff]  ;;  %v1712_v63 = vld [vmem:[#allocation10 + $0x18] sm:$0xff] }
 0x4f0   :  { %1839 = vmatpush.msrb.mxu1 %v1710_v2  ;;  %1880 = vmatpush.msrb.mxu2 %v1711_v27  ;;  %v4954_v29 = vld [vmem:[#allocation11 + $0x1b8] sm:$0xff]  ;;  %v4974_v27 = vld [vmem:[#allocation11 + $0x190] sm:$0xff] }
 0x4f1   :  { %3455 = vpow2.f32 %v3320_v26  ;;  %1921 = vmatpush.msrb.mxu3 %v1712_v63  ;;  %6402 = vst [vmem:[#allocation20_spill] sm:$0xff] %v4954_v29  ;;  %v4968_v2 = vld [vmem:[#allocation11 + $0x198] sm:$0xff] }
 0x4f2   :  { %3457 = vpow2.f32 %v3321_v31  ;;  %v4978_v63 = vld [vmem:[#allocation11 + $0x178] sm:$0xff] }
 0x4f3   :  { %v1464_v44 = vpop.f32.mrf.mxu3  ;;  %v1444_v1 = vpop.f32.mrf.mxu2 }
 0x4f4   :  { %v1470_v47 = vadd.f32 %v1464_v44, %v332_v38  ;;  %v1469_v62 = vadd.f32 %v1444_v1, %v291_v32  ;;  %v4928_v1 = vld [vmem:[#allocation11 + $0x1a8] sm:$0xff] }
 0x4f5   :  { %6400 = vst [vmem:[#allocation21_spill] sm:$0xff] %v4928_v1  ;;  %v4959_v32 = vld [vmem:[#allocation11 + $0x188] sm:$0xff] }
 0x4f6   :  { %v3322_v61 = vmul.f32 -1.442695, %v1470_v47 }
 0x4f7   :  { %v3456_v48 = vpop.eup %3455 }
 0x4f8   :  { %v3458_v11 = vpop.eup %3457  ;;  %v4881_v12 = vadd.f32 1.0, %v3456_v48  ;;  %3459 = vpow2.f32 %v3322_v61 }
 0x4f9   :  { %v4883_v19 = vadd.f32 1.0, %v3458_v11 }
 0x4fa   :  { %3461 = vrcp.f32 %v4881_v12  ;;  %v1487_v34 = vand.u32 2147483648, %v4881_v12  ;;  %v1485_v36 = vand.u32 2147483647, %v4881_v12  ;;  %vm1481_vm10 = vweird.f32 %v4881_v12 }
 0x4fb   :  { %3463 = vrcp.f32 %v4883_v19  ;;  %v1506_v35 = vand.u32 2147483648, %v4883_v19  ;;  %v1504_v38 = vand.u32 2147483647, %v4883_v19  ;;  %vm1500_vm11 = vweird.f32 %v4883_v19 }
 0x4fc   :  { %v1488_v43 = vor.u32 1.1754944e-38, %v1487_v34  ;;  %vm1486_vm14 = vcmp.eq.f32.partialorder %v1485_v36, 8.507059e+37  ;;  %v4988_v34 = vld [vmem:[#allocation11 + $0x140] sm:$0xff] }
 0x4fd   :  { %v1507_v47 = vor.u32 1.1754944e-38, %v1506_v35  ;;  %vm1505_vm15 = vcmp.eq.f32.partialorder %v1504_v38, 8.507059e+37  ;;  %v4990_v35 = vld [vmem:[#allocation11 + $0x148] sm:$0xff] }
 0x4fe   :  { %v3460_v8 = vpop.eup %3459  ;;  %v5001_v38 = vld [vmem:[#allocation11 + $0x128] sm:$0xff] }
 0x4ff   :  { %v1514_v17 = vadd.f32 1.0, %v3460_v8  ;;  %v4952_v8 = vld [vmem:[#allocation11 + $0x1d0] sm:$0xff] }
 0x500   :  { %v3462_v52 = vpop.eup %3461 }
 0x501   :  { %v3464_v51 = vpop.eup %3463  ;;  %v1477_v30 = vmul.f32 %v3462_v52, %v4881_v12  ;;  %3465 = vrcp.f32 %v1514_v17  ;;  %vm1482_vm8 = vweird.f32 %v3462_v52  ;;  %v1526_v25 = vand.u32 2147483648, %v1514_v17 }
 0x502   :  { %v1496_v26 = vmul.f32 %v3464_v51, %v4883_v19  ;;  %3467 = vtanh.f32 %v1469_v62  ;;  %vm1501_vm9 = vweird.f32 %v3464_v51  ;;  %vm1483_vm12 = vmor %vm1481_vm10, %vm1482_vm8  ;;  %vm1520_vm1 = vweird.f32 %v1514_v17  ;;  %v6403_v62 = vld [vmem:[#allocation65_spill] sm:$0xff] }
 0x503   :  { %v1478_v31 = vsub.f32 1.0, %v1477_v30  ;;  %vm1502_vm13 = vmor %vm1500_vm11, %vm1501_vm9  ;;  %v1524_v11 = vand.u32 2147483647, %v1514_v17  ;;  %v1527_v14 = vor.u32 1.1754944e-38, %v1526_v25  ;;  %v6404_v30 = vld [vmem:[#allocation66_spill] sm:$0xff] }
 0x504   :  { %v1497_v33 = vsub.f32 1.0, %v1496_v26  ;;  %v253_v26 = vadd.f32 %v6404_v30, %v6384_v46  ;;  %v4999_v46 = vld [vmem:[#allocation11 + $0x120] sm:$0xff]  ;;  %v5038_v25 = vld [vmem:[#allocation11 + $0x110] sm:$0xff] }
 0x505   :  { %v1479_v60 = vmul.f32 %v3462_v52, %v1478_v31  ;;  %vm1525_vm3 = vcmp.eq.f32.partialorder %v1524_v11, 8.507059e+37 }
 0x506   :  { %v1498_v37 = vmul.f32 %v3464_v51, %v1497_v33 }
 0x507   :  { %v3466_v40 = vpop.eup %3465  ;;  %v1480_v41 = vadd.f32 %v3462_v52, %v1479_v60  ;;  %v4992_v60 = vld [vmem:[#allocation11 + $0x158] sm:$0xff] }
 0x508   :  { %v1499_v44 = vadd.f32 %v3464_v51, %v1498_v37  ;;  %v1516_v45 = vmul.f32 %v3466_v40, %v1514_v17  ;;  %v3468_v39 = vpop.eup %3467  ;;  %vm1521_vm0 = vweird.f32 %v3466_v40  ;;  %v4970_v17 = vld [vmem:[#allocation11 + $0x1b0] sm:$0xff] }
 0x509   :  { %v1484_v58 = vsel %vm1483_vm12, %v3462_v52, %v1480_v41  ;;  %vm1522_vm2 = vmor %vm1520_vm1, %vm1521_vm0  ;;  %v4981_v52 = vld [vmem:[#allocation11 + $0x170] sm:$0xff] }
 0x50a   :  { %v1489_v50 = vsel %vm1486_vm14, %v1488_v43, %v1484_v58  ;;  %v1503_v56 = vsel %vm1502_vm13, %v3464_v51, %v1499_v44  ;;  %v1517_v61 = vsub.f32 1.0, %v1516_v45  ;;  %v212_v51 = vadd.f32 %v6403_v62, %v6382_v53  ;;  %v4997_v53 = vld [vmem:[#allocation11 + $0x150] sm:$0xff]  ;;  %v5011_v45 = vld [vmem:[#allocation11 + $0x100] sm:$0xff] }
 0x50b   :  { %v1508_v49 = vsel %vm1505_vm15, %v1507_v47, %v1503_v56  ;;  %v1531_v13 = vmul.f32 %v3468_v39, %v1489_v50  ;;  %v5009_v44 = vld [vmem:[#allocation11 + $0x130] sm:$0xff]  ;;  %v5013_v47 = vld [vmem:[#allocation11 + $0x108] sm:$0xff]  ;;  %v5016_v58 = vld [vmem:[#allocation11 + $0xe0] sm:$0xff] }
 0x50c   :  { %v1530_v21 = vmul.f32 %v1508_v49, %v4866_v55  ;;  %v1518_v48 = vmul.f32 %v3466_v40, %v1517_v61  ;;  %v6394_v55 = vld [vmem:[#allocation74_spill] sm:$0xff]  ;;  %v5021_v39 = vld [vmem:[#allocation11 + $0xe8] sm:$0xff]  ;;  %v5023_v50 = vld [vmem:[#allocation11 + $0x118] sm:$0xff] }
 0x50d   :  { %v6405_v56 = vld [vmem:[#allocation70_spill] sm:$0xff]  ;;  %v5028_v49 = vld [vmem:[#allocation11 + $0xc0] sm:$0xff] }
 0x50e   :  { %v4898_v59 = vadd.f32 %v1531_v13, %v1530_v21  ;;  %v1519_v57 = vadd.f32 %v3466_v40, %v1518_v48  ;;  %v335_v61 = vadd.f32 %v6405_v56, %v6386_v10  ;;  %v5030_v13 = vld [vmem:[#allocation11 + $0xc8] sm:$0xff]  ;;  %v5032_v21 = vld [vmem:[#allocation11 + $0xf8] sm:$0xff]  ;;  %v5041_v10 = vld [vmem:[#allocation11 + $0xa0] sm:$0xff] }
 0x50f   :  { %6407 = vst [vmem:[#allocation51_spill] sm:$0xff] %v5041_v10  ;;  %v5064_v62 = vld [vmem:[#allocation11 + $0xb0] sm:$0xff] }
 0x510   :  { %3469 = vtanh.f32 %v4898_v59  ;;  %v1523_v12 = vsel %vm1522_vm2, %v3466_v40, %v1519_v57  ;;  %v5004_v40 = vld [vmem:[#allocation11 + $0x138] sm:$0xff]  ;;  %6414 = vst [vmem:[#allocation23_spill] sm:$0xff] %v5064_v62  ;;  %v5092_v56 = vld [vmem:[#allocation11 + $0x70] sm:$0xff] }
 0x511   :  { %v1528_v19 = vsel %vm1525_vm3, %v1527_v14, %v1523_v12  ;;  %v5036_v57 = vld [vmem:[#allocation11 + $0xd8] sm:$0xff]  ;;  %v5043_v12 = vld [vmem:[#allocation11 + $0xa8] sm:$0xff]  ;;  %6421 = vst [vmem:[#allocation30_spill] sm:$0xff] %v5092_v56 }
 0x512   :  { %6406 = vst [vmem:[#allocation50_spill] sm:$0xff] %v5036_v57  ;;  %v5048_v14 = vld [vmem:[#allocation11 + $0xb8] sm:$0xff] }
 0x513   :  { %6408 = vst [vmem:[#allocation53_spill] sm:$0xff] %v5043_v12 }
 0x514   :  { %6409 = vst [vmem:[#allocation52_spill] sm:$0xff] %v5048_v14 }
 0x516   :  { %v3470_v0 = vpop.eup %3469 }
 0x517   :  { %v1534_v15 = vmul.f32 %v3470_v0, %v1528_v19  ;;  %v5050_v0 = vld [vmem:[#allocation11 + $0xf0] sm:$0xff] }
 0x519   :  { %1561 = vmatmul.f32.vlgmr.msra.gmra.mxu0 %v1534_v15  ;;  %1581 = vmatmul.f32.vlgmr.msra.gmra.mxu1 %v1534_v15 }
 0x51a   :  { %1601 = vmatmul.f32.vlgmr.msra.gmra.mxu2 %v1534_v15  ;;  %1621 = vmatmul.f32.vlgmr.msra.gmra.mxu3 %v1534_v15 }
 0x51b   :  { %2050 = vmatpush.msra.mxu0 %v4913_v5  ;;  %2070 = vmatpush.msra.mxu1 %v4915_v3 }
 0x51c   :  { %2110 = vmatpush.msra.mxu3 %v4923_v42  ;;  %2090 = vmatpush.msra.mxu2 %v4949_v18 }
 0x51d   :  { %2051 = vmatpush.msra.mxu0 %v4917_v24  ;;  %2071 = vmatpush.msra.mxu1 %v4921_v7 }
 0x51e   :  { %2111 = vmatpush.msra.mxu3 %v4930_v4  ;;  %2091 = vmatpush.msra.mxu2 %v4952_v8 }
 0x51f   :  { %2052 = vmatpush.msra.mxu0 %v4926_v22  ;;  %2072 = vmatpush.msra.mxu1 %v4928_v1 }
 0x520   :  { %2112 = vmatpush.msra.mxu3 %v4954_v29  ;;  %2092 = vmatpush.msra.mxu2 %v4970_v17 }
 0x521   :  { %1799 = vmatmul.f32.vlgmr.msrb.gmra.mxu0 %v6394_v55  ;;  %1840 = vmatmul.f32.vlgmr.msrb.gmra.mxu1 %v6394_v55 }
 0x522   :  { %1881 = vmatmul.f32.vlgmr.msrb.gmra.mxu2 %v6394_v55  ;;  %1922 = vmatmul.f32.vlgmr.msrb.gmra.mxu3 %v6394_v55  ;;  %v5055_v55 = vld [vmem:[#allocation11 + $0x88] sm:$0xff] }
 0x523   :  { %2073 = vmatpush.msra.mxu1 %v4959_v32  ;;  %2113 = vmatpush.msra.mxu3 %v4968_v2  ;;  %6411 = vst [vmem:[#allocation55_spill] sm:$0xff] %v5055_v55 }
 0x524   :  { %2093 = vmatpush.msra.mxu2 %v4974_v27 }
 0x525   :  { %2074 = vmatpush.msra.mxu1 %v4966_v20  ;;  %2114 = vmatpush.msra.mxu3 %v4978_v63 }
 0x526   :  { %2094 = vmatpush.msra.mxu2 %v4981_v52 }
 0x527   :  { %2075 = vmatpush.msra.mxu1 %v4990_v35  ;;  %2115 = vmatpush.msra.mxu3 %v4992_v60 }
 0x528   :  { %2095 = vmatpush.msra.mxu2 %v4997_v53 }
 0x529   :  { %1802 = vmatmul.f32.gmra.mxu0 %v6395_v16  ;;  %1843 = vmatmul.f32.gmra.mxu1 %v6395_v16 }
 0x52a   :  { %1884 = vmatmul.f32.gmra.mxu2 %v6395_v16  ;;  %1925 = vmatmul.f32.gmra.mxu3 %v6395_v16  ;;  %v5058_v16 = vld [vmem:[#allocation11 + $0xd0] sm:$0xff] }
 0x52b   :  { %2076 = vmatpush.msra.mxu1 %v5001_v38  ;;  %2116 = vmatpush.msra.mxu3 %v5004_v40  ;;  %6412 = vst [vmem:[#allocation56_spill] sm:$0xff] %v5058_v16 }
 0x52c   :  { %2096 = vmatpush.msra.mxu2 %v5009_v44 }
 0x52d   :  { %2077 = vmatpush.msra.mxu1 %v5013_v47  ;;  %2117 = vmatpush.msra.mxu3 %v5023_v50 }
 0x52e   :  { %2097 = vmatpush.msra.mxu2 %v5038_v25 }
 0x52f   :  { %2078 = vmatpush.msra.mxu1 %v5021_v39  ;;  %2118 = vmatpush.msra.mxu3 %v5032_v21 }
 0x530   :  { %2098 = vmatpush.msra.mxu2 %v5050_v0 }
 0x531   :  { %1805 = vmatmul.f32.gmra.mxu0 %v6396_v6  ;;  %1846 = vmatmul.f32.gmra.mxu1 %v6396_v6 }
 0x532   :  { %1887 = vmatmul.f32.gmra.mxu2 %v6396_v6  ;;  %1928 = vmatmul.f32.gmra.mxu3 %v6396_v6 }
 0x533   :  { %2079 = vmatpush.msra.mxu1 %v5030_v13  ;;  %2119 = vmatpush.msra.mxu3 %v5036_v57 }
 0x534   :  { %2099 = vmatpush.msra.mxu2 %v5058_v16 }
 0x535   :  { %2080 = vmatpush.msra.mxu1 %v5043_v12  ;;  %2120 = vmatpush.msra.mxu3 %v5048_v14 }
 0x536   :  { %2100 = vmatpush.msra.mxu2 %v5064_v62 }
 0x537   :  { %2081 = vmatpush.msra.mxu1 %v5055_v55 }
 0x539   :  { %1808 = vmatmul.f32.gmra.mxu0 %v6401_v28  ;;  %1849 = vmatmul.f32.gmra.mxu1 %v6401_v28 }
 0x53a   :  { %1890 = vmatmul.f32.gmra.mxu2 %v6401_v28  ;;  %1931 = vmatmul.f32.gmra.mxu3 %v6401_v28  ;;  %v5062_v28 = vld [vmem:[#allocation11 + $0x98] sm:$0xff] }
 0x53b   :  { %6413 = vst [vmem:[#allocation59_spill] sm:$0xff] %v5062_v28  ;;  %2121 = vmatpush.msra.mxu3 %v5062_v28  ;;  %v5112_v28 = vld [vmem:[#allocation11 + $0x8] sm:$0xff] }
 0x53c   :  { %6428 = vst [vmem:[#allocation36_spill] sm:$0xff] %v5112_v28 }
 0x541   :  { %1811 = vmatmul.f32.gmra.mxu0 %v4787_v23  ;;  %1852 = vmatmul.f32.gmra.mxu1 %v4787_v23 }
 0x542   :  { %1893 = vmatmul.f32.gmra.mxu2 %v4787_v23  ;;  %1934 = vmatmul.f32.gmra.mxu3 %v4787_v23  ;;  %v4957_v23 = vld [vmem:[#allocation11 + $0x180] sm:$0xff] }
 0x543   :  { %2053 = vmatpush.msra.mxu0 %v4957_v23 }
 0x549   :  { %1814 = vmatmul.f32.gmra.mxu0 %v4869_v54  ;;  %1855 = vmatmul.f32.gmra.mxu1 %v4869_v54 }
 0x54a   :  { %1896 = vmatmul.f32.gmra.mxu2 %v4869_v54  ;;  %1937 = vmatmul.f32.gmra.mxu3 %v4869_v54  ;;  %v4962_v54 = vld [vmem:[#allocation11 + $0x160] sm:$0xff] }
 0x54b   :  { %2054 = vmatpush.msra.mxu0 %v4962_v54 }
 0x54d   :  { %2055 = vmatpush.msra.mxu0 %v4988_v34 }
 0x54f   :  { %2056 = vmatpush.msra.mxu0 %v4999_v46 }
 0x551   :  { %1817 = vmatmul.f32.gmra.mxu0 %v1534_v15  ;;  %1858 = vmatmul.f32.gmra.mxu1 %v1534_v15 }
 0x552   :  { %1899 = vmatmul.f32.gmra.mxu2 %v1534_v15  ;;  %1940 = vmatmul.f32.gmra.mxu3 %v1534_v15  ;;  %v5053_v15 = vld [vmem:[#allocation11 + $0x80] sm:$0xff] }
 0x553   :  { %2057 = vmatpush.msra.mxu0 %v5011_v45  ;;  %6410 = vst [vmem:[#allocation54_spill] sm:$0xff] %v5053_v15 }
 0x555   :  { %2058 = vmatpush.msra.mxu0 %v5016_v58 }
 0x557   :  { %2059 = vmatpush.msra.mxu0 %v5028_v49 }
 0x559   :  { %2060 = vmatpush.msra.mxu0 %v5041_v10 }
 0x55b   :  { %2061 = vmatpush.msra.mxu0 %v5053_v15 }
 0x596   :  { %v1562_v31 = vpop.f32.mrf.mxu0  ;;  %v1582_v33 = vpop.f32.mrf.mxu1 }
 0x597   :  { %v1625_v36 = vadd.f32 %v1562_v31, %v212_v51  ;;  %v1626_v37 = vadd.f32 %v1582_v33, %v253_v26  ;;  %v5069_v26 = vld [vmem:[#allocation11 + $0x60] sm:$0xff]  ;;  %v5071_v31 = vld [vmem:[#allocation11 + $0x68] sm:$0xff] }
 0x598   :  { %6415 = vst [vmem:[#allocation25_spill] sm:$0xff] %v5069_v26  ;;  %2062 = vmatpush.msra.mxu0 %v5069_v26  ;;  %2082 = vmatpush.msra.mxu1 %v5071_v31 }
 0x599   :  { %v3323_v41 = vmul.f32 -1.442695, %v1625_v36  ;;  %v3324_v43 = vmul.f32 -1.442695, %v1626_v37  ;;  %6416 = vst [vmem:[#allocation24_spill] sm:$0xff] %v5071_v31  ;;  %v5078_v36 = vld [vmem:[#allocation11 + $0x78] sm:$0xff] }
 0x59a   :  { %6417 = vst [vmem:[#allocation26_spill] sm:$0xff] %v5078_v36  ;;  %v5080_v37 = vld [vmem:[#allocation11 + $0x90] sm:$0xff]  ;;  %2122 = vmatpush.msra.mxu3 %v5078_v36  ;;  %v6426_v31 = vld [vmem:[#allocation72_spill] sm:$0xff] }
 0x59b   :  { %3471 = vpow2.f32 %v3323_v41  ;;  %6418 = vst [vmem:[#allocation27_spill] sm:$0xff] %v5080_v37  ;;  %v5084_v41 = vld [vmem:[#allocation11 + $0x40] sm:$0xff]  ;;  %2101 = vmatpush.msra.mxu2 %v5080_v37  ;;  %v294_v26 = vadd.f32 %v6426_v31, %v6388_v9  ;;  %v5114_v37 = vld [vmem:[#allocation11 + $0x38] sm:$0xff] }
 0x59c   :  { %3473 = vpow2.f32 %v3324_v43  ;;  %6419 = vst [vmem:[#allocation29_spill] sm:$0xff] %v5084_v41  ;;  %v5086_v43 = vld [vmem:[#allocation11 + $0x48] sm:$0xff]  ;;  %2063 = vmatpush.msra.mxu0 %v5084_v41  ;;  %v5110_v36 = vld [vmem:[#allocation11] sm:$0xff]  ;;  %v5122_v41 = vld [vmem:[#allocation11 + $0x18] sm:$0xff] }
 0x59d   :  { %v1622_v48 = vpop.f32.mrf.mxu3  ;;  %6420 = vst [vmem:[#allocation28_spill] sm:$0xff] %v5086_v43  ;;  %2083 = vmatpush.msra.mxu1 %v5086_v43  ;;  %2102 = vmatpush.msra.mxu2 %v5092_v56  ;;  %v5120_v43 = vld [vmem:[#allocation11 + $0x30] sm:$0xff] }
 0x59e   :  { %v1628_v11 = vadd.f32 %v1622_v48, %v335_v61  ;;  %v5094_v61 = vld [vmem:[#allocation11 + $0x58] sm:$0xff]  ;;  %v5098_v48 = vld [vmem:[#allocation11 + $0x20] sm:$0xff]  ;;  %6427 = vst [vmem:[#allocation35_spill] sm:$0xff] %v5110_v36 }
 0x59f   :  { %6422 = vst [vmem:[#allocation31_spill] sm:$0xff] %v5094_v61  ;;  %2123 = vmatpush.msra.mxu3 %v5094_v61  ;;  %2064 = vmatpush.msra.mxu0 %v5098_v48 }
 0x5a0   :  { %v3325_v19 = vmul.f32 -1.442695, %v1628_v11  ;;  %6423 = vst [vmem:[#allocation33_spill] sm:$0xff] %v5098_v48  ;;  %v5100_v11 = vld [vmem:[#allocation11 + $0x28] sm:$0xff] }
 0x5a1   :  { %v3472_v6 = vpop.eup %3471  ;;  %6424 = vst [vmem:[#allocation32_spill] sm:$0xff] %v5100_v11  ;;  %2084 = vmatpush.msra.mxu1 %v5100_v11  ;;  %2124 = vmatpush.msra.mxu3 %v5114_v37 }
 0x5a2   :  { %v3474_v51 = vpop.eup %3473  ;;  %v5066_v30 = vadd.f32 1.0, %v3472_v6  ;;  %3475 = vpow2.f32 %v3325_v19  ;;  %v1602_v19 = vpop.f32.mrf.mxu2  ;;  %v5104_v6 = vld [vmem:[#allocation11 + $0x50] sm:$0xff]  ;;  %6429 = vst [vmem:[#allocation37_spill] sm:$0xff] %v5114_v37  ;;  %2065 = vmatpush.msra.mxu0 %v5110_v36 }
 0x5a3   :  { %v5074_v33 = vadd.f32 1.0, %v3474_v51  ;;  %6425 = vst [vmem:[#allocation34_spill] sm:$0xff] %v5104_v6  ;;  %v1627_v31 = vadd.f32 %v1602_v19, %v294_v26  ;;  %2103 = vmatpush.msra.mxu2 %v5104_v6  ;;  %2085 = vmatpush.msra.mxu1 %v5112_v28 }
 0x5a4   :  { %3477 = vrcp.f32 %v5066_v30  ;;  %6430 = vst [vmem:[#allocation38_spill] sm:$0xff] %v5120_v43  ;;  %2125 = vmatpush.msra.mxu3 %v5122_v41  ;;  %2205 = vmatpush.msrb.mxu0 %v4913_v5  ;;  %v1645_v37 = vand.u32 2147483648, %v5066_v30  ;;  %vm1639_vm6 = vweird.f32 %v5066_v30 }
 0x5a5   :  { %3479 = vrcp.f32 %v5074_v33  ;;  %6431 = vst [vmem:[#allocation39_spill] sm:$0xff] %v5122_v41  ;;  %2104 = vmatpush.msra.mxu2 %v5120_v43  ;;  %2225 = vmatpush.msrb.mxu1 %v4915_v3  ;;  %v1664_v28 = vand.u32 2147483648, %v5074_v33  ;;  %v1643_v43 = vand.u32 2147483647, %v5066_v30  ;;  %vm1658_vm7 = vweird.f32 %v5074_v33 }
 0x5a6   :  { %2265 = vmatpush.msrb.mxu3 %v4923_v42  ;;  %2206 = vmatpush.msrb.mxu0 %v4917_v24 }
 0x5a7   :  { %2226 = vmatpush.msrb.mxu1 %v4921_v7  ;;  %vm1644_vm10 = vcmp.eq.f32.partialorder %v1643_v43, 8.507059e+37 }
 0x5a8   :  { %v3476_v51 = vpop.eup %3475  ;;  %2266 = vmatpush.msrb.mxu3 %v4930_v4  ;;  %2207 = vmatpush.msrb.mxu0 %v4926_v22 }
 0x5a9   :  { %v5116_v55 = vadd.f32 1.0, %v3476_v51  ;;  %v5130_v51 = vld [vmem:[#allocation11 + $0x10] sm:$0xff]  ;;  %2227 = vmatpush.msrb.mxu1 %v4928_v1 }
 0x5aa   :  { %v3478_v9 = vpop.eup %3477  ;;  %6432 = vst [vmem:[#allocation40_spill] sm:$0xff] %v5130_v51  ;;  %2105 = vmatpush.msra.mxu2 %v5130_v51  ;;  %2267 = vmatpush.msrb.mxu3 %v4954_v29 }
 0x5ab   :  { %v3480_v61 = vpop.eup %3479  ;;  %v1635_v56 = vmul.f32 %v3478_v9, %v5066_v30  ;;  %3481 = vrcp.f32 %v5116_v55  ;;  %vm1640_vm4 = vweird.f32 %v3478_v9  ;;  %v1665_v30 = vor.u32 1.1754944e-38, %v1664_v28  ;;  %2208 = vmatpush.msrb.mxu0 %v4957_v23  ;;  %2228 = vmatpush.msrb.mxu1 %v4959_v32 }
 0x5ac   :  { %v1654_v11 = vmul.f32 %v3480_v61, %v5074_v33  ;;  %3483 = vtanh.f32 %v1627_v31  ;;  %2245 = vmatpush.msrb.mxu2 %v4949_v18  ;;  %vm1659_vm5 = vweird.f32 %v3480_v61  ;;  %vm1641_vm8 = vmor %vm1639_vm6, %vm1640_vm4  ;;  %2268 = vmatpush.msrb.mxu3 %v4968_v2  ;;  %vm1678_vm13 = vweird.f32 %v5116_v55 }
 0x5ad   :  { %v1636_v26 = vsub.f32 1.0, %v1635_v56  ;;  %vm1660_vm9 = vmor %vm1658_vm7, %vm1659_vm5  ;;  %2209 = vmatpush.msrb.mxu0 %v4962_v54  ;;  %2229 = vmatpush.msrb.mxu1 %v4966_v20 }
 0x5ae   :  { %v1655_v19 = vsub.f32 1.0, %v1654_v11  ;;  %v1662_v11 = vand.u32 2147483647, %v5074_v33  ;;  %2246 = vmatpush.msrb.mxu2 %v4952_v8  ;;  %2269 = vmatpush.msrb.mxu3 %v4978_v63 }
 0x5af   :  { %v1637_v36 = vmul.f32 %v3478_v9, %v1636_v26  ;;  %v1646_v26 = vor.u32 1.1754944e-38, %v1645_v37  ;;  %2210 = vmatpush.msrb.mxu0 %v4988_v34  ;;  %2230 = vmatpush.msrb.mxu1 %v4990_v35 }
 0x5b0   :  { %v1656_v56 = vmul.f32 %v3480_v61, %v1655_v19  ;;  %2247 = vmatpush.msrb.mxu2 %v4970_v17  ;;  %vm1663_vm11 = vcmp.eq.f32.partialorder %v1662_v11, 8.507059e+37  ;;  %2270 = vmatpush.msrb.mxu3 %v4992_v60  ;;  %v6433_v11 = vld [vmem:[#allocation55_spill] sm:$0xff] }
 0x5b1   :  { %v5147_v31 = vpop.eup %3481  ;;  %v1638_v42 = vadd.f32 %v3478_v9, %v1637_v36  ;;  %2211 = vmatpush.msrb.mxu0 %v4999_v46  ;;  %2231 = vmatpush.msrb.mxu1 %v5001_v38 }
 0x5b2   :  { %v1657_v19 = vadd.f32 %v3480_v61, %v1656_v56  ;;  %v1674_v7 = vmul.f32 %v5147_v31, %v5116_v55  ;;  %v3484_v33 = vpop.eup %3483  ;;  %2248 = vmatpush.msrb.mxu2 %v4974_v27  ;;  %vm1679_vm12 = vweird.f32 %v5147_v31  ;;  %2271 = vmatpush.msrb.mxu3 %v5004_v40 }
 0x5b3   :  { %v1642_v36 = vsel %vm1641_vm8, %v3478_v9, %v1638_v42  ;;  %vm1680_vm14 = vmor %vm1678_vm13, %vm1679_vm12  ;;  %2212 = vmatpush.msrb.mxu0 %v5011_v45  ;;  %2232 = vmatpush.msrb.mxu1 %v5013_v47 }
 0x5b4   :  { %v1647_v22 = vsel %vm1644_vm10, %v1646_v26, %v1642_v36  ;;  %v1661_v37 = vsel %vm1660_vm9, %v3480_v61, %v1657_v19  ;;  %v1675_v56 = vsub.f32 1.0, %v1674_v7  ;;  %2249 = vmatpush.msrb.mxu2 %v4981_v52  ;;  %2272 = vmatpush.msrb.mxu3 %v5023_v50  ;;  %v6435_v26 = vld [vmem:[#allocation59_spill] sm:$0xff]  ;;  %v6436_v19 = vld [vmem:[#allocation25_spill] sm:$0xff]  ;;  %v6438_v36 = vld [vmem:[#allocation30_spill] sm:$0xff] }
 0x5b5   :  { %v1666_v1 = vsel %vm1663_vm11, %v1665_v30, %v1661_v37  ;;  %v1689_v29 = vmul.f32 %v3484_v33, %v1647_v22  ;;  %2213 = vmatpush.msrb.mxu0 %v5016_v58  ;;  %2233 = vmatpush.msrb.mxu1 %v5021_v39  ;;  %v6437_v30 = vld [vmem:[#allocation24_spill] sm:$0xff]  ;;  %v6439_v33 = vld [vmem:[#allocation26_spill] sm:$0xff]  ;;  %v6440_v37 = vld [vmem:[#allocation29_spill] sm:$0xff] }
 0x5b6   :  { %v1688_v42 = vmul.f32 %v1666_v1, %v4898_v59  ;;  %v1676_v28 = vmul.f32 %v5147_v31, %v1675_v56  ;;  %2250 = vmatpush.msrb.mxu2 %v4997_v53  ;;  %v1684_v59 = vand.u32 2147483648, %v5116_v55  ;;  %v1682_v1 = vand.u32 2147483647, %v5116_v55  ;;  %2273 = vmatpush.msrb.mxu3 %v5032_v21  ;;  %v6441_v56 = vld [vmem:[#allocation28_spill] sm:$0xff] }
 0x5b7   :  { %2214 = vmatpush.msrb.mxu0 %v5028_v49  ;;  %2234 = vmatpush.msrb.mxu1 %v5030_v13 }
 0x5b8   :  { %v1690_v7 = vadd.f32 %v1689_v29, %v1688_v42  ;;  %v1677_v22 = vadd.f32 %v5147_v31, %v1676_v28  ;;  %2251 = vmatpush.msrb.mxu2 %v5009_v44  ;;  %v1685_v43 = vor.u32 1.1754944e-38, %v1684_v59  ;;  %vm1683_vm15 = vcmp.eq.f32.partialorder %v1682_v1, 8.507059e+37  ;;  %2274 = vmatpush.msrb.mxu3 %v5036_v57  ;;  %v6443_v28 = vld [vmem:[#allocation31_spill] sm:$0xff]  ;;  %v6446_v59 = vld [vmem:[#allocation37_spill] sm:$0xff] }
 0x5b9   :  { %2215 = vmatpush.msrb.mxu0 %v5041_v10  ;;  %2235 = vmatpush.msrb.mxu1 %v5043_v12  ;;  %v6442_v42 = vmov 0.0   ;;  %v6447_v1 = vld [vmem:[#allocation35_spill] sm:$0xff] }
 0x5ba   :  { %3485 = vtanh.f32 %v1690_v7  ;;  %1700 = vst [vmem:[%s5911_s8] sm:$0xff] %v1690_v7  ;;  %v1681_v29 = vsel %vm1680_vm14, %v5147_v31, %v1677_v22  ;;  %2252 = vmatpush.msrb.mxu2 %v5038_v25  ;;  %2275 = vmatpush.msrb.mxu3 %v5048_v14  ;;  %v6434_v31 = vld [vmem:[#allocation27_spill] sm:$0xff]  ;;  %v6444_v7 = vld [vmem:[#allocation32_spill] sm:$0xff]  ;;  %v6445_v22 = vld [vmem:[#allocation38_spill] sm:$0xff] }
 0x5bb   :  { %v1686_v61 = vsel %vm1683_vm15, %v1685_v43, %v1681_v29  ;;  %2216 = vmatpush.msrb.mxu0 %v5053_v15  ;;  %2236 = vmatpush.msrb.mxu1 %v6433_v11  ;;  %v6448_v29 = vld [vmem:[#allocation36_spill] sm:$0xff]  ;;  %v6449_v43 = vld [vmem:[#allocation18_spill] sm:$0xff] }
 0x5bc   :  { %2253 = vmatpush.msrb.mxu2 %v5050_v0  ;;  %2276 = vmatpush.msrb.mxu3 %v6435_v26 }
 0x5bd   :  { %2217 = vmatpush.msrb.mxu0 %v6436_v19  ;;  %2237 = vmatpush.msrb.mxu1 %v6437_v30 }
 0x5be   :  { %2254 = vmatpush.msrb.mxu2 %v5058_v16  ;;  %2277 = vmatpush.msrb.mxu3 %v6439_v33 }
 0x5bf   :  { %2218 = vmatpush.msrb.mxu0 %v6440_v37  ;;  %2238 = vmatpush.msrb.mxu1 %v6441_v56 }
 0x5c0   :  { %v3486_v55 = vpop.eup %3485  ;;  %2255 = vmatpush.msrb.mxu2 %v5064_v62  ;;  %2278 = vmatpush.msrb.mxu3 %v6443_v28 }
 0x5c1   :  { %v1692_v9 = vmul.f32 %v3486_v55, %v1686_v61  ;;  %2219 = vmatpush.msrb.mxu0 %v5098_v48  ;;  %2239 = vmatpush.msrb.mxu1 %v6444_v7  ;;  %v6450_v55 = vld [vmem:[#allocation16_spill] sm:$0xff]  ;;  %v6451_v61 = vld [vmem:[#allocation19_spill] sm:$0xff] }
 0x5c2   :  { %2256 = vmatpush.msrb.mxu2 %v6434_v31  ;;  %2279 = vmatpush.msrb.mxu3 %v6446_v59 }
 0x5c3   :  { %1698 = vst [vmem:[%s5910_s7] sm:$0xff] %v1692_v9  ;;  %1820 = vmatmul.f32.gmra.mxu0 %v1692_v9  ;;  %1861 = vmatmul.f32.gmra.mxu1 %v1692_v9 }
 0x5c4   :  { %1902 = vmatmul.f32.gmra.mxu2 %v1692_v9  ;;  %1943 = vmatmul.f32.gmra.mxu3 %v1692_v9  ;;  %v6452_v9 = vld [vmem:[#allocation21_spill] sm:$0xff] }
 0x5c5   :  { %2257 = vmatpush.msrb.mxu2 %v6438_v36  ;;  %2220 = vmatpush.msrb.mxu0 %v6447_v1 }
 0x5c6   :  { %2240 = vmatpush.msrb.mxu1 %v6448_v29  ;;  %2280 = vmatpush.msrb.mxu3 %v5122_v41 }
 0x5c7   :  { %2258 = vmatpush.msrb.mxu2 %v5104_v6 }
 0x5c9   :  { %2259 = vmatpush.msrb.mxu2 %v6445_v22 }
 0x5cb   :  { %2066 = vmatmul.f32.vlgmr.msra.gmra.mxu0 %v6442_v42  ;;  %2086 = vmatmul.f32.vlgmr.msra.gmra.mxu1 %v6442_v42 }
 0x5cc   :  { %2106 = vmatmul.f32.vlgmr.msra.gmra.mxu2 %v6442_v42  ;;  %2126 = vmatmul.f32.vlgmr.msra.gmra.mxu3 %v6442_v42  ;;  %v6453_v42 = vld [vmem:[#allocation20_spill] sm:$0xff] }
 0x5cd   :  { %2260 = vmatpush.msrb.mxu2 %v5130_v51  ;;  %2360 = vmatpush.msra.mxu0 %v4913_v5 }
 0x5ce   :  { %2380 = vmatpush.msra.mxu1 %v4915_v3  ;;  %2420 = vmatpush.msra.mxu3 %v6449_v43 }
 0x5cf   :  { %2400 = vmatpush.msra.mxu2 %v4949_v18  ;;  %2361 = vmatpush.msra.mxu0 %v4917_v24 }
 0x5d0   :  { %2381 = vmatpush.msra.mxu1 %v6450_v55  ;;  %2421 = vmatpush.msra.mxu3 %v4930_v4 }
 0x5d1   :  { %2401 = vmatpush.msra.mxu2 %v4952_v8  ;;  %2362 = vmatpush.msra.mxu0 %v6451_v61 }
 0x5d2   :  { %2382 = vmatpush.msra.mxu1 %v6452_v9  ;;  %2422 = vmatpush.msra.mxu3 %v6453_v42 }
 0x5d3   :  { %2402 = vmatpush.msra.mxu2 %v4970_v17  ;;  %2363 = vmatpush.msra.mxu0 %v4957_v23 }
 0x5d4   :  { %2383 = vmatpush.msra.mxu1 %v4959_v32  ;;  %2423 = vmatpush.msra.mxu3 %v4968_v2 }
 0x5d5   :  { %2403 = vmatpush.msra.mxu2 %v4974_v27  ;;  %2364 = vmatpush.msra.mxu0 %v4962_v54 }
 0x5d6   :  { %2384 = vmatpush.msra.mxu1 %v4966_v20  ;;  %2424 = vmatpush.msra.mxu3 %v4978_v63 }
 0x5d7   :  { %2404 = vmatpush.msra.mxu2 %v4981_v52  ;;  %2365 = vmatpush.msra.mxu0 %v4988_v34 }
 0x5d8   :  { %2385 = vmatpush.msra.mxu1 %v4990_v35  ;;  %2425 = vmatpush.msra.mxu3 %v4992_v60 }
 0x5d9   :  { %2405 = vmatpush.msra.mxu2 %v4997_v53  ;;  %2366 = vmatpush.msra.mxu0 %v4999_v46 }
 0x5da   :  { %2386 = vmatpush.msra.mxu1 %v5001_v38  ;;  %2426 = vmatpush.msra.mxu3 %v5004_v40 }
 0x5db   :  { %2406 = vmatpush.msra.mxu2 %v5009_v44  ;;  %2367 = vmatpush.msra.mxu0 %v5011_v45 }
 0x5dc   :  { %2387 = vmatpush.msra.mxu1 %v5013_v47  ;;  %2427 = vmatpush.msra.mxu3 %v5023_v50 }
 0x5dd   :  { %2407 = vmatpush.msra.mxu2 %v5038_v25  ;;  %2368 = vmatpush.msra.mxu0 %v5016_v58 }
 0x5de   :  { %2388 = vmatpush.msra.mxu1 %v5021_v39  ;;  %2428 = vmatpush.msra.mxu3 %v5032_v21 }
 0x5df   :  { %2408 = vmatpush.msra.mxu2 %v5050_v0  ;;  %2369 = vmatpush.msra.mxu0 %v5028_v49 }
 0x5e0   :  { %2389 = vmatpush.msra.mxu1 %v5030_v13  ;;  %2429 = vmatpush.msra.mxu3 %v5036_v57 }
 0x5e1   :  { %2409 = vmatpush.msra.mxu2 %v5058_v16  ;;  %2370 = vmatpush.msra.mxu0 %v5041_v10 }
 0x5e2   :  { %2390 = vmatpush.msra.mxu1 %v5043_v12  ;;  %2430 = vmatpush.msra.mxu3 %v5048_v14 }
 0x5e3   :  { %2410 = vmatpush.msra.mxu2 %v5064_v62  ;;  %2371 = vmatpush.msra.mxu0 %v5053_v15 }
 0x5e4   :  { %2391 = vmatpush.msra.mxu1 %v6433_v11  ;;  %2431 = vmatpush.msra.mxu3 %v6435_v26 }
 0x5e5   :  { %2411 = vmatpush.msra.mxu2 %v6434_v31  ;;  %2372 = vmatpush.msra.mxu0 %v6436_v19 }
 0x5e6   :  { %2392 = vmatpush.msra.mxu1 %v6437_v30  ;;  %2432 = vmatpush.msra.mxu3 %v6439_v33 }
 0x5e7   :  { %2412 = vmatpush.msra.mxu2 %v6438_v36  ;;  %2373 = vmatpush.msra.mxu0 %v6440_v37  ;;  %v1923_v37 = vpop.f32.mrf.mxu3 }
 0x5e8   :  { %2393 = vmatpush.msra.mxu1 %v6441_v56  ;;  %2433 = vmatpush.msra.mxu3 %v6443_v28  ;;  %v1800_v56 = vpop.f32.mrf.mxu0 }
 0x5e9   :  { %2413 = vmatpush.msra.mxu2 %v5104_v6  ;;  %2374 = vmatpush.msra.mxu0 %v5098_v48  ;;  %v1841_v6 = vpop.f32.mrf.mxu1 }
 0x5ea   :  { %2394 = vmatpush.msra.mxu1 %v6444_v7  ;;  %2434 = vmatpush.msra.mxu3 %v6446_v59  ;;  %v1882_v7 = vpop.f32.mrf.mxu2 }
 0x5eb   :  { %2414 = vmatpush.msra.mxu2 %v6445_v22  ;;  %2375 = vmatpush.msra.mxu0 %v6447_v1 }
 0x5ec   :  { %2395 = vmatpush.msra.mxu1 %v6448_v29  ;;  %2435 = vmatpush.msra.mxu3 %v5122_v41 }
 0x5ed   :  { %2415 = vmatpush.msra.mxu2 %v5130_v51 }
 0x5ef   :  { %v5298_v33 = vpop.f32.mrf.mxu3 }
 0x5f0   :  { %v5294_v28 = vpop.f32.mrf.mxu0  ;;  %6456 = vst [vmem:[#allocation43_spill] sm:$0xff] %v5298_v33 }
 0x5f1   :  { %6454 = vst [vmem:[#allocation41_spill] sm:$0xff] %v5294_v28  ;;  %v5296_v48 = vpop.f32.mrf.mxu1 }
 0x5f2   :  { %6455 = vst [vmem:[#allocation42_spill] sm:$0xff] %v5296_v48  ;;  %v5304_v1 = vpop.f32.mrf.mxu2 }
 0x5f3   :  { %6459 = vst [vmem:[#allocation46_spill] sm:$0xff] %v5304_v1 }
 0x5f7   :  { %v5306_v29 = vpop.f32.mrf.mxu3 }
 0x5f8   :  { %v5300_v22 = vpop.f32.mrf.mxu0  ;;  %6460 = vst [vmem:[#allocation47_spill] sm:$0xff] %v5306_v29 }
 0x5f9   :  { %6457 = vst [vmem:[#allocation45_spill] sm:$0xff] %v5300_v22  ;;  %v5302_v59 = vpop.f32.mrf.mxu1 }
 0x5fa   :  { %6458 = vst [vmem:[#allocation44_spill] sm:$0xff] %v5302_v59  ;;  %v5312_v36 = vpop.f32.mrf.mxu2 }
 0x5fb   :  { %6463 = vst [vmem:[#allocation57_spill] sm:$0xff] %v5312_v36 }
 0x5ff   :  { %v5314_v28 = vpop.f32.mrf.mxu3 }
 0x600   :  { %v5308_v51 = vpop.f32.mrf.mxu0  ;;  %6464 = vst [vmem:[#allocation68_spill] sm:$0xff] %v5314_v28 }
 0x601   :  { %6461 = vst [vmem:[#allocation49_spill] sm:$0xff] %v5308_v51  ;;  %v5310_v41 = vpop.f32.mrf.mxu1 }
 0x602   :  { %6462 = vst [vmem:[#allocation67_spill] sm:$0xff] %v5310_v41  ;;  %v5320_v33 = vpop.f32.mrf.mxu2 }
 0x603   :  { %6467 = vst [vmem:[#allocation60_spill] sm:$0xff] %v5320_v33 }
 0x607   :  { %v5322_v22 = vpop.f32.mrf.mxu3 }
 0x608   :  { %v5316_v48 = vpop.f32.mrf.mxu0  ;;  %6468 = vst [vmem:[#allocation73_spill] sm:$0xff] %v5322_v22  ;;  %v1773_v22 = vld [vmem:[%s5909_s6] sm:$0xf] }
 0x609   :  { %6465 = vst [vmem:[#allocation58_spill] sm:$0xff] %v5316_v48  ;;  %v5318_v30 = vpop.f32.mrf.mxu1  ;;  %v5357_v31 = vperm.slane %v1773_v22, 3 }
 0x60a   :  { %6466 = vst [vmem:[#allocation71_spill] sm:$0xff] %v5318_v30  ;;  %v5328_v29 = vpop.f32.mrf.mxu2 }
 0x60b   :  { %6471 = vst [vmem:[#allocation62_spill] sm:$0xff] %v5328_v29  ;;  %v5349_v29 = vperm.slane %v1773_v22, 1  ;;  %v1924_v11 = vadd.f32 %v1923_v37, %v5357_v31 }
 0x60c   :  { %6483 = vst [vmem:[#allocation16_spill] sm:$0xff] %v5357_v31 }
 0x60d   :  { %6480 = vst [vmem:[#allocation70_spill] sm:$0xff] %v5349_v29 }
 0x60f   :  { %v5330_v51 = vpop.f32.mrf.mxu3 }
 0x610   :  { %v5324_v59 = vpop.f32.mrf.mxu0  ;;  %6472 = vst [vmem:[#allocation64_spill] sm:$0xff] %v5330_v51 }
 0x611   :  { %6469 = vst [vmem:[#allocation63_spill] sm:$0xff] %v5324_v59  ;;  %v5326_v1 = vpop.f32.mrf.mxu1 }
 0x612   :  { %6470 = vst [vmem:[#allocation61_spill] sm:$0xff] %v5326_v1  ;;  %v5336_v28 = vpop.f32.mrf.mxu2  ;;  %v5347_v1 = vperm.slane %v1773_v22, 0 }
 0x613   :  { %6475 = vst [vmem:[#allocation17_spill] sm:$0xff] %v5336_v28 }
 0x614   :  { %6479 = vst [vmem:[#allocation66_spill] sm:$0xff] %v5347_v1 }
 0x617   :  { %v5338_v48 = vpop.f32.mrf.mxu3 }
 0x618   :  { %v5332_v41 = vpop.f32.mrf.mxu0  ;;  %6476 = vst [vmem:[#allocation22_spill] sm:$0xff] %v5338_v48 }
 0x619   :  { %6473 = vst [vmem:[#allocation69_spill] sm:$0xff] %v5332_v41  ;;  %v5334_v36 = vpop.f32.mrf.mxu1  ;;  %v1801_v41 = vadd.f32 %v1800_v56, %v5347_v1 }
 0x61a   :  { %6474 = vst [vmem:[#allocation74_spill] sm:$0xff] %v5334_v36  ;;  %v1842_v36 = vadd.f32 %v1841_v6, %v5349_v29  ;;  %v5353_v51 = vpop.f32.mrf.mxu2 }
 0x61b   :  { %6481 = vst [vmem:[#allocation72_spill] sm:$0xff] %v5353_v51 }
 0x640   :  { %v5343_v30 = vpop.f32.mrf.mxu0  ;;  %v5345_v59 = vpop.f32.mrf.mxu1 }
 0x641   :  { %6477 = vst [vmem:[#allocation48_spill] sm:$0xff] %v5343_v30 }
 0x642   :  { %6478 = vst [vmem:[#allocation65_spill] sm:$0xff] %v5345_v59 }
 0x647   :  { %v5355_v28 = vpop.f32.mrf.mxu3  ;;  %v5360_v15 = vpop.f32.mrf.mxu2 }
 0x648   :  { %6482 = vst [vmem:[#allocation18_spill] sm:$0xff] %v5355_v28  ;;  %v2067_v48 = vpop.f32.mrf.mxu0  ;;  %v2087_v33 = vpop.f32.mrf.mxu1 }
 0x649   :  { %v2130_v19 = vadd.f32 %v2067_v48, %v1801_v41  ;;  %v2131_v26 = vadd.f32 %v2087_v33, %v1842_v36  ;;  %6484 = vst [vmem:[#allocation19_spill] sm:$0xff] %v5360_v15  ;;  %v5362_v41 = vperm.slane %v1773_v22, 2 }
 0x64b   :  { %v3326_v30 = vmul.f32 -1.442695, %v2130_v19  ;;  %v3327_v59 = vmul.f32 -1.442695, %v2131_v26  ;;  %6485 = vst [vmem:[#allocation21_spill] sm:$0xff] %v5362_v41  ;;  %v1883_v19 = vadd.f32 %v1882_v7, %v5362_v41 }
 0x64d   :  { %3487 = vpow2.f32 %v3326_v30 }
 0x64e   :  { %3489 = vpow2.f32 %v3327_v59 }
 0x64f   :  { %v2127_v56 = vpop.f32.mrf.mxu3  ;;  %v2107_v48 = vpop.f32.mrf.mxu2 }
 0x650   :  { %v2133_v6 = vadd.f32 %v2127_v56, %v1924_v11  ;;  %v2132_v33 = vadd.f32 %v2107_v48, %v1883_v19 }
 0x652   :  { %v3328_v29 = vmul.f32 -1.442695, %v2133_v6 }
 0x653   :  { %v3488_v51 = vpop.eup %3487 }
 0x654   :  { %v3490_v1 = vpop.eup %3489  ;;  %v2138_v28 = vadd.f32 1.0, %v3488_v51  ;;  %3491 = vpow2.f32 %v3328_v29 }
 0x655   :  { %v2157_v14 = vadd.f32 1.0, %v3490_v1 }
 0x656   :  { %3493 = vrcp.f32 %v2138_v28  ;;  %v2150_v51 = vand.u32 2147483648, %v2138_v28  ;;  %v2148_v29 = vand.u32 2147483647, %v2138_v28  ;;  %vm2144_vm2 = vweird.f32 %v2138_v28 }
 0x657   :  { %3495 = vrcp.f32 %v2157_v14  ;;  %v2169_v1 = vand.u32 2147483648, %v2157_v14  ;;  %v2167_v31 = vand.u32 2147483647, %v2157_v14  ;;  %vm2163_vm3 = vweird.f32 %v2157_v14 }
 0x658   :  { %v2151_v48 = vor.u32 1.1754944e-38, %v2150_v51  ;;  %vm2149_vm5 = vcmp.eq.f32.partialorder %v2148_v29, 8.507059e+37 }
 0x659   :  { %v2170_v41 = vor.u32 1.1754944e-38, %v2169_v1  ;;  %vm2168_vm7 = vcmp.eq.f32.partialorder %v2167_v31, 8.507059e+37 }
 0x65a   :  { %v3492_v26 = vpop.eup %3491 }
 0x65b   :  { %v2177_v30 = vadd.f32 1.0, %v3492_v26 }
 0x65c   :  { %v3494_v36 = vpop.eup %3493 }
 0x65d   :  { %v3496_v37 = vpop.eup %3495  ;;  %v2140_v59 = vmul.f32 %v3494_v36, %v2138_v28  ;;  %3497 = vrcp.f32 %v2177_v30  ;;  %vm2145_vm0 = vweird.f32 %v3494_v36  ;;  %vm2183_vm9 = vweird.f32 %v2177_v30 }
 0x65e   :  { %v2159_v11 = vmul.f32 %v3496_v37, %v2157_v14  ;;  %3499 = vtanh.f32 %v2132_v33  ;;  %vm2164_vm1 = vweird.f32 %v3496_v37  ;;  %vm2146_vm4 = vmor %vm2144_vm2, %vm2145_vm0  ;;  %v2187_v28 = vand.u32 2147483647, %v2177_v30 }
 0x65f   :  { %v2141_v56 = vsub.f32 1.0, %v2140_v59  ;;  %vm2165_vm6 = vmor %vm2163_vm3, %vm2164_vm1 }
 0x660   :  { %v2160_v6 = vsub.f32 1.0, %v2159_v11  ;;  %vm2188_vm11 = vcmp.eq.f32.partialorder %v2187_v28, 8.507059e+37 }
 0x661   :  { %v2142_v22 = vmul.f32 %v3494_v36, %v2141_v56 }
 0x662   :  { %v2161_v15 = vmul.f32 %v3496_v37, %v2160_v6 }
 0x663   :  { %v3498_v62 = vpop.eup %3497  ;;  %v2143_v7 = vadd.f32 %v3494_v36, %v2142_v22 }
 0x664   :  { %v2162_v26 = vadd.f32 %v3496_v37, %v2161_v15  ;;  %v2179_v19 = vmul.f32 %v3498_v62, %v2177_v30  ;;  %v3500_v33 = vpop.eup %3499  ;;  %vm2184_vm8 = vweird.f32 %v3498_v62  ;;  %v2189_v15 = vand.u32 2147483648, %v2177_v30 }
 0x665   :  { %v2147_v59 = vsel %vm2146_vm4, %v3494_v36, %v2143_v7  ;;  %vm2185_vm10 = vmor %vm2183_vm9, %vm2184_vm8 }
 0x666   :  { %v2152_v11 = vsel %vm2149_vm5, %v2151_v48, %v2147_v59  ;;  %v2166_v56 = vsel %vm2165_vm6, %v3496_v37, %v2162_v26  ;;  %v2180_v12 = vsub.f32 1.0, %v2179_v19  ;;  %v2190_v51 = vor.u32 1.1754944e-38, %v2189_v15  ;;  %v6518_v59 = vld [vmem:[#allocation21_spill] sm:$0xff] }
 0x667   :  { %v2171_v6 = vsel %vm2168_vm7, %v2170_v41, %v2166_v56  ;;  %v2194_v10 = vmul.f32 %v3500_v33, %v2152_v11  ;;  %v6519_v33 = vld [vmem:[#allocation46_spill] sm:$0xff] }
 0x668   :  { %v2193_v57 = vmul.f32 0.0, %v2171_v6  ;;  %v2181_v16 = vmul.f32 %v3498_v62, %v2180_v12  ;;  %v1886_v11 = vadd.f32 %v6519_v33, %v6518_v59  ;;  %v5504_v33 = vld [vmem:[#allocation11 + $0x140] sm:$0xff] }
 0x66a   :  { %v5365_v22 = vadd.f32 %v2194_v10, %v2193_v57  ;;  %v2182_v14 = vadd.f32 %v3498_v62, %v2181_v16 }
 0x66c   :  { %3501 = vtanh.f32 %v5365_v22  ;;  %v2186_v36 = vsel %vm2185_vm10, %v3498_v62, %v2182_v14 }
 0x66d   :  { %v2191_v31 = vsel %vm2188_vm11, %v2190_v51, %v2186_v36 }
 0x672   :  { %v3502_v37 = vpop.eup %3501 }
 0x673   :  { %v2197_v1 = vmul.f32 %v3502_v37, %v2191_v31 }
 0x675   :  { %2221 = vmatmul.f32.vlgmr.msrb.gmra.mxu0 %v2197_v1  ;;  %2241 = vmatmul.f32.vlgmr.msrb.gmra.mxu1 %v2197_v1 }
 0x676   :  { %2261 = vmatmul.f32.vlgmr.msrb.gmra.mxu2 %v2197_v1  ;;  %2281 = vmatmul.f32.vlgmr.msrb.gmra.mxu3 %v2197_v1 }
 0x677   :  { %2515 = vmatpush.msrb.mxu0 %v4913_v5  ;;  %2535 = vmatpush.msrb.mxu1 %v4915_v3  ;;  %v6486_v5 = vld [vmem:[#allocation56_spill] sm:$0xff]  ;;  %v6487_v3 = vld [vmem:[#allocation50_spill] sm:$0xff] }
 0x678   :  { %2555 = vmatpush.msrb.mxu2 %v4949_v18  ;;  %2575 = vmatpush.msrb.mxu3 %v6449_v43  ;;  %v6490_v18 = vld [vmem:[#allocation23_spill] sm:$0xff]  ;;  %v6516_v43 = vld [vmem:[#allocation16_spill] sm:$0xff] }
 0x679   :  { %2516 = vmatpush.msrb.mxu0 %v4917_v24  ;;  %2536 = vmatpush.msrb.mxu1 %v6450_v55  ;;  %v6488_v24 = vld [vmem:[#allocation51_spill] sm:$0xff] }
 0x67a   :  { %2556 = vmatpush.msrb.mxu2 %v4952_v8  ;;  %2576 = vmatpush.msrb.mxu3 %v4930_v4  ;;  %v6489_v4 = vld [vmem:[#allocation53_spill] sm:$0xff]  ;;  %v6491_v8 = vld [vmem:[#allocation52_spill] sm:$0xff]  ;;  %v6517_v55 = vld [vmem:[#allocation43_spill] sm:$0xff] }
 0x67b   :  { %2517 = vmatpush.msrb.mxu0 %v6451_v61  ;;  %2537 = vmatpush.msrb.mxu1 %v6452_v9  ;;  %v1927_v61 = vadd.f32 %v6517_v55, %v6516_v43  ;;  %v5471_v55 = vld [vmem:[#allocation11 + $0x1a8] sm:$0xff] }
 0x67c   :  { %2557 = vmatpush.msrb.mxu2 %v4970_v17  ;;  %2577 = vmatpush.msrb.mxu3 %v6453_v42  ;;  %v6497_v17 = vld [vmem:[#allocation24_spill] sm:$0xff] }
 0x67d   :  { %2518 = vmatpush.msrb.mxu0 %v4957_v23  ;;  %2538 = vmatpush.msrb.mxu1 %v4959_v32  ;;  %v6492_v23 = vld [vmem:[#allocation54_spill] sm:$0xff]  ;;  %v6493_v32 = vld [vmem:[#allocation55_spill] sm:$0xff] }
 0x67e   :  { %2558 = vmatpush.msrb.mxu2 %v4974_v27  ;;  %2578 = vmatpush.msrb.mxu3 %v4968_v2  ;;  %v6496_v2 = vld [vmem:[#allocation25_spill] sm:$0xff]  ;;  %v6498_v27 = vld [vmem:[#allocation30_spill] sm:$0xff] }
 0x67f   :  { %2519 = vmatpush.msrb.mxu0 %v4962_v54  ;;  %2539 = vmatpush.msrb.mxu1 %v4966_v20  ;;  %v6494_v54 = vld [vmem:[#allocation27_spill] sm:$0xff] }
 0x680   :  { %2559 = vmatpush.msrb.mxu2 %v4981_v52  ;;  %2579 = vmatpush.msrb.mxu3 %v4978_v63  ;;  %v6495_v20 = vld [vmem:[#allocation59_spill] sm:$0xff]  ;;  %v6499_v63 = vld [vmem:[#allocation26_spill] sm:$0xff]  ;;  %v6500_v52 = vld [vmem:[#allocation29_spill] sm:$0xff] }
 0x681   :  { %2520 = vmatpush.msrb.mxu0 %v4988_v34  ;;  %2540 = vmatpush.msrb.mxu1 %v4990_v35  ;;  %v6501_v34 = vld [vmem:[#allocation28_spill] sm:$0xff]  ;;  %v6502_v35 = vld [vmem:[#allocation34_spill] sm:$0xff] }
 0x682   :  { %2560 = vmatpush.msrb.mxu2 %v4997_v53  ;;  %2580 = vmatpush.msrb.mxu3 %v4992_v60  ;;  %v6503_v60 = vld [vmem:[#allocation31_spill] sm:$0xff]  ;;  %v6504_v53 = vld [vmem:[#allocation33_spill] sm:$0xff] }
 0x683   :  { %2521 = vmatpush.msrb.mxu0 %v4999_v46  ;;  %2541 = vmatpush.msrb.mxu1 %v5001_v38  ;;  %v6505_v46 = vld [vmem:[#allocation32_spill] sm:$0xff]  ;;  %v6506_v38 = vld [vmem:[#allocation38_spill] sm:$0xff] }
 0x684   :  { %2561 = vmatpush.msrb.mxu2 %v5009_v44  ;;  %2581 = vmatpush.msrb.mxu3 %v5004_v40  ;;  %v6507_v40 = vld [vmem:[#allocation37_spill] sm:$0xff]  ;;  %v6508_v44 = vld [vmem:[#allocation35_spill] sm:$0xff] }
 0x685   :  { %2522 = vmatpush.msrb.mxu0 %v5011_v45  ;;  %2542 = vmatpush.msrb.mxu1 %v5013_v47  ;;  %v6509_v45 = vld [vmem:[#allocation36_spill] sm:$0xff] }
 0x686   :  { %2562 = vmatpush.msrb.mxu2 %v5038_v25  ;;  %2582 = vmatpush.msrb.mxu3 %v5023_v50  ;;  %v6510_v47 = vld [vmem:[#allocation40_spill] sm:$0xff]  ;;  %v6513_v50 = vld [vmem:[#allocation41_spill] sm:$0xff] }
 0x687   :  { %2523 = vmatpush.msrb.mxu0 %v5016_v58  ;;  %2543 = vmatpush.msrb.mxu1 %v5021_v39  ;;  %v6511_v58 = vld [vmem:[#allocation39_spill] sm:$0xff]  ;;  %v6512_v39 = vld [vmem:[#allocation66_spill] sm:$0xff] }
 0x688   :  { %2563 = vmatpush.msrb.mxu2 %v5050_v0  ;;  %2583 = vmatpush.msrb.mxu3 %v5032_v21  ;;  %v6515_v21 = vld [vmem:[#allocation42_spill] sm:$0xff] }
 0x689   :  { %2524 = vmatpush.msrb.mxu0 %v5028_v49  ;;  %2544 = vmatpush.msrb.mxu1 %v5030_v13  ;;  %v1804_v49 = vadd.f32 %v6513_v50, %v6512_v39  ;;  %v6514_v13 = vld [vmem:[#allocation70_spill] sm:$0xff] }
 0x68a   :  { %2564 = vmatpush.msrb.mxu2 %v6486_v5  ;;  %2584 = vmatpush.msrb.mxu3 %v6487_v3  ;;  %v1845_v57 = vadd.f32 %v6515_v21, %v6514_v13  ;;  %v5447_v21 = vld [vmem:[#allocation11 + $0x1e8] sm:$0xff] }
 0x68b   :  { %2525 = vmatpush.msrb.mxu0 %v6488_v24  ;;  %2545 = vmatpush.msrb.mxu1 %v6489_v4 }
 0x68c   :  { %2565 = vmatpush.msrb.mxu2 %v6490_v18  ;;  %2585 = vmatpush.msrb.mxu3 %v6491_v8 }
 0x68d   :  { %2526 = vmatpush.msrb.mxu0 %v6492_v23  ;;  %2546 = vmatpush.msrb.mxu1 %v6493_v32 }
 0x68e   :  { %2566 = vmatpush.msrb.mxu2 %v6494_v54  ;;  %2586 = vmatpush.msrb.mxu3 %v6495_v20 }
 0x68f   :  { %2527 = vmatpush.msrb.mxu0 %v6496_v2  ;;  %2547 = vmatpush.msrb.mxu1 %v6497_v17 }
 0x690   :  { %2567 = vmatpush.msrb.mxu2 %v6498_v27  ;;  %2587 = vmatpush.msrb.mxu3 %v6499_v63 }
 0x691   :  { %2528 = vmatpush.msrb.mxu0 %v6500_v52  ;;  %2548 = vmatpush.msrb.mxu1 %v6501_v34 }
 0x692   :  { %2568 = vmatpush.msrb.mxu2 %v6502_v35  ;;  %2588 = vmatpush.msrb.mxu3 %v6503_v60 }
 0x693   :  { %2529 = vmatpush.msrb.mxu0 %v6504_v53  ;;  %2549 = vmatpush.msrb.mxu1 %v6505_v46 }
 0x694   :  { %2569 = vmatpush.msrb.mxu2 %v6506_v38  ;;  %2589 = vmatpush.msrb.mxu3 %v6507_v40 }
 0x695   :  { %2530 = vmatpush.msrb.mxu0 %v6508_v44  ;;  %2550 = vmatpush.msrb.mxu1 %v6509_v45 }
 0x696   :  { %2570 = vmatpush.msrb.mxu2 %v6510_v47  ;;  %2590 = vmatpush.msrb.mxu3 %v6511_v58 }
 0x6f2   :  { %v2222_v25 = vpop.f32.mrf.mxu0  ;;  %v2242_v10 = vpop.f32.mrf.mxu1 }
 0x6f3   :  { %v2285_v12 = vadd.f32 %v2222_v25, %v1804_v49  ;;  %v2286_v0 = vadd.f32 %v2242_v10, %v1845_v57  ;;  %v5450_v57 = vld [vmem:[#allocation11 + $0x1f0] sm:$0xff]  ;;  %v5453_v25 = vld [vmem:[#allocation11 + $0x1f8] sm:$0xff]  ;;  %v5456_v10 = vld [vmem:[#allocation11 + $0x1c0] sm:$0xff] }
 0x6f5   :  { %v3329_v16 = vmul.f32 -1.442695, %v2285_v12  ;;  %v3330_v62 = vmul.f32 -1.442695, %v2286_v0  ;;  %v5459_v12 = vld [vmem:[#allocation11 + $0x1c8] sm:$0xff]  ;;  %v5462_v0 = vld [vmem:[#allocation11 + $0x1d0] sm:$0xff] }
 0x6f7   :  { %3503 = vpow2.f32 %v3329_v16  ;;  %v5465_v16 = vld [vmem:[#allocation11 + $0x1d8] sm:$0xff] }
 0x6f8   :  { %3505 = vpow2.f32 %v3330_v62  ;;  %v5468_v62 = vld [vmem:[#allocation11 + $0x1a0] sm:$0xff] }
 0x6f9   :  { %v2282_v9 = vpop.f32.mrf.mxu3  ;;  %v2262_v26 = vpop.f32.mrf.mxu2 }
 0x6fa   :  { %v2288_v42 = vadd.f32 %v2282_v9, %v1927_v61  ;;  %v2287_v14 = vadd.f32 %v2262_v26, %v1886_v11  ;;  %v5474_v61 = vld [vmem:[#allocation11 + $0x1b0] sm:$0xff]  ;;  %v5477_v9 = vld [vmem:[#allocation11 + $0x1b8] sm:$0xff]  ;;  %v5507_v11 = vld [vmem:[#allocation11 + $0x148] sm:$0xff] }
 0x6fb   :  { %v5498_v26 = vld [vmem:[#allocation11 + $0x170] sm:$0xff] }
 0x6fc   :  { %v3331_v41 = vmul.f32 -1.442695, %v2288_v42  ;;  %v5480_v42 = vld [vmem:[#allocation11 + $0x180] sm:$0xff] }
 0x6fd   :  { %v3504_v30 = vpop.eup %3503 }
 0x6fe   :  { %v3506_v29 = vpop.eup %3505  ;;  %v2293_v7 = vadd.f32 1.0, %v3504_v30  ;;  %3507 = vpow2.f32 %v3331_v41  ;;  %v5483_v41 = vld [vmem:[#allocation11 + $0x188] sm:$0xff]  ;;  %v5486_v30 = vld [vmem:[#allocation11 + $0x190] sm:$0xff] }
 0x6ff   :  { %v2312_v48 = vadd.f32 1.0, %v3506_v29  ;;  %v5489_v29 = vld [vmem:[#allocation11 + $0x198] sm:$0xff] }
 0x700   :  { %3509 = vrcp.f32 %v2293_v7  ;;  %v2305_v31 = vand.u32 2147483648, %v2293_v7  ;;  %v2303_v3 = vand.u32 2147483647, %v2293_v7  ;;  %vm2299_vm14 = vweird.f32 %v2293_v7 }
 0x701   :  { %3511 = vrcp.f32 %v2312_v48  ;;  %v2324_v1 = vand.u32 2147483648, %v2312_v48  ;;  %v2322_v4 = vand.u32 2147483647, %v2312_v48  ;;  %vm2318_vm15 = vweird.f32 %v2312_v48 }
 0x702   :  { %v2306_v23 = vor.u32 1.1754944e-38, %v2305_v31  ;;  %vm2304_vm2 = vcmp.eq.f32.partialorder %v2303_v3, 8.507059e+37  ;;  %v5534_v31 = vld [vmem:[#allocation11 + $0x110] sm:$0xff]  ;;  %v5543_v3 = vld [vmem:[#allocation11 + $0xe8] sm:$0xff] }
 0x703   :  { %v2325_v20 = vor.u32 1.1754944e-38, %v2324_v1  ;;  %vm2323_vm3 = vcmp.eq.f32.partialorder %v2322_v4, 8.507059e+37  ;;  %v5537_v1 = vld [vmem:[#allocation11 + $0x118] sm:$0xff] }
 0x704   :  { %v3508_v19 = vpop.eup %3507  ;;  %v5549_v4 = vld [vmem:[#allocation11 + $0xf8] sm:$0xff] }
 0x705   :  { %v2332_v56 = vadd.f32 1.0, %v3508_v19  ;;  %v5501_v19 = vld [vmem:[#allocation11 + $0x178] sm:$0xff] }
 0x706   :  { %v3510_v6 = vpop.eup %3509 }
 0x707   :  { %v3512_v15 = vpop.eup %3511  ;;  %v2295_v28 = vmul.f32 %v3510_v6, %v2293_v7  ;;  %3513 = vrcp.f32 %v2332_v56  ;;  %vm2300_vm12 = vweird.f32 %v3510_v6  ;;  %v2344_v40 = vand.u32 2147483648, %v2332_v56  ;;  %v5492_v7 = vld [vmem:[#allocation11 + $0x160] sm:$0xff] }
 0x708   :  { %v2314_v36 = vmul.f32 %v3512_v15, %v2312_v48  ;;  %3515 = vtanh.f32 %v2287_v14  ;;  %vm2319_vm13 = vweird.f32 %v3512_v15  ;;  %vm2301_vm0 = vmor %vm2299_vm14, %vm2300_vm12  ;;  %vm2338_vm5 = vweird.f32 %v2332_v56  ;;  %v5495_v48 = vld [vmem:[#allocation11 + $0x168] sm:$0xff]  ;;  %v5516_v14 = vld [vmem:[#allocation11 + $0x120] sm:$0xff] }
 0x709   :  { %v2296_v51 = vsub.f32 1.0, %v2295_v28  ;;  %vm2320_vm1 = vmor %vm2318_vm15, %vm2319_vm13  ;;  %v2342_v44 = vand.u32 2147483647, %v2332_v56  ;;  %v2345_v47 = vor.u32 1.1754944e-38, %v2344_v40  ;;  %v5522_v28 = vld [vmem:[#allocation11 + $0x130] sm:$0xff]  ;;  %v5600_v40 = vld [vmem:[#allocation11 + $0x40] sm:$0xff] }
 0x70a   :  { %v2315_v37 = vsub.f32 1.0, %v2314_v36  ;;  %v5525_v36 = vld [vmem:[#allocation11 + $0x138] sm:$0xff]  ;;  %6534 = vst [vmem:[#allocation26_spill] sm:$0xff] %v5600_v40 }
 0x70b   :  { %v2297_v5 = vmul.f32 %v3510_v6, %v2296_v51  ;;  %vm2343_vm7 = vcmp.eq.f32.partialorder %v2342_v44, 8.507059e+37  ;;  %v5528_v51 = vld [vmem:[#allocation11 + $0x100] sm:$0xff]  ;;  %v5603_v44 = vld [vmem:[#allocation11 + $0x48] sm:$0xff] }
 0x70c   :  { %v2316_v24 = vmul.f32 %v3512_v15, %v2315_v37  ;;  %v5531_v37 = vld [vmem:[#allocation11 + $0x108] sm:$0xff]  ;;  %6535 = vst [vmem:[#allocation29_spill] sm:$0xff] %v5603_v44 }
 0x70d   :  { %v3514_v18 = vpop.eup %3513  ;;  %v2298_v8 = vadd.f32 %v3510_v6, %v2297_v5  ;;  %v5540_v5 = vld [vmem:[#allocation11 + $0xe0] sm:$0xff] }
 0x70e   :  { %v2317_v32 = vadd.f32 %v3512_v15, %v2316_v24  ;;  %v2334_v54 = vmul.f32 %v3514_v18, %v2332_v56  ;;  %v3516_v17 = vpop.eup %3515  ;;  %vm2339_vm4 = vweird.f32 %v3514_v18  ;;  %v5510_v56 = vld [vmem:[#allocation11 + $0x150] sm:$0xff] }
 0x70f   :  { %v2302_v2 = vsel %vm2301_vm0, %v3510_v6, %v2298_v8  ;;  %vm2340_vm6 = vmor %vm2338_vm5, %vm2339_vm4  ;;  %v5513_v6 = vld [vmem:[#allocation11 + $0x158] sm:$0xff]  ;;  %v5546_v24 = vld [vmem:[#allocation11 + $0xf0] sm:$0xff] }
 0x710   :  { %v2307_v27 = vsel %vm2304_vm2, %v2306_v23, %v2302_v2  ;;  %v2321_v63 = vsel %vm2320_vm1, %v3512_v15, %v2317_v32  ;;  %v2335_v52 = vsub.f32 1.0, %v2334_v54  ;;  %v5519_v15 = vld [vmem:[#allocation11 + $0x128] sm:$0xff]  ;;  %v5558_v23 = vld [vmem:[#allocation11 + $0xd0] sm:$0xff]  ;;  %v5561_v32 = vld [vmem:[#allocation11 + $0xd8] sm:$0xff] }
 0x711   :  { %v2326_v34 = vsel %vm2323_vm3, %v2325_v20, %v2321_v63  ;;  %v2349_v35 = vmul.f32 %v3516_v17, %v2307_v27  ;;  %v5555_v8 = vld [vmem:[#allocation11 + $0xc8] sm:$0xff]  ;;  %6520 = vst [vmem:[#allocation20_spill] sm:$0xff] %v5558_v23  ;;  %v5564_v54 = vld [vmem:[#allocation11 + $0xa0] sm:$0xff]  ;;  %v5570_v2 = vld [vmem:[#allocation11 + $0xb0] sm:$0xff] }
 0x712   :  { %v2348_v60 = vmul.f32 %v2326_v34, %v5365_v22  ;;  %v2336_v53 = vmul.f32 %v3514_v18, %v2335_v52  ;;  %v5444_v22 = vld [vmem:[#allocation11 + $0x1e0] sm:$0xff]  ;;  %6521 = vst [vmem:[#allocation56_spill] sm:$0xff] %v5561_v32  ;;  %v5567_v20 = vld [vmem:[#allocation11 + $0xa8] sm:$0xff]  ;;  %v5573_v17 = vld [vmem:[#allocation11 + $0xb8] sm:$0xff] }
 0x713   :  { %6522 = vst [vmem:[#allocation50_spill] sm:$0xff] %v5564_v54  ;;  %v5576_v27 = vld [vmem:[#allocation11 + $0x80] sm:$0xff]  ;;  %v5579_v63 = vld [vmem:[#allocation11 + $0x88] sm:$0xff]  ;;  %v5582_v52 = vld [vmem:[#allocation11 + $0x90] sm:$0xff] }
 0x714   :  { %v5441_v46 = vadd.f32 %v2349_v35, %v2348_v60  ;;  %v2337_v38 = vadd.f32 %v3514_v18, %v2336_v53  ;;  %6523 = vst [vmem:[#allocation51_spill] sm:$0xff] %v5567_v20  ;;  %v5585_v34 = vld [vmem:[#allocation11 + $0x98] sm:$0xff]  ;;  %v5588_v35 = vld [vmem:[#allocation11 + $0x60] sm:$0xff]  ;;  %v5591_v60 = vld [vmem:[#allocation11 + $0x68] sm:$0xff] }
 0x715   :  { %6524 = vst [vmem:[#allocation53_spill] sm:$0xff] %v5570_v2  ;;  %v5594_v53 = vld [vmem:[#allocation11 + $0x70] sm:$0xff] }
 0x716   :  { %3517 = vtanh.f32 %v5441_v46  ;;  %v2341_v45 = vsel %vm2340_vm6, %v3514_v18, %v2337_v38  ;;  %v5552_v18 = vld [vmem:[#allocation11 + $0xc0] sm:$0xff]  ;;  %6525 = vst [vmem:[#allocation23_spill] sm:$0xff] %v5573_v17  ;;  %v5597_v38 = vld [vmem:[#allocation11 + $0x78] sm:$0xff] }
 0x717   :  { %v2346_v50 = vsel %vm2343_vm7, %v2345_v47, %v2341_v45  ;;  %6526 = vst [vmem:[#allocation52_spill] sm:$0xff] %v5576_v27  ;;  %v5606_v45 = vld [vmem:[#allocation11 + $0x50] sm:$0xff]  ;;  %v5609_v47 = vld [vmem:[#allocation11 + $0x58] sm:$0xff] }
 0x718   :  { %6527 = vst [vmem:[#allocation54_spill] sm:$0xff] %v5579_v63 }
 0x719   :  { %6528 = vst [vmem:[#allocation55_spill] sm:$0xff] %v5582_v52 }
 0x71a   :  { %6529 = vst [vmem:[#allocation27_spill] sm:$0xff] %v5585_v34 }
 0x71b   :  { %6530 = vst [vmem:[#allocation59_spill] sm:$0xff] %v5588_v35 }
 0x71c   :  { %v3518_v58 = vpop.eup %3517  ;;  %6531 = vst [vmem:[#allocation25_spill] sm:$0xff] %v5591_v60 }
 0x71d   :  { %v2352_v49 = vmul.f32 %v3518_v58, %v2346_v50  ;;  %6532 = vst [vmem:[#allocation24_spill] sm:$0xff] %v5594_v53  ;;  %v5612_v58 = vld [vmem:[#allocation11 + $0x20] sm:$0xff]  ;;  %v5615_v50 = vld [vmem:[#allocation11 + $0x28] sm:$0xff] }
 0x71e   :  { %6533 = vst [vmem:[#allocation30_spill] sm:$0xff] %v5597_v38 }
 0x71f   :  { %2376 = vmatmul.f32.vlgmr.msra.gmra.mxu0 %v2352_v49  ;;  %2396 = vmatmul.f32.vlgmr.msra.gmra.mxu1 %v2352_v49  ;;  %6536 = vst [vmem:[#allocation28_spill] sm:$0xff] %v5606_v45 }
 0x720   :  { %2416 = vmatmul.f32.vlgmr.msra.gmra.mxu2 %v2352_v49  ;;  %2436 = vmatmul.f32.vlgmr.msra.gmra.mxu3 %v2352_v49  ;;  %6537 = vst [vmem:[#allocation34_spill] sm:$0xff] %v5609_v47  ;;  %v5618_v49 = vld [vmem:[#allocation11 + $0x30] sm:$0xff] }
 0x721   :  { %2670 = vmatpush.msra.mxu0 %v5444_v22  ;;  %2690 = vmatpush.msra.mxu1 %v5447_v21  ;;  %6538 = vst [vmem:[#allocation31_spill] sm:$0xff] %v5612_v58 }
 0x722   :  { %2710 = vmatpush.msra.mxu2 %v5450_v57  ;;  %2730 = vmatpush.msra.mxu3 %v5453_v25  ;;  %6539 = vst [vmem:[#allocation33_spill] sm:$0xff] %v5615_v50 }
 0x723   :  { %2671 = vmatpush.msra.mxu0 %v5456_v10  ;;  %2691 = vmatpush.msra.mxu1 %v5459_v12  ;;  %6540 = vst [vmem:[#allocation32_spill] sm:$0xff] %v5618_v49 }
 0x724   :  { %2711 = vmatpush.msra.mxu2 %v5462_v0  ;;  %2731 = vmatpush.msra.mxu3 %v5465_v16 }
 0x725   :  { %2672 = vmatpush.msra.mxu0 %v5468_v62  ;;  %2692 = vmatpush.msra.mxu1 %v5471_v55 }
 0x726   :  { %2712 = vmatpush.msra.mxu2 %v5474_v61  ;;  %2732 = vmatpush.msra.mxu3 %v5477_v9 }
 0x727   :  { %2673 = vmatpush.msra.mxu0 %v5480_v42  ;;  %2693 = vmatpush.msra.mxu1 %v5483_v41 }
 0x728   :  { %2713 = vmatpush.msra.mxu2 %v5486_v30  ;;  %2733 = vmatpush.msra.mxu3 %v5489_v29 }
 0x729   :  { %2674 = vmatpush.msra.mxu0 %v5492_v7  ;;  %2694 = vmatpush.msra.mxu1 %v5495_v48 }
 0x72a   :  { %2714 = vmatpush.msra.mxu2 %v5498_v26  ;;  %2734 = vmatpush.msra.mxu3 %v5501_v19 }
 0x72b   :  { %2675 = vmatpush.msra.mxu0 %v5504_v33  ;;  %2695 = vmatpush.msra.mxu1 %v5507_v11 }
 0x72c   :  { %2715 = vmatpush.msra.mxu2 %v5510_v56  ;;  %2735 = vmatpush.msra.mxu3 %v5513_v6 }
 0x72d   :  { %2676 = vmatpush.msra.mxu0 %v5516_v14  ;;  %2696 = vmatpush.msra.mxu1 %v5519_v15 }
 0x72e   :  { %2716 = vmatpush.msra.mxu2 %v5522_v28  ;;  %2736 = vmatpush.msra.mxu3 %v5525_v36 }
 0x72f   :  { %2677 = vmatpush.msra.mxu0 %v5528_v51  ;;  %2697 = vmatpush.msra.mxu1 %v5531_v37 }
 0x730   :  { %2717 = vmatpush.msra.mxu2 %v5534_v31  ;;  %2737 = vmatpush.msra.mxu3 %v5537_v1 }
 0x731   :  { %2678 = vmatpush.msra.mxu0 %v5540_v5  ;;  %2698 = vmatpush.msra.mxu1 %v5543_v3 }
 0x732   :  { %2718 = vmatpush.msra.mxu2 %v5546_v24  ;;  %2738 = vmatpush.msra.mxu3 %v5549_v4 }
 0x733   :  { %2679 = vmatpush.msra.mxu0 %v5552_v18  ;;  %2699 = vmatpush.msra.mxu1 %v5555_v8 }
 0x734   :  { %2719 = vmatpush.msra.mxu2 %v5558_v23  ;;  %2739 = vmatpush.msra.mxu3 %v5561_v32 }
 0x735   :  { %2680 = vmatpush.msra.mxu0 %v5564_v54  ;;  %2700 = vmatpush.msra.mxu1 %v5567_v20 }
 0x736   :  { %2720 = vmatpush.msra.mxu2 %v5570_v2  ;;  %2740 = vmatpush.msra.mxu3 %v5573_v17 }
 0x737   :  { %2681 = vmatpush.msra.mxu0 %v5576_v27  ;;  %2701 = vmatpush.msra.mxu1 %v5579_v63 }
 0x738   :  { %2721 = vmatpush.msra.mxu2 %v5582_v52  ;;  %2741 = vmatpush.msra.mxu3 %v5585_v34  ;;  %v6548_v52 = vld [vmem:[#allocation47_spill] sm:$0xff] }
 0x739   :  { %2682 = vmatpush.msra.mxu0 %v5588_v35  ;;  %2702 = vmatpush.msra.mxu1 %v5591_v60 }
 0x73a   :  { %2722 = vmatpush.msra.mxu2 %v5594_v53  ;;  %2742 = vmatpush.msra.mxu3 %v5597_v38 }
 0x73b   :  { %2683 = vmatpush.msra.mxu0 %v5600_v40  ;;  %2703 = vmatpush.msra.mxu1 %v5603_v44  ;;  %v5621_v44 = vld [vmem:[#allocation11 + $0x38] sm:$0xff] }
 0x73c   :  { %2723 = vmatpush.msra.mxu2 %v5606_v45  ;;  %2743 = vmatpush.msra.mxu3 %v5609_v47  ;;  %6541 = vst [vmem:[#allocation38_spill] sm:$0xff] %v5621_v44  ;;  %v5624_v45 = vld [vmem:[#allocation11] sm:$0xff]  ;;  %v5627_v47 = vld [vmem:[#allocation11 + $0x8] sm:$0xff] }
 0x73d   :  { %2684 = vmatpush.msra.mxu0 %v5612_v58  ;;  %2704 = vmatpush.msra.mxu1 %v5615_v50  ;;  %6542 = vst [vmem:[#allocation37_spill] sm:$0xff] %v5624_v45  ;;  %v5630_v58 = vld [vmem:[#allocation11 + $0x10] sm:$0xff]  ;;  %v5633_v50 = vld [vmem:[#allocation11 + $0x18] sm:$0xff] }
 0x73e   :  { %2724 = vmatpush.msra.mxu2 %v5618_v49  ;;  %2744 = vmatpush.msra.mxu3 %v5621_v44  ;;  %6543 = vst [vmem:[#allocation35_spill] sm:$0xff] %v5627_v47  ;;  %v6546_v49 = vld [vmem:[#allocation45_spill] sm:$0xff]  ;;  %v6547_v44 = vld [vmem:[#allocation44_spill] sm:$0xff] }
 0x73f   :  { %2685 = vmatpush.msra.mxu0 %v5624_v45  ;;  %2705 = vmatpush.msra.mxu1 %v5627_v47  ;;  %6544 = vst [vmem:[#allocation36_spill] sm:$0xff] %v5630_v58  ;;  %v1807_v40 = vadd.f32 %v6546_v49, %v6512_v39  ;;  %v1848_v38 = vadd.f32 %v6547_v44, %v6514_v13 }
 0x740   :  { %2725 = vmatpush.msra.mxu2 %v5630_v58  ;;  %6545 = vst [vmem:[#allocation40_spill] sm:$0xff] %v5633_v50  ;;  %2745 = vmatpush.msra.mxu3 %v5633_v50  ;;  %v1930_v58 = vadd.f32 %v6548_v52, %v6516_v43 }
 0x79c   :  { %v2377_v53 = vpop.f32.mrf.mxu0  ;;  %v2397_v45 = vpop.f32.mrf.mxu1 }
 0x79d   :  { %v2440_v60 = vadd.f32 %v2377_v53, %v1807_v40  ;;  %v2441_v35 = vadd.f32 %v2397_v45, %v1848_v38 }
 0x79f   :  { %v3332_v34 = vmul.f32 -1.442695, %v2440_v60  ;;  %v3333_v47 = vmul.f32 -1.442695, %v2441_v35  ;;  %v6549_v60 = vld [vmem:[#allocation57_spill] sm:$0xff] }
 0x7a0   :  { %v1889_v35 = vadd.f32 %v6549_v60, %v6518_v59 }
 0x7a1   :  { %3519 = vpow2.f32 %v3332_v34 }
 0x7a2   :  { %3521 = vpow2.f32 %v3333_v47 }
 0x7a3   :  { %v2437_v63 = vpop.f32.mrf.mxu3  ;;  %v2417_v44 = vpop.f32.mrf.mxu2 }
 0x7a4   :  { %v2443_v27 = vadd.f32 %v2437_v63, %v1930_v58  ;;  %v2442_v40 = vadd.f32 %v2417_v44, %v1889_v35 }
 0x7a6   :  { %v3334_v50 = vmul.f32 -1.442695, %v2443_v27 }
 0x7a7   :  { %v3520_v17 = vpop.eup %3519 }
 0x7a8   :  { %v3522_v2 = vpop.eup %3521  ;;  %v2448_v49 = vadd.f32 1.0, %v3520_v17  ;;  %3523 = vpow2.f32 %v3334_v50 }
 0x7a9   :  { %v2467_v39 = vadd.f32 1.0, %v3522_v2 }
 0x7aa   :  { %3525 = vrcp.f32 %v2448_v49  ;;  %v2460_v58 = vand.u32 2147483648, %v2448_v49  ;;  %v2458_v50 = vand.u32 2147483647, %v2448_v49  ;;  %vm2454_vm10 = vweird.f32 %v2448_v49 }
 0x7ab   :  { %3527 = vrcp.f32 %v2467_v39  ;;  %v2479_v17 = vand.u32 2147483648, %v2467_v39  ;;  %v2477_v13 = vand.u32 2147483647, %v2467_v39  ;;  %vm2473_vm11 = vweird.f32 %v2467_v39 }
 0x7ac   :  { %v2461_v44 = vor.u32 1.1754944e-38, %v2460_v58  ;;  %vm2459_vm14 = vcmp.eq.f32.partialorder %v2458_v50, 8.507059e+37 }
 0x7ad   :  { %vm2478_vm15 = vcmp.eq.f32.partialorder %v2477_v13, 8.507059e+37 }
 0x7ae   :  { %v3524_v53 = vpop.eup %3523 }
 0x7af   :  { %v2487_v34 = vadd.f32 1.0, %v3524_v53 }
 0x7b0   :  { %v3526_v38 = vpop.eup %3525 }
 0x7b1   :  { %v3528_v52 = vpop.eup %3527  ;;  %v2450_v45 = vmul.f32 %v3526_v38, %v2448_v49  ;;  %3529 = vrcp.f32 %v2487_v34  ;;  %vm2455_vm8 = vweird.f32 %v3526_v38  ;;  %vm2493_vm1 = vweird.f32 %v2487_v34 }
 0x7b2   :  { %v2469_v63 = vmul.f32 %v3528_v52, %v2467_v39  ;;  %3531 = vtanh.f32 %v2442_v40  ;;  %vm2474_vm9 = vweird.f32 %v3528_v52  ;;  %vm2456_vm12 = vmor %vm2454_vm10, %vm2455_vm8 }
 0x7b3   :  { %v2451_v27 = vsub.f32 1.0, %v2450_v45  ;;  %vm2475_vm13 = vmor %vm2473_vm11, %vm2474_vm9  ;;  %v2480_v45 = vor.u32 1.1754944e-38, %v2479_v17 }
 0x7b4   :  { %v2470_v47 = vsub.f32 1.0, %v2469_v63 }
 0x7b5   :  { %v2452_v2 = vmul.f32 %v3526_v38, %v2451_v27 }
 0x7b6   :  { %v2471_v43 = vmul.f32 %v3528_v52, %v2470_v47 }
 0x7b7   :  { %v3530_v20 = vpop.eup %3529  ;;  %v2453_v60 = vadd.f32 %v3526_v38, %v2452_v2 }
 0x7b8   :  { %v2472_v53 = vadd.f32 %v3528_v52, %v2471_v43  ;;  %v2489_v35 = vmul.f32 %v3530_v20, %v2487_v34  ;;  %v3532_v40 = vpop.eup %3531  ;;  %vm2494_vm0 = vweird.f32 %v3530_v20  ;;  %v2499_v43 = vand.u32 2147483648, %v2487_v34 }
 0x7b9   :  { %v2457_v63 = vsel %vm2456_vm12, %v3526_v38, %v2453_v60  ;;  %v2497_v38 = vand.u32 2147483647, %v2487_v34  ;;  %vm2495_vm2 = vmor %vm2493_vm1, %vm2494_vm0  ;;  %v6556_v34 = vld [vmem:[#allocation52_spill] sm:$0xff]  ;;  %v6557_v60 = vld [vmem:[#allocation54_spill] sm:$0xff] }
 0x7ba   :  { %v2462_v59 = vsel %vm2459_vm14, %v2461_v44, %v2457_v63  ;;  %v2476_v27 = vsel %vm2475_vm13, %v3528_v52, %v2472_v53  ;;  %v2490_v54 = vsub.f32 1.0, %v2489_v35  ;;  %v2500_v17 = vor.u32 1.1754944e-38, %v2499_v43  ;;  %v6558_v44 = vld [vmem:[#allocation55_spill] sm:$0xff]  ;;  %v6562_v63 = vld [vmem:[#allocation24_spill] sm:$0xff] }
 0x7bb   :  { %v2481_v47 = vsel %vm2478_vm15, %v2480_v45, %v2476_v27  ;;  %v2504_v32 = vmul.f32 %v3532_v40, %v2462_v59  ;;  %vm2498_vm3 = vcmp.eq.f32.partialorder %v2497_v38, 8.507059e+37  ;;  %v6550_v59 = vld [vmem:[#allocation20_spill] sm:$0xff]  ;;  %v6559_v53 = vld [vmem:[#allocation27_spill] sm:$0xff]  ;;  %v6561_v45 = vld [vmem:[#allocation25_spill] sm:$0xff] }
 0x7bc   :  { %v2503_v23 = vmul.f32 %v2481_v47, %v5441_v46  ;;  %v2491_v2 = vmul.f32 %v3530_v20, %v2490_v54  ;;  %v6551_v46 = vld [vmem:[#allocation56_spill] sm:$0xff]  ;;  %v6554_v54 = vld [vmem:[#allocation53_spill] sm:$0xff]  ;;  %v6560_v35 = vld [vmem:[#allocation59_spill] sm:$0xff] }
 0x7bd   :  { %v6563_v40 = vld [vmem:[#allocation30_spill] sm:$0xff]  ;;  %v6565_v47 = vld [vmem:[#allocation29_spill] sm:$0xff]  ;;  %v6568_v43 = vld [vmem:[#allocation31_spill] sm:$0xff] }
 0x7be   :  { %v5645_v49 = vadd.f32 %v2504_v32, %v2503_v23  ;;  %v2492_v39 = vadd.f32 %v3530_v20, %v2491_v2  ;;  %v6552_v23 = vld [vmem:[#allocation50_spill] sm:$0xff]  ;;  %v6553_v32 = vld [vmem:[#allocation51_spill] sm:$0xff]  ;;  %v6566_v2 = vld [vmem:[#allocation28_spill] sm:$0xff] }
 0x7bf   :  { %v6564_v27 = vld [vmem:[#allocation26_spill] sm:$0xff]  ;;  %v6569_v38 = vld [vmem:[#allocation33_spill] sm:$0xff] }
 0x7c0   :  { %3533 = vtanh.f32 %v5645_v49  ;;  %v2496_v58 = vsel %vm2495_vm2, %v3530_v20, %v2492_v39  ;;  %v6555_v20 = vld [vmem:[#allocation23_spill] sm:$0xff]  ;;  %v6567_v39 = vld [vmem:[#allocation34_spill] sm:$0xff] }
 0x7c1   :  { %v2501_v52 = vsel %vm2498_vm3, %v2500_v17, %v2496_v58  ;;  %v6570_v58 = vld [vmem:[#allocation32_spill] sm:$0xff]  ;;  %v6571_v17 = vld [vmem:[#allocation38_spill] sm:$0xff] }
 0x7c6   :  { %v3534_v13 = vpop.eup %3533 }
 0x7c7   :  { %v2507_v50 = vmul.f32 %v3534_v13, %v2501_v52  ;;  %v6572_v13 = vld [vmem:[#allocation37_spill] sm:$0xff]  ;;  %v6573_v52 = vld [vmem:[#allocation35_spill] sm:$0xff] }
 0x7c9   :  { %2531 = vmatmul.f32.vlgmr.msrb.gmra.mxu0 %v2507_v50  ;;  %2551 = vmatmul.f32.vlgmr.msrb.gmra.mxu1 %v2507_v50 }
 0x7ca   :  { %2571 = vmatmul.f32.vlgmr.msrb.gmra.mxu2 %v2507_v50  ;;  %2591 = vmatmul.f32.vlgmr.msrb.gmra.mxu3 %v2507_v50  ;;  %v6574_v50 = vld [vmem:[#allocation36_spill] sm:$0xff] }
 0x7cb   :  { %2825 = vmatpush.msrb.mxu0 %v5444_v22  ;;  %2845 = vmatpush.msrb.mxu1 %v5447_v21 }
 0x7cc   :  { %2865 = vmatpush.msrb.mxu2 %v5450_v57  ;;  %2885 = vmatpush.msrb.mxu3 %v5453_v25 }
 0x7cd   :  { %2826 = vmatpush.msrb.mxu0 %v5456_v10  ;;  %2846 = vmatpush.msrb.mxu1 %v5459_v12 }
 0x7ce   :  { %2866 = vmatpush.msrb.mxu2 %v5462_v0  ;;  %2886 = vmatpush.msrb.mxu3 %v5465_v16 }
 0x7cf   :  { %2827 = vmatpush.msrb.mxu0 %v5468_v62  ;;  %2847 = vmatpush.msrb.mxu1 %v5471_v55 }
 0x7d0   :  { %2867 = vmatpush.msrb.mxu2 %v5474_v61  ;;  %2887 = vmatpush.msrb.mxu3 %v5477_v9 }
 0x7d1   :  { %2828 = vmatpush.msrb.mxu0 %v5480_v42  ;;  %2848 = vmatpush.msrb.mxu1 %v5483_v41 }
 0x7d2   :  { %2868 = vmatpush.msrb.mxu2 %v5486_v30  ;;  %2888 = vmatpush.msrb.mxu3 %v5489_v29 }
 0x7d3   :  { %2829 = vmatpush.msrb.mxu0 %v5492_v7  ;;  %2849 = vmatpush.msrb.mxu1 %v5495_v48 }
 0x7d4   :  { %2869 = vmatpush.msrb.mxu2 %v5498_v26  ;;  %2889 = vmatpush.msrb.mxu3 %v5501_v19 }
 0x7d5   :  { %2830 = vmatpush.msrb.mxu0 %v5504_v33  ;;  %2850 = vmatpush.msrb.mxu1 %v5507_v11 }
 0x7d6   :  { %2870 = vmatpush.msrb.mxu2 %v5510_v56  ;;  %2890 = vmatpush.msrb.mxu3 %v5513_v6 }
 0x7d7   :  { %2831 = vmatpush.msrb.mxu0 %v5516_v14  ;;  %2851 = vmatpush.msrb.mxu1 %v5519_v15 }
 0x7d8   :  { %2871 = vmatpush.msrb.mxu2 %v5522_v28  ;;  %2891 = vmatpush.msrb.mxu3 %v5525_v36 }
 0x7d9   :  { %2832 = vmatpush.msrb.mxu0 %v5528_v51  ;;  %2852 = vmatpush.msrb.mxu1 %v5531_v37 }
 0x7da   :  { %2872 = vmatpush.msrb.mxu2 %v5534_v31  ;;  %2892 = vmatpush.msrb.mxu3 %v5537_v1 }
 0x7db   :  { %2833 = vmatpush.msrb.mxu0 %v5540_v5  ;;  %2853 = vmatpush.msrb.mxu1 %v5543_v3 }
 0x7dc   :  { %2873 = vmatpush.msrb.mxu2 %v5546_v24  ;;  %2893 = vmatpush.msrb.mxu3 %v5549_v4 }
 0x7dd   :  { %2834 = vmatpush.msrb.mxu0 %v5552_v18  ;;  %2854 = vmatpush.msrb.mxu1 %v5555_v8 }
 0x7de   :  { %2874 = vmatpush.msrb.mxu2 %v6550_v59  ;;  %2894 = vmatpush.msrb.mxu3 %v6551_v46 }
 0x7df   :  { %2835 = vmatpush.msrb.mxu0 %v6552_v23  ;;  %2855 = vmatpush.msrb.mxu1 %v6553_v32 }
 0x7e0   :  { %2875 = vmatpush.msrb.mxu2 %v6554_v54  ;;  %2895 = vmatpush.msrb.mxu3 %v6555_v20 }
 0x7e1   :  { %2836 = vmatpush.msrb.mxu0 %v6556_v34  ;;  %2856 = vmatpush.msrb.mxu1 %v6557_v60 }
 0x7e2   :  { %2876 = vmatpush.msrb.mxu2 %v6558_v44  ;;  %2896 = vmatpush.msrb.mxu3 %v6559_v53  ;;  %v6581_v44 = vld [vmem:[#allocation68_spill] sm:$0xff] }
 0x7e3   :  { %2837 = vmatpush.msrb.mxu0 %v6560_v35  ;;  %2857 = vmatpush.msrb.mxu1 %v6561_v45 }
 0x7e4   :  { %2877 = vmatpush.msrb.mxu2 %v6562_v63  ;;  %2897 = vmatpush.msrb.mxu3 %v6563_v40  ;;  %v6579_v63 = vld [vmem:[#allocation67_spill] sm:$0xff] }
 0x7e5   :  { %2838 = vmatpush.msrb.mxu0 %v6564_v27  ;;  %2858 = vmatpush.msrb.mxu1 %v6565_v47  ;;  %v6575_v27 = vld [vmem:[#allocation40_spill] sm:$0xff]  ;;  %v6576_v47 = vld [vmem:[#allocation66_spill] sm:$0xff] }
 0x7e6   :  { %2878 = vmatpush.msrb.mxu2 %v6566_v2  ;;  %2898 = vmatpush.msrb.mxu3 %v6567_v39  ;;  %v6577_v2 = vld [vmem:[#allocation49_spill] sm:$0xff]  ;;  %v6578_v39 = vld [vmem:[#allocation70_spill] sm:$0xff] }
 0x7e7   :  { %2839 = vmatpush.msrb.mxu0 %v6568_v43  ;;  %2859 = vmatpush.msrb.mxu1 %v6569_v38  ;;  %v1810_v40 = vadd.f32 %v6577_v2, %v6576_v47  ;;  %v1851_v43 = vadd.f32 %v6579_v63, %v6578_v39 }
 0x7e8   :  { %2879 = vmatpush.msrb.mxu2 %v6570_v58  ;;  %2899 = vmatpush.msrb.mxu3 %v6571_v17 }
 0x7e9   :  { %2840 = vmatpush.msrb.mxu0 %v6572_v13  ;;  %2860 = vmatpush.msrb.mxu1 %v6573_v52  ;;  %v6580_v13 = vld [vmem:[#allocation16_spill] sm:$0xff] }
 0x7ea   :  { %2880 = vmatpush.msrb.mxu2 %v6574_v50  ;;  %2900 = vmatpush.msrb.mxu3 %v6575_v27  ;;  %v1933_v52 = vadd.f32 %v6581_v44, %v6580_v13 }
 0x846   :  { %v2532_v45 = vpop.f32.mrf.mxu0  ;;  %v2552_v38 = vpop.f32.mrf.mxu1 }
 0x847   :  { %v2595_v35 = vadd.f32 %v2532_v45, %v1810_v40  ;;  %v2596_v58 = vadd.f32 %v2552_v38, %v1851_v43  ;;  %v6582_v40 = vld [vmem:[#allocation21_spill] sm:$0xff] }
 0x849   :  { %v3335_v53 = vmul.f32 -1.442695, %v2595_v35  ;;  %v3336_v17 = vmul.f32 -1.442695, %v2596_v58  ;;  %v6583_v35 = vld [vmem:[#allocation60_spill] sm:$0xff] }
 0x84a   :  { %v1892_v43 = vadd.f32 %v6583_v35, %v6582_v40 }
 0x84b   :  { %3535 = vpow2.f32 %v3335_v53 }
 0x84c   :  { %3537 = vpow2.f32 %v3336_v17 }
 0x84d   :  { %v2592_v50 = vpop.f32.mrf.mxu3  ;;  %v2572_v63 = vpop.f32.mrf.mxu2 }
 0x84e   :  { %v2598_v60 = vadd.f32 %v2592_v50, %v1933_v52  ;;  %v2597_v58 = vadd.f32 %v2572_v63, %v1892_v43 }
 0x850   :  { %v3337_v27 = vmul.f32 -1.442695, %v2598_v60 }
 0x851   :  { %v3536_v34 = vpop.eup %3535 }
 0x852   :  { %v3538_v20 = vpop.eup %3537  ;;  %v2603_v2 = vadd.f32 1.0, %v3536_v34  ;;  %3539 = vpow2.f32 %v3337_v27 }
 0x853   :  { %v2622_v47 = vadd.f32 1.0, %v3538_v20 }
 0x854   :  { %3541 = vrcp.f32 %v2603_v2  ;;  %v2615_v13 = vand.u32 2147483648, %v2603_v2  ;;  %v2613_v27 = vand.u32 2147483647, %v2603_v2  ;;  %vm2609_vm6 = vweird.f32 %v2603_v2 }
 0x855   :  { %3543 = vrcp.f32 %v2622_v47  ;;  %v2634_v34 = vand.u32 2147483648, %v2622_v47  ;;  %v2632_v54 = vand.u32 2147483647, %v2622_v47  ;;  %vm2628_vm7 = vweird.f32 %v2622_v47 }
 0x856   :  { %v2616_v63 = vor.u32 1.1754944e-38, %v2615_v13  ;;  %vm2614_vm10 = vcmp.eq.f32.partialorder %v2613_v27, 8.507059e+37 }
 0x857   :  { %vm2633_vm11 = vcmp.eq.f32.partialorder %v2632_v54, 8.507059e+37 }
 0x858   :  { %v3540_v45 = vpop.eup %3539 }
 0x859   :  { %v2642_v53 = vadd.f32 1.0, %v3540_v45 }
 0x85a   :  { %v3542_v38 = vpop.eup %3541 }
 0x85b   :  { %v3544_v44 = vpop.eup %3543  ;;  %v2605_v17 = vmul.f32 %v3542_v38, %v2603_v2  ;;  %3545 = vrcp.f32 %v2642_v53  ;;  %vm2610_vm4 = vweird.f32 %v3542_v38  ;;  %vm2648_vm13 = vweird.f32 %v2642_v53 }
 0x85c   :  { %v2624_v52 = vmul.f32 %v3544_v44, %v2622_v47  ;;  %3547 = vtanh.f32 %v2597_v58  ;;  %vm2629_vm5 = vweird.f32 %v3544_v44  ;;  %vm2611_vm8 = vmor %vm2609_vm6, %vm2610_vm4  ;;  %v2652_v13 = vand.u32 2147483647, %v2642_v53 }
 0x85d   :  { %v2606_v60 = vsub.f32 1.0, %v2605_v17  ;;  %vm2630_vm9 = vmor %vm2628_vm7, %vm2629_vm5  ;;  %v2635_v17 = vor.u32 1.1754944e-38, %v2634_v34 }
 0x85e   :  { %v2625_v50 = vsub.f32 1.0, %v2624_v52  ;;  %vm2653_vm15 = vcmp.eq.f32.partialorder %v2652_v13, 8.507059e+37  ;;  %v6603_v13 = vld [vmem:[#allocation33_spill] sm:$0xff] }
 0x85f   :  { %v2607_v20 = vmul.f32 %v3542_v38, %v2606_v60 }
 0x860   :  { %v2626_v39 = vmul.f32 %v3544_v44, %v2625_v50 }
 0x861   :  { %v3546_v32 = vpop.eup %3545  ;;  %v2608_v35 = vadd.f32 %v3542_v38, %v2607_v20 }
 0x862   :  { %v2627_v45 = vadd.f32 %v3544_v44, %v2626_v39  ;;  %v2644_v43 = vmul.f32 %v3546_v32, %v2642_v53  ;;  %v3548_v58 = vpop.eup %3547  ;;  %vm2649_vm12 = vweird.f32 %v3546_v32  ;;  %v2654_v39 = vand.u32 2147483648, %v2642_v53  ;;  %v6590_v53 = vld [vmem:[#allocation52_spill] sm:$0xff] }
 0x863   :  { %v2612_v52 = vsel %vm2611_vm8, %v3542_v38, %v2608_v35  ;;  %vm2650_vm14 = vmor %vm2648_vm13, %vm2649_vm12  ;;  %v6591_v35 = vld [vmem:[#allocation54_spill] sm:$0xff] }
 0x864   :  { %v2617_v40 = vsel %vm2614_vm10, %v2616_v63, %v2612_v52  ;;  %v2631_v60 = vsel %vm2630_vm9, %v3544_v44, %v2627_v45  ;;  %v2645_v23 = vsub.f32 1.0, %v2644_v43  ;;  %v2655_v34 = vor.u32 1.1754944e-38, %v2654_v39  ;;  %v6592_v63 = vld [vmem:[#allocation55_spill] sm:$0xff]  ;;  %v6596_v52 = vld [vmem:[#allocation24_spill] sm:$0xff] }
 0x865   :  { %v2636_v50 = vsel %vm2633_vm11, %v2635_v17, %v2631_v60  ;;  %v2659_v46 = vmul.f32 %v3548_v58, %v2617_v40  ;;  %v6589_v40 = vld [vmem:[#allocation23_spill] sm:$0xff]  ;;  %v6595_v17 = vld [vmem:[#allocation25_spill] sm:$0xff]  ;;  %v6597_v58 = vld [vmem:[#allocation30_spill] sm:$0xff] }
 0x866   :  { %v2658_v59 = vmul.f32 %v2636_v50, %v5645_v49  ;;  %v2646_v20 = vmul.f32 %v3546_v32, %v2645_v23  ;;  %v6584_v49 = vld [vmem:[#allocation20_spill] sm:$0xff]  ;;  %v6587_v23 = vld [vmem:[#allocation51_spill] sm:$0xff]  ;;  %v6598_v60 = vld [vmem:[#allocation26_spill] sm:$0xff] }
 0x867   :  { %v6593_v45 = vld [vmem:[#allocation27_spill] sm:$0xff]  ;;  %v6599_v50 = vld [vmem:[#allocation29_spill] sm:$0xff] }
 0x868   :  { %v5721_v2 = vadd.f32 %v2659_v46, %v2658_v59  ;;  %v2647_v47 = vadd.f32 %v3546_v32, %v2646_v20  ;;  %v6585_v59 = vld [vmem:[#allocation56_spill] sm:$0xff]  ;;  %v6586_v46 = vld [vmem:[#allocation50_spill] sm:$0xff]  ;;  %v6594_v43 = vld [vmem:[#allocation59_spill] sm:$0xff] }
 0x869   :  { %v6600_v20 = vld [vmem:[#allocation28_spill] sm:$0xff]  ;;  %v6602_v39 = vld [vmem:[#allocation31_spill] sm:$0xff] }
 0x86a   :  { %3549 = vtanh.f32 %v5721_v2  ;;  %v2651_v38 = vsel %vm2650_vm14, %v3546_v32, %v2647_v47  ;;  %v6588_v32 = vld [vmem:[#allocation53_spill] sm:$0xff]  ;;  %v6601_v47 = vld [vmem:[#allocation34_spill] sm:$0xff] }
 0x86b   :  { %v2656_v44 = vsel %vm2653_vm15, %v2655_v34, %v2651_v38  ;;  %v6604_v38 = vld [vmem:[#allocation32_spill] sm:$0xff]  ;;  %v6605_v34 = vld [vmem:[#allocation38_spill] sm:$0xff] }
 0x870   :  { %v3550_v54 = vpop.eup %3549 }
 0x871   :  { %v2662_v27 = vmul.f32 %v3550_v54, %v2656_v44  ;;  %v6606_v54 = vld [vmem:[#allocation37_spill] sm:$0xff]  ;;  %v6607_v44 = vld [vmem:[#allocation35_spill] sm:$0xff] }
 0x873   :  { %2686 = vmatmul.f32.vlgmr.msra.gmra.mxu0 %v2662_v27  ;;  %2706 = vmatmul.f32.vlgmr.msra.gmra.mxu1 %v2662_v27 }
 0x874   :  { %2726 = vmatmul.f32.vlgmr.msra.gmra.mxu2 %v2662_v27  ;;  %2746 = vmatmul.f32.vlgmr.msra.gmra.mxu3 %v2662_v27  ;;  %v6608_v27 = vld [vmem:[#allocation36_spill] sm:$0xff] }
 0x875   :  { %2980 = vmatpush.msra.mxu0 %v5444_v22  ;;  %3000 = vmatpush.msra.mxu1 %v5447_v21 }
 0x876   :  { %3020 = vmatpush.msra.mxu2 %v5450_v57  ;;  %3040 = vmatpush.msra.mxu3 %v5453_v25 }
 0x877   :  { %2981 = vmatpush.msra.mxu0 %v5456_v10  ;;  %3001 = vmatpush.msra.mxu1 %v5459_v12 }
 0x878   :  { %3021 = vmatpush.msra.mxu2 %v5462_v0  ;;  %3041 = vmatpush.msra.mxu3 %v5465_v16 }
 0x879   :  { %2982 = vmatpush.msra.mxu0 %v5468_v62  ;;  %3002 = vmatpush.msra.mxu1 %v5471_v55 }
 0x87a   :  { %3022 = vmatpush.msra.mxu2 %v5474_v61  ;;  %3042 = vmatpush.msra.mxu3 %v5477_v9 }
 0x87b   :  { %2983 = vmatpush.msra.mxu0 %v5480_v42  ;;  %3003 = vmatpush.msra.mxu1 %v5483_v41 }
 0x87c   :  { %3023 = vmatpush.msra.mxu2 %v5486_v30  ;;  %3043 = vmatpush.msra.mxu3 %v5489_v29 }
 0x87d   :  { %2984 = vmatpush.msra.mxu0 %v5492_v7  ;;  %3004 = vmatpush.msra.mxu1 %v5495_v48 }
 0x87e   :  { %3024 = vmatpush.msra.mxu2 %v5498_v26  ;;  %3044 = vmatpush.msra.mxu3 %v5501_v19 }
 0x87f   :  { %2985 = vmatpush.msra.mxu0 %v5504_v33  ;;  %3005 = vmatpush.msra.mxu1 %v5507_v11 }
 0x880   :  { %3025 = vmatpush.msra.mxu2 %v5510_v56  ;;  %3045 = vmatpush.msra.mxu3 %v5513_v6 }
 0x881   :  { %2986 = vmatpush.msra.mxu0 %v5516_v14  ;;  %3006 = vmatpush.msra.mxu1 %v5519_v15 }
 0x882   :  { %3026 = vmatpush.msra.mxu2 %v5522_v28  ;;  %3046 = vmatpush.msra.mxu3 %v5525_v36 }
 0x883   :  { %2987 = vmatpush.msra.mxu0 %v5528_v51  ;;  %3007 = vmatpush.msra.mxu1 %v5531_v37 }
 0x884   :  { %3027 = vmatpush.msra.mxu2 %v5534_v31  ;;  %3047 = vmatpush.msra.mxu3 %v5537_v1 }
 0x885   :  { %2988 = vmatpush.msra.mxu0 %v5540_v5  ;;  %3008 = vmatpush.msra.mxu1 %v5543_v3 }
 0x886   :  { %3028 = vmatpush.msra.mxu2 %v5546_v24  ;;  %3048 = vmatpush.msra.mxu3 %v5549_v4 }
 0x887   :  { %2989 = vmatpush.msra.mxu0 %v5552_v18  ;;  %3009 = vmatpush.msra.mxu1 %v5555_v8 }
 0x888   :  { %3029 = vmatpush.msra.mxu2 %v6584_v49  ;;  %3049 = vmatpush.msra.mxu3 %v6585_v59 }
 0x889   :  { %2990 = vmatpush.msra.mxu0 %v6586_v46  ;;  %3010 = vmatpush.msra.mxu1 %v6587_v23 }
 0x88a   :  { %3030 = vmatpush.msra.mxu2 %v6588_v32  ;;  %3050 = vmatpush.msra.mxu3 %v6589_v40 }
 0x88b   :  { %2991 = vmatpush.msra.mxu0 %v6590_v53  ;;  %3011 = vmatpush.msra.mxu1 %v6591_v35 }
 0x88c   :  { %3031 = vmatpush.msra.mxu2 %v6592_v63  ;;  %3051 = vmatpush.msra.mxu3 %v6593_v45  ;;  %v6615_v63 = vld [vmem:[#allocation73_spill] sm:$0xff] }
 0x88d   :  { %2992 = vmatpush.msra.mxu0 %v6594_v43  ;;  %3012 = vmatpush.msra.mxu1 %v6595_v17 }
 0x88e   :  { %3032 = vmatpush.msra.mxu2 %v6596_v52  ;;  %3052 = vmatpush.msra.mxu3 %v6597_v58  ;;  %v6613_v52 = vld [vmem:[#allocation71_spill] sm:$0xff] }
 0x88f   :  { %2993 = vmatpush.msra.mxu0 %v6598_v60  ;;  %3013 = vmatpush.msra.mxu1 %v6599_v50  ;;  %v6609_v60 = vld [vmem:[#allocation40_spill] sm:$0xff]  ;;  %v6610_v50 = vld [vmem:[#allocation66_spill] sm:$0xff] }
 0x890   :  { %3033 = vmatpush.msra.mxu2 %v6600_v20  ;;  %3053 = vmatpush.msra.mxu3 %v6601_v47  ;;  %v6611_v20 = vld [vmem:[#allocation58_spill] sm:$0xff] }
 0x891   :  { %2994 = vmatpush.msra.mxu0 %v6602_v39  ;;  %3014 = vmatpush.msra.mxu1 %v6603_v13  ;;  %v1813_v58 = vadd.f32 %v6611_v20, %v6610_v50  ;;  %v6612_v47 = vld [vmem:[#allocation70_spill] sm:$0xff] }
 0x892   :  { %3034 = vmatpush.msra.mxu2 %v6604_v38  ;;  %3054 = vmatpush.msra.mxu3 %v6605_v34  ;;  %v1854_v39 = vadd.f32 %v6613_v52, %v6612_v47 }
 0x893   :  { %2995 = vmatpush.msra.mxu0 %v6606_v54  ;;  %3015 = vmatpush.msra.mxu1 %v6607_v44  ;;  %v6614_v54 = vld [vmem:[#allocation16_spill] sm:$0xff] }
 0x894   :  { %3035 = vmatpush.msra.mxu2 %v6608_v27  ;;  %3055 = vmatpush.msra.mxu3 %v6609_v60  ;;  %v1936_v44 = vadd.f32 %v6615_v63, %v6614_v54 }
 0x8f0   :  { %v2687_v17 = vpop.f32.mrf.mxu0  ;;  %v2707_v13 = vpop.f32.mrf.mxu1 }
 0x8f1   :  { %v2750_v43 = vadd.f32 %v2687_v17, %v1813_v58  ;;  %v2751_v38 = vadd.f32 %v2707_v13, %v1854_v39  ;;  %v6616_v58 = vld [vmem:[#allocation21_spill] sm:$0xff] }
 0x8f3   :  { %v3338_v45 = vmul.f32 -1.442695, %v2750_v43  ;;  %v3339_v34 = vmul.f32 -1.442695, %v2751_v38  ;;  %v6617_v43 = vld [vmem:[#allocation62_spill] sm:$0xff] }
 0x8f4   :  { %v1895_v39 = vadd.f32 %v6617_v43, %v6616_v58 }
 0x8f5   :  { %3551 = vpow2.f32 %v3338_v45 }
 0x8f6   :  { %3553 = vpow2.f32 %v3339_v34 }
 0x8f7   :  { %v2747_v27 = vpop.f32.mrf.mxu3  ;;  %v2727_v52 = vpop.f32.mrf.mxu2 }
 0x8f8   :  { %v2753_v35 = vadd.f32 %v2747_v27, %v1936_v44  ;;  %v2752_v38 = vadd.f32 %v2727_v52, %v1895_v39 }
 0x8fa   :  { %v3340_v60 = vmul.f32 -1.442695, %v2753_v35 }
 0x8fb   :  { %v3552_v53 = vpop.eup %3551 }
 0x8fc   :  { %v3554_v40 = vpop.eup %3553  ;;  %v2758_v20 = vadd.f32 1.0, %v3552_v53  ;;  %3555 = vpow2.f32 %v3340_v60 }
 0x8fd   :  { %v2777_v50 = vadd.f32 1.0, %v3554_v40 }
 0x8fe   :  { %3557 = vrcp.f32 %v2758_v20  ;;  %v2770_v54 = vand.u32 2147483648, %v2758_v20  ;;  %v2768_v60 = vand.u32 2147483647, %v2758_v20  ;;  %vm2764_vm2 = vweird.f32 %v2758_v20 }
 0x8ff   :  { %3559 = vrcp.f32 %v2777_v50  ;;  %v2789_v53 = vand.u32 2147483648, %v2777_v50  ;;  %v2787_v32 = vand.u32 2147483647, %v2777_v50  ;;  %vm2783_vm3 = vweird.f32 %v2777_v50 }
 0x900   :  { %v2771_v52 = vor.u32 1.1754944e-38, %v2770_v54  ;;  %vm2769_vm6 = vcmp.eq.f32.partialorder %v2768_v60, 8.507059e+37 }
 0x901   :  { %vm2788_vm7 = vcmp.eq.f32.partialorder %v2787_v32, 8.507059e+37 }
 0x902   :  { %v3556_v17 = vpop.eup %3555 }
 0x903   :  { %v2797_v45 = vadd.f32 1.0, %v3556_v17 }
 0x904   :  { %v3558_v13 = vpop.eup %3557 }
 0x905   :  { %v3560_v63 = vpop.eup %3559  ;;  %v2760_v34 = vmul.f32 %v3558_v13, %v2758_v20  ;;  %3561 = vrcp.f32 %v2797_v45  ;;  %vm2765_vm0 = vweird.f32 %v3558_v13  ;;  %vm2803_vm9 = vweird.f32 %v2797_v45 }
 0x906   :  { %v2779_v44 = vmul.f32 %v3560_v63, %v2777_v50  ;;  %3563 = vtanh.f32 %v2752_v38  ;;  %vm2784_vm1 = vweird.f32 %v3560_v63  ;;  %vm2766_vm4 = vmor %vm2764_vm2, %vm2765_vm0  ;;  %v2807_v54 = vand.u32 2147483647, %v2797_v45 }
 0x907   :  { %v2761_v35 = vsub.f32 1.0, %v2760_v34  ;;  %vm2785_vm5 = vmor %vm2783_vm3, %vm2784_vm1  ;;  %v2790_v34 = vor.u32 1.1754944e-38, %v2789_v53 }
 0x908   :  { %v2780_v27 = vsub.f32 1.0, %v2779_v44  ;;  %vm2808_vm11 = vcmp.eq.f32.partialorder %v2807_v54, 8.507059e+37 }
 0x909   :  { %v2762_v40 = vmul.f32 %v3558_v13, %v2761_v35 }
 0x90a   :  { %v2781_v47 = vmul.f32 %v3560_v63, %v2780_v27 }
 0x90b   :  { %v3562_v23 = vpop.eup %3561  ;;  %v2763_v43 = vadd.f32 %v3558_v13, %v2762_v40 }
 0x90c   :  { %v2782_v17 = vadd.f32 %v3560_v63, %v2781_v47  ;;  %v2799_v39 = vmul.f32 %v3562_v23, %v2797_v45  ;;  %v3564_v38 = vpop.eup %3563  ;;  %vm2804_vm8 = vweird.f32 %v3562_v23  ;;  %v2809_v47 = vand.u32 2147483648, %v2797_v45 }
 0x90d   :  { %v2767_v44 = vsel %vm2766_vm4, %v3558_v13, %v2763_v43  ;;  %vm2805_vm10 = vmor %vm2803_vm9, %vm2804_vm8 }
 0x90e   :  { %v2772_v58 = vsel %vm2769_vm6, %v2771_v52, %v2767_v44  ;;  %v2786_v35 = vsel %vm2785_vm5, %v3560_v63, %v2782_v17  ;;  %v2800_v46 = vsub.f32 1.0, %v2799_v39  ;;  %v2810_v53 = vor.u32 1.1754944e-38, %v2809_v47  ;;  %v6650_v44 = vld [vmem:[#allocation21_spill] sm:$0xff] }
 0x90f   :  { %v2791_v27 = vsel %vm2788_vm7, %v2790_v34, %v2786_v35  ;;  %v2814_v59 = vmul.f32 %v3564_v38, %v2772_v58  ;;  %v6651_v38 = vld [vmem:[#allocation17_spill] sm:$0xff] }
 0x910   :  { %v2813_v49 = vmul.f32 %v2791_v27, %v5721_v2  ;;  %v2801_v40 = vmul.f32 %v3562_v23, %v2800_v46  ;;  %v6648_v2 = vld [vmem:[#allocation16_spill] sm:$0xff]  ;;  %v1898_v35 = vadd.f32 %v6651_v38, %v6650_v44 }
 0x912   :  { %v5797_v20 = vadd.f32 %v2814_v59, %v2813_v49  ;;  %v2802_v50 = vadd.f32 %v3562_v23, %v2801_v40  ;;  %v6649_v49 = vld [vmem:[#allocation64_spill] sm:$0xff] }
 0x913   :  { %v1939_v59 = vadd.f32 %v6649_v49, %v6648_v2 }
 0x914   :  { %3565 = vtanh.f32 %v5797_v20  ;;  %v2806_v13 = vsel %vm2805_vm10, %v3562_v23, %v2802_v50 }
 0x915   :  { %v2811_v63 = vsel %vm2808_vm11, %v2810_v53, %v2806_v13 }
 0x91a   :  { %v3566_v32 = vpop.eup %3565 }
 0x91b   :  { %v2817_v60 = vmul.f32 %v3566_v32, %v2811_v63 }
 0x91d   :  { %2841 = vmatmul.f32.vlgmr.msrb.gmra.mxu0 %v2817_v60  ;;  %2861 = vmatmul.f32.vlgmr.msrb.gmra.mxu1 %v2817_v60 }
 0x91e   :  { %2881 = vmatmul.f32.vlgmr.msrb.gmra.mxu2 %v2817_v60  ;;  %2901 = vmatmul.f32.vlgmr.msrb.gmra.mxu3 %v2817_v60 }
 0x91f   :  { %3135 = vmatpush.msrb.mxu0 %v5444_v22  ;;  %3155 = vmatpush.msrb.mxu1 %v5447_v21  ;;  %v6618_v22 = vld [vmem:[#allocation20_spill] sm:$0xff] }
 0x920   :  { %3175 = vmatpush.msrb.mxu2 %v5450_v57  ;;  %3195 = vmatpush.msrb.mxu3 %v5453_v25  ;;  %v6619_v21 = vld [vmem:[#allocation56_spill] sm:$0xff]  ;;  %v6620_v57 = vld [vmem:[#allocation50_spill] sm:$0xff]  ;;  %v6621_v25 = vld [vmem:[#allocation51_spill] sm:$0xff] }
 0x921   :  { %3136 = vmatpush.msrb.mxu0 %v5456_v10  ;;  %3156 = vmatpush.msrb.mxu1 %v5459_v12  ;;  %v6622_v10 = vld [vmem:[#allocation53_spill] sm:$0xff]  ;;  %v6623_v12 = vld [vmem:[#allocation23_spill] sm:$0xff] }
 0x922   :  { %3176 = vmatpush.msrb.mxu2 %v5462_v0  ;;  %3196 = vmatpush.msrb.mxu3 %v5465_v16  ;;  %v6624_v0 = vld [vmem:[#allocation52_spill] sm:$0xff]  ;;  %v6625_v16 = vld [vmem:[#allocation54_spill] sm:$0xff] }
 0x923   :  { %3137 = vmatpush.msrb.mxu0 %v5468_v62  ;;  %3157 = vmatpush.msrb.mxu1 %v5471_v55  ;;  %v6626_v62 = vld [vmem:[#allocation55_spill] sm:$0xff] }
 0x924   :  { %3177 = vmatpush.msrb.mxu2 %v5474_v61  ;;  %3197 = vmatpush.msrb.mxu3 %v5477_v9  ;;  %v6627_v55 = vld [vmem:[#allocation27_spill] sm:$0xff]  ;;  %v6629_v9 = vld [vmem:[#allocation25_spill] sm:$0xff] }
 0x925   :  { %3138 = vmatpush.msrb.mxu0 %v5480_v42  ;;  %3158 = vmatpush.msrb.mxu1 %v5483_v41  ;;  %v6628_v61 = vld [vmem:[#allocation59_spill] sm:$0xff]  ;;  %v6630_v42 = vld [vmem:[#allocation24_spill] sm:$0xff]  ;;  %v6631_v41 = vld [vmem:[#allocation30_spill] sm:$0xff] }
 0x926   :  { %3178 = vmatpush.msrb.mxu2 %v5486_v30  ;;  %3198 = vmatpush.msrb.mxu3 %v5489_v29  ;;  %v6632_v30 = vld [vmem:[#allocation26_spill] sm:$0xff]  ;;  %v6633_v29 = vld [vmem:[#allocation29_spill] sm:$0xff] }
 0x927   :  { %3139 = vmatpush.msrb.mxu0 %v5492_v7  ;;  %3159 = vmatpush.msrb.mxu1 %v5495_v48  ;;  %v6634_v7 = vld [vmem:[#allocation28_spill] sm:$0xff]  ;;  %v6635_v48 = vld [vmem:[#allocation34_spill] sm:$0xff] }
 0x928   :  { %3179 = vmatpush.msrb.mxu2 %v5498_v26  ;;  %3199 = vmatpush.msrb.mxu3 %v5501_v19  ;;  %v6636_v26 = vld [vmem:[#allocation31_spill] sm:$0xff]  ;;  %v6637_v19 = vld [vmem:[#allocation33_spill] sm:$0xff] }
 0x929   :  { %3140 = vmatpush.msrb.mxu0 %v5504_v33  ;;  %3160 = vmatpush.msrb.mxu1 %v5507_v11  ;;  %v6638_v33 = vld [vmem:[#allocation32_spill] sm:$0xff]  ;;  %v6639_v11 = vld [vmem:[#allocation38_spill] sm:$0xff] }
 0x92a   :  { %3180 = vmatpush.msrb.mxu2 %v5510_v56  ;;  %3200 = vmatpush.msrb.mxu3 %v5513_v6  ;;  %v6640_v56 = vld [vmem:[#allocation37_spill] sm:$0xff]  ;;  %v6641_v6 = vld [vmem:[#allocation35_spill] sm:$0xff] }
 0x92b   :  { %3141 = vmatpush.msrb.mxu0 %v5516_v14  ;;  %3161 = vmatpush.msrb.mxu1 %v5519_v15  ;;  %v6642_v14 = vld [vmem:[#allocation36_spill] sm:$0xff] }
 0x92c   :  { %3181 = vmatpush.msrb.mxu2 %v5522_v28  ;;  %3201 = vmatpush.msrb.mxu3 %v5525_v36  ;;  %v6643_v15 = vld [vmem:[#allocation40_spill] sm:$0xff]  ;;  %v6644_v28 = vld [vmem:[#allocation66_spill] sm:$0xff]  ;;  %v6645_v36 = vld [vmem:[#allocation63_spill] sm:$0xff] }
 0x92d   :  { %3142 = vmatpush.msrb.mxu0 %v5528_v51  ;;  %3162 = vmatpush.msrb.mxu1 %v5531_v37  ;;  %v1816_v51 = vadd.f32 %v6645_v36, %v6644_v28  ;;  %v6646_v37 = vld [vmem:[#allocation70_spill] sm:$0xff] }
 0x92e   :  { %3182 = vmatpush.msrb.mxu2 %v5534_v31  ;;  %3202 = vmatpush.msrb.mxu3 %v5537_v1  ;;  %v6647_v31 = vld [vmem:[#allocation61_spill] sm:$0xff] }
 0x92f   :  { %3143 = vmatpush.msrb.mxu0 %v5540_v5  ;;  %3163 = vmatpush.msrb.mxu1 %v5543_v3  ;;  %v1857_v1 = vadd.f32 %v6647_v31, %v6646_v37 }
 0x930   :  { %3183 = vmatpush.msrb.mxu2 %v5546_v24  ;;  %3203 = vmatpush.msrb.mxu3 %v5549_v4 }
 0x931   :  { %3144 = vmatpush.msrb.mxu0 %v5552_v18  ;;  %3164 = vmatpush.msrb.mxu1 %v5555_v8 }
 0x932   :  { %3184 = vmatpush.msrb.mxu2 %v6618_v22  ;;  %3204 = vmatpush.msrb.mxu3 %v6619_v21 }
 0x933   :  { %3145 = vmatpush.msrb.mxu0 %v6620_v57  ;;  %3165 = vmatpush.msrb.mxu1 %v6621_v25 }
 0x934   :  { %3185 = vmatpush.msrb.mxu2 %v6622_v10  ;;  %3205 = vmatpush.msrb.mxu3 %v6623_v12 }
 0x935   :  { %3146 = vmatpush.msrb.mxu0 %v6624_v0  ;;  %3166 = vmatpush.msrb.mxu1 %v6625_v16 }
 0x936   :  { %3186 = vmatpush.msrb.mxu2 %v6626_v62  ;;  %3206 = vmatpush.msrb.mxu3 %v6627_v55 }
 0x937   :  { %3147 = vmatpush.msrb.mxu0 %v6628_v61  ;;  %3167 = vmatpush.msrb.mxu1 %v6629_v9 }
 0x938   :  { %3187 = vmatpush.msrb.mxu2 %v6630_v42  ;;  %3207 = vmatpush.msrb.mxu3 %v6631_v41 }
 0x939   :  { %3148 = vmatpush.msrb.mxu0 %v6632_v30  ;;  %3168 = vmatpush.msrb.mxu1 %v6633_v29 }
 0x93a   :  { %3188 = vmatpush.msrb.mxu2 %v6634_v7  ;;  %3208 = vmatpush.msrb.mxu3 %v6635_v48 }
 0x93b   :  { %3149 = vmatpush.msrb.mxu0 %v6636_v26  ;;  %3169 = vmatpush.msrb.mxu1 %v6637_v19 }
 0x93c   :  { %3189 = vmatpush.msrb.mxu2 %v6638_v33  ;;  %3209 = vmatpush.msrb.mxu3 %v6639_v11 }
 0x93d   :  { %3150 = vmatpush.msrb.mxu0 %v6640_v56  ;;  %3170 = vmatpush.msrb.mxu1 %v6641_v6 }
 0x93e   :  { %3190 = vmatpush.msrb.mxu2 %v6642_v14  ;;  %3210 = vmatpush.msrb.mxu3 %v6643_v15 }
 0x99a   :  { %v2842_v5 = vpop.f32.mrf.mxu0  ;;  %v2862_v3 = vpop.f32.mrf.mxu1 }
 0x99b   :  { %v2905_v24 = vadd.f32 %v2842_v5, %v1816_v51  ;;  %v2906_v4 = vadd.f32 %v2862_v3, %v1857_v1  ;;  %v6653_v1 = vld [vmem:[#allocation74_spill] sm:$0xff] }
 0x99c   :  { %v1860_v5 = vadd.f32 %v6653_v1, %v6646_v37 }
 0x99d   :  { %v3341_v18 = vmul.f32 -1.442695, %v2905_v24  ;;  %v3342_v8 = vmul.f32 -1.442695, %v2906_v4 }
 0x99f   :  { %3567 = vpow2.f32 %v3341_v18 }
 0x9a0   :  { %3569 = vpow2.f32 %v3342_v8 }
 0x9a1   :  { %v2902_v46 = vpop.f32.mrf.mxu3  ;;  %v2882_v39 = vpop.f32.mrf.mxu2 }
 0x9a2   :  { %v2908_v23 = vadd.f32 %v2902_v46, %v1939_v59  ;;  %v2907_v50 = vadd.f32 %v2882_v39, %v1898_v35  ;;  %v6654_v59 = vld [vmem:[#allocation22_spill] sm:$0xff]  ;;  %v6655_v35 = vld [vmem:[#allocation72_spill] sm:$0xff] }
 0x9a3   :  { %v1942_v46 = vadd.f32 %v6654_v59, %v6648_v2 }
 0x9a4   :  { %v3343_v58 = vmul.f32 -1.442695, %v2908_v23 }
 0x9a5   :  { %v3568_v45 = vpop.eup %3567 }
 0x9a6   :  { %v3570_v43 = vpop.eup %3569  ;;  %v2913_v52 = vadd.f32 1.0, %v3568_v45  ;;  %3571 = vpow2.f32 %v3343_v58 }
 0x9a7   :  { %v2932_v17 = vadd.f32 1.0, %v3570_v43 }
 0x9a8   :  { %3573 = vrcp.f32 %v2913_v52  ;;  %v2925_v63 = vand.u32 2147483648, %v2913_v52  ;;  %v2923_v21 = vand.u32 2147483647, %v2913_v52  ;;  %vm2919_vm14 = vweird.f32 %v2913_v52 }
 0x9a9   :  { %3575 = vrcp.f32 %v2932_v17  ;;  %v2944_v60 = vand.u32 2147483648, %v2932_v17  ;;  %v2942_v25 = vand.u32 2147483647, %v2932_v17  ;;  %vm2938_vm15 = vweird.f32 %v2932_v17 }
 0x9aa   :  { %v2926_v0 = vor.u32 1.1754944e-38, %v2925_v63  ;;  %vm2924_vm2 = vcmp.eq.f32.partialorder %v2923_v21, 8.507059e+37 }
 0x9ab   :  { %v2945_v55 = vor.u32 1.1754944e-38, %v2944_v60  ;;  %vm2943_vm3 = vcmp.eq.f32.partialorder %v2942_v25, 8.507059e+37 }
 0x9ac   :  { %v3572_v34 = vpop.eup %3571 }
 0x9ad   :  { %v2952_v27 = vadd.f32 1.0, %v3572_v34 }
 0x9ae   :  { %v3574_v40 = vpop.eup %3573 }
 0x9af   :  { %v3576_v47 = vpop.eup %3575  ;;  %v2915_v54 = vmul.f32 %v3574_v40, %v2913_v52  ;;  %3577 = vrcp.f32 %v2952_v27  ;;  %vm2920_vm12 = vweird.f32 %v3574_v40  ;;  %v2964_v11 = vand.u32 2147483648, %v2952_v27 }
 0x9b0   :  { %v2934_v13 = vmul.f32 %v3576_v47, %v2932_v17  ;;  %3579 = vtanh.f32 %v2907_v50  ;;  %vm2939_vm13 = vweird.f32 %v3576_v47  ;;  %vm2921_vm0 = vmor %vm2919_vm14, %vm2920_vm12  ;;  %vm2958_vm5 = vweird.f32 %v2952_v27 }
 0x9b1   :  { %v2916_v53 = vsub.f32 1.0, %v2915_v54  ;;  %vm2940_vm1 = vmor %vm2938_vm15, %vm2939_vm13  ;;  %v2962_v56 = vand.u32 2147483647, %v2952_v27  ;;  %v2965_v14 = vor.u32 1.1754944e-38, %v2964_v11 }
 0x9b2   :  { %v2935_v32 = vsub.f32 1.0, %v2934_v13 }
 0x9b3   :  { %v2917_v22 = vmul.f32 %v3574_v40, %v2916_v53  ;;  %vm2963_vm7 = vcmp.eq.f32.partialorder %v2962_v56, 8.507059e+37 }
 0x9b4   :  { %v2936_v57 = vmul.f32 %v3576_v47, %v2935_v32 }
 0x9b5   :  { %v3578_v10 = vpop.eup %3577  ;;  %v2918_v12 = vadd.f32 %v3574_v40, %v2917_v22 }
 0x9b6   :  { %v2937_v16 = vadd.f32 %v3576_v47, %v2936_v57  ;;  %v2954_v62 = vmul.f32 %v3578_v10, %v2952_v27  ;;  %v3580_v9 = vpop.eup %3579  ;;  %vm2959_vm4 = vweird.f32 %v3578_v10  ;;  %v1901_v27 = vadd.f32 %v6655_v35, %v6650_v44 }
 0x9b7   :  { %v2922_v61 = vsel %vm2921_vm0, %v3574_v40, %v2918_v12  ;;  %vm2960_vm6 = vmor %vm2958_vm5, %vm2959_vm4 }
 0x9b8   :  { %v2927_v42 = vsel %vm2924_vm2, %v2926_v0, %v2922_v61  ;;  %v2941_v41 = vsel %vm2940_vm1, %v3576_v47, %v2937_v16  ;;  %v2955_v30 = vsub.f32 1.0, %v2954_v62 }
 0x9b9   :  { %v2946_v29 = vsel %vm2943_vm3, %v2945_v55, %v2941_v41  ;;  %v2969_v7 = vmul.f32 %v3580_v9, %v2927_v42 }
 0x9ba   :  { %v2968_v48 = vmul.f32 %v2946_v29, %v5797_v20  ;;  %v2956_v26 = vmul.f32 %v3578_v10, %v2955_v30  ;;  %v6652_v20 = vld [vmem:[#allocation69_spill] sm:$0xff] }
 0x9bb   :  { %v1819_v31 = vadd.f32 %v6652_v20, %v6644_v28 }
 0x9bc   :  { %v5873_v19 = vadd.f32 %v2969_v7, %v2968_v48  ;;  %v2957_v33 = vadd.f32 %v3578_v10, %v2956_v26 }
 0x9be   :  { %3581 = vtanh.f32 %v5873_v19  ;;  %v2961_v6 = vsel %vm2960_vm6, %v3578_v10, %v2957_v33 }
 0x9bf   :  { %v2966_v36 = vsel %vm2963_vm7, %v2965_v14, %v2961_v6 }
 0x9c4   :  { %v3582_v15 = vpop.eup %3581 }
 0x9c5   :  { %v2972_v51 = vmul.f32 %v3582_v15, %v2966_v36 }
 0x9c7   :  { %2996 = vmatmul.f32.vlgmr.msra.gmra.mxu0 %v2972_v51  ;;  %3016 = vmatmul.f32.vlgmr.msra.gmra.mxu1 %v2972_v51 }
 0x9c8   :  { %3036 = vmatmul.f32.vlgmr.msra.gmra.mxu2 %v2972_v51  ;;  %3056 = vmatmul.f32.vlgmr.msra.gmra.mxu3 %v2972_v51 }
 0xa44   :  { %v2997_v3 = vpop.f32.mrf.mxu0  ;;  %v3017_v24 = vpop.f32.mrf.mxu1 }
 0xa45   :  { %v3060_v4 = vadd.f32 %v2997_v3, %v1819_v31  ;;  %v3061_v18 = vadd.f32 %v3017_v24, %v1860_v5  ;;  %v6657_v5 = vld [vmem:[#allocation65_spill] sm:$0xff] }
 0xa46   :  { %v1863_v3 = vadd.f32 %v6657_v5, %v6646_v37 }
 0xa47   :  { %v3344_v8 = vmul.f32 -1.442695, %v3060_v4  ;;  %v3345_v49 = vmul.f32 -1.442695, %v3061_v18 }
 0xa49   :  { %3583 = vpow2.f32 %v3344_v8 }
 0xa4a   :  { %3585 = vpow2.f32 %v3345_v49 }
 0xa4b   :  { %v3057_v23 = vpop.f32.mrf.mxu3  ;;  %v3037_v34 = vpop.f32.mrf.mxu2 }
 0xa4c   :  { %v3063_v58 = vadd.f32 %v3057_v23, %v1942_v46  ;;  %v3062_v47 = vadd.f32 %v3037_v34, %v1901_v27  ;;  %v6658_v46 = vld [vmem:[#allocation18_spill] sm:$0xff] }
 0xa4d   :  { %v1945_v23 = vadd.f32 %v6658_v46, %v6648_v2 }
 0xa4e   :  { %v3346_v45 = vmul.f32 -1.442695, %v3063_v58 }
 0xa4f   :  { %v3584_v43 = vpop.eup %3583 }
 0xa50   :  { %v3586_v52 = vpop.eup %3585  ;;  %v3068_v17 = vadd.f32 1.0, %v3584_v43  ;;  %3587 = vpow2.f32 %v3346_v45 }
 0xa51   :  { %v3087_v39 = vadd.f32 1.0, %v3586_v52 }
 0xa52   :  { %3589 = vrcp.f32 %v3068_v17  ;;  %v3080_v60 = vand.u32 2147483648, %v3068_v17  ;;  %v3078_v57 = vand.u32 2147483647, %v3068_v17  ;;  %vm3074_vm10 = vweird.f32 %v3068_v17 }
 0xa53   :  { %3591 = vrcp.f32 %v3087_v39  ;;  %v3099_v22 = vand.u32 2147483648, %v3087_v39  ;;  %v3097_v10 = vand.u32 2147483647, %v3087_v39  ;;  %vm3093_vm11 = vweird.f32 %v3087_v39 }
 0xa54   :  { %v3081_v16 = vor.u32 1.1754944e-38, %v3080_v60  ;;  %vm3079_vm14 = vcmp.eq.f32.partialorder %v3078_v57, 8.507059e+37 }
 0xa55   :  { %v3100_v61 = vor.u32 1.1754944e-38, %v3099_v22  ;;  %vm3098_vm15 = vcmp.eq.f32.partialorder %v3097_v10, 8.507059e+37 }
 0xa56   :  { %v3588_v38 = vpop.eup %3587 }
 0xa57   :  { %v3107_v40 = vadd.f32 1.0, %v3588_v38  ;;  %v6659_v38 = vld [vmem:[#allocation19_spill] sm:$0xff] }
 0xa58   :  { %v3590_v50 = vpop.eup %3589  ;;  %v1904_v35 = vadd.f32 %v6659_v38, %v6650_v44 }
 0xa59   :  { %v3592_v54 = vpop.eup %3591  ;;  %v3070_v13 = vmul.f32 %v3590_v50, %v3068_v17  ;;  %3593 = vrcp.f32 %v3107_v40  ;;  %vm3075_vm8 = vweird.f32 %v3590_v50  ;;  %v3119_v6 = vand.u32 2147483648, %v3107_v40 }
 0xa5a   :  { %v3089_v53 = vmul.f32 %v3592_v54, %v3087_v39  ;;  %3595 = vtanh.f32 %v3062_v47  ;;  %vm3094_vm9 = vweird.f32 %v3592_v54  ;;  %vm3076_vm12 = vmor %vm3074_vm10, %vm3075_vm8  ;;  %vm3113_vm1 = vweird.f32 %v3107_v40 }
 0xa5b   :  { %v3071_v32 = vsub.f32 1.0, %v3070_v13  ;;  %vm3095_vm13 = vmor %vm3093_vm11, %vm3094_vm9  ;;  %v3117_v14 = vand.u32 2147483647, %v3107_v40  ;;  %v3120_v36 = vor.u32 1.1754944e-38, %v3119_v6 }
 0xa5c   :  { %v3090_v63 = vsub.f32 1.0, %v3089_v53 }
 0xa5d   :  { %v3072_v21 = vmul.f32 %v3590_v50, %v3071_v32  ;;  %vm3118_vm3 = vcmp.eq.f32.partialorder %v3117_v14, 8.507059e+37 }
 0xa5e   :  { %v3091_v25 = vmul.f32 %v3592_v54, %v3090_v63 }
 0xa5f   :  { %v3594_v12 = vpop.eup %3593  ;;  %v3073_v0 = vadd.f32 %v3590_v50, %v3072_v21 }
 0xa60   :  { %v3092_v62 = vadd.f32 %v3592_v54, %v3091_v25  ;;  %v3109_v55 = vmul.f32 %v3594_v12, %v3107_v40  ;;  %v3596_v42 = vpop.eup %3595  ;;  %vm3114_vm0 = vweird.f32 %v3594_v12 }
 0xa61   :  { %v3077_v9 = vsel %vm3076_vm12, %v3590_v50, %v3073_v0  ;;  %vm3115_vm2 = vmor %vm3113_vm1, %vm3114_vm0 }
 0xa62   :  { %v3082_v41 = vsel %vm3079_vm14, %v3081_v16, %v3077_v9  ;;  %v3096_v30 = vsel %vm3095_vm13, %v3592_v54, %v3092_v62  ;;  %v3110_v29 = vsub.f32 1.0, %v3109_v55 }
 0xa63   :  { %v3101_v7 = vsel %vm3098_vm15, %v3100_v61, %v3096_v30  ;;  %v3124_v48 = vmul.f32 %v3596_v42, %v3082_v41 }
 0xa64   :  { %v3123_v26 = vmul.f32 %v3101_v7, %v5873_v19  ;;  %v3111_v33 = vmul.f32 %v3594_v12, %v3110_v29  ;;  %v6656_v19 = vld [vmem:[#allocation48_spill] sm:$0xff] }
 0xa65   :  { %v1822_v1 = vadd.f32 %v6656_v19, %v6644_v28 }
 0xa66   :  { %v5885_v11 = vadd.f32 %v3124_v48, %v3123_v26  ;;  %v3112_v56 = vadd.f32 %v3594_v12, %v3111_v33 }
 0xa68   :  { %3597 = vtanh.f32 %v5885_v11  ;;  %v3116_v15 = vsel %vm3115_vm2, %v3594_v12, %v3112_v56 }
 0xa69   :  { %v3121_v20 = vsel %vm3118_vm3, %v3120_v36, %v3116_v15 }
 0xa6e   :  { %v3598_v51 = vpop.eup %3597 }
 0xa6f   :  { %v3127_v31 = vmul.f32 %v3598_v51, %v3121_v20 }
 0xa71   :  { %3151 = vmatmul.f32.vlgmr.msrb.gmra.mxu0 %v3127_v31  ;;  %3171 = vmatmul.f32.vlgmr.msrb.gmra.mxu1 %v3127_v31 }
 0xa72   :  { %3191 = vmatmul.f32.vlgmr.msrb.gmra.mxu2 %v3127_v31  ;;  %3211 = vmatmul.f32.vlgmr.msrb.gmra.mxu3 %v3127_v31 }
 0xaee   :  { %v3152_v24 = vpop.f32.mrf.mxu0  ;;  %v3172_v4 = vpop.f32.mrf.mxu1 }
 0xaef   :  { %v3215_v18 = vadd.f32 %v3152_v24, %v1822_v1  ;;  %v3216_v8 = vadd.f32 %v3172_v4, %v1863_v3 }
 0xaf1   :  { %v3347_v49 = vmul.f32 -1.442695, %v3215_v18  ;;  %v3348_v59 = vmul.f32 -1.442695, %v3216_v8 }
 0xaf3   :  { %3599 = vpow2.f32 %v3347_v49 }
 0xaf4   :  { %3601 = vpow2.f32 %v3348_v59 }
 0xaf5   :  { %v3212_v58 = vpop.f32.mrf.mxu3  ;;  %v3192_v37 = vpop.f32.mrf.mxu2 }
 0xaf6   :  { %v3218_v45 = vadd.f32 %v3212_v58, %v1945_v23  ;;  %v3217_v50 = vadd.f32 %v3192_v37, %v1904_v35 }
 0xaf8   :  { %v3349_v43 = vmul.f32 -1.442695, %v3218_v45 }
 0xaf9   :  { %v3600_v52 = vpop.eup %3599 }
 0xafa   :  { %v3602_v17 = vpop.eup %3601  ;;  %v3223_v28 = vadd.f32 1.0, %v3600_v52  ;;  %3603 = vpow2.f32 %v3349_v43 }
 0xafb   :  { %v3242_v39 = vadd.f32 1.0, %v3602_v17 }
 0xafc   :  { %3605 = vrcp.f32 %v3223_v28  ;;  %v3235_v32 = vand.u32 2147483648, %v3223_v28  ;;  %v3233_v22 = vand.u32 2147483647, %v3223_v28  ;;  %vm3229_vm6 = vweird.f32 %v3223_v28 }
 0xafd   :  { %3607 = vrcp.f32 %v3242_v39  ;;  %v3254_v63 = vand.u32 2147483648, %v3242_v39  ;;  %v3252_v57 = vand.u32 2147483647, %v3242_v39  ;;  %vm3248_vm7 = vweird.f32 %v3242_v39 }
 0xafe   :  { %v3236_v10 = vor.u32 1.1754944e-38, %v3235_v32  ;;  %vm3234_vm10 = vcmp.eq.f32.partialorder %v3233_v22, 8.507059e+37 }
 0xaff   :  { %v3255_v16 = vor.u32 1.1754944e-38, %v3254_v63  ;;  %vm3253_vm11 = vcmp.eq.f32.partialorder %v3252_v57, 8.507059e+37 }
 0xb00   :  { %v3604_v34 = vpop.eup %3603 }
 0xb01   :  { %v3262_v27 = vadd.f32 1.0, %v3604_v34 }
 0xb02   :  { %v3606_v40 = vpop.eup %3605 }
 0xb03   :  { %v3608_v2 = vpop.eup %3607  ;;  %v3225_v47 = vmul.f32 %v3606_v40, %v3223_v28  ;;  %3609 = vrcp.f32 %v3262_v27  ;;  %vm3230_vm4 = vweird.f32 %v3606_v40  ;;  %v3274_v33 = vand.u32 2147483648, %v3262_v27 }
 0xb04   :  { %v3244_v54 = vmul.f32 %v3608_v2, %v3242_v39  ;;  %3611 = vtanh.f32 %v3217_v50  ;;  %vm3249_vm5 = vweird.f32 %v3608_v2  ;;  %vm3231_vm8 = vmor %vm3229_vm6, %vm3230_vm4  ;;  %vm3268_vm13 = vweird.f32 %v3262_v27 }
 0xb05   :  { %v3226_v13 = vsub.f32 1.0, %v3225_v47  ;;  %vm3250_vm9 = vmor %vm3248_vm7, %vm3249_vm5  ;;  %v3272_v56 = vand.u32 2147483647, %v3262_v27  ;;  %v3275_v14 = vor.u32 1.1754944e-38, %v3274_v33 }
 0xb06   :  { %v3245_v53 = vsub.f32 1.0, %v3244_v54 }
 0xb07   :  { %v3227_v60 = vmul.f32 %v3606_v40, %v3226_v13  ;;  %vm3273_vm15 = vcmp.eq.f32.partialorder %v3272_v56, 8.507059e+37 }
 0xb08   :  { %v3246_v21 = vmul.f32 %v3608_v2, %v3245_v53 }
 0xb09   :  { %v3610_v25 = vpop.eup %3609  ;;  %v3228_v44 = vadd.f32 %v3606_v40, %v3227_v60 }
 0xb0a   :  { %v3247_v12 = vadd.f32 %v3608_v2, %v3246_v21  ;;  %v3264_v0 = vmul.f32 %v3610_v25, %v3262_v27  ;;  %v3612_v55 = vpop.eup %3611  ;;  %vm3269_vm12 = vweird.f32 %v3610_v25 }
 0xb0b   :  { %v3232_v62 = vsel %vm3231_vm8, %v3606_v40, %v3228_v44  ;;  %vm3270_vm14 = vmor %vm3268_vm13, %vm3269_vm12 }
 0xb0c   :  { %v3237_v61 = vsel %vm3234_vm10, %v3236_v10, %v3232_v62  ;;  %v3251_v9 = vsel %vm3250_vm9, %v3608_v2, %v3247_v12  ;;  %v3265_v42 = vsub.f32 1.0, %v3264_v0 }
 0xb0d   :  { %v3256_v41 = vsel %vm3253_vm11, %v3255_v16, %v3251_v9  ;;  %v3279_v30 = vmul.f32 %v3612_v55, %v3237_v61 }
 0xb0e   :  { %v3278_v29 = vmul.f32 %v3256_v41, %v5885_v11  ;;  %v3266_v7 = vmul.f32 %v3610_v25, %v3265_v42 }
 0xb10   :  { %v3280_v48 = vadd.f32 %v3279_v30, %v3278_v29  ;;  %v3267_v26 = vadd.f32 %v3610_v25, %v3266_v7 }
 0xb12   :  { %3613 = vtanh.f32 %v3280_v48  ;;  %3351 = vst [vmem:[%s5911_s8 + $0x8] sm:$0xff] %v3280_v48  ;;  %v3271_v6 = vsel %vm3270_vm14, %v3610_v25, %v3267_v26 }
 0xb13   :  { %v3276_v36 = vsel %vm3273_vm15, %v3275_v14, %v3271_v6 }
 0xb18   :  { %v3614_v15 = vpop.eup %3613 }
 0xb19   :  { %v3282_v51 = vmul.f32 %v3614_v15, %v3276_v36 }
 0xb1b   :  { %3350 = vst [vmem:[%s5910_s7 + $0x8] sm:$0xff] %v3282_v51 }
 0xb1c   :  { %3299 = vsyncpa [#allocation7], 1 }
 0xb1d   :  { %3300 = vsyncpa [#allocation9], 1 }
 0xb1e   :  { %3301 = vsyncpa [#allocation12], 1 }

</bundles_post_ra>
